<compile_context>
chip_gen: v6e
topology: v6e:2x2x1
jax: 0.10.0
libtpu: 0.0.40
codegen_flags: <defaults>
</compile_context>

<pallas_src>
import functools

import jax
import jax.numpy as jnp
from jax.experimental import pallas as pl
from jax.experimental.pallas import tpu as pltpu

# Scoped-VMEM ceiling that is legal on every generation (v5e/v6e phys 128 MiB,
# v7x phys 64 MiB, default scoped 16/32/32 MiB).
_VMEM_LIMIT = 32 * 1024 * 1024


# ---------------------------------------------------------------------------
# Generic stacked fused matmul:  y[h] = act((x[h] @ w[h]) * scale[h] + bias[h])
# Grid = (H, K//tk): head axis "parallel" (megacore / both TCs), K axis
# "arbitrary" with a VMEM f32 accumulator (skipped entirely when nk == 1).
# Weights may be int8 (quantized Linear heads; dequant scale folded into
# scale[h]) or bf16 (convs); accumulation is always f32 on the MXU.
# ---------------------------------------------------------------------------
def _mm_affine_kernel_single(x_ref, w_ref, s_ref, b_ref, o_ref, *, act):
    x = x_ref[...]
    w = w_ref[...]
    if w.dtype != x.dtype:
        w = w.astype(x.dtype)              # int8 -> bf16 is exact for |q| <= 127
    y = jnp.dot(x, w, preferred_element_type=jnp.float32)
    y = y * s_ref[...] + b_ref[...]
    if act == "relu":
        y = jnp.maximum(y, 0.0)
    o_ref[...] = y.astype(o_ref.dtype)


def _mm_affine_kernel_acc(x_ref, w_ref, s_ref, b_ref, o_ref, acc_ref, *, nk, act):
    @pl.when(pl.program_id(1) == 0)
    def _():
        acc_ref[...] = jnp.zeros_like(acc_ref)

    x = x_ref[...]
    w = w_ref[...]
    if w.dtype != x.dtype:
        w = w.astype(x.dtype)
    acc_ref[...] += jnp.dot(x, w, preferred_element_type=jnp.float32)

    @pl.when(pl.program_id(1) == nk - 1)
    def _():
        y = acc_ref[...] * s_ref[...] + b_ref[...]
        if act == "relu":
            y = jnp.maximum(y, 0.0)
        o_ref[...] = y.astype(o_ref.dtype)


def _pick_tk(K, *, elem_bytes, n_cols, budget_bytes=4 << 20, cap=25600):
    """Largest K-tile <= cap whose (tk, n_cols) weight block fits the VMEM budget."""
    max_tk = min(cap, max(128, budget_bytes // max(1, n_cols * elem_bytes)))
    if K <= max_tk:
        return K
    t = (max_tk // 128) * 128
    while t >= 128:
        if K % t == 0:
            return t
        t -= 128
    # No lane-aligned divisor found: fall back to a single tile.  Only hit for
    # small / odd K; never for the shapes in this model (latent VMEM risk noted).
    return K


def stacked_matmul_affine(x, w, scale, bias, *, act="none", tk=None):
    """x: (H, M, K), w: (H, K, N), scale/bias: (H, N)  ->  (H, M, N) float32."""
    H, M, K = x.shape
    _, _, N = w.shape
    if tk is None:
        tk = _pick_tk(K, elem_bytes=w.dtype.itemsize, n_cols=N)
    assert K % tk == 0, (K, tk)
    nk = K // tk

    in_specs = [
        pl.BlockSpec((None, M, tk), lambda h, k: (h, 0, k)),
        pl.BlockSpec((None, tk, N), lambda h, k: (h, k, 0)),
        pl.BlockSpec((None, 1, N), lambda h, k: (h, 0, 0)),
        pl.BlockSpec((None, 1, N), lambda h, k: (h, 0, 0)),
    ]
    out_spec = pl.BlockSpec((None, M, N), lambda h, k: (h, 0, 0))

    if nk == 1:
        # Single K tile: no (M, N) f32 accumulator scratch (avoids the padded
        # scratch flagged in the review for the N=8 DownScale conv1).
        kernel = functools.partial(_mm_affine_kernel_single, act=act)
        scratch = []
    else:
        kernel = functools.partial(_mm_affine_kernel_acc, nk=nk, act=act)
        scratch = [pltpu.VMEM((M, N), jnp.float32)]

    return pl.pallas_call(
        kernel,
        out_shape=jax.ShapeDtypeStruct((H, M, N), jnp.float32),
        grid_spec=pltpu.PrefetchScalarGridSpec(
            num_scalar_prefetch=0,
            grid=(H, nk),
            in_specs=in_specs,
            out_specs=out_spec,
            scratch_shapes=scratch),
        compiler_params=pltpu.CompilerParams(
            dimension_semantics=("parallel", "arbitrary"),
            vmem_limit_bytes=_VMEM_LIMIT),
    )(x, w,
      scale.reshape(H, 1, N).astype(jnp.float32),
      bias.reshape(H, 1, N).astype(jnp.float32))


# ---------------------------------------------------------------------------
# Linear heads: int8 per-output-column quantized weights, bf16 activations,
# f32 accumulation, dequant scale folded into the affine epilogue.
# ---------------------------------------------------------------------------
def quantize_heads_int8(w):
    """Per-output-column symmetric int8 quantization.  w: (H, K, N) f32."""
    amax = jnp.max(jnp.abs(w), axis=1)                       # (H, N)
    scale = jnp.maximum(amax, 1e-12) / 127.0
    wq = jnp.clip(jnp.round(w / scale[:, None, :]), -127, 127).astype(jnp.int8)
    return wq, scale


def linear_heads(xs, wq_stk, scale_stk, b_stk):
    """A group of nn.Linear heads sharing K, fused into one pallas_call.

    xs: list of (B, K) f32 activations; wq_stk: (H, K, 128) int8;
    scale_stk/b_stk: (H, 128) f32.  Returns list of (B, 128) f32 outputs.
    """
    x = jnp.stack([a.astype(jnp.bfloat16) for a in xs])      # (H, B, K) bf16
    out = stacked_matmul_affine(x, wq_stk, scale_stk, b_stk, act="none")
    return [out[i] for i in range(out.shape[0])]


# ---------------------------------------------------------------------------
# Fused AdaptiveMaxPool3d(8) + channel concat for D=H=W=16 (window 2).
# Each branch is reshaped (free, row-major) to (B, 8, 2, 8, 2, 8, 2*C) so the
# W-pooling pair lives on the LANE dim (2C is a multiple of 128) and the block
# sublane dim is 8 -- no (2, C) sublane padding.  Grid = (B, 2): one half of
# the output depth (4 slices) per step (~8.5 MiB of input, double-buffered).
# All five branches are written into channel slices of ONE (B,8,8,8,1088)
# lane-dense output, so the concatenated tensor is never re-read for a concat.
# ---------------------------------------------------------------------------
def _fused_pool_kernel(*refs, channels):
    o_ref = refs[-1]
    off = 0
    for x_ref, c in zip(refs[:-1], channels):
        x = x_ref[...]                                 # (Dt, 2, 8, 2, 8, 2c)
        x = jnp.maximum(x[:, 0], x[:, 1])              # D-pair -> (Dt, 8, 2, 8, 2c)
        x = jnp.maximum(x[:, :, 0], x[:, :, 1])        # H-pair -> (Dt, 8, 8, 2c)
        x = jnp.maximum(x[..., :c], x[..., c:])        # W-pair -> (Dt, 8, 8, c)
        o_ref[:, :, :, off:off + c] = x.astype(o_ref.dtype)
        off += c


def fused_pool_concat_to8(branches, *, out_dtype=jnp.bfloat16, d_tiles=2):
    """AdaptiveMaxPool3d(8) of each NDHWC branch (16^3) fused with channel concat."""
    B, D, H, W, _ = branches[0].shape
    # TODO(synk): kernel assumes pool window == stride == 2 (AdaptiveMaxPool3d(8) on 16^3).
    assert D == H == W == 16
    channels = tuple(int(b.shape[-1]) for b in branches)
    Ct = sum(channels)
    Dt = 8 // d_tiles

    xs = [b.reshape(B, 8, 2, 8, 2, 8, 2 * c) for b, c in zip(branches, channels)]
    in_specs = [
        pl.BlockSpec((None, Dt, 2, 8, 2, 8, 2 * c),
                     lambda b, d: (b, d, 0, 0, 0, 0, 0))
        for c in channels
    ]
    kernel = functools.partial(_fused_pool_kernel, channels=channels)
    return pl.pallas_call(
        kernel,
        out_shape=jax.ShapeDtypeStruct((B, 8, 8, 8, Ct), out_dtype),
        grid_spec=pltpu.PrefetchScalarGridSpec(
            num_scalar_prefetch=0,
            grid=(B, d_tiles),
            in_specs=in_specs,
            out_specs=pl.BlockSpec((None, Dt, 8, 8, Ct),
                                   lambda b, d: (b, d, 0, 0, 0)),
        ),
        compiler_params=pltpu.CompilerParams(
            dimension_semantics=("parallel", "parallel"),
            vmem_limit_bytes=_VMEM_LIMIT),
    )(*xs)


# ---------------------------------------------------------------------------
# DownScale (bottle_neck): conv1x1x1+BN+ReLU, conv3x3x3(s=2,p=1)+BN+ReLU,
# conv1x1x1+BN+ReLU.  BatchNorm3d folded (eval mode) into scale/bias.
# Weights stored channels-last: w1 (Cin,P), w2 (3,3,3,P,P)->(27P,P), w3 (P,P).
# Both the x and y directions run in the SAME pallas_call (leading stack axis
# marked "parallel"); conv2+conv3 are fused into a single kernel.
# ---------------------------------------------------------------------------
def init_downscale_params(key, in_planes, planes=8):
    ks = jax.random.split(key, 6)
    std = 0.05
    w1 = std * jax.random.normal(ks[0], (in_planes, planes), jnp.float32)
    w2 = std * jax.random.normal(ks[1], (3, 3, 3, planes, planes), jnp.float32)
    w3 = std * jax.random.normal(ks[2], (planes, planes), jnp.float32)

    def bn(k):
        k1, k2 = jax.random.split(k)
        scale = 1.0 + 0.05 * jax.random.normal(k1, (planes,), jnp.float32)
        bias = 0.05 * jax.random.normal(k2, (planes,), jnp.float32)
        return scale, bias

    s1, b1 = bn(ks[3])
    s2, b2 = bn(ks[4])
    s3, b3 = bn(ks[5])
    # TODO(synk): loading real PyTorch Conv3d weights (Cout,Cin,kd,kh,kw) needs a
    # permute to (kd,kh,kw,Cin,Cout) before this reshape.
    return dict(w1=w1, w2=w2.reshape(27 * planes, planes), w3=w3,
                s1=s1, b1=b1, s2=s2, b2=b2, s3=s3, b3=b3)


def _conv23_pair_kernel(p_ref, w2_ref, s2_ref, b2_ref, w3_ref, s3_ref, b3_ref,
                        o_ref):
    h2 = jnp.dot(p_ref[...], w2_ref[...], preferred_element_type=jnp.float32)
    h2 = jnp.maximum(h2 * s2_ref[...] + b2_ref[...], 0.0)
    h3 = jnp.dot(h2, w3_ref[...], preferred_element_type=jnp.float32)
    o_ref[...] = jnp.maximum(h3 * s3_ref[...] + b3_ref[...], 0.0).astype(o_ref.dtype)


def downscale_pair_forward(feat_x, feat_y, px, py):
    """feat_{x,y}: (B, 8, 8, 8, Cin) NDHWC (bf16)  ->  two (B, 4, 4, 4, P) NDHWC."""
    B, D, H, W, Cin = feat_x.shape
    P = px["w1"].shape[1]
    M = B * D * H * W

    # conv1x1x1 + BN1 + ReLU (both directions), bf16 activations/weights,
    # f32 accumulation.  K=1088 fits one tile -> no accumulator scratch.
    x_stk = jnp.stack([feat_x.reshape(M, Cin), feat_y.reshape(M, Cin)])   # bf16
    w1 = jnp.stack([px["w1"], py["w1"]]).astype(jnp.bfloat16)
    s1 = jnp.stack([px["s1"], py["s1"]])
    b1 = jnp.stack([px["b1"], py["b1"]])
    h1 = stacked_matmul_affine(x_stk, w1, s1, b1, act="relu")             # (2, M, P)
    h1 = h1.reshape(2, B, D, H, W, P)

    # conv3x3x3 stride=2 pad=1: im2col in glue (tiny), then one fused Pallas
    # kernel does (patches @ w2)*s2+b2, ReLU, (@ w3)*s3+b3, ReLU.
    hp = jnp.pad(h1, ((0, 0), (0, 0), (1, 1), (1, 1), (1, 1), (0, 0)))
    Do = D // 2
    cols = []
    for kd in range(3):
        for kh in range(3):
            for kw in range(3):
                cols.append(hp[:, :, kd:kd + 2 * Do - 1:2,
                               kh:kh + 2 * Do - 1:2,
                               kw:kw + 2 * Do - 1:2, :])
    Mo = B * Do * Do * Do
    patches = jnp.concatenate(cols, axis=-1).reshape(2, Mo, 27 * P)
    patches = patches.astype(jnp.bfloat16)

    w2 = jnp.stack([px["w2"], py["w2"]]).astype(jnp.bfloat16)             # (2, 27P, P)
    s2 = jnp.stack([px["s2"], py["s2"]]).reshape(2, 1, P)
    b2 = jnp.stack([px["b2"], py["b2"]]).reshape(2, 1, P)
    w3 = jnp.stack([px["w3"], py["w3"]])                                  # (2, P, P)
    s3 = jnp.stack([px["s3"], py["s3"]]).reshape(2, 1, P)
    b3 = jnp.stack([px["b3"], py["b3"]]).reshape(2, 1, P)

    out = pl.pallas_call(
        _conv23_pair_kernel,
        out_shape=jax.ShapeDtypeStruct((2, Mo, P), jnp.float32),
        grid_spec=pltpu.PrefetchScalarGridSpec(
            num_scalar_prefetch=0,
            grid=(2,),
            in_specs=[
                pl.BlockSpec((None, Mo, 27 * P), lambda h: (h, 0, 0)),
                pl.BlockSpec((None, 27 * P, P), lambda h: (h, 0, 0)),
                pl.BlockSpec((None, 1, P), lambda h: (h, 0, 0)),
                pl.BlockSpec((None, 1, P), lambda h: (h, 0, 0)),
                pl.BlockSpec((None, P, P), lambda h: (h, 0, 0)),
                pl.BlockSpec((None, 1, P), lambda h: (h, 0, 0)),
                pl.BlockSpec((None, 1, P), lambda h: (h, 0, 0)),
            ],
            out_specs=pl.BlockSpec((None, Mo, P), lambda h: (h, 0, 0)),
        ),
        compiler_params=pltpu.CompilerParams(
            dimension_semantics=("parallel",)),
    )(patches, w2, s2, b2, w3, s3, b3)

    out = out.reshape(2, B, Do, Do, Do, P)
    return out[0], out[1]


# ---------------------------------------------------------------------------
if __name__ == "__main__":
    key = jax.random.PRNGKey(0)
    keys = jax.random.split(key, 32)
    B, S, Cb = 2, 16, 64   # batch, backbone spatial, backbone channels

    # TODO(synk): generate_model(10) (3D-ResNet backbone) is undefined in the
    # reference; these inputs stand in for its (B, 64, S, S, S) output (NDHWC here).
    x_feat = jax.random.normal(keys[0], (B, S, S, S, Cb), jnp.float32)
    y_feat = jax.random.normal(keys[1], (B, S, S, S, Cb), jnp.float32)

    # TODO(synk): depthwise_separable_conv branches and get_res_extend_block are
    # undefined; their 256-channel 3D feature outputs are stubbed at matching shapes.
    branch = lambda k: jax.random.normal(k, (B, S, S, S, 256), jnp.float32)
    cor_x, sag_x, axl_x, res_featx = (branch(keys[i]) for i in range(2, 6))
    cor_y, sag_y, axl_y, res_featy = (branch(keys[i]) for i in range(6, 10))

    # TODO(synk): NONLocalBlock3D is undefined; its attention weight/value side
    # outputs are stubbed at the flattened sizes the fc heads expect.
    att_weight_imgx = jax.random.normal(keys[10], (B, 512 * 128), jnp.float32)
    att_value_imgx = jax.random.normal(keys[11], (B, 128 * 512), jnp.float32)
    att_weight_imgy = jax.random.normal(keys[12], (B, 512 * 128), jnp.float32)
    att_value_imgy = jax.random.normal(keys[13], (B, 128 * 512), jnp.float32)

    # TODO(synk): frozen AttentionModel teacher (surt_teacher) is undefined /
    # checkpoint-loaded; its fused surface attention outputs are stubbed.
    fuse_att_surfx = jax.random.normal(keys[14], (B, 640 * 640), jnp.float32)
    fuse_v_surfx = jax.random.normal(keys[15], (B, 640 * 64), jnp.float32)
    fuse_att_surfy = jax.random.normal(keys[16], (B, 640 * 640), jnp.float32)
    fuse_v_surfy = jax.random.normal(keys[17], (B, 640 * 64), jnp.float32)

    # Deterministic parameters.
    in_planes = 256 * 3 + 256 + 64     # 1088
    ds_x = init_downscale_params(keys[18], in_planes, planes=8)
    ds_y = init_downscale_params(keys[19], in_planes, planes=8)

    # Linear-head weights: generated in f32 (mirrors a PyTorch checkpoint) and
    # quantized to int8 with per-output-column scales (halves the ~300 MB
    # weight stream vs bf16; dequant folded into the kernel epilogue).
    def head_group_params(k, K, n_heads):
        k1, k2 = jax.random.split(k)
        w = 0.01 * jax.random.normal(k1, (n_heads, K, 128), jnp.float32)
        b = 0.01 * jax.random.normal(k2, (n_heads, 128), jnp.float32)
        wq, scale = quantize_heads_int8(w)
        return wq, scale, b

    w_fuse_att, s_fuse_att, b_fuse_att = head_group_params(keys[20], 640 * 640, 2)
    w_fuse_v, s_fuse_v, b_fuse_v = head_group_params(keys[21], 640 * 64, 2)
    w_img, s_img, b_img = head_group_params(keys[22], 512 * 128, 4)

    # Tiny MVNet classifier-tail parameters (LayerNorm + fc1/fc2 + 2x SubClf).
    tk_ = jax.random.split(keys[28], 6)
    tail = dict(
        ln_g=jnp.ones((1024,), jnp.float32), ln_b=jnp.zeros((1024,), jnp.float32),
        fc1_w=0.02 * jax.random.normal(tk_[0], (1024, 32), jnp.float32),
        fc1_b=jnp.zeros((32,), jnp.float32),
        fc2_w=0.02 * jax.random.normal(tk_[1], (32, 1), jnp.float32),
        fc2_b=jnp.zeros((1,), jnp.float32),
        c1_w1=0.02 * jax.random.normal(tk_[2], (512, 32), jnp.float32),
        c1_b1=jnp.zeros((32,), jnp.float32),
        c1_w2=0.02 * jax.random.normal(tk_[3], (32, 1), jnp.float32),
        c1_b2=jnp.zeros((1,), jnp.float32),
        c2_w1=0.02 * jax.random.normal(tk_[4], (512, 32), jnp.float32),
        c2_b1=jnp.zeros((32,), jnp.float32),
        c2_w2=0.02 * jax.random.normal(tk_[5], (32, 1), jnp.float32),
        c2_b2=jnp.zeros((1,), jnp.float32),
    )

    # ---------------------------- forward ---------------------------------
    # Pool + concat of the five branches of each direction in ONE fused kernel
    # (no 33.5 MB concat materialized, no per-branch pool outputs re-read).
    featx_in = fused_pool_concat_to8((cor_x, sag_x, axl_x, res_featx, x_feat))
    featy_in = fused_pool_concat_to8((cor_y, sag_y, axl_y, res_featy, y_feat))
    # TODO(synk): attx/atty (NONLocalBlock3D) undefined -> identity passthrough.

    featx_out, featy_out = downscale_pair_forward(featx_in, featy_in, ds_x, ds_y)
    featx_out = jnp.transpose(featx_out, (0, 4, 1, 2, 3))    # -> NCDHW (B,8,4,4,4)
    featy_out = jnp.transpose(featy_out, (0, 4, 1, 2, 3))

    # 8 Linear heads, fused per shared-K group (1 pallas_call per group).
    fuse_att_out = linear_heads([fuse_att_surfx, fuse_att_surfy],
                                w_fuse_att, s_fuse_att, b_fuse_att)
    fuse_v_out = linear_heads([fuse_v_surfx, fuse_v_surfy],
                              w_fuse_v, s_fuse_v, b_fuse_v)
    img_out = linear_heads(
        [att_weight_imgx, att_value_imgx, att_weight_imgy, att_value_imgy],
        w_img, s_img, b_img)

    fc_outs = (fuse_att_out[0], fuse_v_out[0], fuse_att_out[1], fuse_v_out[1],
               img_out[0], img_out[1], img_out[2], img_out[3])

    # ---------------- MVNet classifier tail (plain jnp glue) ---------------
    # Dropout is identity in eval mode; AdaptiveAvgPool3d(4) on a 4^3 volume is
    # identity.  TODO(synk): tail is O(40K flops) -- left to XLA, no Pallas benefit.
    x_fl = featx_out.reshape(B, -1)                           # (B, 512)
    y_fl = featy_out.reshape(B, -1)
    feat = jnp.concatenate([x_fl, y_fl], axis=1)              # (B, 1024)
    mu = feat.mean(-1, keepdims=True)
    var = jnp.mean((feat - mu) ** 2, axis=-1, keepdims=True)
    feat = (feat - mu) / jnp.sqrt(var + 1e-6) * tail["ln_g"] + tail["ln_b"]
    h = feat @ tail["fc1_w"] + tail["fc1_b"]
    h = h * jax.nn.sigmoid(h)
    h = jnp.where(h >= 0, h, 0.2 * h)                         # LeakyReLU(0.2)
    out_main = jax.nn.sigmoid(h @ tail["fc2_w"] + tail["fc2_b"])   # (B, 1)

    def subclf(v, w1, b1, w2, b2):
        t = v @ w1 + b1
        t = jnp.where(t >= 0, t, 0.2 * t)
        return jax.nn.sigmoid(t @ w2 + b2)

    out_xfl = subclf(x_fl, tail["c1_w1"], tail["c1_b1"], tail["c1_w2"], tail["c1_b2"])
    out_yfl = subclf(y_fl, tail["c2_w1"], tail["c2_b1"], tail["c2_w2"], tail["c2_b2"])

    outs = (out_main, out_xfl, out_yfl) + fc_outs
    jax.block_until_ready(outs)
    assert featx_in.shape == (B, 8, 8, 8, 1088)
    assert featx_out.shape == (B, 8, 4, 4, 4)
    assert outs[0].shape == (B, 1) and outs[1].shape == (B, 1) and outs[2].shape == (B, 1)
    assert all(o.shape == (B, 128) for o in outs[3:])
    print("KERNEL_OK")
</pallas_src>

<mosaic_0001>
module attributes {stable_mosaic.version = 11 : i64} {
  func.func @_fused_pool_kernel(%arg0: i32, %arg1: i32, %arg2: memref<1x4x2x8x2x8x512xf32, #tpu.memory_space<vmem>>, %arg3: memref<1x4x2x8x2x8x512xf32, #tpu.memory_space<vmem>>, %arg4: memref<1x4x2x8x2x8x512xf32, #tpu.memory_space<vmem>>, %arg5: memref<1x4x2x8x2x8x512xf32, #tpu.memory_space<vmem>>, %arg6: memref<1x4x2x8x2x8x128xf32, #tpu.memory_space<vmem>>, %arg7: memref<1x4x8x8x1088xbf16, #tpu.memory_space<vmem>>) attributes {dimension_semantics = [#tpu.dimension_semantics<parallel>, #tpu.dimension_semantics<parallel>], iteration_bounds = array<i64: 2, 2>, scalar_prefetch = 0 : i64, scratch_operands = 0 : i64, tpu.core_type = #tpu.core_type<tc>, window_params = [{transform_indices = @transform_0, window_bounds = array<i64: 1, 4, 2, 8, 2, 8, 512>}, {transform_indices = @transform_1, window_bounds = array<i64: 1, 4, 2, 8, 2, 8, 512>}, {transform_indices = @transform_2, window_bounds = array<i64: 1, 4, 2, 8, 2, 8, 512>}, {transform_indices = @transform_3, window_bounds = array<i64: 1, 4, 2, 8, 2, 8, 512>}, {transform_indices = @transform_4, window_bounds = array<i64: 1, 4, 2, 8, 2, 8, 128>}, {transform_indices = @transform_5, window_bounds = array<i64: 1, 4, 8, 8, 1088>}]} {
    %c0 = arith.constant 0 : index
    %c0_0 = arith.constant 0 : index
    %c0_1 = arith.constant 0 : index
    %c0_2 = arith.constant 0 : index
    %c0_3 = arith.constant 0 : index
    %c0_4 = arith.constant 0 : index
    %c0_5 = arith.constant 0 : index
    %0 = vector.load %arg2[%c0, %c0_0, %c0_1, %c0_2, %c0_3, %c0_4, %c0_5] : memref<1x4x2x8x2x8x512xf32, #tpu.memory_space<vmem>>, vector<1x4x2x8x2x8x512xf32>
    %1 = vector.shape_cast %0 : vector<1x4x2x8x2x8x512xf32> to vector<4x2x8x2x8x512xf32>
    %2 = vector.extract_strided_slice %1 {offsets = [0, 0, 0, 0, 0, 0], sizes = [4, 1, 8, 2, 8, 512], strides = [1, 1, 1, 1, 1, 1]} : vector<4x2x8x2x8x512xf32> to vector<4x1x8x2x8x512xf32>
    %3 = vector.shape_cast %2 : vector<4x1x8x2x8x512xf32> to vector<4x8x2x8x512xf32>
    %4 = vector.extract_strided_slice %1 {offsets = [0, 1, 0, 0, 0, 0], sizes = [4, 1, 8, 2, 8, 512], strides = [1, 1, 1, 1, 1, 1]} : vector<4x2x8x2x8x512xf32> to vector<4x1x8x2x8x512xf32>
    %5 = vector.shape_cast %4 : vector<4x1x8x2x8x512xf32> to vector<4x8x2x8x512xf32>
    %6 = arith.maximumf %3, %5 : vector<4x8x2x8x512xf32>
    %7 = vector.extract_strided_slice %6 {offsets = [0, 0, 0, 0, 0], sizes = [4, 8, 1, 8, 512], strides = [1, 1, 1, 1, 1]} : vector<4x8x2x8x512xf32> to vector<4x8x1x8x512xf32>
    %8 = vector.shape_cast %7 : vector<4x8x1x8x512xf32> to vector<4x8x8x512xf32>
    %9 = vector.extract_strided_slice %6 {offsets = [0, 0, 1, 0, 0], sizes = [4, 8, 1, 8, 512], strides = [1, 1, 1, 1, 1]} : vector<4x8x2x8x512xf32> to vector<4x8x1x8x512xf32>
    %10 = vector.shape_cast %9 : vector<4x8x1x8x512xf32> to vector<4x8x8x512xf32>
    %11 = arith.maximumf %8, %10 : vector<4x8x8x512xf32>
    %12 = vector.extract_strided_slice %11 {offsets = [0, 0, 0, 0], sizes = [4, 8, 8, 256], strides = [1, 1, 1, 1]} : vector<4x8x8x512xf32> to vector<4x8x8x256xf32>
    %13 = vector.extract_strided_slice %11 {offsets = [0, 0, 0, 256], sizes = [4, 8, 8, 256], strides = [1, 1, 1, 1]} : vector<4x8x8x512xf32> to vector<4x8x8x256xf32>
    %14 = arith.maximumf %12, %13 : vector<4x8x8x256xf32>
    %15 = arith.truncf %14 : vector<4x8x8x256xf32> to vector<4x8x8x256xbf16>
    %c0_6 = arith.constant 0 : index
    %c0_7 = arith.constant 0 : index
    %c0_8 = arith.constant 0 : index
    %c0_9 = arith.constant 0 : index
    %c0_10 = arith.constant 0 : index
    %16 = vector.load %arg7[%c0_6, %c0_7, %c0_8, %c0_9, %c0_10] : memref<1x4x8x8x1088xbf16, #tpu.memory_space<vmem>>, vector<1x4x8x8x256xbf16>
    %17 = vector.shape_cast %16 : vector<1x4x8x8x256xbf16> to vector<4x8x8x256xbf16>
    %18 = vector.shape_cast %15 : vector<4x8x8x256xbf16> to vector<1x4x8x8x256xbf16>
    tpu.vector_store %arg7[%c0_6, %c0_7, %c0_8, %c0_9, %c0_10], %18 {strides = array<i32>} : memref<1x4x8x8x1088xbf16, #tpu.memory_space<vmem>>, vector<1x4x8x8x256xbf16>,
    %c0_11 = arith.constant 0 : index
    %c0_12 = arith.constant 0 : index
    %c0_13 = arith.constant 0 : index
    %c0_14 = arith.constant 0 : index
    %c0_15 = arith.constant 0 : index
    %c0_16 = arith.constant 0 : index
    %c0_17 = arith.constant 0 : index
    %19 = vector.load %arg3[%c0_11, %c0_12, %c0_13, %c0_14, %c0_15, %c0_16, %c0_17] : memref<1x4x2x8x2x8x512xf32, #tpu.memory_space<vmem>>, vector<1x4x2x8x2x8x512xf32>
    %20 = vector.shape_cast %19 : vector<1x4x2x8x2x8x512xf32> to vector<4x2x8x2x8x512xf32>
    %21 = vector.extract_strided_slice %20 {offsets = [0, 0, 0, 0, 0, 0], sizes = [4, 1, 8, 2, 8, 512], strides = [1, 1, 1, 1, 1, 1]} : vector<4x2x8x2x8x512xf32> to vector<4x1x8x2x8x512xf32>
    %22 = vector.shape_cast %21 : vector<4x1x8x2x8x512xf32> to vector<4x8x2x8x512xf32>
    %23 = vector.extract_strided_slice %20 {offsets = [0, 1, 0, 0, 0, 0], sizes = [4, 1, 8, 2, 8, 512], strides = [1, 1, 1, 1, 1, 1]} : vector<4x2x8x2x8x512xf32> to vector<4x1x8x2x8x512xf32>
    %24 = vector.shape_cast %23 : vector<4x1x8x2x8x512xf32> to vector<4x8x2x8x512xf32>
    %25 = arith.maximumf %22, %24 : vector<4x8x2x8x512xf32>
    %26 = vector.extract_strided_slice %25 {offsets = [0, 0, 0, 0, 0], sizes = [4, 8, 1, 8, 512], strides = [1, 1, 1, 1, 1]} : vector<4x8x2x8x512xf32> to vector<4x8x1x8x512xf32>
    %27 = vector.shape_cast %26 : vector<4x8x1x8x512xf32> to vector<4x8x8x512xf32>
    %28 = vector.extract_strided_slice %25 {offsets = [0, 0, 1, 0, 0], sizes = [4, 8, 1, 8, 512], strides = [1, 1, 1, 1, 1]} : vector<4x8x2x8x512xf32> to vector<4x8x1x8x512xf32>
    %29 = vector.shape_cast %28 : vector<4x8x1x8x512xf32> to vector<4x8x8x512xf32>
    %30 = arith.maximumf %27, %29 : vector<4x8x8x512xf32>
    %31 = vector.extract_strided_slice %30 {offsets = [0, 0, 0, 0], sizes = [4, 8, 8, 256], strides = [1, 1, 1, 1]} : vector<4x8x8x512xf32> to vector<4x8x8x256xf32>
    %32 = vector.extract_strided_slice %30 {offsets = [0, 0, 0, 256], sizes = [4, 8, 8, 256], strides = [1, 1, 1, 1]} : vector<4x8x8x512xf32> to vector<4x8x8x256xf32>
    %33 = arith.maximumf %31, %32 : vector<4x8x8x256xf32>
    %34 = arith.truncf %33 : vector<4x8x8x256xf32> to vector<4x8x8x256xbf16>
    %c0_18 = arith.constant 0 : index
    %c0_19 = arith.constant 0 : index
    %c0_20 = arith.constant 0 : index
    %c0_21 = arith.constant 0 : index
    %c256 = arith.constant 256 : index
    %35 = vector.load %arg7[%c0_18, %c0_19, %c0_20, %c0_21, %c256] : memref<1x4x8x8x1088xbf16, #tpu.memory_space<vmem>>, vector<1x4x8x8x256xbf16>
    %36 = vector.shape_cast %35 : vector<1x4x8x8x256xbf16> to vector<4x8x8x256xbf16>
    %37 = vector.shape_cast %34 : vector<4x8x8x256xbf16> to vector<1x4x8x8x256xbf16>
    tpu.vector_store %arg7[%c0_18, %c0_19, %c0_20, %c0_21, %c256], %37 {strides = array<i32>} : memref<1x4x8x8x1088xbf16, #tpu.memory_space<vmem>>, vector<1x4x8x8x256xbf16>,
    %c0_22 = arith.constant 0 : index
    %c0_23 = arith.constant 0 : index
    %c0_24 = arith.constant 0 : index
    %c0_25 = arith.constant 0 : index
    %c0_26 = arith.constant 0 : index
    %c0_27 = arith.constant 0 : index
    %c0_28 = arith.constant 0 : index
    %38 = vector.load %arg4[%c0_22, %c0_23, %c0_24, %c0_25, %c0_26, %c0_27, %c0_28] : memref<1x4x2x8x2x8x512xf32, #tpu.memory_space<vmem>>, vector<1x4x2x8x2x8x512xf32>
    %39 = vector.shape_cast %38 : vector<1x4x2x8x2x8x512xf32> to vector<4x2x8x2x8x512xf32>
    %40 = vector.extract_strided_slice %39 {offsets = [0, 0, 0, 0, 0, 0], sizes = [4, 1, 8, 2, 8, 512], strides = [1, 1, 1, 1, 1, 1]} : vector<4x2x8x2x8x512xf32> to vector<4x1x8x2x8x512xf32>
    %41 = vector.shape_cast %40 : vector<4x1x8x2x8x512xf32> to vector<4x8x2x8x512xf32>
    %42 = vector.extract_strided_slice %39 {offsets = [0, 1, 0, 0, 0, 0], sizes = [4, 1, 8, 2, 8, 512], strides = [1, 1, 1, 1, 1, 1]} : vector<4x2x8x2x8x512xf32> to vector<4x1x8x2x8x512xf32>
    %43 = vector.shape_cast %42 : vector<4x1x8x2x8x512xf32> to vector<4x8x2x8x512xf32>
    %44 = arith.maximumf %41, %43 : vector<4x8x2x8x512xf32>
    %45 = vector.extract_strided_slice %44 {offsets = [0, 0, 0, 0, 0], sizes = [4, 8, 1, 8, 512], strides = [1, 1, 1, 1, 1]} : vector<4x8x2x8x512xf32> to vector<4x8x1x8x512xf32>
    %46 = vector.shape_cast %45 : vector<4x8x1x8x512xf32> to vector<4x8x8x512xf32>
    %47 = vector.extract_strided_slice %44 {offsets = [0, 0, 1, 0, 0], sizes = [4, 8, 1, 8, 512], strides = [1, 1, 1, 1, 1]} : vector<4x8x2x8x512xf32> to vector<4x8x1x8x512xf32>
    %48 = vector.shape_cast %47 : vector<4x8x1x8x512xf32> to vector<4x8x8x512xf32>
    %49 = arith.maximumf %46, %48 : vector<4x8x8x512xf32>
    %50 = vector.extract_strided_slice %49 {offsets = [0, 0, 0, 0], sizes = [4, 8, 8, 256], strides = [1, 1, 1, 1]} : vector<4x8x8x512xf32> to vector<4x8x8x256xf32>
    %51 = vector.extract_strided_slice %49 {offsets = [0, 0, 0, 256], sizes = [4, 8, 8, 256], strides = [1, 1, 1, 1]} : vector<4x8x8x512xf32> to vector<4x8x8x256xf32>
    %52 = arith.maximumf %50, %51 : vector<4x8x8x256xf32>
    %53 = arith.truncf %52 : vector<4x8x8x256xf32> to vector<4x8x8x256xbf16>
    %c0_29 = arith.constant 0 : index
    %c0_30 = arith.constant 0 : index
    %c0_31 = arith.constant 0 : index
    %c0_32 = arith.constant 0 : index
    %c512 = arith.constant 512 : index
    %54 = vector.load %arg7[%c0_29, %c0_30, %c0_31, %c0_32, %c512] : memref<1x4x8x8x1088xbf16, #tpu.memory_space<vmem>>, vector<1x4x8x8x256xbf16>
    %55 = vector.shape_cast %54 : vector<1x4x8x8x256xbf16> to vector<4x8x8x256xbf16>
    %56 = vector.shape_cast %53 : vector<4x8x8x256xbf16> to vector<1x4x8x8x256xbf16>
    tpu.vector_store %arg7[%c0_29, %c0_30, %c0_31, %c0_32, %c512], %56 {strides = array<i32>} : memref<1x4x8x8x1088xbf16, #tpu.memory_space<vmem>>, vector<1x4x8x8x256xbf16>,
    %c0_33 = arith.constant 0 : index
    %c0_34 = arith.constant 0 : index
    %c0_35 = arith.constant 0 : index
    %c0_36 = arith.constant 0 : index
    %c0_37 = arith.constant 0 : index
    %c0_38 = arith.constant 0 : index
    %c0_39 = arith.constant 0 : index
    %57 = vector.load %arg5[%c0_33, %c0_34, %c0_35, %c0_36, %c0_37, %c0_38, %c0_39] : memref<1x4x2x8x2x8x512xf32, #tpu.memory_space<vmem>>, vector<1x4x2x8x2x8x512xf32>
    %58 = vector.shape_cast %57 : vector<1x4x2x8x2x8x512xf32> to vector<4x2x8x2x8x512xf32>
    %59 = vector.extract_strided_slice %58 {offsets = [0, 0, 0, 0, 0, 0], sizes = [4, 1, 8, 2, 8, 512], strides = [1, 1, 1, 1, 1, 1]} : vector<4x2x8x2x8x512xf32> to vector<4x1x8x2x8x512xf32>
    %60 = vector.shape_cast %59 : vector<4x1x8x2x8x512xf32> to vector<4x8x2x8x512xf32>
    %61 = vector.extract_strided_slice %58 {offsets = [0, 1, 0, 0, 0, 0], sizes = [4, 1, 8, 2, 8, 512], strides = [1, 1, 1, 1, 1, 1]} : vector<4x2x8x2x8x512xf32> to vector<4x1x8x2x8x512xf32>
    %62 = vector.shape_cast %61 : vector<4x1x8x2x8x512xf32> to vector<4x8x2x8x512xf32>
    %63 = arith.maximumf %60, %62 : vector<4x8x2x8x512xf32>
    %64 = vector.extract_strided_slice %63 {offsets = [0, 0, 0, 0, 0], sizes = [4, 8, 1, 8, 512], strides = [1, 1, 1, 1, 1]} : vector<4x8x2x8x512xf32> to vector<4x8x1x8x512xf32>
    %65 = vector.shape_cast %64 : vector<4x8x1x8x512xf32> to vector<4x8x8x512xf32>
    %66 = vector.extract_strided_slice %63 {offsets = [0, 0, 1, 0, 0], sizes = [4, 8, 1, 8, 512], strides = [1, 1, 1, 1, 1]} : vector<4x8x2x8x512xf32> to vector<4x8x1x8x512xf32>
    %67 = vector.shape_cast %66 : vector<4x8x1x8x512xf32> to vector<4x8x8x512xf32>
    %68 = arith.maximumf %65, %67 : vector<4x8x8x512xf32>
    %69 = vector.extract_strided_slice %68 {offsets = [0, 0, 0, 0], sizes = [4, 8, 8, 256], strides = [1, 1, 1, 1]} : vector<4x8x8x512xf32> to vector<4x8x8x256xf32>
    %70 = vector.extract_strided_slice %68 {offsets = [0, 0, 0, 256], sizes = [4, 8, 8, 256], strides = [1, 1, 1, 1]} : vector<4x8x8x512xf32> to vector<4x8x8x256xf32>
    %71 = arith.maximumf %69, %70 : vector<4x8x8x256xf32>
    %72 = arith.truncf %71 : vector<4x8x8x256xf32> to vector<4x8x8x256xbf16>
    %c0_40 = arith.constant 0 : index
    %c0_41 = arith.constant 0 : index
    %c0_42 = arith.constant 0 : index
    %c0_43 = arith.constant 0 : index
    %c768 = arith.constant 768 : index
    %73 = vector.load %arg7[%c0_40, %c0_41, %c0_42, %c0_43, %c768] : memref<1x4x8x8x1088xbf16, #tpu.memory_space<vmem>>, vector<1x4x8x8x256xbf16>
    %74 = vector.shape_cast %73 : vector<1x4x8x8x256xbf16> to vector<4x8x8x256xbf16>
    %75 = vector.shape_cast %72 : vector<4x8x8x256xbf16> to vector<1x4x8x8x256xbf16>
    tpu.vector_store %arg7[%c0_40, %c0_41, %c0_42, %c0_43, %c768], %75 {strides = array<i32>} : memref<1x4x8x8x1088xbf16, #tpu.memory_space<vmem>>, vector<1x4x8x8x256xbf16>,
    %c0_44 = arith.constant 0 : index
    %c0_45 = arith.constant 0 : index
    %c0_46 = arith.constant 0 : index
    %c0_47 = arith.constant 0 : index
    %c0_48 = arith.constant 0 : index
    %c0_49 = arith.constant 0 : index
    %c0_50 = arith.constant 0 : index
    %76 = vector.load %arg6[%c0_44, %c0_45, %c0_46, %c0_47, %c0_48, %c0_49, %c0_50] : memref<1x4x2x8x2x8x128xf32, #tpu.memory_space<vmem>>, vector<1x4x2x8x2x8x128xf32>
    %77 = vector.shape_cast %76 : vector<1x4x2x8x2x8x128xf32> to vector<4x2x8x2x8x128xf32>
    %78 = vector.extract_strided_slice %77 {offsets = [0, 0, 0, 0, 0, 0], sizes = [4, 1, 8, 2, 8, 128], strides = [1, 1, 1, 1, 1, 1]} : vector<4x2x8x2x8x128xf32> to vector<4x1x8x2x8x128xf32>
    %79 = vector.shape_cast %78 : vector<4x1x8x2x8x128xf32> to vector<4x8x2x8x128xf32>
    %80 = vector.extract_strided_slice %77 {offsets = [0, 1, 0, 0, 0, 0], sizes = [4, 1, 8, 2, 8, 128], strides = [1, 1, 1, 1, 1, 1]} : vector<4x2x8x2x8x128xf32> to vector<4x1x8x2x8x128xf32>
    %81 = vector.shape_cast %80 : vector<4x1x8x2x8x128xf32> to vector<4x8x2x8x128xf32>
    %82 = arith.maximumf %79, %81 : vector<4x8x2x8x128xf32>
    %83 = vector.extract_strided_slice %82 {offsets = [0, 0, 0, 0, 0], sizes = [4, 8, 1, 8, 128], strides = [1, 1, 1, 1, 1]} : vector<4x8x2x8x128xf32> to vector<4x8x1x8x128xf32>
    %84 = vector.shape_cast %83 : vector<4x8x1x8x128xf32> to vector<4x8x8x128xf32>
    %85 = vector.extract_strided_slice %82 {offsets = [0, 0, 1, 0, 0], sizes = [4, 8, 1, 8, 128], strides = [1, 1, 1, 1, 1]} : vector<4x8x2x8x128xf32> to vector<4x8x1x8x128xf32>
    %86 = vector.shape_cast %85 : vector<4x8x1x8x128xf32> to vector<4x8x8x128xf32>
    %87 = arith.maximumf %84, %86 : vector<4x8x8x128xf32>
    %88 = vector.extract_strided_slice %87 {offsets = [0, 0, 0, 0], sizes = [4, 8, 8, 64], strides = [1, 1, 1, 1]} : vector<4x8x8x128xf32> to vector<4x8x8x64xf32>
    %89 = vector.extract_strided_slice %87 {offsets = [0, 0, 0, 64], sizes = [4, 8, 8, 64], strides = [1, 1, 1, 1]} : vector<4x8x8x128xf32> to vector<4x8x8x64xf32>
    %90 = arith.maximumf %88, %89 : vector<4x8x8x64xf32>
    %91 = arith.truncf %90 : vector<4x8x8x64xf32> to vector<4x8x8x64xbf16>
    %c0_51 = arith.constant 0 : index
    %c0_52 = arith.constant 0 : index
    %c0_53 = arith.constant 0 : index
    %c0_54 = arith.constant 0 : index
    %c1024 = arith.constant 1024 : index
    %92 = vector.load %arg7[%c0_51, %c0_52, %c0_53, %c0_54, %c1024] : memref<1x4x8x8x1088xbf16, #tpu.memory_space<vmem>>, vector<1x4x8x8x64xbf16>
    %93 = vector.shape_cast %92 : vector<1x4x8x8x64xbf16> to vector<4x8x8x64xbf16>
    %94 = vector.shape_cast %91 : vector<4x8x8x64xbf16> to vector<1x4x8x8x64xbf16>
    tpu.vector_store %arg7[%c0_51, %c0_52, %c0_53, %c0_54, %c1024], %94 {strides = array<i32>} : memref<1x4x8x8x1088xbf16, #tpu.memory_space<vmem>>, vector<1x4x8x8x64xbf16>,
    return
  }
  func.func @transform_0(%arg0: i32, %arg1: i32) -> (i32, i32, i32, i32, i32, i32, i32) {
    %c0_i32 = arith.constant 0 : i32
    %c0_i32_0 = arith.constant 0 : i32
    %c0_i32_1 = arith.constant 0 : i32
    %c0_i32_2 = arith.constant 0 : i32
    %c0_i32_3 = arith.constant 0 : i32
    %c0_i32_4 = arith.constant 0 : i32
    return %arg0, %arg1, %c0_i32, %c0_i32_0, %c0_i32_1, %c0_i32_2, %c0_i32_3 : i32, i32, i32, i32, i32, i32, i32
  }
  func.func @transform_1(%arg0: i32, %arg1: i32) -> (i32, i32, i32, i32, i32, i32, i32) {
    %c0_i32 = arith.constant 0 : i32
    %c0_i32_0 = arith.constant 0 : i32
    %c0_i32_1 = arith.constant 0 : i32
    %c0_i32_2 = arith.constant 0 : i32
    %c0_i32_3 = arith.constant 0 : i32
    %c0_i32_4 = arith.constant 0 : i32
    return %arg0, %arg1, %c0_i32, %c0_i32_0, %c0_i32_1, %c0_i32_2, %c0_i32_3 : i32, i32, i32, i32, i32, i32, i32
  }
  func.func @transform_2(%arg0: i32, %arg1: i32) -> (i32, i32, i32, i32, i32, i32, i32) {
    %c0_i32 = arith.constant 0 : i32
    %c0_i32_0 = arith.constant 0 : i32
    %c0_i32_1 = arith.constant 0 : i32
    %c0_i32_2 = arith.constant 0 : i32
    %c0_i32_3 = arith.constant 0 : i32
    %c0_i32_4 = arith.constant 0 : i32
    return %arg0, %arg1, %c0_i32, %c0_i32_0, %c0_i32_1, %c0_i32_2, %c0_i32_3 : i32, i32, i32, i32, i32, i32, i32
  }
  func.func @transform_3(%arg0: i32, %arg1: i32) -> (i32, i32, i32, i32, i32, i32, i32) {
    %c0_i32 = arith.constant 0 : i32
    %c0_i32_0 = arith.constant 0 : i32
    %c0_i32_1 = arith.constant 0 : i32
    %c0_i32_2 = arith.constant 0 : i32
    %c0_i32_3 = arith.constant 0 : i32
    %c0_i32_4 = arith.constant 0 : i32
    return %arg0, %arg1, %c0_i32, %c0_i32_0, %c0_i32_1, %c0_i32_2, %c0_i32_3 : i32, i32, i32, i32, i32, i32, i32
  }
  func.func @transform_4(%arg0: i32, %arg1: i32) -> (i32, i32, i32, i32, i32, i32, i32) {
    %c0_i32 = arith.constant 0 : i32
    %c0_i32_0 = arith.constant 0 : i32
    %c0_i32_1 = arith.constant 0 : i32
    %c0_i32_2 = arith.constant 0 : i32
    %c0_i32_3 = arith.constant 0 : i32
    %c0_i32_4 = arith.constant 0 : i32
    return %arg0, %arg1, %c0_i32, %c0_i32_0, %c0_i32_1, %c0_i32_2, %c0_i32_3 : i32, i32, i32, i32, i32, i32, i32
  }
  func.func @transform_5(%arg0: i32, %arg1: i32) -> (i32, i32, i32, i32, i32) {
    %c0_i32 = arith.constant 0 : i32
    %c0_i32_0 = arith.constant 0 : i32
    %c0_i32_1 = arith.constant 0 : i32
    %c0_i32_2 = arith.constant 0 : i32
    return %arg0, %arg1, %c0_i32, %c0_i32_0, %c0_i32_1 : i32, i32, i32, i32, i32
  }
}

</mosaic_0001>

<bundles_post_ra>
// kernel: tpu_custom_call.1
= control target key start
LH: loop header
LB: loop body
LE: loop exit
PB: predicated region body
PF: predicated region fallthrough
CT: control target
= control target key end

     0   :  { %s17526_s0 = inlined_call_operand.hbm [shape: f32[2,8,2,8,2,8,512], index: 0, kind: input, shape index: {}]   ;;  %s17527_s1 = inlined_call_operand.hbm [shape: f32[2,8,2,8,2,8,512], index: 1, kind: input, shape index: {}]   ;;  %s17528_s2 = inlined_call_operand.hbm [shape: f32[2,8,2,8,2,8,512], index: 2, kind: input, shape index: {}]   ;;  %s17529_s3 = inlined_call_operand.hbm [shape: f32[2,8,2,8,2,8,512], index: 3, kind: input, shape index: {}]   ;;  %s17530_s4 = inlined_call_operand.hbm [shape: f32[2,8,2,8,2,8,128], index: 4, kind: input, shape index: {}]   ;;  %s17531_s5 = inlined_call_operand.hbm [shape: bf16[2,8,8,8,1088], index: 5, kind: output, shape index: {}]  }
   0x1   :  { %18113 = sst [smem:[#allocation158_spill]] %s17527_s1 }
   0x2   :  { %18114 = sst [smem:[#allocation159_spill]] %s17529_s3 }
   0x3   :  { %18115 = sst [smem:[#allocation160_spill]] %s17531_s5 }
   0x4   :  { %10 = vsyncpa [#allocation3], 0 }
   0x5   :  { %12 = vsyncpa [#allocation3 + $0x1], 0 }
   0x6   :  { %13 = vsyncpa [#allocation6], 0 }
   0x7   :  { %15 = vsyncpa [#allocation6 + $0x1], 0 }
   0x8   :  { %16 = vsyncpa [#allocation9], 0 }
   0x9   :  { %18 = vsyncpa [#allocation9 + $0x1], 0 }
   0xa   :  { %19 = vsyncpa [#allocation4], 0 }
   0xb   :  { %21 = vsyncpa [#allocation4 + $0x1], 0  ;;  %s6866_s18 = smov 0   ;;  %s6868_s19 = smov 0  }
   0xc   :  { %s6870_s20 = smov 0   ;;  %s6872_s21 = smov 0  }
   0xd   :  { %s6874_s22 = smov 0   ;;  %s6876_s23 = smov 0  }
   0xe   :  { %s6878_s24 = smov 0   ;;  %s6880_s25 = smov 0  }
   0xf LB: > { %18116 = sst [smem:[#allocation16_spill]] %s6793_s18  ;;  %s6907_s26 = sadd.s32 4294967295, %s6821_s25   ;;  %s6821_s25 = sphi %s6880_s25, %s27_s25   ;;  %s6817_s24 = sphi %s6878_s24, %s20331_s24   ;;  %s6813_s23 = sphi %s6876_s23, %s20330_s23   ;;  %s6809_s22 = sphi %s6874_s22, %s20329_s22   ;;  %s6805_s21 = sphi %s6872_s21, %s20328_s21   ;;  %s6801_s20 = sphi %s6870_s20, %s20323_s20   ;;  %s6797_s19 = sphi %s6868_s19, %s20327_s19   ;;  %s6793_s18 = sphi %s6866_s18, %s20326_s18  }
  0x10   : > { %18117 = sst [smem:[#allocation17_spill]] %s6801_s20  ;;  %s6089_s27 = sadd.s32 4294967294, %s6821_s25  }
  0x11   : > { %18118 = sst [smem:[#allocation18_spill]] %s6805_s21  ;;  %s36_s28 = sadd.s32 1, %s6813_s23 }
  0x12   : > { %18119 = sst [smem:[#allocation19_spill]] %s6809_s22  ;;  %s39_s29 = sadd.s32 1, %s6817_s24 }
  0x13   : > { %18120 = sst [smem:[#allocation20_spill]] %s6821_s25  ;;  %p37_p0 = scmp.ge.s32.totalorder %s36_s28, 2 }
  0x14   : > { %18121 = sst [smem:[#allocation21_spill]] %s6907_s26  ;;  %s48_s30 = sadd.s32 1, %s6801_s20 }
  0x15   : > { %p55_p1 = scmp.ne.s32.totalorder %s6801_s20, %s6797_s19  ;;  %p56_p2 = scmp.eq.s32.totalorder %s6821_s25, 0 }
  0x16   : > { %s20333_s28 = smov (%p37_p0, %s36_s28), 0  ;;  %s20335_s29 = smov (!%p37_p0, %s39_s29), %s6817_s24 }
  0x17   : > { %18122 = sst [smem:[#allocation22_spill]] %s20333_s28  ;;  %s44_s6 = ssub.s32 %s6813_s23, %s20333_s28 }
  0x18   : > { %p6921_p3 = por %p56_p2, %p55_p1  ;;  %p41_p4 = scmp.ge.s32.totalorder %s20335_s29, 2 }
  0x19   : > { %p61_p5 = scmp.ne.s32.totalorder %s6797_s19, %s6793_s18  ;;  %p62_p6 = scmp.eq.s32.totalorder %s6907_s26, 0 }
  0x1a   : > { %p199_p7 = scmp.eq.s32.totalorder %s6907_s26, 3  ;;  %s20337_s29 = smov (%p41_p4, %s20335_s29), 0 }
  0x1b   : > { %18124 = sst [smem:[#allocation23_spill]] %s20337_s29  ;;  %p6931_p8 = por %p62_p6, %p61_p5 }
  0x1c   : > { %p6935_p9 = por %p199_p7, %p55_p1  ;;  %s43_s10 = ssub.s32 %s6817_s24, %s20337_s29 }
  0x1d   : > { %p205_p10 = scmp.eq.s32.totalorder %s6089_s27, 3  ;;  %s45_s11 = sor.u32 %s44_s6, %s43_s10 }
  0x1e   : > { %s18126_s9 = scalar_select %p6935_p9, 1, 0 }
  0x1f   : > { %p46_p11 = scmp.eq.s32.totalorder %s45_s11, 0  ;;  %p6941_p12 = por %p205_p10, %p61_p5 }
  0x20   : > { %18127 = sst [smem:[#allocation24_spill]] %s18126_s9  ;;  %p6424_p13 = scmp.lt.s32.totalorder %s6821_s25, 4 }
  0x21   : > { %s18128_s12 = scalar_select %p6941_p12, 1, 0 }
  0x22   : > { %s6947_s13 = sand.u32 1, %s6801_s20   ;;  %s6256_s16 = sshll.u32 %s6813_s23, 9 }
  0x23   : > { %18129 = sst [smem:[#allocation25_spill]] %s18128_s12  ;;  %s6953_s15 = sshll.u32 %s6947_s13, 12 }
  0x24   : > { %s6950_s14 = scalar_select %p46_p11, %s6801_s20, %s48_s30  }
  0x25   : > { %s6095_s17 = sshll.u32 %s6817_s24, 10  ;;  %p6959_p0 = pnand %p6424_p13, %p6921_p3 }
  0x26   : > { %18130 = sst [smem:[#allocation26_spill]] %s6950_s14  ;;  %s236_s6 = sadd.s32 %s6256_s16, %s6095_s17 }
  0x27   : > { %s6963_s10 = sshll.u32 %s236_s6, 7  ;;  %s17536_s11 = sand.u32 1, %s6821_s25  }
  0x28   : > { %s18132_s1 = sld [smem:[#allocation158_spill]]  ;;  %s253_s14 = scalar_lea.vmem [#allocation5], %s6953_s15 }
  0x29   : > { %s263_s20 = sshll.u32 %s253_s14, 4  ;;  %p6117_p1 = scmp.ge.s32.totalorder %s6821_s25, 1  ;;  %s264_s20 = int_to_ptr.vmem [resolvable:$true] %s263_s20 }
  0x2a   : > { %s6974_s7 = scalar_lea.sflag [#allocation6], %s17536_s11  ;;  %p6978_p2 = pneg %p6959_p0 }
  0x2b   : > { %s6590_s16 = scalar_lea.vmem %s264_s20, 65536  ;;  %s6823_s28 = smov [#allocation5]  }
  0x2c   : > { %p6591_p3 = scmp.ne.s32.totalorder %s264_s20, %s6590_s16  ;;  %s6595_s29 = sshll.u32 %s6823_s28, 4  ;;  %s6596_s29 = int_to_ptr.vmem [resolvable:$false] %s6595_s29 }
  0x2d   : > { %s6597_s14 = scalar_lea.vmem %s6596_s29, 131072  ;;  %p6598_p6 = scmp.lt.s32.totalorder %s264_s20, %s6596_s29 }
  0x2e   : > { %s262_s30 = scalar_lea.hbm %s18132_s1, %s6963_s10  ;;  %p6593_p4 = pnand %p6591_p3, %p6978_p2 }
  0x2f   : > { %p6599_p7 = scmp.lt.s32.totalorder %s6597_s14, %s6590_s16 }
  0x30   : > { %p6594_p5 = pneg %p6593_p4 }
  0x31   : > { %p6600_p10 = por %p6599_p7, %p6598_p6 }
  0x33   : > { %p6601_p11 = pnand %p6600_p10, %p6594_p5 }
  0x35   : > { %6604 = shalt.err (!%p6601_p11)
}
  0x36   : > { %s6824_s17 = smov 512   ;;  %s6825_s6 = smov 32  }
  0x37   : > { %6410 = dma.hbm_to_vmem [thread:$0]  (!%p6959_p0), %s262_s30, 65536, %s264_s20, %s6974_s7, %s6824_s17, %s6824_s17, %s6825_s6  }
  0x38   : > { %p343_p13 = scmp.lt.s32.totalorder %s6821_s25, 5  ;;  %s18134_s3 = sld [smem:[#allocation159_spill]] }
  0x39   : > { %s301_s11 = scalar_lea.vmem [#allocation8], %s6953_s15  ;;  %s18136_s18 = sand.u32 1, %s6821_s25  }
  0x3a   : > { %p6997_p3 = pnand %p6117_p1, %p343_p13  ;;  %s311_s1 = sshll.u32 %s301_s11, 4  ;;  %s312_s1 = int_to_ptr.vmem [resolvable:$true] %s311_s1 }
  0x3b   : > { %s7004_s9 = scalar_lea.sflag [#allocation9], %s18136_s18  ;;  %s6618_s5 = scalar_lea.vmem %s312_s1, 65536 }
  0x3c   : > { %p6619_p4 = scmp.ne.s32.totalorder %s312_s1, %s6618_s5  ;;  %s6826_s20 = smov [#allocation8]  }
  0x3d   : > { %s6623_s30 = sshll.u32 %s6826_s20, 4  ;;  %s6624_s30 = int_to_ptr.vmem [resolvable:$false] %s6623_s30 }
  0x3e   : > { %s310_s29 = scalar_lea.hbm %s18134_s3, %s6963_s10  ;;  %p6621_p5 = pnand %p6619_p4, %p6978_p2 }
  0x3f   : > { %s6625_s16 = scalar_lea.vmem %s6624_s30, 131072  ;;  %p6626_p7 = scmp.lt.s32.totalorder %s312_s1, %s6624_s30 }
  0x40   : > { %p6622_p6 = pneg %p6621_p5  ;;  %p6627_p1 = scmp.lt.s32.totalorder %s6625_s16, %s6618_s5 }
  0x42   : > { %p6628_p10 = por %p6627_p1, %p6626_p7 }
  0x44   : > { %p6629_p11 = pnand %p6628_p10, %p6622_p6 }
  0x46   : > { %6632 = shalt.err (!%p6629_p11)
}
  0x47   : > { %6416 = dma.hbm_to_vmem [thread:$0]  (!%p6959_p0), %s310_s29, 65536, %s312_s1, %s7004_s9, %s6824_s17, %s6824_s17, %s6825_s6  }
  0x48   : > { %s238_s28 = scalar_lea.hbm %s17526_s0, %s6963_s10  ;;  %s229_s5 = scalar_lea.vmem [#allocation2], %s6953_s15 }
  0x49   : > { %s239_s20 = sshll.u32 %s229_s5, 4  ;;  %s286_s3 = scalar_lea.hbm %s17528_s2, %s6963_s10  ;;  %s240_s20 = int_to_ptr.vmem [resolvable:$true] %s239_s20 }
  0x4a   : > { %s226_s25 = scalar_lea.sflag [#allocation3], %s6947_s13  ;;  %s6646_s22 = scalar_lea.vmem %s240_s20, 65536 }
  0x4b   : > { %p6647_p13 = scmp.ne.s32.totalorder %s240_s20, %s6646_s22  ;;  %s6827_s21 = smov [#allocation2]  }
  0x4c   : > { %s6651_s26 = sshll.u32 %s6827_s21, 4  ;;  %s6652_s26 = int_to_ptr.vmem [resolvable:$false] %s6651_s26 }
  0x4d   : > { %p6649_p4 = pnand %p6647_p13, %p6978_p2  ;;  %s6653_s1 = scalar_lea.vmem %s6652_s26, 131072 }
  0x4e   : > { %p6654_p6 = scmp.lt.s32.totalorder %s240_s20, %s6652_s26  ;;  %p6655_p7 = scmp.lt.s32.totalorder %s6653_s1, %s6646_s22 }
  0x4f   : > { %p6650_p5 = pneg %p6649_p4 }
  0x50   : > { %p6656_p1 = por %p6655_p7, %p6654_p6 }
  0x52   : > { %p6657_p10 = pnand %p6656_p1, %p6650_p5 }
  0x54   : > { %6660 = shalt.err (!%p6657_p10)
}
  0x55   : > { %6407 = dma.hbm_to_vmem [thread:$0]  (!%p6959_p0), %s238_s28, 65536, %s240_s20, %s226_s25, %s6824_s17, %s6824_s17, %s6825_s6  }
  0x56   : > { %s277_s29 = scalar_lea.vmem [#allocation7], %s6953_s15  ;;  %s6112_s11 = sshll.u32 %s6947_s13, 10 }
  0x57   : > { %s287_s18 = sshll.u32 %s277_s29, 4  ;;  %s6828_s22 = smov [#allocation7]   ;;  %s288_s18 = int_to_ptr.vmem [resolvable:$true] %s287_s18 }
  0x58   : > { %s6674_s21 = scalar_lea.vmem %s288_s18, 65536  ;;  %s6679_s26 = sshll.u32 %s6828_s22, 4  ;;  %s6680_s26 = int_to_ptr.vmem [resolvable:$false] %s6679_s26 }
  0x59   : > { %p6675_p11 = scmp.ne.s32.totalorder %s288_s18, %s6674_s21  ;;  %s6681_s5 = scalar_lea.vmem %s6680_s26, 131072 }
  0x5a   : > { %p6682_p5 = scmp.lt.s32.totalorder %s288_s18, %s6680_s26  ;;  %p6683_p6 = scmp.lt.s32.totalorder %s6681_s5, %s6674_s21 }
  0x5b   : > { %p6677_p13 = pnand %p6675_p11, %p6978_p2 }
  0x5c   : > { %p6684_p7 = por %p6683_p6, %p6682_p5 }
  0x5d   : > { %p6678_p4 = pneg %p6677_p13 }
  0x5f   : > { %p6685_p1 = pnand %p6684_p7, %p6678_p4 }
  0x61   : > { %6688 = shalt.err (!%p6685_p1)
}
  0x62   : > { %6413 = dma.hbm_to_vmem [thread:$0]  (!%p6959_p0), %s286_s3, 65536, %s288_s18, %s6974_s7, %s6824_s17, %s6824_s17, %s6825_s6  }
  0x63   : > { %s6260_s15 = sshll.u32 %s6813_s23, 7  ;;  %s6115_s28 = sshll.u32 %s6817_s24, 8 }
  0x64   : > { %s332_s20 = sadd.s32 %s6260_s15, %s6115_s28  ;;  %s325_s30 = scalar_lea.vmem [#allocation10], %s6112_s11 }
  0x65   : > { %s335_s16 = sshll.u32 %s325_s30, 4  ;;  %s6116_s1 = sshll.u32 %s332_s20, 7  ;;  %s336_s16 = int_to_ptr.vmem [resolvable:$true] %s335_s16 }
  0x66   : > { %s334_s22 = scalar_lea.hbm %s17530_s4, %s6116_s1  ;;  %s6702_s26 = scalar_lea.vmem %s336_s16, 16384 }
  0x67   : > { %p6703_p10 = scmp.ne.s32.totalorder %s336_s16, %s6702_s26  ;;  %s6829_s10 = smov [#allocation10]  }
  0x68   : > { %s6707_s5 = sshll.u32 %s6829_s10, 4  ;;  %s6708_s5 = int_to_ptr.vmem [resolvable:$false] %s6707_s5 }
  0x69   : > { %p6705_p11 = pnand %p6703_p10, %p6978_p2  ;;  %s6709_s3 = scalar_lea.vmem %s6708_s5, 32768 }
  0x6a   : > { %p6710_p4 = scmp.lt.s32.totalorder %s336_s16, %s6708_s5  ;;  %p6711_p5 = scmp.lt.s32.totalorder %s6709_s3, %s6702_s26 }
  0x6b   : > { %p6706_p13 = pneg %p6705_p11 }
  0x6c   : > { %p6712_p6 = por %p6711_p5, %p6710_p4 }
  0x6e   : > { %p6713_p7 = pnand %p6712_p6, %p6706_p13 }
  0x70   : > { %6716 = shalt.err (!%p6713_p7)
}
  0x71   : > { %s6830_s7 = smov 128   ;;  %s6831_s17 = smov 8  }
  0x72   : > { %6419 = dma.hbm_to_vmem [thread:$0]  (!%p6959_p0), %s334_s22, 16384, %s336_s16, %s7004_s9, %s6830_s7, %s6830_s7, %s6831_s17  }
  0x73   : > { %347 = sbr.rel (%p6997_p3) target bundleno = 1252 (0x4e4), region = 40 }
  0x78   : > { %s7059_s12 = sand.u32 1, %s6797_s19  }
  0x79   : > { %s6118_s6 = sshll.u32 %s7059_s12, 12  ;;  %s350_s18 = scalar_lea.sflag [#allocation3], %s7059_s12 }
  0x7a   : > { %s7063_s11 = scalar_lea.vmem [#allocation2], %s6118_s6 }
  0x7b   : > { %6776 = dma.done.wait (%p6931_p8), %s350_s18, 65536  }
  0x7c   : > { %6778 = vsyncadd (%p6931_p8), %s350_s18, 4294901760  ;;  %s18137_s27 = sld [smem:[#allocation21_spill]]  ;;  %s7070_s25 = scalar_lea.vmem [#allocation5], %s6118_s6 }
  0x82   : > { %s358_s9 = sand.u32 1, %s18137_s27  }
  0x83   : > { %s359_s14 = scalar_lea.sflag [#allocation6], %s358_s9 }
  0x84   : > { %6780 = dma.done.wait (%p6931_p8), %s359_s14, 131072  }
  0x85   : > { %6782 = vsyncadd (%p6931_p8), %s359_s14, 4294836224  ;;  %s7076_s13 = scalar_lea.vmem [#allocation7], %s6118_s6  ;;  %s377_s15 = scalar_lea.sflag [#allocation9], %s358_s9 }
  0x86   : > { %s7078_s28 = scalar_lea.vmem [#allocation8], %s6118_s6 }
  0x87   : > { %6784 = dma.done.wait (%p6931_p8), %s377_s15, 81920  }
  0x88   : > { %6786 = vsyncadd (%p6931_p8), %s377_s15, 4294885376  ;;  %s6122_s20 = sshll.u32 %s7059_s12, 10  ;;  %s6832_s8 = smov 64   ;;  %vm5850_vm0 = vcmask 519168  }
  0x89   : > { %s7085_s30 = scalar_lea.vmem [#allocation10], %s6122_s20  ;;  %s6389_s16 = smul.u32 1152, %s7059_s12 }
  0x8a   : > { %v5442_v0 = vld [vmem:[%s7085_s30 + $0x40] sm:$0xff]  ;;  %v5443_v1 = vld [vmem:[%s7085_s30 + $0x48] sm:$0xff]  ;;  %v5444_v2 = vld [vmem:[%s7085_s30 + $0x50] sm:$0xff]  ;;  %s20287_s29 = sld [smem:[#allocation18_spill]]  ;;  %s5884_s27 = scalar_lea.sflag [#allocation4], %s7059_s12 }
  0x8b   : > { %v5445_v3 = vld [vmem:[%s7085_s30 + $0x58] sm:$0xff]  ;;  %v5458_v4 = vld [vmem:[%s7085_s30 + $0xc0] sm:$0xff]  ;;  %v5459_v5 = vld [vmem:[%s7085_s30 + $0xc8] sm:$0xff]  ;;  %s8679_s1 = scalar_lea.vmem [#allocation11], %s6389_s16  ;;  %s20290_s21 = sld [smem:[#allocation19_spill]] }
  0x8c   : > { %v5460_v6 = vld [vmem:[%s7085_s30 + $0xd0] sm:$0xff]  ;;  %v5461_v7 = vld [vmem:[%s7085_s30 + $0xd8] sm:$0xff]  ;;  %v5570_v8 = vmax.f32 %v5442_v0, %v5458_v4  ;;  %v5571_v9 = vmax.f32 %v5443_v1, %v5459_v5  ;;  %v5434_v10 = vld [vmem:[%s7085_s30] sm:$0xff]  ;;  %s5900_s5 = sshll.u32 %s8679_s1, 4  ;;  %s20317_s6 = sld [smem:[#allocation160_spill]]  ;;  %s17460_s5 = int_to_ptr.vmem [resolvable:$true] %s5900_s5 }
  0x8d   : > { %v5572_v11 = vmax.f32 %v5444_v2, %v5460_v6  ;;  %v5573_v12 = vmax.f32 %v5445_v3, %v5461_v7  ;;  %v5435_v13 = vld [vmem:[%s7085_s30 + $0x8] sm:$0xff]  ;;  %v5436_v14 = vld [vmem:[%s7085_s30 + $0x10] sm:$0xff]  ;;  %v5437_v15 = vld [vmem:[%s7085_s30 + $0x18] sm:$0xff]  ;;  %s6717_s9 = scalar_lea.vmem %s17460_s5, 18432  ;;  %s6833_s14 = smov [#allocation11]  }
  0x8e   : > { %v7099_v16 = vmax.f32 %v5570_v8, %v5571_v9  ;;  %v5450_v17 = vld [vmem:[%s7085_s30 + $0x80] sm:$0xff]  ;;  %v5451_v18 = vld [vmem:[%s7085_s30 + $0x88] sm:$0xff]  ;;  %v5452_v19 = vld [vmem:[%s7085_s30 + $0x90] sm:$0xff]  ;;  %p6718_p8 = scmp.ne.s32.totalorder %s17460_s5, %s6717_s9 }
  0x8f   : > { %v7104_v20 = vmax.f32 %v5572_v11, %v5573_v12  ;;  %v5453_v21 = vld [vmem:[%s7085_s30 + $0x98] sm:$0xff]  ;;  %v5562_v22 = vmax.f32 %v5434_v10, %v5450_v17  ;;  %v5563_v23 = vmax.f32 %v5435_v13, %v5451_v18  ;;  %v5564_v24 = vmax.f32 %v5436_v14, %v5452_v19  ;;  %v5446_v25 = vld [vmem:[%s7085_s30 + $0x60] sm:$0xff]  ;;  %v5447_v26 = vld [vmem:[%s7085_s30 + $0x68] sm:$0xff] }
  0x90   : > { %18138 = vst [vmem:[#allocation27_spill] sm:$0xff] %v7099_v16  ;;  %v5565_v27 = vmax.f32 %v5437_v15, %v5453_v21  ;;  %v5448_v28 = vld [vmem:[%s7085_s30 + $0x70] sm:$0xff]  ;;  %v5449_v29 = vld [vmem:[%s7085_s30 + $0x78] sm:$0xff]  ;;  %v5462_v30 = vld [vmem:[%s7085_s30 + $0xe0] sm:$0xff]  ;;  %s6390_s22 = smul.u32 288, %s20287_s29  ;;  %p6719_p0 = pnand %p6718_p8, %p6935_p9 }
  0x91   : > { %18139 = vst [vmem:[#allocation28_spill] sm:$0xff] %v7104_v20  ;;  %v6507_v31 = vpack.i.bf16 %v7104_v20, %v7099_v16  ;;  %v7114_v32 = vmax.f32 %v5562_v22, %v5563_v23  ;;  %v5463_v33 = vld [vmem:[%s7085_s30 + $0xe8] sm:$0xff]  ;;  %v5464_v34 = vld [vmem:[%s7085_s30 + $0xf0] sm:$0xff]  ;;  %v5465_v35 = vld [vmem:[%s7085_s30 + $0xf8] sm:$0xff]  ;;  %v5574_v36 = vmax.f32 %v5446_v25, %v5462_v30  ;;  %s6391_s26 = smul.u32 576, %s20290_s21 }
  0x92   : > { %v7119_v37 = vmax.f32 %v5564_v24, %v5565_v27  ;;  %v5575_v38 = vmax.f32 %v5447_v26, %v5463_v33  ;;  %v5576_v39 = vmax.f32 %v5448_v28, %v5464_v34  ;;  %v5577_v40 = vmax.f32 %v5449_v29, %v5465_v35  ;;  %v5438_v41 = vld [vmem:[%s7085_s30 + $0x20] sm:$0xff]  ;;  %v5439_v42 = vld [vmem:[%s7085_s30 + $0x28] sm:$0xff]  ;;  %v5440_v43 = vld [vmem:[%s7085_s30 + $0x30] sm:$0xff]  ;;  %p6720_p2 = pneg %p6719_p0 }
  0x93   : > { %18140 = vst [vmem:[#allocation29_spill] sm:$0xff] %v7114_v32  ;;  %6508 = vrot.lane.b32.xlu1 %v6507_v31, %s6832_s8  ;;  %v5441_v44 = vld [vmem:[%s7085_s30 + $0x38] sm:$0xff]  ;;  %v5454_v45 = vld [vmem:[%s7085_s30 + $0xa0] sm:$0xff]  ;;  %v5455_v46 = vld [vmem:[%s7085_s30 + $0xa8] sm:$0xff]  ;;  %s17442_s10 = sadd.s32 %s6391_s26, %s6390_s22 }
  0x94   : > { %18141 = vst [vmem:[#allocation30_spill] sm:$0xff] %v7119_v37  ;;  %v6497_v47 = vpack.i.bf16 %v7119_v37, %v7114_v32  ;;  %v7130_v48 = vmax.f32 %v5574_v36, %v5575_v38  ;;  %v7132_v49 = vmax.f32 %v5576_v39, %v5577_v40  ;;  %v5456_v50 = vld [vmem:[%s7085_s30 + $0xb0] sm:$0xff]  ;;  %v5457_v51 = vld [vmem:[%s7085_s30 + $0xb8] sm:$0xff]  ;;  %v5566_v52 = vmax.f32 %v5438_v41, %v5454_v45  ;;  %v5470_v53 = vld [vmem:[%s7085_s30 + $0x120] sm:$0xff]  ;;  %s6253_s3 = sshll.u32 %s17442_s10, 6 }
  0x95   : > { %v5567_v54 = vmax.f32 %v5439_v42, %v5455_v46  ;;  %v5568_v55 = vmax.f32 %v5440_v43, %v5456_v50  ;;  %v5569_v56 = vmax.f32 %v5441_v44, %v5457_v51  ;;  %v5471_v57 = vld [vmem:[%s7085_s30 + $0x128] sm:$0xff]  ;;  %v5472_v58 = vld [vmem:[%s7085_s30 + $0x130] sm:$0xff]  ;;  %v5473_v59 = vld [vmem:[%s7085_s30 + $0x138] sm:$0xff] }
  0x96   : > { %18142 = vst [vmem:[#allocation31_spill] sm:$0xff] %v7130_v48  ;;  %18143 = vst [vmem:[#allocation32_spill] sm:$0xff] %v7132_v49  ;;  %6498 = vrot.lane.b32.xlu0 %v6497_v47, %s6832_s8  ;;  %v6512_v60 = vpack.i.bf16 %v7132_v49, %v7130_v48  ;;  %v5486_v61 = vld [vmem:[%s7085_s30 + $0x1a0] sm:$0xff]  ;;  %v5487_v62 = vld [vmem:[%s7085_s30 + $0x1a8] sm:$0xff] }
  0x97   : > { %v5488_v63 = vld [vmem:[%s7085_s30 + $0x1b0] sm:$0xff]  ;;  %v7146_v0 = vmax.f32 %v5566_v52, %v5567_v54  ;;  %v7148_v1 = vmax.f32 %v5568_v55, %v5569_v56  ;;  %v5489_v2 = vld [vmem:[%s7085_s30 + $0x1b8] sm:$0xff]  ;;  %v5582_v3 = vmax.f32 %v5470_v53, %v5486_v61  ;;  %v5583_v4 = vmax.f32 %v5471_v57, %v5487_v62  ;;  %v5466_v5 = vld [vmem:[%s7085_s30 + $0x100] sm:$0xff] }
  0x98   : > { %v5467_v6 = vld [vmem:[%s7085_s30 + $0x108] sm:$0xff]  ;;  %6513 = vrot.lane.b32.xlu1 %v6512_v60, %s6832_s8  ;;  %v5584_v7 = vmax.f32 %v5472_v58, %v5488_v63  ;;  %v5585_v8 = vmax.f32 %v5473_v59, %v5489_v2  ;;  %v5468_v9 = vld [vmem:[%s7085_s30 + $0x110] sm:$0xff]  ;;  %v5469_v10 = vld [vmem:[%s7085_s30 + $0x118] sm:$0xff] }
  0x99   : > { %18144 = vst [vmem:[#allocation33_spill] sm:$0xff] %v7146_v0  ;;  %18145 = vst [vmem:[#allocation34_spill] sm:$0xff] %v7148_v1  ;;  %v5482_v11 = vld [vmem:[%s7085_s30 + $0x180] sm:$0xff]  ;;  %v6502_v12 = vpack.i.bf16 %v7148_v1, %v7146_v0  ;;  %v7159_v13 = vmax.f32 %v5582_v3, %v5583_v4  ;;  %v5483_v14 = vld [vmem:[%s7085_s30 + $0x188] sm:$0xff] }
  0x9a   : > { %v5484_v15 = vld [vmem:[%s7085_s30 + $0x190] sm:$0xff]  ;;  %v5485_v17 = vld [vmem:[%s7085_s30 + $0x198] sm:$0xff]  ;;  %v5578_v18 = vmax.f32 %v5466_v5, %v5482_v11  ;;  %v7164_v19 = vmax.f32 %v5584_v7, %v5585_v8  ;;  %v5579_v21 = vmax.f32 %v5467_v6, %v5483_v14  ;;  %v5478_v24 = vld [vmem:[%s7085_s30 + $0x160] sm:$0xff] }
  0x9b   : > { %18146 = vst [vmem:[#allocation35_spill] sm:$0xff] %v7159_v13  ;;  %v5580_v22 = vmax.f32 %v5468_v9, %v5484_v15  ;;  %v5581_v23 = vmax.f32 %v5469_v10, %v5485_v17  ;;  %v5479_v25 = vld [vmem:[%s7085_s30 + $0x168] sm:$0xff]  ;;  %v5480_v26 = vld [vmem:[%s7085_s30 + $0x170] sm:$0xff]  ;;  %6503 = vrot.lane.b32.xlu0 %v6502_v12, %s6832_s8  ;;  %v5481_v27 = vld [vmem:[%s7085_s30 + $0x178] sm:$0xff] }
  0x9c   : > { %18147 = vst [vmem:[#allocation36_spill] sm:$0xff] %v7164_v19  ;;  %v5494_v28 = vld [vmem:[%s7085_s30 + $0x1e0] sm:$0xff]  ;;  %v5495_v29 = vld [vmem:[%s7085_s30 + $0x1e8] sm:$0xff]  ;;  %v6522_v30 = vpack.i.bf16 %v7164_v19, %v7159_v13  ;;  %v7175_v31 = vmax.f32 %v5578_v18, %v5579_v21  ;;  %v5496_v34 = vld [vmem:[%s7085_s30 + $0x1f0] sm:$0xff] }
  0x9d   : > { %v7177_v33 = vmax.f32 %v5580_v22, %v5581_v23  ;;  %v5497_v35 = vld [vmem:[%s7085_s30 + $0x1f8] sm:$0xff]  ;;  %v5590_v36 = vmax.f32 %v5478_v24, %v5494_v28  ;;  %v5474_v38 = vld [vmem:[%s7085_s30 + $0x140] sm:$0xff]  ;;  %v5591_v39 = vmax.f32 %v5479_v25, %v5495_v29  ;;  %v5592_v40 = vmax.f32 %v5480_v26, %v5496_v34  ;;  %v5475_v42 = vld [vmem:[%s7085_s30 + $0x148] sm:$0xff] }
  0x9e   : > { %18148 = vst [vmem:[#allocation37_spill] sm:$0xff] %v7175_v31  ;;  %v5593_v41 = vmax.f32 %v5481_v27, %v5497_v35  ;;  %v5476_v43 = vld [vmem:[%s7085_s30 + $0x150] sm:$0xff]  ;;  %v5477_v44 = vld [vmem:[%s7085_s30 + $0x158] sm:$0xff]  ;;  %6523 = vrot.lane.b32.xlu1 %v6522_v30, %s6832_s8  ;;  %v5490_v46 = vld [vmem:[%s7085_s30 + $0x1c0] sm:$0xff] }
  0x9f   : > { %18149 = vst [vmem:[#allocation38_spill] sm:$0xff] %v7177_v33  ;;  %v6517_v45 = vpack.i.bf16 %v7177_v33, %v7175_v31  ;;  %v5491_v47 = vld [vmem:[%s7085_s30 + $0x1c8] sm:$0xff]  ;;  %v5492_v50 = vld [vmem:[%s7085_s30 + $0x1d0] sm:$0xff]  ;;  %v7191_v51 = vmax.f32 %v5590_v36, %v5591_v39  ;;  %v5493_v53 = vld [vmem:[%s7085_s30 + $0x1d8] sm:$0xff]  ;;  %v5586_v54 = vmax.f32 %v5474_v38, %v5490_v46 }
  0xa0   : > { %v7193_v52 = vmax.f32 %v5592_v40, %v5593_v41  ;;  %v5587_v55 = vmax.f32 %v5475_v42, %v5491_v47  ;;  %v5502_v56 = vld [vmem:[%s7085_s30 + $0x220] sm:$0xff]  ;;  %v5503_v57 = vld [vmem:[%s7085_s30 + $0x228] sm:$0xff]  ;;  %v5588_v58 = vmax.f32 %v5476_v43, %v5492_v50  ;;  %v5589_v59 = vmax.f32 %v5477_v44, %v5493_v53  ;;  %v5504_v60 = vld [vmem:[%s7085_s30 + $0x230] sm:$0xff] }
  0xa1   : > { %18150 = vst [vmem:[#allocation39_spill] sm:$0xff] %v7191_v51  ;;  %6518 = vrot.lane.b32.xlu0 %v6517_v45, %s6832_s8  ;;  %v5505_v61 = vld [vmem:[%s7085_s30 + $0x238] sm:$0xff]  ;;  %v5518_v62 = vld [vmem:[%s7085_s30 + $0x2a0] sm:$0xff]  ;;  %v5519_v3 = vld [vmem:[%s7085_s30 + $0x2a8] sm:$0xff] }
  0xa2   : > { %18151 = vst [vmem:[#allocation40_spill] sm:$0xff] %v7193_v52  ;;  %v6532_v63 = vpack.i.bf16 %v7193_v52, %v7191_v51  ;;  %v7204_v2 = vmax.f32 %v5586_v54, %v5587_v55  ;;  %v5520_v4 = vld [vmem:[%s7085_s30 + $0x2b0] sm:$0xff]  ;;  %v5521_v5 = vld [vmem:[%s7085_s30 + $0x2b8] sm:$0xff]  ;;  %v5598_v6 = vmax.f32 %v5502_v56, %v5518_v62  ;;  %v7209_v7 = vmax.f32 %v5588_v58, %v5589_v59  ;;  %v5498_v11 = vld [vmem:[%s7085_s30 + $0x200] sm:$0xff] }
  0xa3   : > { %v5599_v8 = vmax.f32 %v5503_v57, %v5519_v3  ;;  %v5600_v9 = vmax.f32 %v5504_v60, %v5520_v4  ;;  %v5601_v10 = vmax.f32 %v5505_v61, %v5521_v5  ;;  %v5499_v12 = vld [vmem:[%s7085_s30 + $0x208] sm:$0xff]  ;;  %v5500_v14 = vld [vmem:[%s7085_s30 + $0x210] sm:$0xff]  ;;  %v5501_v15 = vld [vmem:[%s7085_s30 + $0x218] sm:$0xff] }
  0xa4   : > { %18152 = vst [vmem:[#allocation41_spill] sm:$0xff] %v7204_v2  ;;  %18153 = vst [vmem:[#allocation42_spill] sm:$0xff] %v7209_v7  ;;  %6533 = vrot.lane.b32.xlu1 %v6532_v63, %s6832_s8  ;;  %v5514_v17 = vld [vmem:[%s7085_s30 + $0x280] sm:$0xff]  ;;  %v5515_v18 = vld [vmem:[%s7085_s30 + $0x288] sm:$0xff]  ;;  %v6527_v21 = vpack.i.bf16 %v7209_v7, %v7204_v2 }
  0xa5   : > { %v7220_v22 = vmax.f32 %v5598_v6, %v5599_v8  ;;  %v7222_v23 = vmax.f32 %v5600_v9, %v5601_v10  ;;  %v5516_v24 = vld [vmem:[%s7085_s30 + $0x290] sm:$0xff]  ;;  %v5517_v25 = vld [vmem:[%s7085_s30 + $0x298] sm:$0xff]  ;;  %v5594_v26 = vmax.f32 %v5498_v11, %v5514_v17  ;;  %v5510_v27 = vld [vmem:[%s7085_s30 + $0x260] sm:$0xff]  ;;  %v5595_v28 = vmax.f32 %v5499_v12, %v5515_v18 }
  0xa6   : > { %v5596_v29 = vmax.f32 %v5500_v14, %v5516_v24  ;;  %v5597_v30 = vmax.f32 %v5501_v15, %v5517_v25  ;;  %v5511_v34 = vld [vmem:[%s7085_s30 + $0x268] sm:$0xff]  ;;  %v5512_v35 = vld [vmem:[%s7085_s30 + $0x270] sm:$0xff]  ;;  %v5513_v36 = vld [vmem:[%s7085_s30 + $0x278] sm:$0xff]  ;;  %6528 = vrot.lane.b32.xlu0 %v6527_v21, %s6832_s8 }
  0xa7   : > { %18154 = vst [vmem:[#allocation43_spill] sm:$0xff] %v7220_v22  ;;  %18155 = vst [vmem:[#allocation44_spill] sm:$0xff] %v7222_v23  ;;  %v6542_v38 = vpack.i.bf16 %v7222_v23, %v7220_v22  ;;  %v5526_v39 = vld [vmem:[%s7085_s30 + $0x2e0] sm:$0xff]  ;;  %v5527_v40 = vld [vmem:[%s7085_s30 + $0x2e8] sm:$0xff]  ;;  %v7236_v42 = vmax.f32 %v5594_v26, %v5595_v28 }
  0xa8   : > { %v5528_v41 = vld [vmem:[%s7085_s30 + $0x2f0] sm:$0xff]  ;;  %v7238_v43 = vmax.f32 %v5596_v29, %v5597_v30  ;;  %v5529_v44 = vld [vmem:[%s7085_s30 + $0x2f8] sm:$0xff]  ;;  %v5606_v45 = vmax.f32 %v5510_v27, %v5526_v39  ;;  %v5607_v46 = vmax.f32 %v5511_v34, %v5527_v40  ;;  %v5506_v47 = vld [vmem:[%s7085_s30 + $0x240] sm:$0xff] }
  0xa9   : > { %18156 = vst [vmem:[#allocation45_spill] sm:$0xff] %v7236_v42  ;;  %v5507_v50 = vld [vmem:[%s7085_s30 + $0x248] sm:$0xff]  ;;  %6543 = vrot.lane.b32.xlu1 %v6542_v38, %s6832_s8  ;;  %v5608_v53 = vmax.f32 %v5512_v35, %v5528_v41  ;;  %v5609_v54 = vmax.f32 %v5513_v36, %v5529_v44  ;;  %v5508_v55 = vld [vmem:[%s7085_s30 + $0x250] sm:$0xff]  ;;  %v5509_v56 = vld [vmem:[%s7085_s30 + $0x258] sm:$0xff] }
  0xaa   : > { %18157 = vst [vmem:[#allocation46_spill] sm:$0xff] %v7238_v43  ;;  %v5522_v57 = vld [vmem:[%s7085_s30 + $0x2c0] sm:$0xff]  ;;  %v6537_v58 = vpack.i.bf16 %v7238_v43, %v7236_v42  ;;  %v7249_v59 = vmax.f32 %v5606_v45, %v5607_v46  ;;  %v5523_v60 = vld [vmem:[%s7085_s30 + $0x2c8] sm:$0xff]  ;;  %v5524_v61 = vld [vmem:[%s7085_s30 + $0x2d0] sm:$0xff] }
  0xab   : > { %v5525_v62 = vld [vmem:[%s7085_s30 + $0x2d8] sm:$0xff]  ;;  %v5602_v63 = vmax.f32 %v5506_v47, %v5522_v57  ;;  %v7254_v3 = vmax.f32 %v5608_v53, %v5609_v54  ;;  %v5603_v4 = vmax.f32 %v5507_v50, %v5523_v60  ;;  %v5604_v5 = vmax.f32 %v5508_v55, %v5524_v61  ;;  %v5534_v8 = vld [vmem:[%s7085_s30 + $0x320] sm:$0xff]  ;;  %v5535_v9 = vld [vmem:[%s7085_s30 + $0x328] sm:$0xff] }
  0xac   : > { %18158 = vst [vmem:[#allocation47_spill] sm:$0xff] %v7249_v59  ;;  %v5605_v6 = vmax.f32 %v5509_v56, %v5525_v62  ;;  %v5536_v10 = vld [vmem:[%s7085_s30 + $0x330] sm:$0xff]  ;;  %6538 = vrot.lane.b32.xlu0 %v6537_v58, %s6832_s8  ;;  %v5537_v11 = vld [vmem:[%s7085_s30 + $0x338] sm:$0xff]  ;;  %v5550_v12 = vld [vmem:[%s7085_s30 + $0x3a0] sm:$0xff] }
  0xad   : > { %18159 = vst [vmem:[#allocation48_spill] sm:$0xff] %v7254_v3  ;;  %v5551_v14 = vld [vmem:[%s7085_s30 + $0x3a8] sm:$0xff]  ;;  %v6552_v15 = vpack.i.bf16 %v7254_v3, %v7249_v59  ;;  %v7265_v17 = vmax.f32 %v5602_v63, %v5603_v4  ;;  %v5552_v21 = vld [vmem:[%s7085_s30 + $0x3b0] sm:$0xff]  ;;  %v5553_v24 = vld [vmem:[%s7085_s30 + $0x3b8] sm:$0xff]  ;;  %v5614_v25 = vmax.f32 %v5534_v8, %v5550_v12 }
  0xae   : > { %v7267_v18 = vmax.f32 %v5604_v5, %v5605_v6  ;;  %v5530_v26 = vld [vmem:[%s7085_s30 + $0x300] sm:$0xff]  ;;  %v5615_v27 = vmax.f32 %v5535_v9, %v5551_v14  ;;  %v5616_v28 = vmax.f32 %v5536_v10, %v5552_v21  ;;  %v5617_v29 = vmax.f32 %v5537_v11, %v5553_v24  ;;  %v5531_v30 = vld [vmem:[%s7085_s30 + $0x308] sm:$0xff]  ;;  %v5532_v34 = vld [vmem:[%s7085_s30 + $0x310] sm:$0xff] }
  0xaf   : > { %18160 = vst [vmem:[#allocation49_spill] sm:$0xff] %v7265_v17  ;;  %v5533_v35 = vld [vmem:[%s7085_s30 + $0x318] sm:$0xff]  ;;  %6553 = vrot.lane.b32.xlu1 %v6552_v15, %s6832_s8  ;;  %v5546_v38 = vld [vmem:[%s7085_s30 + $0x380] sm:$0xff]  ;;  %v5547_v39 = vld [vmem:[%s7085_s30 + $0x388] sm:$0xff] }
  0xb0   : > { %18161 = vst [vmem:[#allocation50_spill] sm:$0xff] %v7267_v18  ;;  %v6547_v36 = vpack.i.bf16 %v7267_v18, %v7265_v17  ;;  %v5548_v40 = vld [vmem:[%s7085_s30 + $0x390] sm:$0xff]  ;;  %v7281_v41 = vmax.f32 %v5614_v25, %v5615_v27  ;;  %v7283_v44 = vmax.f32 %v5616_v28, %v5617_v29  ;;  %v5549_v45 = vld [vmem:[%s7085_s30 + $0x398] sm:$0xff]  ;;  %v5610_v46 = vmax.f32 %v5530_v26, %v5546_v38  ;;  %v5542_v50 = vld [vmem:[%s7085_s30 + $0x360] sm:$0xff] }
  0xb1   : > { %v5611_v47 = vmax.f32 %v5531_v30, %v5547_v39  ;;  %v5543_v53 = vld [vmem:[%s7085_s30 + $0x368] sm:$0xff]  ;;  %v5612_v54 = vmax.f32 %v5532_v34, %v5548_v40  ;;  %v5613_v55 = vmax.f32 %v5533_v35, %v5549_v45  ;;  %v5544_v56 = vld [vmem:[%s7085_s30 + $0x370] sm:$0xff]  ;;  %v5545_v57 = vld [vmem:[%s7085_s30 + $0x378] sm:$0xff] }
  0xb2   : > { %18162 = vst [vmem:[#allocation51_spill] sm:$0xff] %v7281_v41  ;;  %18163 = vst [vmem:[#allocation52_spill] sm:$0xff] %v7283_v44  ;;  %6548 = vrot.lane.b32.xlu0 %v6547_v36, %s6832_s8  ;;  %v5558_v58 = vld [vmem:[%s7085_s30 + $0x3e0] sm:$0xff]  ;;  %v6562_v60 = vpack.i.bf16 %v7283_v44, %v7281_v41  ;;  %v5559_v62 = vld [vmem:[%s7085_s30 + $0x3e8] sm:$0xff] }
  0xb3   : > { %v7294_v61 = vmax.f32 %v5610_v46, %v5611_v47  ;;  %v5560_v63 = vld [vmem:[%s7085_s30 + $0x3f0] sm:$0xff]  ;;  %v5561_v4 = vld [vmem:[%s7085_s30 + $0x3f8] sm:$0xff]  ;;  %v5622_v5 = vmax.f32 %v5542_v50, %v5558_v58  ;;  %v7299_v6 = vmax.f32 %v5612_v54, %v5613_v55  ;;  %v5623_v8 = vmax.f32 %v5543_v53, %v5559_v62  ;;  %v5538_v11 = vld [vmem:[%s7085_s30 + $0x340] sm:$0xff] }
  0xb4   : > { %v5624_v9 = vmax.f32 %v5544_v56, %v5560_v63  ;;  %v5625_v10 = vmax.f32 %v5545_v57, %v5561_v4  ;;  %v5539_v12 = vld [vmem:[%s7085_s30 + $0x348] sm:$0xff]  ;;  %v5540_v14 = vld [vmem:[%s7085_s30 + $0x350] sm:$0xff]  ;;  %6563 = vrot.lane.b32.xlu1 %v6562_v60, %s6832_s8  ;;  %v5541_v15 = vld [vmem:[%s7085_s30 + $0x358] sm:$0xff] }
  0xb5   : > { %18164 = vst [vmem:[#allocation53_spill] sm:$0xff] %v7294_v61  ;;  %18165 = vst [vmem:[#allocation54_spill] sm:$0xff] %v7299_v6  ;;  %v5554_v21 = vld [vmem:[%s7085_s30 + $0x3c0] sm:$0xff]  ;;  %v5555_v24 = vld [vmem:[%s7085_s30 + $0x3c8] sm:$0xff]  ;;  %v6557_v25 = vpack.i.bf16 %v7299_v6, %v7294_v61  ;;  %v7310_v26 = vmax.f32 %v5622_v5, %v5623_v8 }
  0xb6   : > { %v7312_v27 = vmax.f32 %v5624_v9, %v5625_v10  ;;  %v5556_v28 = vld [vmem:[%s7085_s30 + $0x3d0] sm:$0xff]  ;;  %v5557_v29 = vld [vmem:[%s7085_s30 + $0x3d8] sm:$0xff]  ;;  %v5618_v30 = vmax.f32 %v5538_v11, %v5554_v21  ;;  %v5619_v34 = vmax.f32 %v5539_v12, %v5555_v24  ;;  %v7328_v46 = vld [vmem:[%s7063_s11] sm:$0xff] }
  0xb7   : > { %18166 = vst [vmem:[#allocation55_spill] sm:$0xff] %v7310_v26  ;;  %v5620_v35 = vmax.f32 %v5540_v14, %v5556_v28  ;;  %v5621_v36 = vmax.f32 %v5541_v15, %v5557_v29  ;;  %6558 = vrot.lane.b32.xlu0 %v6557_v25, %s6832_s8  ;;  %v7331_v47 = vld [vmem:[%s7063_s11 + $0x8] sm:$0xff]  ;;  %v7334_v50 = vld [vmem:[%s7063_s11 + $0x10] sm:$0xff]  ;;  %v7337_v53 = vld [vmem:[%s7063_s11 + $0x200] sm:$0xff] }
  0xb8   : > { %18167 = vst [vmem:[#allocation56_spill] sm:$0xff] %v7312_v27  ;;  %v6572_v38 = vpack.i.bf16 %v7312_v27, %v7310_v26  ;;  %v7319_v39 = vmax.f32 %v5618_v30, %v5619_v34  ;;  %18170 = vst [vmem:[#allocation59_spill] sm:$0xff] %v7334_v50  ;;  %v7340_v54 = vld [vmem:[%s7063_s11 + $0x208] sm:$0xff]  ;;  %v7343_v55 = vld [vmem:[%s7063_s11 + $0x210] sm:$0xff] }
  0xb9   : > { %v7321_v40 = vmax.f32 %v5620_v35, %v5621_v36  ;;  %18171 = vst [vmem:[#allocation60_spill] sm:$0xff] %v7343_v55  ;;  %v7346_v56 = vld [vmem:[%s7063_s11 + $0x18] sm:$0xff]  ;;  %v7349_v57 = vld [vmem:[%s7063_s11 + $0x20] sm:$0xff]  ;;  %v7352_v58 = vld [vmem:[%s7063_s11 + $0x28] sm:$0xff] }
  0xba   : > { %18168 = vst [vmem:[#allocation57_spill] sm:$0xff] %v7319_v39  ;;  %6573 = vrot.lane.b32.xlu1 %v6572_v38, %s6832_s8  ;;  %18172 = vst [vmem:[#allocation61_spill] sm:$0xff] %v7346_v56  ;;  %v7355_v60 = vld [vmem:[%s7063_s11 + $0x30] sm:$0xff]  ;;  %v7358_v62 = vld [vmem:[%s7063_s11 + $0x218] sm:$0xff] }
  0xbb   : > { %18169 = vst [vmem:[#allocation58_spill] sm:$0xff] %v7321_v40  ;;  %v6567_v45 = vpack.i.bf16 %v7321_v40, %v7319_v39  ;;  %18173 = vst [vmem:[#allocation62_spill] sm:$0xff] %v7358_v62  ;;  %v7361_v63 = vld [vmem:[%s7063_s11 + $0x220] sm:$0xff]  ;;  %v7364_v4 = vld [vmem:[%s7063_s11 + $0x228] sm:$0xff] }
  0xbc   : > { %v7367_v5 = vld [vmem:[%s7063_s11 + $0x230] sm:$0xff]  ;;  %v7370_v8 = vld [vmem:[%s7063_s11 + $0x38] sm:$0xff]  ;;  %v7373_v9 = vld [vmem:[%s7063_s11 + $0x40] sm:$0xff] }
  0xbd   : > { %6568 = vrot.lane.b32.xlu0 %v6567_v45, %s6832_s8  ;;  %18174 = vst [vmem:[#allocation63_spill] sm:$0xff] %v7370_v8  ;;  %18175 = vst [vmem:[#allocation64_spill] sm:$0xff] %v7373_v9  ;;  %v7376_v10 = vld [vmem:[%s7063_s11 + $0x48] sm:$0xff]  ;;  %v7379_v11 = vld [vmem:[%s7063_s11 + $0x50] sm:$0xff] }
  0xbe   : > { %18176 = vst [vmem:[#allocation65_spill] sm:$0xff] %v7376_v10  ;;  %18177 = vst [vmem:[#allocation66_spill] sm:$0xff] %v7379_v11  ;;  %v7382_v12 = vld [vmem:[%s7063_s11 + $0x238] sm:$0xff]  ;;  %v7385_v14 = vld [vmem:[%s7063_s11 + $0x240] sm:$0xff] }
  0xbf   : > { %18178 = vst [vmem:[#allocation67_spill] sm:$0xff] %v7382_v12  ;;  %18179 = vst [vmem:[#allocation68_spill] sm:$0xff] %v7385_v14  ;;  %v7388_v15 = vld [vmem:[%s7063_s11 + $0x248] sm:$0xff]  ;;  %v7391_v21 = vld [vmem:[%s7063_s11 + $0x250] sm:$0xff] }
  0xc0   : > { %18180 = vst [vmem:[#allocation69_spill] sm:$0xff] %v7388_v15  ;;  %18181 = vst [vmem:[#allocation70_spill] sm:$0xff] %v7391_v21  ;;  %v7394_v24 = vld [vmem:[%s7063_s11 + $0x58] sm:$0xff]  ;;  %v7397_v25 = vld [vmem:[%s7063_s11 + $0x60] sm:$0xff] }
  0xc1   : > { %18182 = vst [vmem:[#allocation71_spill] sm:$0xff] %v7394_v24  ;;  %18183 = vst [vmem:[#allocation72_spill] sm:$0xff] %v7397_v25  ;;  %v7400_v28 = vld [vmem:[%s7063_s11 + $0x68] sm:$0xff]  ;;  %v7403_v29 = vld [vmem:[%s7063_s11 + $0x70] sm:$0xff] }
  0xc2   : > { %18184 = vst [vmem:[#allocation73_spill] sm:$0xff] %v7400_v28  ;;  %18185 = vst [vmem:[#allocation74_spill] sm:$0xff] %v7403_v29  ;;  %v7406_v30 = vld [vmem:[%s7063_s11 + $0x258] sm:$0xff]  ;;  %v7409_v34 = vld [vmem:[%s7063_s11 + $0x260] sm:$0xff] }
  0xc3   : > { %18186 = vst [vmem:[#allocation75_spill] sm:$0xff] %v7406_v30  ;;  %18187 = vst [vmem:[#allocation76_spill] sm:$0xff] %v7409_v34  ;;  %v7412_v35 = vld [vmem:[%s7063_s11 + $0x268] sm:$0xff]  ;;  %v7415_v36 = vld [vmem:[%s7063_s11 + $0x270] sm:$0xff] }
  0xc4   : > { %18188 = vst [vmem:[#allocation77_spill] sm:$0xff] %v7412_v35  ;;  %18189 = vst [vmem:[#allocation78_spill] sm:$0xff] %v7415_v36  ;;  %v7418_v38 = vld [vmem:[%s7063_s11 + $0x78] sm:$0xff]  ;;  %v7421_v45 = vld [vmem:[%s7063_s11 + $0x80] sm:$0xff] }
  0xc5   : > { %18190 = vst [vmem:[#allocation79_spill] sm:$0xff] %v7421_v45  ;;  %v7424_v32 = vld [vmem:[%s7063_s11 + $0x88] sm:$0xff]  ;;  %v7427_v39 = vld [vmem:[%s7063_s11 + $0x90] sm:$0xff]  ;;  %v7430_v40 = vld [vmem:[%s7063_s11 + $0x278] sm:$0xff] }
  0xc6   : > { %18191 = vst [vmem:[#allocation80_spill] sm:$0xff] %v7424_v32  ;;  %18192 = vst [vmem:[#allocation81_spill] sm:$0xff] %v7427_v39  ;;  %v7433_v26 = vld [vmem:[%s7063_s11 + $0x280] sm:$0xff]  ;;  %v7436_v27 = vld [vmem:[%s7063_s11 + $0x288] sm:$0xff] }
  0xc7   : > { %18193 = vst [vmem:[#allocation82_spill] sm:$0xff] %v7430_v40  ;;  %18194 = vst [vmem:[#allocation83_spill] sm:$0xff] %v7433_v26  ;;  %v7439_v61 = vld [vmem:[%s7063_s11 + $0x290] sm:$0xff]  ;;  %v7442_v6 = vld [vmem:[%s7063_s11 + $0x98] sm:$0xff] }
  0xc8   : > { %18195 = vst [vmem:[#allocation84_spill] sm:$0xff] %v7436_v27  ;;  %18196 = vst [vmem:[#allocation85_spill] sm:$0xff] %v7439_v61  ;;  %v7445_v41 = vld [vmem:[%s7063_s11 + $0xa0] sm:$0xff]  ;;  %v7448_v44 = vld [vmem:[%s7063_s11 + $0xa8] sm:$0xff] }
  0xc9   : > { %18197 = vst [vmem:[#allocation86_spill] sm:$0xff] %v7442_v6  ;;  %18198 = vst [vmem:[#allocation87_spill] sm:$0xff] %v7448_v44  ;;  %v7451_v17 = vld [vmem:[%s7063_s11 + $0xb0] sm:$0xff]  ;;  %v7454_v18 = vld [vmem:[%s7063_s11 + $0x298] sm:$0xff] }
  0xca   : > { %18199 = vst [vmem:[#allocation88_spill] sm:$0xff] %v7451_v17  ;;  %18200 = vst [vmem:[#allocation89_spill] sm:$0xff] %v7454_v18  ;;  %v7457_v59 = vld [vmem:[%s7063_s11 + $0x2a0] sm:$0xff]  ;;  %v7460_v3 = vld [vmem:[%s7063_s11 + $0x2a8] sm:$0xff] }
  0xcb   : > { %18201 = vst [vmem:[#allocation90_spill] sm:$0xff] %v7457_v59  ;;  %18202 = vst [vmem:[#allocation91_spill] sm:$0xff] %v7460_v3  ;;  %v7463_v42 = vld [vmem:[%s7063_s11 + $0x2b0] sm:$0xff]  ;;  %v7472_v2 = vld [vmem:[%s7063_s11 + $0xb8] sm:$0xff] }
  0xcc   : > { %18203 = vst [vmem:[#allocation92_spill] sm:$0xff] %v7463_v42  ;;  %v7475_v7 = vld [vmem:[%s7063_s11 + $0xc0] sm:$0xff]  ;;  %v7478_v51 = vld [vmem:[%s7063_s11 + $0xc8] sm:$0xff]  ;;  %v7481_v52 = vld [vmem:[%s7063_s11 + $0xd0] sm:$0xff] }
  0xcd   : > { %18204 = vst [vmem:[#allocation93_spill] sm:$0xff] %v7475_v7  ;;  %18205 = vst [vmem:[#allocation94_spill] sm:$0xff] %v7478_v51  ;;  %v7484_v43 = vld [vmem:[%s7063_s11 + $0x2b8] sm:$0xff]  ;;  %v7487_v22 = vld [vmem:[%s7063_s11 + $0x2c0] sm:$0xff] }
  0xce   : > { %18206 = vst [vmem:[#allocation95_spill] sm:$0xff] %v7481_v52  ;;  %18207 = vst [vmem:[#allocation96_spill] sm:$0xff] %v7484_v43  ;;  %v7490_v31 = vld [vmem:[%s7063_s11 + $0x2c8] sm:$0xff]  ;;  %v7493_v23 = vld [vmem:[%s7063_s11 + $0x2d0] sm:$0xff] }
  0xcf   : > { %18208 = vst [vmem:[#allocation97_spill] sm:$0xff] %v7487_v22  ;;  %18209 = vst [vmem:[#allocation98_spill] sm:$0xff] %v7490_v31  ;;  %v7504_v1 = vld [vmem:[%s7063_s11 + $0xd8] sm:$0xff]  ;;  %v7507_v48 = vld [vmem:[%s7063_s11 + $0xe0] sm:$0xff] }
  0xd0   : > { %18210 = vst [vmem:[#allocation99_spill] sm:$0xff] %v7493_v23  ;;  %18211 = vst [vmem:[#allocation100_spill] sm:$0xff] %v7504_v1  ;;  %v7510_v33 = vld [vmem:[%s7063_s11 + $0xe8] sm:$0xff]  ;;  %v7513_v49 = vld [vmem:[%s7063_s11 + $0xf0] sm:$0xff] }
  0xd1   : > { %18212 = vst [vmem:[#allocation101_spill] sm:$0xff] %v7507_v48  ;;  %18213 = vst [vmem:[#allocation102_spill] sm:$0xff] %v7510_v33  ;;  %v7516_v13 = vld [vmem:[%s7063_s11 + $0x2d8] sm:$0xff]  ;;  %v7519_v19 = vld [vmem:[%s7063_s11 + $0x2e0] sm:$0xff] }
  0xd2   : > { %18214 = vst [vmem:[#allocation103_spill] sm:$0xff] %v7513_v49  ;;  %18215 = vst [vmem:[#allocation104_spill] sm:$0xff] %v7516_v13  ;;  %v7522_v37 = vld [vmem:[%s7063_s11 + $0x2e8] sm:$0xff]  ;;  %v7525_v0 = vld [vmem:[%s7063_s11 + $0x2f0] sm:$0xff] }
  0xd3   : > { %18216 = vst [vmem:[#allocation105_spill] sm:$0xff] %v7519_v19  ;;  %18217 = vst [vmem:[#allocation106_spill] sm:$0xff] %v7522_v37  ;;  %v7536_v55 = vld [vmem:[%s7063_s11 + $0xf8] sm:$0xff]  ;;  %v7539_v50 = vld [vmem:[%s7063_s11 + $0x100] sm:$0xff] }
  0xd4   : > { %18218 = vst [vmem:[#allocation107_spill] sm:$0xff] %v7525_v0  ;;  %18219 = vst [vmem:[#allocation108_spill] sm:$0xff] %v7536_v55  ;;  %v7542_v16 = vld [vmem:[%s7063_s11 + $0x108] sm:$0xff]  ;;  %v7545_v12 = vld [vmem:[%s7063_s11 + $0x110] sm:$0xff] }
  0xd5   : > { %18220 = vst [vmem:[#allocation109_spill] sm:$0xff] %v7539_v50  ;;  %18221 = vst [vmem:[#allocation110_spill] sm:$0xff] %v7542_v16  ;;  %v7548_v20 = vld [vmem:[%s7063_s11 + $0x2f8] sm:$0xff]  ;;  %v7551_v62 = vld [vmem:[%s7063_s11 + $0x300] sm:$0xff] }
  0xd6   : > { %18222 = vst [vmem:[#allocation111_spill] sm:$0xff] %v7545_v12  ;;  %18223 = vst [vmem:[#allocation112_spill] sm:$0xff] %v7548_v20  ;;  %v7554_v15 = vld [vmem:[%s7063_s11 + $0x308] sm:$0xff]  ;;  %v7557_v56 = vld [vmem:[%s7063_s11 + $0x310] sm:$0xff] }
  0xd7   : > { %18224 = vst [vmem:[#allocation113_spill] sm:$0xff] %v7551_v62  ;;  %18225 = vst [vmem:[#allocation114_spill] sm:$0xff] %v7554_v15  ;;  %v7568_v9 = vld [vmem:[%s7063_s11 + $0x118] sm:$0xff]  ;;  %v7571_v8 = vld [vmem:[%s7063_s11 + $0x120] sm:$0xff] }
  0xd8   : > { %18226 = vst [vmem:[#allocation115_spill] sm:$0xff] %v7557_v56  ;;  %18227 = vst [vmem:[#allocation116_spill] sm:$0xff] %v7568_v9  ;;  %v7574_v21 = vld [vmem:[%s7063_s11 + $0x128] sm:$0xff]  ;;  %v7577_v30 = vld [vmem:[%s7063_s11 + $0x130] sm:$0xff] }
  0xd9   : > { %18228 = vst [vmem:[#allocation117_spill] sm:$0xff] %v7574_v21  ;;  %18229 = vst [vmem:[#allocation118_spill] sm:$0xff] %v7577_v30  ;;  %v7580_v11 = vld [vmem:[%s7063_s11 + $0x318] sm:$0xff]  ;;  %v7583_v24 = vld [vmem:[%s7063_s11 + $0x320] sm:$0xff] }
  0xda   : > { %18230 = vst [vmem:[#allocation119_spill] sm:$0xff] %v7580_v11  ;;  %v7586_v10 = vld [vmem:[%s7063_s11 + $0x328] sm:$0xff]  ;;  %v7589_v35 = vld [vmem:[%s7063_s11 + $0x330] sm:$0xff]  ;;  %v7600_v34 = vld [vmem:[%s7063_s11 + $0x138] sm:$0xff] }
  0xdb   : > { %18231 = vst [vmem:[#allocation120_spill] sm:$0xff] %v7586_v10  ;;  %18232 = vst [vmem:[#allocation121_spill] sm:$0xff] %v7589_v35  ;;  %v7603_v25 = vld [vmem:[%s7063_s11 + $0x140] sm:$0xff]  ;;  %v7606_v14 = vld [vmem:[%s7063_s11 + $0x148] sm:$0xff] }
  0xdc   : > { %18233 = vst [vmem:[#allocation122_spill] sm:$0xff] %v7606_v14  ;;  %v7609_v40 = vld [vmem:[%s7063_s11 + $0x150] sm:$0xff]  ;;  %v7612_v36 = vld [vmem:[%s7063_s11 + $0x338] sm:$0xff]  ;;  %v7615_v26 = vld [vmem:[%s7063_s11 + $0x340] sm:$0xff] }
  0xdd   : > { %18234 = vst [vmem:[#allocation123_spill] sm:$0xff] %v7609_v40  ;;  %v7618_v29 = vld [vmem:[%s7063_s11 + $0x348] sm:$0xff]  ;;  %v7629_v32 = vld [vmem:[%s7063_s11 + $0x158] sm:$0xff]  ;;  %v7632_v45 = vld [vmem:[%s7063_s11 + $0x160] sm:$0xff] }
  0xde   : > { %18235 = vst [vmem:[#allocation124_spill] sm:$0xff] %v7618_v29  ;;  %v7635_v28 = vld [vmem:[%s7063_s11 + $0x168] sm:$0xff]  ;;  %v7638_v18 = vld [vmem:[%s7063_s11 + $0x170] sm:$0xff]  ;;  %v7644_v6 = vld [vmem:[%s7063_s11 + $0x358] sm:$0xff] }
  0xdf   : > { %v7641_v61 = vld [vmem:[%s7063_s11 + $0x350] sm:$0xff]  ;;  %v7647_v39 = vld [vmem:[%s7063_s11 + $0x360] sm:$0xff]  ;;  %v7658_v44 = vld [vmem:[%s7063_s11 + $0x178] sm:$0xff] }
  0xe0   : > { %18236 = vst [vmem:[#allocation125_spill] sm:$0xff] %v7641_v61  ;;  %v7661_v59 = vld [vmem:[%s7063_s11 + $0x180] sm:$0xff]  ;;  %v7664_v27 = vld [vmem:[%s7063_s11 + $0x188] sm:$0xff]  ;;  %v7667_v43 = vld [vmem:[%s7063_s11 + $0x190] sm:$0xff]  ;;  %v998_v12 = vmax.f32 %v7632_v45, %v7647_v39 }
  0xe1   : > { %v7670_v42 = vld [vmem:[%s7063_s11 + $0x368] sm:$0xff]  ;;  %v7673_v22 = vld [vmem:[%s7063_s11 + $0x370] sm:$0xff]  ;;  %v7676_v17 = vld [vmem:[%s7063_s11 + $0x378] sm:$0xff] }
  0xe2   : > { %v7687_v51 = vld [vmem:[%s7063_s11 + $0x198] sm:$0xff]  ;;  %v7690_v7 = vld [vmem:[%s7063_s11 + $0x1a0] sm:$0xff]  ;;  %v7693_v3 = vld [vmem:[%s7063_s11 + $0x1a8] sm:$0xff]  ;;  %v999_v9 = vmax.f32 %v7635_v28, %v7670_v42  ;;  %v1000_v29 = vmax.f32 %v7638_v18, %v7673_v22  ;;  %v18243_v42 = vmax.f32 %v7349_v57, %v7361_v63  ;;  %v18249_v18 = vmax.f32 %v7355_v60, %v7367_v5 }
  0xe3   : > { %v7696_v13 = vld [vmem:[%s7063_s11 + $0x1b0] sm:$0xff]  ;;  %v7699_v23 = vld [vmem:[%s7063_s11 + $0x380] sm:$0xff]  ;;  %v7702_v1 = vld [vmem:[%s7063_s11 + $0x388] sm:$0xff] }
  0xe4   : > { %v7705_v52 = vld [vmem:[%s7063_s11 + $0x390] sm:$0xff]  ;;  %v7716_v33 = vld [vmem:[%s7063_s11 + $0x1b8] sm:$0xff]  ;;  %v7719_v19 = vld [vmem:[%s7063_s11 + $0x1c0] sm:$0xff] }
  0xe5   : > { %v7722_v31 = vld [vmem:[%s7063_s11 + $0x1c8] sm:$0xff]  ;;  %v7725_v20 = vld [vmem:[%s7063_s11 + $0x1d0] sm:$0xff]  ;;  %v7728_v0 = vld [vmem:[%s7063_s11 + $0x398] sm:$0xff] }
  0xe6   : > { %18237 = vst [vmem:[#allocation126_spill] sm:$0xff] %v7725_v20  ;;  %v7731_v62 = vld [vmem:[%s7063_s11 + $0x3a0] sm:$0xff]  ;;  %v7734_v49 = vld [vmem:[%s7063_s11 + $0x3a8] sm:$0xff]  ;;  %v7745_v16 = vld [vmem:[%s7063_s11 + $0x1d8] sm:$0xff] }
  0xe7   : > { %18238 = vst [vmem:[#allocation127_spill] sm:$0xff] %v7745_v16  ;;  %v7748_v50 = vld [vmem:[%s7063_s11 + $0x1e0] sm:$0xff]  ;;  %v7751_v55 = vld [vmem:[%s7063_s11 + $0x1e8] sm:$0xff]  ;;  %v7754_v48 = vld [vmem:[%s7063_s11 + $0x1f0] sm:$0xff]  ;;  %v1006_v45 = vmax.f32 %v7690_v7, %v7731_v62  ;;  %v1007_v15 = vmax.f32 %v7693_v3, %v7734_v49  ;;  %v18244_v7 = vmax.f32 %v7328_v46, %v7337_v53  ;;  %v18246_v3 = vmax.f32 %v7352_v58, %v7364_v4 }
  0xe8   : > { %v7757_v37 = vld [vmem:[%s7063_s11 + $0x3b0] sm:$0xff]  ;;  %v7760_v56 = vld [vmem:[%s7063_s11 + $0x3b8] sm:$0xff]  ;;  %v7763_v11 = vld [vmem:[%s7063_s11 + $0x3c0] sm:$0xff]  ;;  %v18247_v62 = vmax.f32 %v7331_v47, %v7340_v54 }
  0xe9   : > { %v7774_v30 = vld [vmem:[%s7063_s11 + $0x3c8] sm:$0xff]  ;;  %v7777_v10 = vld [vmem:[%s7063_s11 + $0x3d0] sm:$0xff]  ;;  %v7780_v21 = vld [vmem:[%s7063_s11 + $0x3d8] sm:$0xff]  ;;  %v7845_v49 = vmax.f32 %v18244_v7, %v18243_v42 }
  0xea   : > { %18239 = vst [vmem:[#allocation128_spill] sm:$0xff] %v7777_v10  ;;  %18240 = vst [vmem:[#allocation129_spill] sm:$0xff] %v7780_v21  ;;  %v7791_v35 = vld [vmem:[%s7063_s11 + $0x3e0] sm:$0xff]  ;;  %v7794_v61 = vld [vmem:[%s7063_s11 + $0x3e8] sm:$0xff]  ;;  %v7853_v14 = vmax.f32 %v18247_v62, %v18246_v3 }
  0xeb   : > { %v7797_v40 = vld [vmem:[%s7063_s11 + $0x3f0] sm:$0xff]  ;;  %v7808_v28 = vld [vmem:[%s7063_s11 + $0x1f8] sm:$0xff]  ;;  %18245 = vst [vmem:[#allocation132_spill] sm:$0xff] %v7845_v49  ;;  %v18250_v39 = vld [vmem:[#allocation59_spill] sm:$0xff] }
  0xec   : > { %18241 = vst [vmem:[#allocation130_spill] sm:$0xff] %v7808_v28  ;;  %v7811_v22 = vld [vmem:[%s7063_s11 + $0x3f8] sm:$0xff]  ;;  %18248 = vst [vmem:[#allocation133_spill] sm:$0xff] %v7853_v14  ;;  %v18251_v57 = vld [vmem:[#allocation60_spill] sm:$0xff] }
  0xed   : > { %18242 = vst [vmem:[#allocation131_spill] sm:$0xff] %v7811_v22  ;;  %v18252_v63 = vmax.f32 %v18250_v39, %v18251_v57  ;;  %v7864_v53 = vld [vmem:[%s7063_s11 + $0x400] sm:$0xff]  ;;  %v18257_v4 = vld [vmem:[#allocation61_spill] sm:$0xff]  ;;  %v18258_v49 = vld [vmem:[#allocation62_spill] sm:$0xff] }
  0xee   : > { %v18254_v42 = vld [vmem:[#allocation63_spill] sm:$0xff]  ;;  %v18259_v47 = vmax.f32 %v18257_v4, %v18258_v49  ;;  %v18261_v3 = vld [vmem:[#allocation72_spill] sm:$0xff]  ;;  %v18269_v57 = vld [vmem:[#allocation77_spill] sm:$0xff] }
  0xef   : > { %v7861_v46 = vmax.f32 %v18252_v63, %v18249_v18  ;;  %v18255_v7 = vld [vmem:[#allocation67_spill] sm:$0xff]  ;;  %v18262_v62 = vld [vmem:[#allocation76_spill] sm:$0xff]  ;;  %v18268_v18 = vld [vmem:[#allocation73_spill] sm:$0xff] }
  0xf0   : > { %v18256_v58 = vmax.f32 %v18254_v42, %v18255_v7  ;;  %v18263_v14 = vmax.f32 %v18261_v3, %v18262_v62  ;;  %v18264_v60 = vld [vmem:[#allocation64_spill] sm:$0xff]  ;;  %v18270_v63 = vmax.f32 %v18268_v18, %v18269_v57  ;;  %v18272_v16 = vld [vmem:[#allocation69_spill] sm:$0xff]  ;;  %v18275_v7 = vld [vmem:[#allocation74_spill] sm:$0xff] }
  0xf1   : > { %18253 = vst [vmem:[#allocation59_spill] sm:$0xff] %v7861_v46  ;;  %v18265_v5 = vld [vmem:[#allocation68_spill] sm:$0xff]  ;;  %v18271_v46 = vld [vmem:[#allocation65_spill] sm:$0xff]  ;;  %v18276_v49 = vld [vmem:[#allocation78_spill] sm:$0xff] }
  0xf2   : > { %v7872_v54 = vmax.f32 %v18259_v47, %v18256_v58  ;;  %v18266_v21 = vmax.f32 %v18264_v60, %v18265_v5  ;;  %v18273_v22 = vmax.f32 %v18271_v46, %v18272_v16  ;;  %v18277_v58 = vmax.f32 %v18275_v7, %v18276_v49  ;;  %v18278_v4 = vld [vmem:[#allocation66_spill] sm:$0xff]  ;;  %v18284_v46 = vld [vmem:[#allocation71_spill] sm:$0xff] }
  0xf3   : > { %v18279_v47 = vld [vmem:[#allocation70_spill] sm:$0xff]  ;;  %v18285_v60 = vld [vmem:[#allocation75_spill] sm:$0xff] }
  0xf4   : > { %18260 = vst [vmem:[#allocation60_spill] sm:$0xff] %v7872_v54  ;;  %v7880_v39 = vmax.f32 %v18266_v21, %v18263_v14  ;;  %v7888_v42 = vmax.f32 %v18273_v22, %v18270_v63  ;;  %v18280_v54 = vmax.f32 %v18278_v4, %v18279_v47  ;;  %v7899_v14 = vld [vmem:[%s7063_s11 + $0x408] sm:$0xff]  ;;  %v7902_v21 = vld [vmem:[%s7063_s11 + $0x410] sm:$0xff]  ;;  %v7905_v62 = vld [vmem:[%s7063_s11 + $0x418] sm:$0xff]  ;;  %v18286_v5 = vmax.f32 %v18284_v46, %v18285_v60 }
  0xf5   : > { %v18282_v16 = vld [vmem:[#allocation82_spill] sm:$0xff]  ;;  %v18290_v63 = vld [vmem:[#allocation79_spill] sm:$0xff]  ;;  %v18302_v46 = vld [vmem:[#allocation92_spill] sm:$0xff] }
  0xf6   : > { %18267 = vst [vmem:[#allocation63_spill] sm:$0xff] %v7880_v39  ;;  %18274 = vst [vmem:[#allocation67_spill] sm:$0xff] %v7888_v42  ;;  %v7896_v3 = vmax.f32 %v18280_v54, %v18277_v58  ;;  %v18283_v22 = vmax.f32 %v7418_v38, %v18282_v16  ;;  %v18288_v57 = vld [vmem:[#allocation90_spill] sm:$0xff]  ;;  %v18291_v7 = vld [vmem:[#allocation83_spill] sm:$0xff] }
  0xf7   : > { %v18289_v54 = vmax.f32 %v7445_v41, %v18288_v57  ;;  %v18292_v49 = vmax.f32 %v18290_v63, %v18291_v7  ;;  %v18294_v4 = vld [vmem:[#allocation87_spill] sm:$0xff]  ;;  %v18297_v39 = vld [vmem:[#allocation80_spill] sm:$0xff]  ;;  %v18304_v60 = vld [vmem:[#allocation81_spill] sm:$0xff] }
  0xf8   : > { %18281 = vst [vmem:[#allocation61_spill] sm:$0xff] %v7896_v3  ;;  %v7913_v18 = vmax.f32 %v18286_v5, %v18283_v22  ;;  %v18295_v47 = vld [vmem:[#allocation91_spill] sm:$0xff]  ;;  %v18298_v3 = vld [vmem:[#allocation84_spill] sm:$0xff]  ;;  %v18305_v5 = vld [vmem:[#allocation85_spill] sm:$0xff] }
  0xf9   : > { %v7921_v58 = vmax.f32 %v18292_v49, %v18289_v54  ;;  %v18296_v42 = vmax.f32 %v18294_v4, %v18295_v47  ;;  %v18299_v28 = vmax.f32 %v18297_v39, %v18298_v3  ;;  %v18301_v16 = vld [vmem:[#allocation88_spill] sm:$0xff]  ;;  %v7940_v57 = vld [vmem:[%s7063_s11 + $0x420] sm:$0xff]  ;;  %v7946_v63 = vld [vmem:[%s7063_s11 + $0x430] sm:$0xff] }
  0xfa   : > { %18287 = vst [vmem:[#allocation62_spill] sm:$0xff] %v7913_v18  ;;  %v18303_v22 = vmax.f32 %v18301_v16, %v18302_v46  ;;  %v18306_v18 = vmax.f32 %v18304_v60, %v18305_v5  ;;  %v7943_v54 = vld [vmem:[%s7063_s11 + $0x428] sm:$0xff]  ;;  %v18311_v3 = vld [vmem:[#allocation89_spill] sm:$0xff]  ;;  %v18321_v5 = vld [vmem:[#allocation102_spill] sm:$0xff] }
  0xfb   : > { %18293 = vst [vmem:[#allocation72_spill] sm:$0xff] %v7921_v58  ;;  %v7929_v38 = vmax.f32 %v18299_v28, %v18296_v42  ;;  %v18308_v28 = vld [vmem:[#allocation96_spill] sm:$0xff]  ;;  %v18310_v42 = vld [vmem:[#allocation86_spill] sm:$0xff]  ;;  %v18314_v4 = vld [vmem:[#allocation101_spill] sm:$0xff] }
  0xfc   : > { %v7937_v41 = vmax.f32 %v18306_v18, %v18303_v22  ;;  %v18309_v39 = vmax.f32 %v7472_v2, %v18308_v28  ;;  %v18312_v7 = vmax.f32 %v18310_v42, %v18311_v3  ;;  %v18315_v18 = vld [vmem:[#allocation105_spill] sm:$0xff]  ;;  %v18325_v10 = vld [vmem:[#allocation98_spill] sm:$0xff]  ;;  %v18328_v28 = vld [vmem:[#allocation103_spill] sm:$0xff] }
  0xfd   : > { %18300 = vst [vmem:[#allocation76_spill] sm:$0xff] %v7929_v38  ;;  %v18316_v47 = vmax.f32 %v18314_v4, %v18315_v18  ;;  %v18317_v16 = vld [vmem:[#allocation93_spill] sm:$0xff]  ;;  %v18322_v38 = vld [vmem:[#allocation106_spill] sm:$0xff]  ;;  %v18329_v42 = vld [vmem:[#allocation107_spill] sm:$0xff] }
  0xfe   : > { %18307 = vst [vmem:[#allocation64_spill] sm:$0xff] %v7937_v41  ;;  %v7954_v49 = vmax.f32 %v18312_v7, %v18309_v39  ;;  %v18318_v46 = vld [vmem:[#allocation97_spill] sm:$0xff]  ;;  %v18323_v58 = vmax.f32 %v18321_v5, %v18322_v38  ;;  %v18324_v41 = vld [vmem:[#allocation94_spill] sm:$0xff]  ;;  %v18330_v39 = vmax.f32 %v18328_v28, %v18329_v42  ;;  %v18331_v3 = vld [vmem:[#allocation95_spill] sm:$0xff] }
  0xff   : > { %v18319_v22 = vmax.f32 %v18317_v16, %v18318_v46  ;;  %v18326_v20 = vmax.f32 %v18324_v41, %v18325_v10  ;;  %v18332_v7 = vld [vmem:[#allocation99_spill] sm:$0xff]  ;;  %v7981_v18 = vld [vmem:[%s7063_s11 + $0x438] sm:$0xff]  ;;  %v7987_v38 = vld [vmem:[%s7063_s11 + $0x448] sm:$0xff] }
 0x100   : > { %18313 = vst [vmem:[#allocation68_spill] sm:$0xff] %v7954_v49  ;;  %v18333_v49 = vmax.f32 %v18331_v3, %v18332_v7  ;;  %v18335_v10 = vld [vmem:[#allocation108_spill] sm:$0xff]  ;;  %v18343_v5 = vld [vmem:[#allocation109_spill] sm:$0xff] }
 0x101   : > { %v7962_v60 = vmax.f32 %v18319_v22, %v18316_v47  ;;  %v7970_v2 = vmax.f32 %v18326_v20, %v18323_v58  ;;  %v7984_v47 = vld [vmem:[%s7063_s11 + $0x440] sm:$0xff]  ;;  %v18336_v20 = vld [vmem:[#allocation112_spill] sm:$0xff]  ;;  %v18344_v28 = vld [vmem:[#allocation113_spill] sm:$0xff] }
 0x102   : > { %v7978_v4 = vmax.f32 %v18333_v49, %v18330_v39  ;;  %v18337_v58 = vmax.f32 %v18335_v10, %v18336_v20  ;;  %v18338_v41 = vld [vmem:[#allocation100_spill] sm:$0xff]  ;;  %v18342_v49 = vmax.f32 %v7571_v8, %v7583_v24  ;;  %v18345_v42 = vmax.f32 %v18343_v5, %v18344_v28  ;;  %v18347_v3 = vld [vmem:[#allocation117_spill] sm:$0xff]  ;;  %v18351_v10 = vld [vmem:[#allocation114_spill] sm:$0xff] }
 0x103   : > { %18320 = vst [vmem:[#allocation73_spill] sm:$0xff] %v7962_v60  ;;  %18327 = vst [vmem:[#allocation77_spill] sm:$0xff] %v7970_v2  ;;  %v18339_v16 = vld [vmem:[#allocation104_spill] sm:$0xff]  ;;  %v18350_v60 = vld [vmem:[#allocation110_spill] sm:$0xff] }
 0x104   : > { %18334 = vst [vmem:[#allocation65_spill] sm:$0xff] %v7978_v4  ;;  %v18340_v46 = vmax.f32 %v18338_v41, %v18339_v16  ;;  %v8003_v39 = vmax.f32 %v18345_v42, %v18342_v49  ;;  %v18348_v7 = vld [vmem:[#allocation120_spill] sm:$0xff]  ;;  %v18352_v20 = vmax.f32 %v18350_v60, %v18351_v10  ;;  %v18355_v16 = vld [vmem:[#allocation121_spill] sm:$0xff]  ;;  %v18358_v8 = vld [vmem:[#allocation115_spill] sm:$0xff]  ;;  %v18361_v60 = vmax.f32 %v7600_v34, %v7612_v36 }
 0x105   : > { %v18349_v2 = vmax.f32 %v18347_v3, %v18348_v7  ;;  %v8022_v5 = vld [vmem:[%s7063_s11 + $0x450] sm:$0xff]  ;;  %v8025_v49 = vld [vmem:[%s7063_s11 + $0x458] sm:$0xff]  ;;  %v8028_v28 = vld [vmem:[%s7063_s11 + $0x460] sm:$0xff] }
 0x106   : > { %v7995_v22 = vmax.f32 %v18340_v46, %v18337_v58  ;;  %18346 = vst [vmem:[#allocation74_spill] sm:$0xff] %v8003_v39  ;;  %v18354_v58 = vld [vmem:[#allocation118_spill] sm:$0xff]  ;;  %v8031_v42 = vld [vmem:[%s7063_s11 + $0x600] sm:$0xff]  ;;  %v18373_v34 = vld [vmem:[#allocation125_spill] sm:$0xff] }
 0x107   : > { %v8011_v41 = vmax.f32 %v18352_v20, %v18349_v2  ;;  %v18356_v46 = vmax.f32 %v18354_v58, %v18355_v16  ;;  %v18362_v2 = vld [vmem:[#allocation116_spill] sm:$0xff]  ;;  %v18363_v3 = vld [vmem:[#allocation119_spill] sm:$0xff]  ;;  %v18368_v58 = vld [vmem:[#allocation122_spill] sm:$0xff] }
 0x108   : > { %18341 = vst [vmem:[#allocation69_spill] sm:$0xff] %v7995_v22  ;;  %v18357_v22 = vld [vmem:[#allocation111_spill] sm:$0xff]  ;;  %v18364_v7 = vmax.f32 %v18362_v2, %v18363_v3  ;;  %v18369_v16 = vld [vmem:[#allocation124_spill] sm:$0xff]  ;;  %v8060_v3 = vld [vmem:[%s7063_s11 + $0x470] sm:$0xff] }
 0x109   : > { %18353 = vst [vmem:[#allocation78_spill] sm:$0xff] %v8011_v41  ;;  %v18359_v24 = vmax.f32 %v18357_v22, %v18358_v8  ;;  %v18366_v22 = vmax.f32 %v7603_v25, %v7615_v26  ;;  %v8063_v26 = vld [vmem:[%s7063_s11 + $0x478] sm:$0xff]  ;;  %v8069_v25 = vld [vmem:[%s7063_s11 + $0x610] sm:$0xff]  ;;  %v8267_v41 = vld [vmem:[%s7063_s11 + $0x6a0] sm:$0xff] }
 0x10a   : > { %v8039_v10 = vmax.f32 %v18364_v7, %v18361_v60  ;;  %v8057_v60 = vld [vmem:[%s7063_s11 + $0x468] sm:$0xff]  ;;  %v8159_v7 = vld [vmem:[%s7063_s11 + $0x4b0] sm:$0xff] }
 0x10b   : > { %v8019_v4 = vmax.f32 %v18359_v24, %v18356_v46  ;;  %v8044_v20 = vmax.f32 %v18366_v22, %v998_v12  ;;  %v18370_v46 = vmax.f32 %v18368_v58, %v18369_v16  ;;  %v18372_v24 = vld [vmem:[#allocation123_spill] sm:$0xff]  ;;  %v8066_v12 = vld [vmem:[%s7063_s11 + $0x608] sm:$0xff]  ;;  %v18377_v22 = vmax.f32 %v7629_v32, %v7644_v6  ;;  %v8101_v32 = vld [vmem:[%s7063_s11 + $0x490] sm:$0xff] }
 0x10c   : > { %18365 = vst [vmem:[#allocation70_spill] sm:$0xff] %v8039_v10  ;;  %v18374_v36 = vmax.f32 %v18372_v24, %v18373_v34  ;;  %v18379_v16 = vmax.f32 %v7661_v59, %v7699_v23  ;;  %v18381_v24 = vmax.f32 %v7664_v27, %v7702_v1  ;;  %18383 = vst [vmem:[#allocation87_spill] sm:$0xff] %v8101_v32  ;;  %v8104_v6 = vld [vmem:[%s7063_s11 + $0x620] sm:$0xff]  ;;  %v8110_v23 = vld [vmem:[%s7063_s11 + $0x630] sm:$0xff] }
 0x10d   : > { %18360 = vst [vmem:[#allocation66_spill] sm:$0xff] %v8019_v4  ;;  %18367 = vst [vmem:[#allocation82_spill] sm:$0xff] %v8044_v20  ;;  %v8049_v8 = vmax.f32 %v18370_v46, %v999_v9  ;;  %v8072_v9 = vld [vmem:[%s7063_s11 + $0x618] sm:$0xff]  ;;  %v8139_v1 = vld [vmem:[%s7063_s11 + $0x640] sm:$0xff] }
 0x10e   : > { %v8054_v2 = vmax.f32 %v18374_v36, %v1000_v29  ;;  %v18376_v29 = vmax.f32 %v7658_v44, %v7676_v17  ;;  %v8087_v46 = vmax.f32 %v18379_v16, %v1006_v45  ;;  %v8092_v34 = vmax.f32 %v18381_v24, %v1007_v15  ;;  %v8095_v17 = vld [vmem:[%s7063_s11 + $0x480] sm:$0xff]  ;;  %v8098_v44 = vld [vmem:[%s7063_s11 + $0x488] sm:$0xff]  ;;  %v8136_v59 = vld [vmem:[%s7063_s11 + $0x638] sm:$0xff] }
 0x10f   : > { %18371 = vst [vmem:[#allocation71_spill] sm:$0xff] %v8049_v8  ;;  %v8107_v36 = vld [vmem:[%s7063_s11 + $0x628] sm:$0xff]  ;;  %v18384_v15 = vmax.f32 %v7696_v13, %v7757_v37  ;;  %v18385_v45 = vmax.f32 %v7667_v43, %v7705_v52  ;;  %v8130_v16 = vld [vmem:[%s7063_s11 + $0x4a0] sm:$0xff]  ;;  %v1022_v37 = vmax.f32 %v7940_v57, %v8104_v6  ;;  %v18388_v43 = vmax.f32 %v7716_v33, %v7760_v56  ;;  %v8162_v57 = vld [vmem:[%s7063_s11 + $0x4b8] sm:$0xff] }
 0x110   : > { %18375 = vst [vmem:[#allocation75_spill] sm:$0xff] %v8054_v2  ;;  %v8082_v58 = vmax.f32 %v18377_v22, %v18376_v29  ;;  %18380 = vst [vmem:[#allocation79_spill] sm:$0xff] %v8087_v46  ;;  %v8127_v22 = vld [vmem:[%s7063_s11 + $0x498] sm:$0xff]  ;;  %v8133_v24 = vld [vmem:[%s7063_s11 + $0x4a8] sm:$0xff]  ;;  %v1023_v13 = vmax.f32 %v7943_v54, %v8107_v36  ;;  %v18392_v56 = vmax.f32 %v7748_v50, %v7791_v35 }
 0x111   : > { %18382 = vst [vmem:[#allocation83_spill] sm:$0xff] %v8092_v34  ;;  %v8124_v29 = vmax.f32 %v18385_v45, %v18384_v15  ;;  %18387 = vst [vmem:[#allocation80_spill] sm:$0xff] %v8127_v22  ;;  %v8142_v27 = vld [vmem:[%s7063_s11 + $0x648] sm:$0xff]  ;;  %v18389_v15 = vmax.f32 %v7687_v51, %v7728_v0  ;;  %v8165_v6 = vld [vmem:[%s7063_s11 + $0x4c0] sm:$0xff]  ;;  %v18396_v35 = vmax.f32 %v7751_v55, %v7794_v61 }
 0x112   : > { %18378 = vst [vmem:[#allocation90_spill] sm:$0xff] %v8082_v58  ;;  %v8168_v54 = vld [vmem:[%s7063_s11 + $0x650] sm:$0xff]  ;;  %v8171_v36 = vld [vmem:[%s7063_s11 + $0x658] sm:$0xff]  ;;  %v8174_v52 = vld [vmem:[%s7063_s11 + $0x660] sm:$0xff] }
 0x113   : > { %18386 = vst [vmem:[#allocation91_spill] sm:$0xff] %v8124_v29  ;;  %v8156_v45 = vmax.f32 %v18389_v15, %v18388_v43  ;;  %18391 = vst [vmem:[#allocation88_spill] sm:$0xff] %v8171_v36  ;;  %v18393_v43 = vmax.f32 %v7719_v19, %v7763_v11  ;;  %v8191_v34 = vld [vmem:[%s7063_s11 + $0x4c8] sm:$0xff]  ;;  %v8194_v0 = vld [vmem:[%s7063_s11 + $0x4d0] sm:$0xff] }
 0x114   : > { %v8200_v33 = vld [vmem:[%s7063_s11 + $0x668] sm:$0xff]  ;;  %v8203_v46 = vld [vmem:[%s7063_s11 + $0x670] sm:$0xff]  ;;  %v8206_v51 = vld [vmem:[%s7063_s11 + $0x678] sm:$0xff] }
 0x115   : > { %18390 = vst [vmem:[#allocation84_spill] sm:$0xff] %v8156_v45  ;;  %v8188_v15 = vmax.f32 %v18393_v43, %v18392_v56  ;;  %v8197_v45 = vld [vmem:[%s7063_s11 + $0x4d8] sm:$0xff]  ;;  %v18397_v56 = vmax.f32 %v7722_v31, %v7774_v30  ;;  %v8226_v19 = vld [vmem:[%s7063_s11 + $0x4e8] sm:$0xff]  ;;  %v8229_v29 = vld [vmem:[%s7063_s11 + $0x4f0] sm:$0xff]  ;;  %v18402_v30 = vmax.f32 %v7754_v48, %v7797_v40 }
 0x116   : > { %18395 = vst [vmem:[#allocation81_spill] sm:$0xff] %v8197_v45  ;;  %v8232_v50 = vld [vmem:[%s7063_s11 + $0x680] sm:$0xff]  ;;  %v8235_v8 = vld [vmem:[%s7063_s11 + $0x688] sm:$0xff]  ;;  %v8238_v11 = vld [vmem:[%s7063_s11 + $0x690] sm:$0xff] }
 0x117   : > { %18394 = vst [vmem:[#allocation92_spill] sm:$0xff] %v8188_v15  ;;  %v8220_v43 = vmax.f32 %v18397_v56, %v18396_v35  ;;  %v8223_v15 = vld [vmem:[%s7063_s11 + $0x4e0] sm:$0xff]  ;;  %18399 = vst [vmem:[#allocation96_spill] sm:$0xff] %v8232_v50  ;;  %v18403_v35 = vld [vmem:[#allocation126_spill] sm:$0xff] }
 0x118   : > { %18400 = vst [vmem:[#allocation86_spill] sm:$0xff] %v8235_v8  ;;  %18401 = vst [vmem:[#allocation89_spill] sm:$0xff] %v8238_v11  ;;  %v18404_v56 = vld [vmem:[#allocation128_spill] sm:$0xff]  ;;  %v8255_v20 = vld [vmem:[%s7063_s11 + $0x4f8] sm:$0xff] }
 0x119   : > { %18398 = vst [vmem:[#allocation85_spill] sm:$0xff] %v8220_v43  ;;  %v18405_v43 = vmax.f32 %v18403_v35, %v18404_v56  ;;  %v8258_v31 = vld [vmem:[%s7063_s11 + $0x500] sm:$0xff]  ;;  %v8261_v2 = vld [vmem:[%s7063_s11 + $0x508] sm:$0xff]  ;;  %v8264_v61 = vld [vmem:[%s7063_s11 + $0x698] sm:$0xff] }
 0x11a   : > { %18407 = vst [vmem:[#allocation105_spill] sm:$0xff] %v8264_v61  ;;  %v8270_v55 = vld [vmem:[%s7063_s11 + $0x6a8] sm:$0xff]  ;;  %v18409_v35 = vld [vmem:[#allocation131_spill] sm:$0xff]  ;;  %v18412_v10 = vld [vmem:[#allocation129_spill] sm:$0xff] }
 0x11b   : > { %v8252_v58 = vmax.f32 %v18405_v43, %v18402_v30  ;;  %v18408_v30 = vld [vmem:[#allocation130_spill] sm:$0xff]  ;;  %v8287_v36 = vld [vmem:[%s7063_s11 + $0x510] sm:$0xff]  ;;  %v8293_v50 = vld [vmem:[%s7063_s11 + $0x520] sm:$0xff] }
 0x11c   : > { %v18410_v56 = vmax.f32 %v18408_v30, %v18409_v35  ;;  %18415 = vst [vmem:[#allocation97_spill] sm:$0xff] %v8287_v36  ;;  %v8290_v48 = vld [vmem:[%s7063_s11 + $0x518] sm:$0xff]  ;;  %v8296_v40 = vld [vmem:[%s7063_s11 + $0x6b0] sm:$0xff]  ;;  %v8302_v43 = vld [vmem:[%s7063_s11 + $0x6c0] sm:$0xff]  ;;  %v18419_v30 = vmax.f32 %v7864_v53, %v8031_v42 }
 0x11d   : > { %18406 = vst [vmem:[#allocation101_spill] sm:$0xff] %v8252_v58  ;;  %v18411_v58 = vld [vmem:[#allocation127_spill] sm:$0xff]  ;;  %18416 = vst [vmem:[#allocation102_spill] sm:$0xff] %v8290_v48  ;;  %v8299_v8 = vld [vmem:[%s7063_s11 + $0x6b8] sm:$0xff] }
 0x11e   : > { %v18413_v39 = vmax.f32 %v18411_v58, %v18412_v10  ;;  %18417 = vst [vmem:[#allocation106_spill] sm:$0xff] %v8299_v8  ;;  %18418 = vst [vmem:[#allocation94_spill] sm:$0xff] %v8302_v43  ;;  %v8313_v35 = vmax.f32 %v18419_v30, %v1022_v37  ;;  %v8322_v10 = vld [vmem:[%s7063_s11 + $0x538] sm:$0xff]  ;;  %v8325_v61 = vld [vmem:[%s7063_s11 + $0x6c8] sm:$0xff]  ;;  %v18424_v30 = vmax.f32 %v7899_v14, %v8066_v12 }
 0x11f   : > { %18421 = vst [vmem:[#allocation103_spill] sm:$0xff] %v8325_v61  ;;  %v8331_v22 = vld [vmem:[%s7063_s11 + $0x6d8] sm:$0xff]  ;;  %v8348_v11 = vld [vmem:[%s7063_s11 + $0x548] sm:$0xff]  ;;  %v8351_v53 = vld [vmem:[%s7063_s11 + $0x550] sm:$0xff]  ;;  %v18429_v37 = vmax.f32 %v7902_v21, %v8069_v25 }
 0x120   : > { %v8284_v4 = vmax.f32 %v18413_v39, %v18410_v56  ;;  %18420 = vst [vmem:[#allocation98_spill] sm:$0xff] %v8313_v35  ;;  %v8316_v56 = vld [vmem:[%s7063_s11 + $0x528] sm:$0xff]  ;;  %v8328_v39 = vld [vmem:[%s7063_s11 + $0x6d0] sm:$0xff]  ;;  %18423 = vst [vmem:[#allocation95_spill] sm:$0xff] %v8331_v22  ;;  %v8342_v58 = vmax.f32 %v18424_v30, %v1023_v13  ;;  %v18428_v30 = vmax.f32 %v7946_v63, %v8110_v23 }
 0x121   : > { %18422 = vst [vmem:[#allocation107_spill] sm:$0xff] %v8328_v39  ;;  %v8345_v35 = vld [vmem:[%s7063_s11 + $0x540] sm:$0xff]  ;;  %18426 = vst [vmem:[#allocation108_spill] sm:$0xff] %v8348_v11  ;;  %v8357_v42 = vld [vmem:[%s7063_s11 + $0x6e8] sm:$0xff]  ;;  %v18434_v23 = vmax.f32 %v7981_v18, %v8136_v59  ;;  %v18440_v59 = vmax.f32 %v8028_v28, %v8174_v52  ;;  %v18444_v52 = vmax.f32 %v8057_v60, %v8200_v33 }
 0x122   : > { %18414 = vst [vmem:[#allocation93_spill] sm:$0xff] %v8284_v4  ;;  %v8319_v4 = vld [vmem:[%s7063_s11 + $0x530] sm:$0xff]  ;;  %18425 = vst [vmem:[#allocation99_spill] sm:$0xff] %v8342_v58  ;;  %v8354_v32 = vld [vmem:[%s7063_s11 + $0x6e0] sm:$0xff]  ;;  %v8374_v58 = vmax.f32 %v18429_v37, %v18428_v30  ;;  %v18435_v37 = vmax.f32 %v7905_v62, %v8072_v9 }
 0x123   : > { %18427 = vst [vmem:[#allocation112_spill] sm:$0xff] %v8351_v53  ;;  %v8360_v8 = vld [vmem:[%s7063_s11 + $0x6f0] sm:$0xff]  ;;  %v8377_v43 = vld [vmem:[%s7063_s11 + $0x558] sm:$0xff]  ;;  %v8380_v14 = vld [vmem:[%s7063_s11 + $0x560] sm:$0xff]  ;;  %v6509_v53 = vpop.permute.xlu1 %6508 }
 0x124   : > { %18430 = vst [vmem:[#allocation100_spill] sm:$0xff] %v8374_v58  ;;  %18431 = vst [vmem:[#allocation104_spill] sm:$0xff] %v8377_v43  ;;  %v8383_v61 = vld [vmem:[%s7063_s11 + $0x568] sm:$0xff]  ;;  %v8386_v12 = vld [vmem:[%s7063_s11 + $0x6f8] sm:$0xff]  ;;  %v8406_v30 = vmax.f32 %v18435_v37, %v18434_v23  ;;  %v18441_v23 = vmax.f32 %v7984_v47, %v8139_v1  ;;  %v6511_v11 = vunpack.i.h.bf16 %v6509_v53 }
 0x125   : > { %18432 = vst [vmem:[#allocation109_spill] sm:$0xff] %v8383_v61  ;;  %v8389_v39 = vld [vmem:[%s7063_s11 + $0x700] sm:$0xff]  ;;  %v8392_v13 = vld [vmem:[%s7063_s11 + $0x708] sm:$0xff]  ;;  %v8409_v58 = vld [vmem:[%s7063_s11 + $0x570] sm:$0xff] }
 0x126   : > { %18433 = vst [vmem:[#allocation113_spill] sm:$0xff] %v8389_v39  ;;  %18436 = vst [vmem:[#allocation117_spill] sm:$0xff] %v8406_v30  ;;  %v8412_v21 = vld [vmem:[%s7063_s11 + $0x578] sm:$0xff]  ;;  %v8415_v22 = vld [vmem:[%s7063_s11 + $0x580] sm:$0xff]  ;;  %v8438_v37 = vmax.f32 %v18441_v23, %v18440_v59  ;;  %v18445_v59 = vmax.f32 %v7987_v38, %v8142_v27 }
 0x127   : > { %18437 = vst [vmem:[#allocation120_spill] sm:$0xff] %v8415_v22  ;;  %v8418_v63 = vld [vmem:[%s7063_s11 + $0x710] sm:$0xff]  ;;  %v8421_v45 = vld [vmem:[%s7063_s11 + $0x718] sm:$0xff]  ;;  %v8424_v25 = vld [vmem:[%s7063_s11 + $0x720] sm:$0xff] }
 0x128   : > { %18438 = vst [vmem:[#allocation110_spill] sm:$0xff] %v8418_v63  ;;  %18439 = vst [vmem:[#allocation114_spill] sm:$0xff] %v8421_v45  ;;  %v8441_v62 = vld [vmem:[%s7063_s11 + $0x588] sm:$0xff]  ;;  %v8447_v18 = vld [vmem:[%s7063_s11 + $0x730] sm:$0xff]  ;;  %v8464_v23 = vmax.f32 %v18445_v59, %v18444_v52  ;;  %v18451_v52 = vmax.f32 %v8060_v3, %v8203_v46  ;;  %v18452_v59 = vmax.f32 %v8022_v5, %v8168_v54 }
 0x129   : > { %18442 = vst [vmem:[#allocation118_spill] sm:$0xff] %v8438_v37  ;;  %18443 = vst [vmem:[#allocation121_spill] sm:$0xff] %v8441_v62  ;;  %v8444_v30 = vld [vmem:[%s7063_s11 + $0x728] sm:$0xff]  ;;  %v8450_v39 = vld [vmem:[%s7063_s11 + $0x738] sm:$0xff]  ;;  %v18458_v54 = vmax.f32 %v8063_v26, %v8206_v51 }
 0x12a   : > { %18446 = vst [vmem:[#allocation111_spill] sm:$0xff] %v8464_v23  ;;  %v8467_v9 = vld [vmem:[%s7063_s11 + $0x590] sm:$0xff]  ;;  %v8470_v28 = vld [vmem:[%s7063_s11 + $0x598] sm:$0xff]  ;;  %v8473_v37 = vld [vmem:[%s7063_s11 + $0x5a0] sm:$0xff]  ;;  %v8499_v23 = vmax.f32 %v18452_v59, %v18451_v52 }
 0x12b   : > { %18447 = vst [vmem:[#allocation115_spill] sm:$0xff] %v8467_v9  ;;  %18448 = vst [vmem:[#allocation116_spill] sm:$0xff] %v8470_v28  ;;  %v8476_v47 = vld [vmem:[%s7063_s11 + $0x5a8] sm:$0xff]  ;;  %v8479_v45 = vld [vmem:[%s7063_s11 + $0x740] sm:$0xff]  ;;  %v6514_v28 = vpop.permute.xlu1 %6513 }
 0x12c   : > { %v8482_v1 = vld [vmem:[%s7063_s11 + $0x748] sm:$0xff]  ;;  %v8485_v60 = vld [vmem:[%s7063_s11 + $0x750] sm:$0xff]  ;;  %18453 = vst [vmem:[#allocation124_spill] sm:$0xff] %v8499_v23  ;;  %v8505_v38 = vld [vmem:[%s7063_s11 + $0x5b8] sm:$0xff]  ;;  %v6515_v9 = vunpack.i.l.bf16 %v6514_v28 }
 0x12d   : > { %18449 = vst [vmem:[#allocation119_spill] sm:$0xff] %v8482_v1  ;;  %18450 = vst [vmem:[#allocation122_spill] sm:$0xff] %v8485_v60  ;;  %v8502_v48 = vld [vmem:[%s7063_s11 + $0x5b0] sm:$0xff]  ;;  %v8508_v63 = vld [vmem:[%s7063_s11 + $0x758] sm:$0xff] }
 0x12e   : > { %18454 = vst [vmem:[#allocation123_spill] sm:$0xff] %v8502_v48  ;;  %18455 = vst [vmem:[#allocation125_spill] sm:$0xff] %v8505_v38  ;;  %v8511_v27 = vld [vmem:[%s7063_s11 + $0x760] sm:$0xff]  ;;  %v8514_v36 = vld [vmem:[%s7063_s11 + $0x768] sm:$0xff] }
 0x12f   : > { %18456 = vst [vmem:[#allocation126_spill] sm:$0xff] %v8508_v63  ;;  %18457 = vst [vmem:[#allocation128_spill] sm:$0xff] %v8514_v36  ;;  %v18459_v52 = vld [vmem:[#allocation88_spill] sm:$0xff]  ;;  %v8531_v23 = vld [vmem:[%s7063_s11 + $0x5c0] sm:$0xff]  ;;  %v6510_v36 = vunpack.i.l.bf16 %v6509_v53 }
 0x130   : > { %v18460_v59 = vmax.f32 %v8025_v49, %v18459_v52  ;;  %v8534_v3 = vld [vmem:[%s7063_s11 + $0x5c8] sm:$0xff]  ;;  %v8537_v5 = vld [vmem:[%s7063_s11 + $0x5d0] sm:$0xff]  ;;  %v8543_v46 = vld [vmem:[%s7063_s11 + $0x778] sm:$0xff] }
 0x131   : > { %v8540_v1 = vld [vmem:[%s7063_s11 + $0x770] sm:$0xff]  ;;  %18463 = vst [vmem:[#allocation127_spill] sm:$0xff] %v8543_v46  ;;  %v8546_v60 = vld [vmem:[%s7063_s11 + $0x780] sm:$0xff]  ;;  %v18466_v52 = vld [vmem:[#allocation96_spill] sm:$0xff] }
 0x132   : > { %v8528_v33 = vmax.f32 %v18460_v59, %v18458_v54  ;;  %18462 = vst [vmem:[#allocation131_spill] sm:$0xff] %v8540_v1  ;;  %18464 = vst [vmem:[#allocation129_spill] sm:$0xff] %v8546_v60  ;;  %v18465_v54 = vmax.f32 %v8130_v16, %v8267_v41  ;;  %v18467_v59 = vmax.f32 %v8095_v17, %v18466_v52  ;;  %v8564_v49 = vld [vmem:[%s7063_s11 + $0x5d8] sm:$0xff]  ;;  %v8567_v26 = vld [vmem:[%s7063_s11 + $0x5e0] sm:$0xff] }
 0x133   : > { %v8570_v63 = vld [vmem:[%s7063_s11 + $0x788] sm:$0xff]  ;;  %v8573_v51 = vld [vmem:[%s7063_s11 + $0x790] sm:$0xff]  ;;  %v8576_v41 = vld [vmem:[%s7063_s11 + $0x798] sm:$0xff]  ;;  %v18472_v52 = vmax.f32 %v8133_v24, %v8270_v55 }
 0x134   : > { %18461 = vst [vmem:[#allocation130_spill] sm:$0xff] %v8528_v33  ;;  %v8560_v33 = vmax.f32 %v18467_v59, %v18465_v54  ;;  %18469 = vst [vmem:[#allocation96_spill] sm:$0xff] %v8570_v63  ;;  %v18473_v59 = vld [vmem:[#allocation86_spill] sm:$0xff]  ;;  %v8593_v61 = vld [vmem:[%s7063_s11 + $0x5e8] sm:$0xff] }
 0x135   : > { %18470 = vst [vmem:[#allocation134_spill] sm:$0xff] %v8573_v51  ;;  %18471 = vst [vmem:[#allocation135_spill] sm:$0xff] %v8576_v41  ;;  %v8596_v17 = vld [vmem:[%s7063_s11 + $0x7a0] sm:$0xff]  ;;  %v8599_v1 = vld [vmem:[%s7063_s11 + $0x7a8] sm:$0xff]  ;;  %v6516_v51 = vunpack.i.h.bf16 %v6514_v28 }
 0x136   : > { %18468 = vst [vmem:[#allocation88_spill] sm:$0xff] %v8560_v33  ;;  %v18474_v33 = vmax.f32 %v8098_v44, %v18473_v59  ;;  %v8602_v16 = vld [vmem:[%s7063_s11 + $0x7b0] sm:$0xff]  ;;  %v18477_v44 = vmax.f32 %v8159_v7, %v8296_v40  ;;  %v18478_v55 = vld [vmem:[#allocation87_spill] sm:$0xff]  ;;  %v8618_v54 = vld [vmem:[%s7063_s11 + $0x5f8] sm:$0xff] }
 0x137   : > { %18476 = vst [vmem:[#allocation136_spill] sm:$0xff] %v8602_v16  ;;  %v8615_v59 = vld [vmem:[%s7063_s11 + $0x5f0] sm:$0xff]  ;;  %v8624_v60 = vld [vmem:[%s7063_s11 + $0x7c0] sm:$0xff]  ;;  %v8627_v24 = vld [vmem:[%s7063_s11 + $0x7c8] sm:$0xff] }
 0x138   : > { %v8590_v43 = vmax.f32 %v18474_v33, %v18472_v52  ;;  %v18479_v33 = vld [vmem:[#allocation89_spill] sm:$0xff]  ;;  %v18485_v63 = vld [vmem:[#allocation27_spill] sm:$0xff]  ;;  %v8645_v46 = vld [vmem:[%s7063_s11 + $0x7d8] sm:$0xff] }
 0x139   : > { %v18480_v52 = vmax.f32 %v18478_v55, %v18479_v33  ;;  %v8637_v33 = vpop.permute.xlu0 %6498  ;;  %v5790_v62 = vmax.f32 %v18485_v63, %v6510_v36  ;;  %v8642_v22 = vld [vmem:[%s7063_s11 + $0x7d0] sm:$0xff]  ;;  %v8648_v7 = vld [vmem:[%s7063_s11 + $0x7e0] sm:$0xff]  ;;  %v8656_v41 = vld [vmem:[%s7063_s11 + $0x7e8] sm:$0xff] }
 0x13a   : > { %18475 = vst [vmem:[#allocation86_spill] sm:$0xff] %v8590_v43  ;;  %v8621_v43 = vld [vmem:[%s7063_s11 + $0x7b8] sm:$0xff]  ;;  %18483 = vst [vmem:[#allocation137_spill] sm:$0xff] %v8637_v33  ;;  %v6501_v55 = vunpack.i.h.bf16 %v8637_v33  ;;  %v1078_v38 = vmax.f32 %v8567_v26, %v8648_v7  ;;  %v1079_v63 = vmax.f32 %v8593_v61, %v8656_v41  ;;  %v18489_v61 = vld [vmem:[#allocation80_spill] sm:$0xff] }
 0x13b   : > { %v8612_v53 = vmax.f32 %v18480_v52, %v18477_v44  ;;  %18482 = vst [vmem:[#allocation89_spill] sm:$0xff] %v8621_v43  ;;  %v18484_v52 = vld [vmem:[#allocation28_spill] sm:$0xff]  ;;  %v8662_v36 = vld [vmem:[%s7063_s11 + $0x7f8] sm:$0xff]  ;;  %v5822_v43 = vpack.c.bf16 %v5790_v62, %v5790_v62  ;;  %v18490_v41 = vld [vmem:[#allocation105_spill] sm:$0xff] }
 0x13c   : > { %v18486_v16 = vld [vmem:[#allocation30_spill] sm:$0xff]  ;;  %v1081_v28 = vmax.f32 %v8618_v54, %v8662_v36  ;;  %v18498_v54 = vld [vmem:[#allocation31_spill] sm:$0xff] }
 0x13d   : > { %18481 = vst [vmem:[#allocation87_spill] sm:$0xff] %v8612_v53  ;;  %v5791_v53 = vmax.f32 %v18484_v52, %v6511_v11  ;;  %v8659_v11 = vld [vmem:[%s7063_s11 + $0x7f0] sm:$0xff]  ;;  %v5787_v48 = vmax.f32 %v18486_v16, %v6501_v55  ;;  %5855 = vst.msk [vmem:[%s8679_s1 + $0xb0] sm:$0xf] %vm5850_vm0, %v5822_v43  ;;  %v18487_v26 = vld [vmem:[#allocation106_spill] sm:$0xff]  ;;  %v5792_v36 = vmax.f32 %v18498_v54, %v6515_v9 }
 0x13e   : > { %v1080_v62 = vmax.f32 %v8615_v59, %v8659_v11  ;;  %v18488_v16 = vmax.f32 %v8162_v57, %v18487_v26  ;;  %v18494_v43 = vld [vmem:[#allocation94_spill] sm:$0xff]  ;;  %v6504_v59 = vpop.permute.xlu0 %6503  ;;  %v18497_v11 = vld [vmem:[#allocation32_spill] sm:$0xff]  ;;  %v18499_v57 = vmax.f32 %v8226_v19, %v8357_v42  ;;  %v18500_v26 = vld [vmem:[#allocation103_spill] sm:$0xff]  ;;  %v18507_v19 = vmax.f32 %v8255_v20, %v8386_v12 }
 0x13f   : > { %v5823_v44 = vpack.c.bf16 %v5791_v53, %v5791_v53  ;;  %v18491_v53 = vmax.f32 %v18489_v61, %v18490_v41  ;;  %v18495_v55 = vmax.f32 %v8165_v6, %v18494_v43  ;;  %v5793_v40 = vmax.f32 %v18497_v11, %v6516_v51  ;;  %v18504_v41 = vld [vmem:[#allocation107_spill] sm:$0xff]  ;;  %v18519_v11 = vld [vmem:[#allocation34_spill] sm:$0xff] }
 0x140   : > { %v5819_v52 = vpack.c.bf16 %v5787_v48, %v5787_v48  ;;  %v18503_v6 = vmax.f32 %v8229_v29, %v8360_v8  ;;  %v18505_v51 = vmax.f32 %v8194_v0, %v18504_v41  ;;  %v18508_v48 = vld [vmem:[#allocation81_spill] sm:$0xff]  ;;  %v18509_v42 = vld [vmem:[#allocation95_spill] sm:$0xff]  ;;  %v5824_v43 = vpack.c.bf16 %v5792_v36, %v5792_v36 }
 0x141   : > { %5856 = vst.msk [vmem:[%s8679_s1 + $0xd4] sm:$0xf] %vm5850_vm0, %v5823_v44  ;;  %v8695_v7 = vmax.f32 %v18491_v53, %v18488_v16  ;;  %v18493_v44 = vmax.f32 %v8223_v15, %v8354_v32  ;;  %v18501_v16 = vmax.f32 %v8191_v34, %v18500_v26  ;;  %v6506_v32 = vunpack.i.h.bf16 %v6504_v59  ;;  %v18513_v29 = vld [vmem:[#allocation113_spill] sm:$0xff] }
 0x142   : > { %v6505_v15 = vunpack.i.l.bf16 %v6504_v59  ;;  %v8721_v9 = vmax.f32 %v18505_v51, %v18503_v6  ;;  %v18510_v34 = vmax.f32 %v18508_v48, %v18509_v42  ;;  %5852 = vst.msk [vmem:[%s8679_s1 + $0x44] sm:$0xf] %vm5850_vm0, %v5819_v52  ;;  %v18512_v8 = vmax.f32 %v8293_v50, %v8424_v25  ;;  %v18520_v52 = vld [vmem:[#allocation33_spill] sm:$0xff]  ;;  %5857 = vst.msk [vmem:[%s8679_s1 + $0xf8] sm:$0xf] %vm5850_vm0, %v5824_v43  ;;  %v18535_v6 = vld [vmem:[#allocation128_spill] sm:$0xff] }
 0x143   : > { %18492 = vst [vmem:[#allocation28_spill] sm:$0xff] %v8695_v7  ;;  %v8703_v33 = vmax.f32 %v18495_v55, %v18493_v44  ;;  %v8713_v61 = vmax.f32 %v18501_v16, %v18499_v57  ;;  %v5825_v44 = vpack.c.bf16 %v5793_v40, %v5793_v40  ;;  %v18514_v0 = vmax.f32 %v8258_v31, %v18513_v29  ;;  %v6524_v40 = vpop.permute.xlu1 %6523  ;;  %v18522_v25 = vld [vmem:[#allocation97_spill] sm:$0xff]  ;;  %v18523_v31 = vld [vmem:[#allocation110_spill] sm:$0xff]  ;;  %v18537_v51 = vld [vmem:[#allocation108_spill] sm:$0xff] }
 0x144   : > { %18506 = vst [vmem:[#allocation106_spill] sm:$0xff] %v8721_v9  ;;  %v8729_v53 = vmax.f32 %v18510_v34, %v18507_v19  ;;  %v18516_v20 = vmax.f32 %v8316_v56, %v8444_v30  ;;  %v18517_v12 = vmax.f32 %v8261_v2, %v8392_v13  ;;  %v5789_v54 = vmax.f32 %v18519_v11, %v6506_v32  ;;  %v18527_v30 = vld [vmem:[#allocation102_spill] sm:$0xff]  ;;  %v18538_v19 = vld [vmem:[#allocation119_spill] sm:$0xff]  ;;  %v6519_v34 = vpop.permute.xlu0 %6518 }
 0x145   : > { %18496 = vst [vmem:[#allocation27_spill] sm:$0xff] %v8703_v33  ;;  %18502 = vst [vmem:[#allocation30_spill] sm:$0xff] %v8713_v61  ;;  %v8739_v55 = vmax.f32 %v18514_v0, %v18512_v8  ;;  %v5788_v36 = vmax.f32 %v18520_v52, %v6505_v15  ;;  %v18521_v50 = vmax.f32 %v8319_v4, %v8447_v18  ;;  %v18528_v2 = vld [vmem:[#allocation114_spill] sm:$0xff]  ;;  %v6526_v32 = vunpack.i.h.bf16 %v6524_v40  ;;  %v18541_v43 = vld [vmem:[#allocation131_spill] sm:$0xff] }
 0x146   : > { %18511 = vst [vmem:[#allocation80_spill] sm:$0xff] %v8729_v53  ;;  %v8747_v59 = vmax.f32 %v18517_v12, %v18516_v20  ;;  %v18524_v57 = vmax.f32 %v18522_v25, %v18523_v31  ;;  %v18526_v56 = vmax.f32 %v8322_v10, %v8450_v39  ;;  %v18529_v13 = vmax.f32 %v18527_v30, %v18528_v2  ;;  %v18534_v39 = vld [vmem:[#allocation109_spill] sm:$0xff]  ;;  %v18549_v12 = vld [vmem:[#allocation104_spill] sm:$0xff]  ;;  %v9127_v53 = vld [vmem:[%s7063_s11 + $0x8d8] sm:$0xff] }
 0x147   : > { %18515 = vst [vmem:[#allocation105_spill] sm:$0xff] %v8739_v55  ;;  %v6525_v15 = vunpack.i.l.bf16 %v6524_v40  ;;  %5858 = vst.msk [vmem:[%s8679_s1 + $0x11c] sm:$0xf] %vm5850_vm0, %v5825_v44  ;;  %v18531_v4 = vmax.f32 %v8380_v14, %v8511_v27  ;;  %v18532_v18 = vmax.f32 %v8345_v35, %v8479_v45  ;;  %v18536_v41 = vmax.f32 %v18534_v39, %v18535_v6  ;;  %v18543_v14 = vld [vmem:[#allocation112_spill] sm:$0xff]  ;;  %v18544_v27 = vld [vmem:[#allocation122_spill] sm:$0xff] }
 0x148   : > { %18518 = vst [vmem:[#allocation94_spill] sm:$0xff] %v8747_v59  ;;  %v8757_v26 = vmax.f32 %v18524_v57, %v18521_v50  ;;  %v8765_v16 = vmax.f32 %v18529_v13, %v18526_v56  ;;  %v18539_v48 = vmax.f32 %v18537_v51, %v18538_v19  ;;  %v5821_v44 = vpack.c.bf16 %v5789_v54, %v5789_v54  ;;  %v18547_v35 = vld [vmem:[#allocation127_spill] sm:$0xff]  ;;  %v18550_v40 = vld [vmem:[#allocation126_spill] sm:$0xff]  ;;  %v18553_v50 = vld [vmem:[#allocation36_spill] sm:$0xff] }
 0x149   : > { %v8777_v10 = vmax.f32 %v18532_v18, %v18531_v4  ;;  %v5820_v8 = vpack.c.bf16 %v5788_v36, %v5788_v36  ;;  %v18542_v29 = vmax.f32 %v8409_v58, %v18541_v43  ;;  %v18545_v0 = vmax.f32 %v18543_v14, %v18544_v27  ;;  %v18554_v54 = vld [vmem:[#allocation35_spill] sm:$0xff]  ;;  %v18557_v56 = vld [vmem:[#allocation129_spill] sm:$0xff]  ;;  %v18566_v6 = vld [vmem:[#allocation136_spill] sm:$0xff]  ;;  %18673 = vst [vmem:[#allocation141_spill] sm:$0xff] %v9127_v53 }
 0x14a   : > { %18525 = vst [vmem:[#allocation32_spill] sm:$0xff] %v8757_v26  ;;  %18530 = vst [vmem:[#allocation31_spill] sm:$0xff] %v8765_v16  ;;  %v8785_v42 = vmax.f32 %v18539_v48, %v18536_v41  ;;  %v18548_v20 = vmax.f32 %v8412_v21, %v18547_v35  ;;  %v18551_v11 = vmax.f32 %v18549_v12, %v18550_v40  ;;  %v6521_v31 = vunpack.i.h.bf16 %v6519_v34  ;;  %v18556_v21 = vld [vmem:[#allocation120_spill] sm:$0xff]  ;;  %v18565_v39 = vld [vmem:[#allocation123_spill] sm:$0xff] }
 0x14b   : > { %18533 = vst [vmem:[#allocation103_spill] sm:$0xff] %v8777_v10  ;;  %v8793_v45 = vmax.f32 %v18545_v0, %v18542_v29  ;;  %v5797_v25 = vmax.f32 %v18553_v50, %v6526_v32  ;;  %v5796_v36 = vmax.f32 %v18554_v54, %v6525_v15  ;;  %v6520_v57 = vunpack.i.l.bf16 %v6519_v34  ;;  %5854 = vst.msk [vmem:[%s8679_s1 + $0x8c] sm:$0xf] %vm5850_vm0, %v5821_v44  ;;  %v18561_v32 = vld [vmem:[#allocation121_spill] sm:$0xff]  ;;  %v18562_v15 = vld [vmem:[#allocation96_spill] sm:$0xff] }
 0x14c   : > { %18540 = vst [vmem:[#allocation107_spill] sm:$0xff] %v8785_v42  ;;  %v8801_v52 = vmax.f32 %v18551_v11, %v18548_v20  ;;  %5853 = vst.msk [vmem:[%s8679_s1 + $0x68] sm:$0xf] %vm5850_vm0, %v5820_v8  ;;  %v18555_v58 = vmax.f32 %v8473_v37, %v8596_v17  ;;  %v18558_v30 = vmax.f32 %v18556_v21, %v18557_v56  ;;  %v18568_v51 = vld [vmem:[#allocation115_spill] sm:$0xff]  ;;  %v18569_v19 = vld [vmem:[#allocation134_spill] sm:$0xff] }
 0x14d   : > { %18546 = vst [vmem:[#allocation81_spill] sm:$0xff] %v8793_v45  ;;  %v18560_v13 = vmax.f32 %v8476_v47, %v8599_v1  ;;  %v18563_v4 = vmax.f32 %v18561_v32, %v18562_v15  ;;  %v18567_v41 = vmax.f32 %v18565_v39, %v18566_v6  ;;  %v18570_v48 = vmax.f32 %v18568_v51, %v18569_v19  ;;  %v18572_v17 = vld [vmem:[#allocation125_spill] sm:$0xff]  ;;  %v18575_v8 = vld [vmem:[#allocation116_spill] sm:$0xff]  ;;  %v18576_v43 = vld [vmem:[#allocation135_spill] sm:$0xff]  ;;  %v6534_v1 = vpop.permute.xlu1 %6533 }
 0x14e   : > { %18552 = vst [vmem:[#allocation95_spill] sm:$0xff] %v8801_v52  ;;  %v8815_v2 = vmax.f32 %v18558_v30, %v18555_v58  ;;  %v18573_v34 = vld [vmem:[#allocation89_spill] sm:$0xff]  ;;  %v18577_v29 = vmax.f32 %v18575_v8, %v18576_v43  ;;  %v5829_v14 = vpack.c.bf16 %v5797_v25, %v5797_v25  ;;  %v5828_v27 = vpack.c.bf16 %v5796_v36, %v5796_v36  ;;  %v18579_v0 = vld [vmem:[#allocation38_spill] sm:$0xff]  ;;  %v8934_v32 = vld [vmem:[%s7063_s11 + $0x840] sm:$0xff] }
 0x14f   : > { %v8823_v18 = vmax.f32 %v18563_v4, %v18560_v13  ;;  %v8831_v37 = vmax.f32 %v18570_v48, %v18567_v41  ;;  %v18574_v44 = vmax.f32 %v18572_v17, %v18573_v34  ;;  %v5795_v35 = vmax.f32 %v18579_v0, %v6521_v31  ;;  %v18580_v20 = vld [vmem:[#allocation37_spill] sm:$0xff]  ;;  %v8931_v39 = vld [vmem:[%s7063_s11 + $0x838] sm:$0xff]  ;;  %18622 = vst [vmem:[#allocation131_spill] sm:$0xff] %v8934_v32  ;;  %v8994_v8 = vld [vmem:[%s7063_s11 + $0xa40] sm:$0xff] }
 0x150   : > { %18559 = vst [vmem:[#allocation113_spill] sm:$0xff] %v8815_v2  ;;  %v5794_v12 = vmax.f32 %v18580_v20, %v6520_v57  ;;  %v6536_v40 = vunpack.i.h.bf16 %v6534_v1  ;;  %v6535_v11 = vunpack.i.l.bf16 %v6534_v1  ;;  %v18581_v50 = vmax.f32 %v8531_v23, %v8624_v60  ;;  %5862 = vst.msk [vmem:[%s8679_s1 + $0x1ac] sm:$0xf] %vm5850_vm0, %v5829_v14  ;;  %v18641_v17 = vld [vmem:[#allocation47_spill] sm:$0xff]  ;;  %v9012_v15 = vld [vmem:[%s7063_s11 + $0xa50] sm:$0xff] }
 0x151   : > { %18564 = vst [vmem:[#allocation34_spill] sm:$0xff] %v8823_v18  ;;  %18571 = vst [vmem:[#allocation33_spill] sm:$0xff] %v8831_v37  ;;  %v8839_v47 = vmax.f32 %v18577_v29, %v18574_v44  ;;  %v18583_v58 = vmax.f32 %v8534_v3, %v8627_v24  ;;  %v5827_v25 = vpack.c.bf16 %v5795_v35, %v5795_v35  ;;  %v18589_v3 = vld [vmem:[#allocation40_spill] sm:$0xff]  ;;  %v6544_v51 = vpop.permute.xlu1 %6543  ;;  %v18604_v35 = vld [vmem:[#allocation41_spill] sm:$0xff] }
 0x152   : > { %v8846_v54 = vmax.f32 %v18581_v50, %v1078_v38  ;;  %5861 = vst.msk [vmem:[%s8679_s1 + $0x188] sm:$0xf] %vm5850_vm0, %v5828_v27  ;;  %v5826_v36 = vpack.c.bf16 %v5794_v12, %v5794_v12  ;;  %v18585_v31 = vmax.f32 %v8537_v5, %v8642_v22  ;;  %v18587_v23 = vmax.f32 %v8564_v49, %v8645_v46  ;;  %v6529_v38 = vpop.permute.xlu0 %6528  ;;  %v18603_v27 = vld [vmem:[#allocation42_spill] sm:$0xff]  ;;  %v8940_v44 = vld [vmem:[%s7063_s11 + $0xa00] sm:$0xff]  ;;  %v8952_v50 = vld [vmem:[%s7063_s11 + $0xa10] sm:$0xff] }
 0x153   : > { %18578 = vst [vmem:[#allocation97_spill] sm:$0xff] %v8839_v47  ;;  %v8851_v21 = vmax.f32 %v18583_v58, %v1079_v63  ;;  %v5801_v24 = vmax.f32 %v18589_v3, %v6536_v40  ;;  %v18590_v63 = vld [vmem:[#allocation39_spill] sm:$0xff]  ;;  %v6531_v22 = vunpack.i.h.bf16 %v6529_v38  ;;  %v6530_v5 = vunpack.i.l.bf16 %v6529_v38  ;;  %5860 = vst.msk [vmem:[%s8679_s1 + $0x164] sm:$0xf] %vm5850_vm0, %v5827_v25  ;;  %v8937_v25 = vld [vmem:[%s7063_s11 + $0x848] sm:$0xff] }
 0x154   : > { %18582 = vst [vmem:[#allocation110_spill] sm:$0xff] %v8846_v54  ;;  %v8860_v57 = vmax.f32 %v18585_v31, %v1080_v62  ;;  %v8865_v60 = vmax.f32 %v18587_v23, %v1081_v28  ;;  %v5800_v56 = vmax.f32 %v18590_v63, %v6535_v11  ;;  %5859 = vst.msk [vmem:[%s8679_s1 + $0x140] sm:$0xf] %vm5850_vm0, %v5826_v36  ;;  %v6546_v1 = vunpack.i.h.bf16 %v6544_v51  ;;  %v8908_v23 = vld [vmem:[%s7063_s11 + $0x810] sm:$0xff]  ;;  %v18628_v38 = vld [vmem:[#allocation46_spill] sm:$0xff] }
 0x155   : > { %18584 = vst [vmem:[#allocation102_spill] sm:$0xff] %v8851_v21  ;;  %v5833_v19 = vpack.c.bf16 %v5801_v24, %v5801_v24  ;;  %v6545_v14 = vunpack.i.l.bf16 %v6544_v51  ;;  %v5799_v0 = vmax.f32 %v18603_v27, %v6531_v22  ;;  %v5798_v20 = vmax.f32 %v18604_v35, %v6530_v5  ;;  %v18614_v5 = vld [vmem:[#allocation43_spill] sm:$0xff]  ;;  %v8905_v35 = vld [vmem:[%s7063_s11 + $0x808] sm:$0xff]  ;;  %18615 = vst [vmem:[#allocation128_spill] sm:$0xff] %v8908_v23 }
 0x156   : > { %18586 = vst [vmem:[#allocation114_spill] sm:$0xff] %v8860_v57  ;;  %18588 = vst [vmem:[#allocation109_spill] sm:$0xff] %v8865_v60  ;;  %v5832_v48 = vpack.c.bf16 %v5800_v56, %v5800_v56  ;;  %v6539_v63 = vpop.permute.xlu0 %6538  ;;  %v18613_v56 = vld [vmem:[#allocation44_spill] sm:$0xff]  ;;  %v8902_v27 = vld [vmem:[%s7063_s11 + $0x800] sm:$0xff] }
 0x157   : > { %5866 = vst.msk [vmem:[%s8679_s1 + $0x23c] sm:$0xf] %vm5850_vm0, %v5833_v19  ;;  %v5805_v22 = vmax.f32 %v18613_v56, %v6546_v1  ;;  %v5804_v51 = vmax.f32 %v18614_v5, %v6545_v14  ;;  %v5831_v19 = vpack.c.bf16 %v5799_v0, %v5799_v0  ;;  %v6541_v24 = vunpack.i.h.bf16 %v6539_v63  ;;  %v8911_v56 = vld [vmem:[%s7063_s11 + $0x818] sm:$0xff]  ;;  %v8914_v14 = vld [vmem:[%s7063_s11 + $0x820] sm:$0xff]  ;;  %v8917_v0 = vld [vmem:[%s7063_s11 + $0x828] sm:$0xff]  ;;  %v6554_v5 = vpop.permute.xlu1 %6553 }
 0x158   : > { %5865 = vst.msk [vmem:[%s8679_s1 + $0x218] sm:$0xf] %vm5850_vm0, %v5832_v48  ;;  %v5830_v48 = vpack.c.bf16 %v5798_v20, %v5798_v20  ;;  %v6540_v1 = vunpack.i.l.bf16 %v6539_v63  ;;  %18616 = vst [vmem:[#allocation108_spill] sm:$0xff] %v8911_v56  ;;  %v8928_v63 = vld [vmem:[%s7063_s11 + $0x830] sm:$0xff]  ;;  %v8955_v58 = vld [vmem:[%s7063_s11 + $0xa18] sm:$0xff]  ;;  %v6555_v29 = vunpack.i.l.bf16 %v6554_v5 }
 0x159   : > { %v5837_v41 = vpack.c.bf16 %v5805_v22, %v5805_v22  ;;  %v5836_v62 = vpack.c.bf16 %v5804_v51, %v5804_v51  ;;  %5864 = vst.msk [vmem:[%s8679_s1 + $0x1f4] sm:$0xf] %vm5850_vm0, %v5831_v19  ;;  %18621 = vst [vmem:[#allocation119_spill] sm:$0xff] %v8931_v39  ;;  %v8943_v22 = vld [vmem:[%s7063_s11 + $0xa08] sm:$0xff]  ;;  %v5803_v3 = vmax.f32 %v18628_v38, %v6541_v24  ;;  %v18629_v36 = vld [vmem:[#allocation45_spill] sm:$0xff] }
 0x15a   : > { %5863 = vst.msk [vmem:[%s8679_s1 + $0x1d0] sm:$0xf] %vm5850_vm0, %v5830_v48  ;;  %18623 = vst [vmem:[#allocation112_spill] sm:$0xff] %v8937_v25  ;;  %v5802_v31 = vmax.f32 %v18629_v36, %v6540_v1  ;;  %v8958_v12 = vld [vmem:[%s7063_s11 + $0xa20] sm:$0xff]  ;;  %v6556_v48 = vunpack.i.h.bf16 %v6554_v5  ;;  %v8969_v36 = vld [vmem:[%s7063_s11 + $0x850] sm:$0xff]  ;;  %v5808_v34 = vmax.f32 %v18641_v17, %v6555_v29 }
 0x15b   : > { %18630 = vst [vmem:[#allocation122_spill] sm:$0xff] %v8952_v50  ;;  %18631 = vst [vmem:[#allocation127_spill] sm:$0xff] %v8955_v58  ;;  %v8972_v38 = vld [vmem:[%s7063_s11 + $0x858] sm:$0xff]  ;;  %v8975_v24 = vld [vmem:[%s7063_s11 + $0xa28] sm:$0xff]  ;;  %v5835_v5 = vpack.c.bf16 %v5803_v3, %v5803_v3 }
 0x15c   : > { %5870 = vst.msk [vmem:[%s8679_s1 + $0x2cc] sm:$0xf] %vm5850_vm0, %v5837_v41  ;;  %5869 = vst.msk [vmem:[%s8679_s1 + $0x2a8] sm:$0xf] %vm5850_vm0, %v5836_v62  ;;  %v8978_v1 = vld [vmem:[%s7063_s11 + $0xa30] sm:$0xff]  ;;  %v8981_v19 = vld [vmem:[%s7063_s11 + $0xa38] sm:$0xff]  ;;  %v6549_v62 = vpop.permute.xlu0 %6548  ;;  %v5834_v51 = vpack.c.bf16 %v5802_v31, %v5802_v31  ;;  %v6564_v41 = vpop.permute.xlu1 %6563  ;;  %v5840_v13 = vpack.c.bf16 %v5808_v34, %v5808_v34 }
 0x15d   : > { %18632 = vst [vmem:[#allocation104_spill] sm:$0xff] %v8969_v36  ;;  %18633 = vst [vmem:[#allocation126_spill] sm:$0xff] %v8972_v38  ;;  %v8988_v11 = vld [vmem:[%s7063_s11 + $0x860] sm:$0xff]  ;;  %v8991_v40 = vld [vmem:[%s7063_s11 + $0x868] sm:$0xff]  ;;  %v6551_v28 = vunpack.i.h.bf16 %v6549_v62  ;;  %v6550_v6 = vunpack.i.l.bf16 %v6549_v62  ;;  %v6566_v3 = vunpack.i.h.bf16 %v6564_v41  ;;  %v6565_v18 = vunpack.i.l.bf16 %v6564_v41 }
 0x15e   : > { %18634 = vst [vmem:[#allocation36_spill] sm:$0xff] %v8978_v1  ;;  %18635 = vst [vmem:[#allocation35_spill] sm:$0xff] %v8981_v19  ;;  %v8997_v20 = vld [vmem:[%s7063_s11 + $0xa48] sm:$0xff]  ;;  %v9006_v46 = vld [vmem:[%s7063_s11 + $0x870] sm:$0xff] }
 0x15f   : > { %18636 = vst [vmem:[#allocation120_spill] sm:$0xff] %v8988_v11  ;;  %18637 = vst [vmem:[#allocation129_spill] sm:$0xff] %v8991_v40  ;;  %v18640_v31 = vld [vmem:[#allocation48_spill] sm:$0xff]  ;;  %v9009_v49 = vld [vmem:[%s7063_s11 + $0x878] sm:$0xff] }
 0x160   : > { %18638 = vst [vmem:[#allocation121_spill] sm:$0xff] %v8994_v8  ;;  %18639 = vst [vmem:[#allocation96_spill] sm:$0xff] %v8997_v20  ;;  %v5809_v43 = vmax.f32 %v18640_v31, %v6556_v48  ;;  %v9015_v4 = vld [vmem:[%s7063_s11 + $0xa58] sm:$0xff]  ;;  %v9022_v48 = vld [vmem:[%s7063_s11 + $0x880] sm:$0xff] }
 0x161   : > { %18642 = vst [vmem:[#allocation123_spill] sm:$0xff] %v9006_v46  ;;  %18643 = vst [vmem:[#allocation136_spill] sm:$0xff] %v9009_v49  ;;  %v9025_v17 = vld [vmem:[%s7063_s11 + $0x888] sm:$0xff]  ;;  %v9028_v29 = vld [vmem:[%s7063_s11 + $0xa60] sm:$0xff] }
 0x162   : > { %18644 = vst [vmem:[#allocation115_spill] sm:$0xff] %v9012_v15  ;;  %18645 = vst [vmem:[#allocation134_spill] sm:$0xff] %v9015_v4  ;;  %v9031_v62 = vld [vmem:[%s7063_s11 + $0xa68] sm:$0xff]  ;;  %v5841_v30 = vpack.c.bf16 %v5809_v43, %v5809_v43  ;;  %v18650_v21 = vld [vmem:[#allocation50_spill] sm:$0xff] }
 0x163   : > { %5868 = vst.msk [vmem:[%s8679_s1 + $0x284] sm:$0xf] %vm5850_vm0, %v5835_v5  ;;  %5867 = vst.msk [vmem:[%s8679_s1 + $0x260] sm:$0xf] %vm5850_vm0, %v5834_v51  ;;  %v5807_v60 = vmax.f32 %v18650_v21, %v6551_v28  ;;  %v18651_v54 = vld [vmem:[#allocation49_spill] sm:$0xff]  ;;  %v9050_v51 = vld [vmem:[%s7063_s11 + $0xa78] sm:$0xff] }
 0x164   : > { %18646 = vst [vmem:[#allocation125_spill] sm:$0xff] %v9022_v48  ;;  %18647 = vst [vmem:[#allocation89_spill] sm:$0xff] %v9025_v17  ;;  %v5806_v31 = vmax.f32 %v18651_v54, %v6550_v6  ;;  %v9044_v57 = vld [vmem:[%s7063_s11 + $0x890] sm:$0xff]  ;;  %v9053_v47 = vld [vmem:[%s7063_s11 + $0x898] sm:$0xff] }
 0x165   : > { %18648 = vst [vmem:[#allocation116_spill] sm:$0xff] %v9028_v29  ;;  %18649 = vst [vmem:[#allocation135_spill] sm:$0xff] %v9031_v62  ;;  %v9047_v5 = vld [vmem:[%s7063_s11 + $0xa70] sm:$0xff]  ;;  %v9056_v43 = vld [vmem:[%s7063_s11 + $0xa80] sm:$0xff]  ;;  %v5839_v28 = vpack.c.bf16 %v5807_v60, %v5807_v60 }
 0x166   : > { %18652 = vst [vmem:[#allocation38_spill] sm:$0xff] %v9044_v57  ;;  %18653 = vst [vmem:[#allocation37_spill] sm:$0xff] %v9047_v5  ;;  %v9059_v34 = vld [vmem:[%s7063_s11 + $0xa88] sm:$0xff]  ;;  %v5838_v6 = vpack.c.bf16 %v5806_v31, %v5806_v31  ;;  %v9070_v41 = vld [vmem:[%s7063_s11 + $0x8a0] sm:$0xff] }
 0x167   : > { %18654 = vst [vmem:[#allocation40_spill] sm:$0xff] %v9050_v51  ;;  %18655 = vst [vmem:[#allocation39_spill] sm:$0xff] %v9053_v47  ;;  %v9073_v2 = vld [vmem:[%s7063_s11 + $0x8a8] sm:$0xff]  ;;  %v9076_v37 = vld [vmem:[%s7063_s11 + $0xa90] sm:$0xff] }
 0x168   : > { %18656 = vst [vmem:[#allocation42_spill] sm:$0xff] %v9056_v43  ;;  %18657 = vst [vmem:[#allocation41_spill] sm:$0xff] %v9059_v34  ;;  %v9079_v54 = vld [vmem:[%s7063_s11 + $0xa98] sm:$0xff]  ;;  %v18663_v42 = vld [vmem:[#allocation51_spill] sm:$0xff] }
 0x169   : > { %5874 = vst.msk [vmem:[%s8679_s1 + $0x35c] sm:$0xf] %vm5850_vm0, %v5841_v30  ;;  %5873 = vst.msk [vmem:[%s8679_s1 + $0x338] sm:$0xf] %vm5850_vm0, %v5840_v13  ;;  %v6559_v30 = vpop.permute.xlu0 %6558  ;;  %v18662_v13 = vld [vmem:[#allocation52_spill] sm:$0xff]  ;;  %v5812_v52 = vmax.f32 %v18663_v42, %v6565_v18  ;;  %v9088_v10 = vld [vmem:[%s7063_s11 + $0x8b0] sm:$0xff] }
 0x16a   : > { %18658 = vst [vmem:[#allocation44_spill] sm:$0xff] %v9070_v41  ;;  %18659 = vst [vmem:[#allocation43_spill] sm:$0xff] %v9073_v2  ;;  %v5813_v31 = vmax.f32 %v18662_v13, %v6566_v3  ;;  %v9091_v45 = vld [vmem:[%s7063_s11 + $0x8b8] sm:$0xff]  ;;  %v9094_v59 = vld [vmem:[%s7063_s11 + $0xaa0] sm:$0xff]  ;;  %v6561_v16 = vunpack.i.h.bf16 %v6559_v30  ;;  %v6560_v55 = vunpack.i.l.bf16 %v6559_v30  ;;  %v6574_v30 = vpop.permute.xlu1 %6573 }
 0x16b   : > { %18660 = vst [vmem:[#allocation46_spill] sm:$0xff] %v9076_v37  ;;  %18661 = vst [vmem:[#allocation45_spill] sm:$0xff] %v9079_v54  ;;  %v9105_v42 = vld [vmem:[%s7063_s11 + $0x8c0] sm:$0xff]  ;;  %v9108_v18 = vld [vmem:[%s7063_s11 + $0x8c8] sm:$0xff]  ;;  %v5844_v26 = vpack.c.bf16 %v5812_v52, %v5812_v52  ;;  %v6576_v9 = vunpack.i.h.bf16 %v6574_v30  ;;  %v6575_v7 = vunpack.i.l.bf16 %v6574_v30 }
 0x16c   : > { %18664 = vst [vmem:[#allocation48_spill] sm:$0xff] %v9088_v10  ;;  %18665 = vst [vmem:[#allocation47_spill] sm:$0xff] %v9091_v45  ;;  %v9111_v3 = vld [vmem:[%s7063_s11 + $0xaa8] sm:$0xff]  ;;  %v9114_v13 = vld [vmem:[%s7063_s11 + $0xab0] sm:$0xff] }
 0x16d   : > { %18666 = vst [vmem:[#allocation50_spill] sm:$0xff] %v9094_v59  ;;  %5872 = vst.msk [vmem:[%s8679_s1 + $0x314] sm:$0xf] %vm5850_vm0, %v5839_v28  ;;  %v9117_v21 = vld [vmem:[%s7063_s11 + $0xab8] sm:$0xff]  ;;  %v9124_v61 = vld [vmem:[%s7063_s11 + $0x8d0] sm:$0xff]  ;;  %v6569_v49 = vpop.permute.xlu0 %6568 }
 0x16e   : > { %5871 = vst.msk [vmem:[%s8679_s1 + $0x2f0] sm:$0xf] %vm5850_vm0, %v5838_v6  ;;  %18667 = vst [vmem:[#allocation49_spill] sm:$0xff] %v9105_v42  ;;  %v5845_v6 = vpack.c.bf16 %v5813_v31, %v5813_v31  ;;  %v9130_v33 = vld [vmem:[%s7063_s11 + $0xac0] sm:$0xff]  ;;  %v9133_v60 = vld [vmem:[%s7063_s11 + $0xac8] sm:$0xff] }
 0x16f   : > { %18668 = vst [vmem:[#allocation52_spill] sm:$0xff] %v9108_v18  ;;  %18669 = vst [vmem:[#allocation51_spill] sm:$0xff] %v9111_v3  ;;  %v9136_v28 = vld [vmem:[%s7063_s11 + $0xad0] sm:$0xff]  ;;  %v18677_v34 = vld [vmem:[#allocation54_spill] sm:$0xff] }
 0x170   : > { %18670 = vst [vmem:[#allocation138_spill] sm:$0xff] %v9114_v13  ;;  %18671 = vst [vmem:[#allocation139_spill] sm:$0xff] %v9117_v21  ;;  %v5811_v17 = vmax.f32 %v18677_v34, %v6561_v16  ;;  %v18678_v43 = vld [vmem:[#allocation53_spill] sm:$0xff]  ;;  %v9145_v4 = vld [vmem:[%s7063_s11 + $0x8e0] sm:$0xff] }
 0x171   : > { %18672 = vst [vmem:[#allocation140_spill] sm:$0xff] %v9124_v61  ;;  %18674 = vst [vmem:[#allocation142_spill] sm:$0xff] %v9130_v33  ;;  %v5810_v48 = vmax.f32 %v18678_v43, %v6560_v55  ;;  %v9148_v38 = vld [vmem:[%s7063_s11 + $0x8e8] sm:$0xff]  ;;  %v9151_v51 = vld [vmem:[%s7063_s11 + $0xad8] sm:$0xff] }
 0x172   : > { %18675 = vst [vmem:[#allocation143_spill] sm:$0xff] %v9133_v60  ;;  %18676 = vst [vmem:[#allocation144_spill] sm:$0xff] %v9136_v28  ;;  %v9154_v31 = vld [vmem:[%s7063_s11 + $0xae0] sm:$0xff]  ;;  %v9157_v37 = vld [vmem:[%s7063_s11 + $0xae8] sm:$0xff]  ;;  %v5843_v59 = vpack.c.bf16 %v5811_v17, %v5811_v17 }
 0x173   : > { %18679 = vst [vmem:[#allocation54_spill] sm:$0xff] %v9145_v4  ;;  %18680 = vst [vmem:[#allocation53_spill] sm:$0xff] %v9148_v38  ;;  %v9164_v30 = vld [vmem:[%s7063_s11 + $0x8f0] sm:$0xff]  ;;  %v9167_v16 = vld [vmem:[%s7063_s11 + $0x8f8] sm:$0xff]  ;;  %v5842_v54 = vpack.c.bf16 %v5810_v48, %v5810_v48 }
 0x174   : > { %18681 = vst [vmem:[#allocation145_spill] sm:$0xff] %v9151_v51  ;;  %18682 = vst [vmem:[#allocation146_spill] sm:$0xff] %v9154_v31  ;;  %v9170_v55 = vld [vmem:[%s7063_s11 + $0x900] sm:$0xff]  ;;  %v9173_v43 = vld [vmem:[%s7063_s11 + $0x908] sm:$0xff] }
 0x175   : > { %18683 = vst [vmem:[#allocation147_spill] sm:$0xff] %v9157_v37  ;;  %5878 = vst.msk [vmem:[%s8679_s1 + $0x3ec] sm:$0xf] %vm5850_vm0, %v5845_v6  ;;  %v9176_v34 = vld [vmem:[%s7063_s11 + $0xaf0] sm:$0xff]  ;;  %v9179_v52 = vld [vmem:[%s7063_s11 + $0xaf8] sm:$0xff] }
 0x176   : > { %5877 = vst.msk [vmem:[%s8679_s1 + $0x3c8] sm:$0xf] %vm5850_vm0, %v5844_v26  ;;  %18684 = vst [vmem:[#allocation148_spill] sm:$0xff] %v9164_v30  ;;  %v9182_v6 = vld [vmem:[%s7063_s11 + $0xb00] sm:$0xff]  ;;  %v18691_v15 = vld [vmem:[#allocation56_spill] sm:$0xff] }
 0x177   : > { %18685 = vst [vmem:[#allocation149_spill] sm:$0xff] %v9167_v16  ;;  %18686 = vst [vmem:[#allocation150_spill] sm:$0xff] %v9170_v55  ;;  %v5817_v36 = vmax.f32 %v18691_v15, %v6576_v9  ;;  %v18692_v5 = vld [vmem:[#allocation55_spill] sm:$0xff]  ;;  %v9195_v3 = vld [vmem:[%s7063_s11 + $0x910] sm:$0xff]  ;;  %v6571_v9 = vunpack.i.h.bf16 %v6569_v49  ;;  %v6570_v15 = vunpack.i.l.bf16 %v6569_v49 }
 0x178   : > { %18687 = vst [vmem:[#allocation151_spill] sm:$0xff] %v9173_v43  ;;  %18688 = vst [vmem:[#allocation152_spill] sm:$0xff] %v9176_v34  ;;  %v5816_v26 = vmax.f32 %v18692_v5, %v6575_v7  ;;  %v9198_v2 = vld [vmem:[%s7063_s11 + $0x918] sm:$0xff]  ;;  %v9201_v47 = vld [vmem:[%s7063_s11 + $0xb08] sm:$0xff] }
 0x179   : > { %18689 = vst [vmem:[#allocation153_spill] sm:$0xff] %v9179_v52  ;;  %18690 = vst [vmem:[#allocation154_spill] sm:$0xff] %v9182_v6  ;;  %v9204_v13 = vld [vmem:[%s7063_s11 + $0xb10] sm:$0xff]  ;;  %v9207_v57 = vld [vmem:[%s7063_s11 + $0xb18] sm:$0xff]  ;;  %v5849_v20 = vpack.c.bf16 %v5817_v36, %v5817_v36 }
 0x17a   : > { %18693 = vst [vmem:[#allocation56_spill] sm:$0xff] %v9195_v3  ;;  %18694 = vst [vmem:[#allocation55_spill] sm:$0xff] %v9198_v2  ;;  %v9210_v7 = vld [vmem:[%s7063_s11 + $0x920] sm:$0xff]  ;;  %v9213_v48 = vld [vmem:[%s7063_s11 + $0x928] sm:$0xff]  ;;  %v5848_v25 = vpack.c.bf16 %v5816_v26, %v5816_v26 }
 0x17b   : > { %18695 = vst [vmem:[#allocation155_spill] sm:$0xff] %v9201_v47  ;;  %18696 = vst [vmem:[#allocation156_spill] sm:$0xff] %v9204_v13  ;;  %v9216_v17 = vld [vmem:[%s7063_s11 + $0x930] sm:$0xff]  ;;  %v9219_v5 = vld [vmem:[%s7063_s11 + $0x938] sm:$0xff] }
 0x17c   : > { %18697 = vst [vmem:[#allocation157_spill] sm:$0xff] %v9207_v57  ;;  %v9222_v21 = vld [vmem:[%s7063_s11 + $0xb20] sm:$0xff]  ;;  %v9225_v45 = vld [vmem:[%s7063_s11 + $0xb28] sm:$0xff]  ;;  %v9228_v10 = vld [vmem:[%s7063_s11 + $0xb30] sm:$0xff] }
 0x17d   : > { %v9231_v49 = vld [vmem:[%s7063_s11 + $0xb38] sm:$0xff]  ;;  %5876 = vst.msk [vmem:[%s8679_s1 + $0x3a4] sm:$0xf] %vm5850_vm0, %v5843_v59  ;;  %5875 = vst.msk [vmem:[%s8679_s1 + $0x380] sm:$0xf] %vm5850_vm0, %v5842_v54  ;;  %v9242_v62 = vld [vmem:[%s7063_s11 + $0x940] sm:$0xff]  ;;  %v1119_v57 = vmax.f32 %v9213_v48, %v9225_v45  ;;  %v1120_v2 = vmax.f32 %v9216_v17, %v9228_v10 }
 0x17e   : > { %v9245_v40 = vld [vmem:[%s7063_s11 + $0x948] sm:$0xff]  ;;  %v9248_v41 = vld [vmem:[%s7063_s11 + $0x950] sm:$0xff]  ;;  %v9251_v46 = vld [vmem:[%s7063_s11 + $0x958] sm:$0xff]  ;;  %5882 = vst.msk [vmem:[%s8679_s1 + $0x47c] sm:$0xf] %vm5850_vm0, %v5849_v20  ;;  %v1121_v3 = vmax.f32 %v9219_v5, %v9231_v49 }
 0x17f   : > { %v9254_v36 = vld [vmem:[%s7063_s11 + $0xb40] sm:$0xff]  ;;  %v9257_v26 = vld [vmem:[%s7063_s11 + $0xb48] sm:$0xff]  ;;  %v9260_v59 = vld [vmem:[%s7063_s11 + $0xb50] sm:$0xff]  ;;  %5881 = vst.msk [vmem:[%s8679_s1 + $0x458] sm:$0xf] %vm5850_vm0, %v5848_v25 }
 0x180   : > { %v18698_v18 = vld [vmem:[#allocation58_spill] sm:$0xff]  ;;  %v18699_v42 = vld [vmem:[#allocation57_spill] sm:$0xff]  ;;  %v9269_v32 = vld [vmem:[%s7063_s11 + $0x960] sm:$0xff]  ;;  %v1122_v17 = vmax.f32 %v9242_v62, %v9254_v36 }
 0x181   : > { %v5815_v33 = vmax.f32 %v18698_v18, %v6571_v9  ;;  %v5814_v8 = vmax.f32 %v18699_v42, %v6570_v15  ;;  %v9272_v29 = vld [vmem:[%s7063_s11 + $0x968] sm:$0xff]  ;;  %v9275_v11 = vld [vmem:[%s7063_s11 + $0x970] sm:$0xff]  ;;  %v9278_v54 = vld [vmem:[%s7063_s11 + $0x978] sm:$0xff] }
 0x182   : > { %v9281_v28 = vld [vmem:[%s7063_s11 + $0xb58] sm:$0xff]  ;;  %v9284_v60 = vld [vmem:[%s7063_s11 + $0xb60] sm:$0xff]  ;;  %v9287_v51 = vld [vmem:[%s7063_s11 + $0xb68] sm:$0xff] }
 0x183   : > { %v9298_v9 = vld [vmem:[%s7063_s11 + $0x980] sm:$0xff]  ;;  %v9301_v15 = vld [vmem:[%s7063_s11 + $0x988] sm:$0xff]  ;;  %v9304_v53 = vld [vmem:[%s7063_s11 + $0x990] sm:$0xff]  ;;  %v5847_v4 = vpack.c.bf16 %v5815_v33, %v5815_v33  ;;  %v5846_v58 = vpack.c.bf16 %v5814_v8, %v5814_v8  ;;  %v1118_v8 = vmax.f32 %v9210_v7, %v9222_v21  ;;  %v1125_v5 = vmax.f32 %v9251_v46, %v9281_v28 }
 0x184   : > { %v9307_v42 = vld [vmem:[%s7063_s11 + $0x998] sm:$0xff]  ;;  %v9310_v18 = vld [vmem:[%s7063_s11 + $0xb70] sm:$0xff]  ;;  %v9316_v20 = vld [vmem:[%s7063_s11 + $0xb80] sm:$0xff]  ;;  %v1126_v23 = vmax.f32 %v9269_v32, %v9284_v60  ;;  %v1127_v1 = vmax.f32 %v9272_v29, %v9287_v51 }
 0x185   : > { %v9313_v61 = vld [vmem:[%s7063_s11 + $0xb78] sm:$0xff]  ;;  %v9327_v56 = vld [vmem:[%s7063_s11 + $0x9a0] sm:$0xff]  ;;  %v9330_v25 = vld [vmem:[%s7063_s11 + $0x9a8] sm:$0xff]  ;;  %5880 = vst.msk [vmem:[%s8679_s1 + $0x434] sm:$0xf] %vm5850_vm0, %v5847_v4  ;;  %v1123_v4 = vmax.f32 %v9245_v40, %v9257_v26  ;;  %v1128_v62 = vmax.f32 %v9275_v11, %v9310_v18  ;;  %v1130_v46 = vmax.f32 %v9298_v9, %v9316_v20 }
 0x186   : > { %v9333_v34 = vld [vmem:[%s7063_s11 + $0x9b0] sm:$0xff]  ;;  %v9336_v37 = vld [vmem:[%s7063_s11 + $0x9b8] sm:$0xff]  ;;  %v9339_v52 = vld [vmem:[%s7063_s11 + $0xb88] sm:$0xff]  ;;  %5879 = vst.msk [vmem:[%s8679_s1 + $0x410] sm:$0xf] %vm5850_vm0, %v5846_v58  ;;  %v1124_v58 = vmax.f32 %v9248_v41, %v9260_v59  ;;  %v1129_v40 = vmax.f32 %v9278_v54, %v9313_v61 }
 0x187   : > { %v9342_v38 = vld [vmem:[%s7063_s11 + $0xb90] sm:$0xff]  ;;  %v9345_v31 = vld [vmem:[%s7063_s11 + $0xb98] sm:$0xff]  ;;  %v9352_v47 = vld [vmem:[%s7063_s11 + $0x9c0] sm:$0xff]  ;;  %v1131_v28 = vmax.f32 %v9301_v15, %v9339_v52 }
 0x188   : > { %v9355_v43 = vld [vmem:[%s7063_s11 + $0x9c8] sm:$0xff]  ;;  %v9358_v6 = vld [vmem:[%s7063_s11 + $0x9d0] sm:$0xff]  ;;  %v9361_v55 = vld [vmem:[%s7063_s11 + $0x9d8] sm:$0xff]  ;;  %v1132_v32 = vmax.f32 %v9304_v53, %v9342_v38  ;;  %v1133_v29 = vmax.f32 %v9307_v42, %v9345_v31 }
 0x189   : > { %v9364_v16 = vld [vmem:[%s7063_s11 + $0xba0] sm:$0xff]  ;;  %v9367_v33 = vld [vmem:[%s7063_s11 + $0xba8] sm:$0xff]  ;;  %v9370_v13 = vld [vmem:[%s7063_s11 + $0xbb0] sm:$0xff] }
 0x18a   : > { %v9385_v30 = vld [vmem:[%s7063_s11 + $0x9e0] sm:$0xff]  ;;  %v9388_v19 = vld [vmem:[%s7063_s11 + $0x9e8] sm:$0xff]  ;;  %v9391_v21 = vld [vmem:[%s7063_s11 + $0x9f0] sm:$0xff]  ;;  %v1134_v11 = vmax.f32 %v9327_v56, %v9364_v16  ;;  %v1135_v61 = vmax.f32 %v9330_v25, %v9367_v33  ;;  %v1136_v51 = vmax.f32 %v9333_v34, %v9370_v13  ;;  %v18700_v13 = vmax.f32 %v8914_v14, %v8958_v12 }
 0x18b   : > { %v9394_v45 = vld [vmem:[%s7063_s11 + $0x9f8] sm:$0xff]  ;;  %v818_v7 = vld [vmem:[%s7063_s11 + $0xbc0] sm:$0xff]  ;;  %v819_v48 = vld [vmem:[%s7063_s11 + $0xbc8] sm:$0xff] }
 0x18c   : > { %v817_v10 = vld [vmem:[%s7063_s11 + $0xbb8] sm:$0xff]  ;;  %v820_v49 = vld [vmem:[%s7063_s11 + $0xbd0] sm:$0xff]  ;;  %v822_v50 = vld [vmem:[%s7063_s11 + $0xbe0] sm:$0xff]  ;;  %v1138_v59 = vmax.f32 %v9352_v47, %v818_v7  ;;  %v1139_v52 = vmax.f32 %v9355_v43, %v819_v48  ;;  %v18703_v43 = vmax.f32 %v8917_v0, %v8975_v24 }
 0x18d   : > { %v821_v39 = vld [vmem:[%s7063_s11 + $0xbd8] sm:$0xff]  ;;  %v823_v36 = vld [vmem:[%s7063_s11 + $0xbe8] sm:$0xff]  ;;  %v824_v41 = vld [vmem:[%s7063_s11 + $0xbf0] sm:$0xff]  ;;  %v1137_v60 = vmax.f32 %v9336_v37, %v817_v10  ;;  %v1140_v53 = vmax.f32 %v9358_v6, %v820_v49  ;;  %v1142_v31 = vmax.f32 %v9385_v30, %v822_v50  ;;  %v18701_v37 = vmax.f32 %v8902_v27, %v8940_v44 }
 0x18e   : > { %v825_v26 = vld [vmem:[%s7063_s11 + $0xbf8] sm:$0xff]  ;;  %v1141_v38 = vmax.f32 %v9361_v55, %v821_v39  ;;  %v1143_v56 = vmax.f32 %v9388_v19, %v823_v36  ;;  %v1144_v16 = vmax.f32 %v9391_v21, %v824_v41  ;;  %v18704_v39 = vmax.f32 %v8905_v35, %v8943_v22  ;;  %v18706_v19 = vld [vmem:[#allocation36_spill] sm:$0xff]  ;;  %v18712_v14 = vld [vmem:[#allocation119_spill] sm:$0xff] }
 0x18f   : > { %v1145_v54 = vmax.f32 %v9394_v45, %v825_v26  ;;  %v9450_v47 = vmax.f32 %v18701_v37, %v18700_v13  ;;  %v18707_v30 = vmax.f32 %v8928_v63, %v18706_v19  ;;  %v18708_v55 = vld [vmem:[#allocation128_spill] sm:$0xff]  ;;  %v18709_v34 = vld [vmem:[#allocation122_spill] sm:$0xff]  ;;  %v18713_v44 = vld [vmem:[#allocation35_spill] sm:$0xff] }
 0x190   : > { %v9458_v50 = vmax.f32 %v18704_v39, %v18703_v43  ;;  %v18710_v6 = vmax.f32 %v18708_v55, %v18709_v34  ;;  %v18714_v27 = vmax.f32 %v18712_v14, %v18713_v44  ;;  %v18715_v42 = vld [vmem:[#allocation108_spill] sm:$0xff]  ;;  %v18716_v18 = vld [vmem:[#allocation127_spill] sm:$0xff]  ;;  %v18723_v20 = vld [vmem:[#allocation121_spill] sm:$0xff] }
 0x191   : > { %18702 = vst [vmem:[#allocation58_spill] sm:$0xff] %v9450_v47  ;;  %v18717_v9 = vmax.f32 %v18715_v42, %v18716_v18  ;;  %v18719_v24 = vld [vmem:[#allocation120_spill] sm:$0xff]  ;;  %v18722_v15 = vld [vmem:[#allocation131_spill] sm:$0xff]  ;;  %v18726_v33 = vld [vmem:[#allocation129_spill] sm:$0xff] }
 0x192   : > { %18705 = vst [vmem:[#allocation57_spill] sm:$0xff] %v9458_v50  ;;  %v9466_v12 = vmax.f32 %v18710_v6, %v18707_v30  ;;  %v18720_v35 = vld [vmem:[#allocation116_spill] sm:$0xff]  ;;  %v18724_v25 = vmax.f32 %v18722_v15, %v18723_v20  ;;  %v18727_v21 = vld [vmem:[#allocation135_spill] sm:$0xff]  ;;  %v18734_v41 = vld [vmem:[#allocation37_spill] sm:$0xff] }
 0x193   : > { %v9474_v0 = vmax.f32 %v18717_v9, %v18714_v27  ;;  %v18721_v22 = vmax.f32 %v18719_v24, %v18720_v35  ;;  %v18728_v45 = vmax.f32 %v18726_v33, %v18727_v21  ;;  %v18729_v10 = vld [vmem:[#allocation112_spill] sm:$0xff]  ;;  %v18733_v36 = vld [vmem:[#allocation123_spill] sm:$0xff]  ;;  %v18743_v34 = vld [vmem:[#allocation126_spill] sm:$0xff] }
 0x194   : > { %18711 = vst [vmem:[#allocation36_spill] sm:$0xff] %v9466_v12  ;;  %v18730_v7 = vld [vmem:[#allocation96_spill] sm:$0xff]  ;;  %v18735_v26 = vmax.f32 %v18733_v36, %v18734_v41  ;;  %v18737_v37 = vld [vmem:[#allocation115_spill] sm:$0xff]  ;;  %v18744_v6 = vld [vmem:[#allocation134_spill] sm:$0xff] }
 0x195   : > { %18718 = vst [vmem:[#allocation128_spill] sm:$0xff] %v9474_v0  ;;  %v9482_v63 = vmax.f32 %v18724_v25, %v18721_v22  ;;  %v18731_v48 = vmax.f32 %v18729_v10, %v18730_v7  ;;  %v18736_v13 = vld [vmem:[#allocation104_spill] sm:$0xff]  ;;  %v18745_v14 = vmax.f32 %v18743_v34, %v18744_v6  ;;  %v18748_v42 = vld [vmem:[#allocation50_spill] sm:$0xff]  ;;  %v18750_v9 = vld [vmem:[#allocation125_spill] sm:$0xff] }
 0x196   : > { %v18738_v43 = vmax.f32 %v18736_v13, %v18737_v37  ;;  %v18740_v19 = vld [vmem:[#allocation136_spill] sm:$0xff]  ;;  %v18751_v24 = vld [vmem:[#allocation42_spill] sm:$0xff]  ;;  %v18754_v15 = vld [vmem:[#allocation43_spill] sm:$0xff] }
 0x197   : > { %18725 = vst [vmem:[#allocation122_spill] sm:$0xff] %v9482_v63  ;;  %v9490_v49 = vmax.f32 %v18731_v48, %v18728_v45  ;;  %v18741_v30 = vld [vmem:[#allocation40_spill] sm:$0xff]  ;;  %v18752_v35 = vmax.f32 %v18750_v9, %v18751_v24  ;;  %v18755_v20 = vld [vmem:[#allocation51_spill] sm:$0xff]  ;;  %v18757_v33 = vld [vmem:[#allocation89_spill] sm:$0xff] }
 0x198   : > { %v9498_v39 = vmax.f32 %v18738_v43, %v18735_v26  ;;  %v18742_v55 = vmax.f32 %v18740_v19, %v18741_v30  ;;  %v18747_v27 = vld [vmem:[#allocation44_spill] sm:$0xff]  ;;  %v18756_v25 = vmax.f32 %v18754_v15, %v18755_v20  ;;  %v18758_v21 = vld [vmem:[#allocation41_spill] sm:$0xff]  ;;  %v18762_v48 = vld [vmem:[#allocation138_spill] sm:$0xff] }
 0x199   : > { %18732 = vst [vmem:[#allocation119_spill] sm:$0xff] %v9490_v49  ;;  %v18749_v18 = vmax.f32 %v18747_v27, %v18748_v42  ;;  %v18759_v45 = vmax.f32 %v18757_v33, %v18758_v21  ;;  %v18761_v7 = vld [vmem:[#allocation48_spill] sm:$0xff]  ;;  %v18764_v41 = vld [vmem:[#allocation38_spill] sm:$0xff]  ;;  %v18768_v43 = vld [vmem:[#allocation47_spill] sm:$0xff] }
 0x19a   : > { %18739 = vst [vmem:[#allocation35_spill] sm:$0xff] %v9498_v39  ;;  %v9506_v44 = vmax.f32 %v18745_v14, %v18742_v55  ;;  %v18763_v36 = vmax.f32 %v18761_v7, %v18762_v48  ;;  %v18765_v26 = vld [vmem:[#allocation46_spill] sm:$0xff]  ;;  %v18769_v19 = vld [vmem:[#allocation139_spill] sm:$0xff]  ;;  %v18772_v34 = vld [vmem:[#allocation45_spill] sm:$0xff] }
 0x19b   : > { %v9514_v22 = vmax.f32 %v18752_v35, %v18749_v18  ;;  %v9522_v10 = vmax.f32 %v18759_v45, %v18756_v25  ;;  %v18766_v13 = vmax.f32 %v18764_v41, %v18765_v26  ;;  %v18770_v30 = vmax.f32 %v18768_v43, %v18769_v19  ;;  %v18771_v55 = vld [vmem:[#allocation39_spill] sm:$0xff]  ;;  %v18775_v27 = vld [vmem:[#allocation54_spill] sm:$0xff]  ;;  %v18778_v9 = vld [vmem:[#allocation49_spill] sm:$0xff] }
 0x19c   : > { %18746 = vst [vmem:[#allocation108_spill] sm:$0xff] %v9506_v44  ;;  %v18773_v6 = vmax.f32 %v18771_v55, %v18772_v34  ;;  %v18776_v42 = vld [vmem:[#allocation146_spill] sm:$0xff]  ;;  %v18782_v20 = vld [vmem:[#allocation53_spill] sm:$0xff]  ;;  %v18783_v25 = vld [vmem:[#allocation147_spill] sm:$0xff] }
 0x19d   : > { %18753 = vst [vmem:[#allocation127_spill] sm:$0xff] %v9514_v22  ;;  %18760 = vst [vmem:[#allocation120_spill] sm:$0xff] %v9522_v10  ;;  %v9530_v37 = vmax.f32 %v18766_v13, %v18763_v36  ;;  %v18777_v18 = vmax.f32 %v18775_v27, %v18776_v42  ;;  %v18779_v24 = vld [vmem:[#allocation142_spill] sm:$0xff]  ;;  %v18784_v33 = vmax.f32 %v18782_v20, %v18783_v25  ;;  %v18785_v21 = vld [vmem:[#allocation52_spill] sm:$0xff] }
 0x19e   : > { %v9538_v14 = vmax.f32 %v18773_v6, %v18770_v30  ;;  %v18780_v35 = vmax.f32 %v18778_v9, %v18779_v24  ;;  %v18786_v45 = vld [vmem:[#allocation143_spill] sm:$0xff]  ;;  %v18789_v36 = vld [vmem:[#allocation148_spill] sm:$0xff]  ;;  %v18796_v55 = vld [vmem:[#allocation149_spill] sm:$0xff] }
 0x19f   : > { %18767 = vst [vmem:[#allocation116_spill] sm:$0xff] %v9530_v37  ;;  %v18787_v7 = vmax.f32 %v18785_v21, %v18786_v45  ;;  %v18790_v41 = vld [vmem:[#allocation152_spill] sm:$0xff]  ;;  %v18797_v34 = vld [vmem:[#allocation153_spill] sm:$0xff]  ;;  %v18803_v24 = vld [vmem:[#allocation150_spill] sm:$0xff] }
 0x1a0   : > { %18774 = vst [vmem:[#allocation131_spill] sm:$0xff] %v9538_v14  ;;  %v9546_v15 = vmax.f32 %v18780_v35, %v18777_v18  ;;  %v18791_v26 = vmax.f32 %v18789_v36, %v18790_v41  ;;  %v18792_v13 = vld [vmem:[#allocation140_spill] sm:$0xff]  ;;  %v18798_v6 = vmax.f32 %v18796_v55, %v18797_v34  ;;  %v18799_v27 = vld [vmem:[#allocation141_spill] sm:$0xff]  ;;  %v18804_v35 = vld [vmem:[#allocation154_spill] sm:$0xff] }
 0x1a1   : > { %v9554_v48 = vmax.f32 %v18787_v7, %v18784_v33  ;;  %v18793_v43 = vld [vmem:[#allocation144_spill] sm:$0xff]  ;;  %v18800_v42 = vld [vmem:[#allocation145_spill] sm:$0xff]  ;;  %v18805_v20 = vmax.f32 %v18803_v24, %v18804_v35  ;;  %v18807_v33 = vld [vmem:[#allocation151_spill] sm:$0xff]  ;;  %v9604_v24 = vmax.f32 %v1132_v32, %v1136_v51  ;;  %v9608_v35 = vmax.f32 %v1138_v59, %v1142_v31 }
 0x1a2   : > { %18781 = vst [vmem:[#allocation121_spill] sm:$0xff] %v9546_v15  ;;  %v18794_v19 = vmax.f32 %v18792_v13, %v18793_v43  ;;  %v18801_v18 = vmax.f32 %v18799_v27, %v18800_v42  ;;  %v18808_v21 = vld [vmem:[#allocation155_spill] sm:$0xff]  ;;  %v18811_v36 = vld [vmem:[#allocation56_spill] sm:$0xff]  ;;  %v9594_v27 = vmax.f32 %v1123_v4, %v1127_v1  ;;  %v9598_v42 = vmax.f32 %v1125_v5, %v1129_v40  ;;  %v9655_v32 = vld [vmem:[%s7063_s11 + $0xc10] sm:$0xff] }
 0x1a3   : > { %18788 = vst [vmem:[#allocation129_spill] sm:$0xff] %v9554_v48  ;;  %v9575_v25 = vmax.f32 %v18805_v20, %v1118_v8  ;;  %v18809_v45 = vmax.f32 %v18807_v33, %v18808_v21  ;;  %v18812_v41 = vld [vmem:[#allocation156_spill] sm:$0xff]  ;;  %v18815_v43 = vld [vmem:[#allocation55_spill] sm:$0xff]  ;;  %v9596_v8 = vmax.f32 %v1124_v58, %v1128_v62  ;;  %18825 = vst [vmem:[#allocation50_spill] sm:$0xff] %v9604_v24 }
 0x1a4   : > { %v9562_v30 = vmax.f32 %v18794_v19, %v18791_v26  ;;  %v9570_v9 = vmax.f32 %v18801_v18, %v18798_v6  ;;  %v18813_v26 = vmax.f32 %v18811_v36, %v18812_v41  ;;  %v18816_v19 = vld [vmem:[#allocation157_spill] sm:$0xff]  ;;  %v9592_v6 = vmax.f32 %v1122_v17, %v1126_v23  ;;  %18820 = vst [vmem:[#allocation136_spill] sm:$0xff] %v9594_v27  ;;  %v9649_v41 = vld [vmem:[%s7063_s11 + $0xc00] sm:$0xff]  ;;  %v9652_v59 = vld [vmem:[%s7063_s11 + $0xc08] sm:$0xff] }
 0x1a5   : > { %18806 = vst [vmem:[#allocation96_spill] sm:$0xff] %v9575_v25  ;;  %v9580_v7 = vmax.f32 %v18809_v45, %v1119_v57  ;;  %v18817_v55 = vmax.f32 %v18815_v43, %v18816_v19  ;;  %18821 = vst [vmem:[#allocation40_spill] sm:$0xff] %v9596_v8  ;;  %v9600_v57 = vmax.f32 %v1130_v46, %v1134_v11  ;;  %v9666_v21 = vld [vmem:[%s7063_s11 + $0xc18] sm:$0xff]  ;;  %v9669_v45 = vld [vmem:[%s7063_s11 + $0xc20] sm:$0xff] }
 0x1a6   : > { %18795 = vst [vmem:[#allocation135_spill] sm:$0xff] %v9562_v30  ;;  %18802 = vst [vmem:[#allocation112_spill] sm:$0xff] %v9570_v9  ;;  %v9585_v13 = vmax.f32 %v18813_v26, %v1120_v2  ;;  %v9602_v18 = vmax.f32 %v1131_v28, %v1135_v61  ;;  %v9606_v2 = vmax.f32 %v1133_v29, %v1137_v60  ;;  %v9672_v20 = vld [vmem:[%s7063_s11 + $0xc28] sm:$0xff]  ;;  %v9683_v0 = vld [vmem:[%s7063_s11 + $0xc30] sm:$0xff] }
 0x1a7   : > { %18810 = vst [vmem:[#allocation123_spill] sm:$0xff] %v9580_v7  ;;  %v9590_v34 = vmax.f32 %v18817_v55, %v1121_v3  ;;  %18819 = vst [vmem:[#allocation115_spill] sm:$0xff] %v9592_v6  ;;  %v9610_v3 = vmax.f32 %v1139_v52, %v1143_v56  ;;  %v9612_v23 = vmax.f32 %v1140_v53, %v1144_v16  ;;  %v9686_v50 = vld [vmem:[%s7063_s11 + $0xc38] sm:$0xff]  ;;  %v9689_v12 = vld [vmem:[%s7063_s11 + $0xc40] sm:$0xff] }
 0x1a8   : > { %18814 = vst [vmem:[#allocation37_spill] sm:$0xff] %v9585_v13  ;;  %18822 = vst [vmem:[#allocation126_spill] sm:$0xff] %v9598_v42  ;;  %v9614_v1 = vmax.f32 %v1141_v38, %v1145_v54  ;;  %v9700_v14 = vld [vmem:[%s7063_s11 + $0xc48] sm:$0xff]  ;;  %v9703_v10 = vld [vmem:[%s7063_s11 + $0xc50] sm:$0xff] }
 0x1a9   : > { %18818 = vst [vmem:[#allocation104_spill] sm:$0xff] %v9590_v34  ;;  %18823 = vst [vmem:[#allocation134_spill] sm:$0xff] %v9600_v57  ;;  %v9706_v37 = vld [vmem:[%s7063_s11 + $0xc58] sm:$0xff]  ;;  %v9717_v34 = vld [vmem:[%s7063_s11 + $0xc60] sm:$0xff] }
 0x1aa   : > { %18824 = vst [vmem:[#allocation44_spill] sm:$0xff] %v9602_v18  ;;  %18826 = vst [vmem:[#allocation125_spill] sm:$0xff] %v9606_v2  ;;  %v9720_v7 = vld [vmem:[%s7063_s11 + $0xc68] sm:$0xff]  ;;  %v9723_v13 = vld [vmem:[%s7063_s11 + $0xc70] sm:$0xff] }
 0x1ab   : > { %18827 = vst [vmem:[#allocation42_spill] sm:$0xff] %v9608_v35  ;;  %18828 = vst [vmem:[#allocation43_spill] sm:$0xff] %v9610_v3  ;;  %v890_v31 = vld [vmem:[%s7063_s11 + $0xe00] sm:$0xff]  ;;  %v891_v8 = vld [vmem:[%s7063_s11 + $0xe08] sm:$0xff] }
 0x1ac   : > { %18829 = vst [vmem:[#allocation51_spill] sm:$0xff] %v9612_v23  ;;  %18830 = vst [vmem:[#allocation89_spill] sm:$0xff] %v9614_v1  ;;  %v9728_v6 = vld [vmem:[%s7063_s11 + $0xe10] sm:$0xff]  ;;  %v18867_v36 = vld [vmem:[#allocation132_spill] sm:$0xff] }
 0x1ad   : > { %v18868_v2 = vld [vmem:[#allocation59_spill] sm:$0xff]  ;;  %v18870_v24 = vld [vmem:[#allocation133_spill] sm:$0xff]  ;;  %v18871_v57 = vld [vmem:[#allocation60_spill] sm:$0xff] }
 0x1ae   : > { %v18869_v18 = vmax.f32 %v18867_v36, %v18868_v2  ;;  %v18872_v42 = vmax.f32 %v18870_v24, %v18871_v57  ;;  %v18873_v25 = vld [vmem:[#allocation63_spill] sm:$0xff]  ;;  %v18874_v9 = vld [vmem:[#allocation61_spill] sm:$0xff]  ;;  %v18877_v15 = vld [vmem:[#allocation62_spill] sm:$0xff] }
 0x1af   : > { %v18875_v48 = vmax.f32 %v18873_v25, %v18874_v9  ;;  %v18876_v30 = vld [vmem:[#allocation67_spill] sm:$0xff]  ;;  %v9747_v23 = vld [vmem:[%s7063_s11 + $0xc78] sm:$0xff]  ;;  %v9753_v1 = vld [vmem:[%s7063_s11 + $0xc88] sm:$0xff]  ;;  %v1146_v9 = vmax.f32 %v9649_v41, %v890_v31 }
 0x1b0   : > { %v6261_v27 = vpack.c.bf16 %v18872_v42, %v18869_v18  ;;  %v18878_v22 = vmax.f32 %v18876_v30, %v18877_v15  ;;  %v9750_v40 = vld [vmem:[%s7063_s11 + $0xc80] sm:$0xff]  ;;  %v9756_v2 = vld [vmem:[%s7063_s11 + $0xe18] sm:$0xff]  ;;  %v895_v42 = vld [vmem:[%s7063_s11 + $0xe28] sm:$0xff]  ;;  %v1147_v15 = vmax.f32 %v9652_v59, %v891_v8 }
 0x1b1   : > { %v894_v57 = vld [vmem:[%s7063_s11 + $0xe20] sm:$0xff]  ;;  %v18880_v30 = vld [vmem:[#allocation64_spill] sm:$0xff]  ;;  %v9771_v35 = vld [vmem:[%s7063_s11 + $0xc90] sm:$0xff] }
 0x1b2   : > { %v6262_v43 = vpack.c.bf16 %v18878_v22, %v18875_v48  ;;  %v1148_v22 = vmax.f32 %v9655_v32, %v9728_v6  ;;  %v18879_v48 = vld [vmem:[#allocation72_spill] sm:$0xff]  ;;  %v9774_v31 = vld [vmem:[%s7063_s11 + $0xc98] sm:$0xff]  ;;  %v9777_v8 = vld [vmem:[%s7063_s11 + $0xca0] sm:$0xff]  ;;  %v1149_v32 = vmax.f32 %v9666_v21, %v9756_v2  ;;  %1658 = vst [vmem:[%s8679_s1] sm:$0xff] %v6261_v27 }
 0x1b3   : > { %v18881_v25 = vmax.f32 %v18879_v48, %v18880_v30  ;;  %v18882_v18 = vld [vmem:[#allocation76_spill] sm:$0xff]  ;;  %v896_v59 = vld [vmem:[%s7063_s11 + $0xe30] sm:$0xff]  ;;  %v897_v41 = vld [vmem:[%s7063_s11 + $0xe38] sm:$0xff]  ;;  %v1150_v48 = vmax.f32 %v9669_v45, %v894_v57  ;;  %v1151_v30 = vmax.f32 %v9672_v20, %v895_v42 }
 0x1b4   : > { %v18883_v24 = vld [vmem:[#allocation68_spill] sm:$0xff]  ;;  %v9782_v6 = vld [vmem:[%s7063_s11 + $0xe40] sm:$0xff]  ;;  %v18889_v44 = vld [vmem:[#allocation69_spill] sm:$0xff]  ;;  %1659 = vst [vmem:[%s8679_s1 + $0x24] sm:$0xff] %v6262_v43 }
 0x1b5   : > { %v18884_v36 = vmax.f32 %v18882_v18, %v18883_v24  ;;  %v18886_v18 = vld [vmem:[#allocation65_spill] sm:$0xff]  ;;  %v9797_v21 = vld [vmem:[%s7063_s11 + $0xca8] sm:$0xff]  ;;  %v9803_v2 = vld [vmem:[%s7063_s11 + $0xcb8] sm:$0xff]  ;;  %v1154_v27 = vmax.f32 %v9689_v12, %v9782_v6 }
 0x1b6   : > { %v9800_v45 = vld [vmem:[%s7063_s11 + $0xcb0] sm:$0xff]  ;;  %v9806_v20 = vld [vmem:[%s7063_s11 + $0xe48] sm:$0xff]  ;;  %v9812_v42 = vld [vmem:[%s7063_s11 + $0xe58] sm:$0xff] }
 0x1b7   : > { %v6263_v3 = vpack.c.bf16 %v18884_v36, %v18881_v25  ;;  %v18885_v25 = vld [vmem:[#allocation73_spill] sm:$0xff]  ;;  %v18891_v43 = vld [vmem:[#allocation74_spill] sm:$0xff]  ;;  %v9826_v16 = vld [vmem:[%s7063_s11 + $0xcc0] sm:$0xff]  ;;  %v1155_v6 = vmax.f32 %v9700_v14, %v9806_v20 }
 0x1b8   : > { %v18887_v24 = vmax.f32 %v18885_v25, %v18886_v18  ;;  %v18888_v36 = vld [vmem:[#allocation77_spill] sm:$0xff]  ;;  %v18892_v25 = vld [vmem:[#allocation66_spill] sm:$0xff]  ;;  %v903_v12 = vld [vmem:[%s7063_s11 + $0xe68] sm:$0xff] }
 0x1b9   : > { %v18890_v49 = vmax.f32 %v18888_v36, %v18889_v44  ;;  %v9809_v57 = vld [vmem:[%s7063_s11 + $0xe50] sm:$0xff]  ;;  %v1153_v44 = vmax.f32 %v9686_v50, %v897_v41  ;;  %v18893_v18 = vmax.f32 %v18891_v43, %v18892_v25  ;;  %v18895_v36 = vld [vmem:[#allocation70_spill] sm:$0xff]  ;;  %1660 = vst [vmem:[%s8679_s1 + $0x48] sm:$0xff] %v6263_v3  ;;  %v9845_v43 = vmax.f32 %v1146_v9, %v1150_v48  ;;  %v9855_v14 = vld [vmem:[%s7063_s11 + $0xce8] sm:$0xff] }
 0x1ba   : > { %v9832_v50 = vld [vmem:[%s7063_s11 + $0xcd0] sm:$0xff]  ;;  %v9849_v25 = vld [vmem:[%s7063_s11 + $0xcd8] sm:$0xff]  ;;  %v9870_v3 = vmax.f32 %v1147_v15, %v1151_v30  ;;  %v9880_v61 = vld [vmem:[%s7063_s11 + $0xd00] sm:$0xff]  ;;  %v18905_v11 = vmax.f32 %v9703_v10, %v9809_v57 }
 0x1bb   : > { %v6264_v39 = vpack.c.bf16 %v18890_v49, %v18887_v24  ;;  %v1152_v49 = vmax.f32 %v9683_v0, %v896_v59  ;;  %v18894_v24 = vld [vmem:[#allocation78_spill] sm:$0xff]  ;;  %v9829_v0 = vld [vmem:[%s7063_s11 + $0xcc8] sm:$0xff]  ;;  %v902_v59 = vld [vmem:[%s7063_s11 + $0xe60] sm:$0xff]  ;;  %18897 = vst [vmem:[#allocation41_spill] sm:$0xff] %v9845_v43 }
 0x1bc   : > { %v18896_v63 = vmax.f32 %v18894_v24, %v18895_v36  ;;  %v9837_v41 = vld [vmem:[%s7063_s11 + $0xe70] sm:$0xff]  ;;  %v9858_v20 = vld [vmem:[%s7063_s11 + $0xe78] sm:$0xff]  ;;  %v9861_v24 = vld [vmem:[%s7063_s11 + $0xe80] sm:$0xff]  ;;  %v1158_v9 = vmax.f32 %v9717_v34, %v902_v59  ;;  %18898 = vst [vmem:[#allocation48_spill] sm:$0xff] %v9870_v3 }
 0x1bd   : > { %1661 = vst [vmem:[%s8679_s1 + $0x6c] sm:$0xff] %v6264_v39  ;;  %v9864_v36 = vld [vmem:[%s7063_s11 + $0xe88] sm:$0xff]  ;;  %v1159_v39 = vmax.f32 %v9720_v7, %v903_v12  ;;  %v1160_v48 = vmax.f32 %v9723_v13, %v9837_v41  ;;  %v9877_v54 = vld [vmem:[%s7063_s11 + $0xcf8] sm:$0xff]  ;;  %v9883_v34 = vld [vmem:[%s7063_s11 + $0xe90] sm:$0xff]  ;;  %v1161_v13 = vmax.f32 %v9747_v23, %v9858_v20  ;;  %v9897_v30 = vmax.f32 %v1148_v22, %v1152_v49 }
 0x1be   : > { %v6265_v47 = vpack.c.bf16 %v18896_v63, %v18893_v18  ;;  %v9852_v18 = vld [vmem:[%s7063_s11 + $0xce0] sm:$0xff]  ;;  %v9874_v63 = vld [vmem:[%s7063_s11 + $0xcf0] sm:$0xff]  ;;  %v9886_v59 = vld [vmem:[%s7063_s11 + $0xe98] sm:$0xff] }
 0x1bf   : > { %v9889_v7 = vld [vmem:[%s7063_s11 + $0xea0] sm:$0xff]  ;;  %18899 = vst [vmem:[#allocation138_spill] sm:$0xff] %v9897_v30  ;;  %v9900_v12 = vld [vmem:[%s7063_s11 + $0xd08] sm:$0xff]  ;;  %v9903_v41 = vld [vmem:[%s7063_s11 + $0xd10] sm:$0xff]  ;;  %v10004_v46 = vmax.f32 %v18905_v11, %v1160_v48  ;;  %v18909_v48 = vmax.f32 %v9706_v37, %v9812_v42 }
 0x1c0   : > { %1662 = vst [vmem:[%s8679_s1 + $0x90] sm:$0xff] %v6265_v47  ;;  %v1162_v47 = vmax.f32 %v9750_v40, %v9861_v24  ;;  %18900 = vst [vmem:[#allocation38_spill] sm:$0xff] %v9903_v41  ;;  %v9906_v58 = vld [vmem:[%s7063_s11 + $0xd18] sm:$0xff]  ;;  %v9909_v56 = vld [vmem:[%s7063_s11 + $0xea8] sm:$0xff]  ;;  %v1166_v49 = vmax.f32 %v9777_v8, %v9889_v7  ;;  %v9923_v24 = vmax.f32 %v1149_v32, %v1153_v44 }
 0x1c1   : > { %18901 = vst [vmem:[#allocation46_spill] sm:$0xff] %v9906_v58  ;;  %v9912_v23 = vld [vmem:[%s7063_s11 + $0xeb0] sm:$0xff]  ;;  %v9915_v40 = vld [vmem:[%s7063_s11 + $0xeb8] sm:$0xff]  ;;  %v9926_v15 = vld [vmem:[%s7063_s11 + $0xd20] sm:$0xff]  ;;  %v1167_v8 = vmax.f32 %v9797_v21, %v9909_v56  ;;  %v9949_v7 = vmax.f32 %v1154_v27, %v1158_v9 }
 0x1c2   : > { %18902 = vst [vmem:[#allocation47_spill] sm:$0xff] %v9923_v24  ;;  %v9929_v33 = vld [vmem:[%s7063_s11 + $0xd28] sm:$0xff]  ;;  %v9932_v38 = vld [vmem:[%s7063_s11 + $0xd30] sm:$0xff]  ;;  %v9935_v19 = vld [vmem:[%s7063_s11 + $0xec0] sm:$0xff]  ;;  %v1168_v32 = vmax.f32 %v9800_v45, %v9912_v23  ;;  %v9975_v23 = vmax.f32 %v1155_v6, %v1159_v39  ;;  %v10033_v39 = vmax.f32 %v18909_v48, %v1161_v13  ;;  %v10059_v48 = vmax.f32 %v1162_v47, %v1166_v49 }
 0x1c3   : > { %v9938_v20 = vld [vmem:[%s7063_s11 + $0xec8] sm:$0xff]  ;;  %v9941_v22 = vld [vmem:[%s7063_s11 + $0xed0] sm:$0xff]  ;;  %18903 = vst [vmem:[#allocation139_spill] sm:$0xff] %v9949_v7  ;;  %v9952_v55 = vld [vmem:[%s7063_s11 + $0xd38] sm:$0xff] }
 0x1c4   : > { %v9955_v26 = vld [vmem:[%s7063_s11 + $0xd40] sm:$0xff]  ;;  %v9958_v52 = vld [vmem:[%s7063_s11 + $0xd48] sm:$0xff]  ;;  %v9961_v53 = vld [vmem:[%s7063_s11 + $0xed8] sm:$0xff]  ;;  %18904 = vst [vmem:[#allocation39_spill] sm:$0xff] %v9975_v23 }
 0x1c5   : > { %v9964_v56 = vld [vmem:[%s7063_s11 + $0xee0] sm:$0xff]  ;;  %v9967_v21 = vld [vmem:[%s7063_s11 + $0xee8] sm:$0xff]  ;;  %v9978_v44 = vld [vmem:[%s7063_s11 + $0xd50] sm:$0xff]  ;;  %18906 = vst [vmem:[#allocation45_spill] sm:$0xff] %v10004_v46 }
 0x1c6   : > { %v9981_v51 = vld [vmem:[%s7063_s11 + $0xd58] sm:$0xff]  ;;  %v9984_v60 = vld [vmem:[%s7063_s11 + $0xd60] sm:$0xff]  ;;  %v9987_v29 = vld [vmem:[%s7063_s11 + $0xef0] sm:$0xff]  ;;  %v1174_v6 = vmax.f32 %v9852_v18, %v9964_v56  ;;  %18910 = vst [vmem:[#allocation49_spill] sm:$0xff] %v10033_v39 }
 0x1c7   : > { %v9990_v45 = vld [vmem:[%s7063_s11 + $0xef8] sm:$0xff]  ;;  %v9993_v27 = vld [vmem:[%s7063_s11 + $0xf00] sm:$0xff]  ;;  %v10007_v28 = vld [vmem:[%s7063_s11 + $0xd68] sm:$0xff]  ;;  %18911 = vst [vmem:[#allocation142_spill] sm:$0xff] %v10059_v48  ;;  %v18912_v48 = vmax.f32 %v9753_v1, %v9864_v36 }
 0x1c8   : > { %v10010_v5 = vld [vmem:[%s7063_s11 + $0xd70] sm:$0xff]  ;;  %v10013_v9 = vld [vmem:[%s7063_s11 + $0xd78] sm:$0xff]  ;;  %v10016_v62 = vld [vmem:[%s7063_s11 + $0xf08] sm:$0xff] }
 0x1c9   : > { %v10019_v18 = vld [vmem:[%s7063_s11 + $0xf10] sm:$0xff]  ;;  %v10022_v56 = vld [vmem:[%s7063_s11 + $0xf18] sm:$0xff]  ;;  %v10036_v17 = vld [vmem:[%s7063_s11 + $0xd80] sm:$0xff]  ;;  %v10088_v24 = vmax.f32 %v18912_v48, %v1167_v8  ;;  %v18914_v48 = vmax.f32 %v9771_v35, %v9883_v34 }
 0x1ca   : > { %18907 = vst [vmem:[#allocation54_spill] sm:$0xff] %v10019_v18  ;;  %18908 = vst [vmem:[#allocation146_spill] sm:$0xff] %v10022_v56  ;;  %v10039_v4 = vld [vmem:[%s7063_s11 + $0xd88] sm:$0xff]  ;;  %v10042_v10 = vld [vmem:[%s7063_s11 + $0xd90] sm:$0xff] }
 0x1cb   : > { %v10045_v23 = vld [vmem:[%s7063_s11 + $0xf20] sm:$0xff]  ;;  %v10048_v11 = vld [vmem:[%s7063_s11 + $0xf28] sm:$0xff]  ;;  %v10051_v7 = vld [vmem:[%s7063_s11 + $0xf30] sm:$0xff]  ;;  %18913 = vst [vmem:[#allocation53_spill] sm:$0xff] %v10088_v24  ;;  %v10117_v49 = vmax.f32 %v18914_v48, %v1168_v32  ;;  %v18916_v32 = vmax.f32 %v9803_v2, %v9915_v40 }
 0x1cc   : > { %v10062_v57 = vld [vmem:[%s7063_s11 + $0xd98] sm:$0xff]  ;;  %v10065_v39 = vld [vmem:[%s7063_s11 + $0xda0] sm:$0xff]  ;;  %v10068_v46 = vld [vmem:[%s7063_s11 + $0xda8] sm:$0xff]  ;;  %v1182_v13 = vmax.f32 %v9926_v15, %v10045_v23 }
 0x1cd   : > { %v10071_v3 = vld [vmem:[%s7063_s11 + $0xf38] sm:$0xff]  ;;  %v10074_v37 = vld [vmem:[%s7063_s11 + $0xf40] sm:$0xff]  ;;  %v10077_v42 = vld [vmem:[%s7063_s11 + $0xf48] sm:$0xff]  ;;  %18915 = vst [vmem:[#allocation147_spill] sm:$0xff] %v10117_v49 }
 0x1ce   : > { %v10091_v43 = vld [vmem:[%s7063_s11 + $0xdb0] sm:$0xff]  ;;  %v10094_v30 = vld [vmem:[%s7063_s11 + $0xdb8] sm:$0xff]  ;;  %v10097_v15 = vld [vmem:[%s7063_s11 + $0xdc0] sm:$0xff]  ;;  %v1185_v1 = vmax.f32 %v9952_v55, %v10071_v3  ;;  %v1186_v36 = vmax.f32 %v9955_v26, %v10074_v37  ;;  %v1187_v8 = vmax.f32 %v9958_v52, %v10077_v42  ;;  %v18917_v37 = vmax.f32 %v9774_v31, %v9886_v59 }
 0x1cf   : > { %v10100_v23 = vld [vmem:[%s7063_s11 + $0xf50] sm:$0xff]  ;;  %v10103_v47 = vld [vmem:[%s7063_s11 + $0xf58] sm:$0xff]  ;;  %v10106_v56 = vld [vmem:[%s7063_s11 + $0xf60] sm:$0xff]  ;;  %v18919_v31 = vmax.f32 %v9826_v16, %v9935_v19  ;;  %v18921_v16 = vmax.f32 %v9829_v0, %v9938_v20  ;;  %v18923_v0 = vmax.f32 %v9832_v50, %v9941_v22 }
 0x1d0   : > { %v10120_v24 = vld [vmem:[%s7063_s11 + $0xdc8] sm:$0xff]  ;;  %v10123_v58 = vld [vmem:[%s7063_s11 + $0xdd0] sm:$0xff]  ;;  %v10126_v55 = vld [vmem:[%s7063_s11 + $0xdd8] sm:$0xff]  ;;  %v1188_v52 = vmax.f32 %v9978_v44, %v10100_v23  ;;  %v1189_v35 = vmax.f32 %v9981_v51, %v10103_v47  ;;  %v1190_v34 = vmax.f32 %v9984_v60, %v10106_v56  ;;  %v10143_v42 = vmax.f32 %v18917_v37, %v18916_v32 }
 0x1d1   : > { %v935_v3 = vld [vmem:[%s7063_s11 + $0xf68] sm:$0xff]  ;;  %v936_v18 = vld [vmem:[%s7063_s11 + $0xf70] sm:$0xff]  ;;  %v937_v26 = vld [vmem:[%s7063_s11 + $0xf78] sm:$0xff]  ;;  %v10157_v59 = vmax.f32 %v18919_v31, %v1174_v6 }
 0x1d2   : > { %18918 = vst [vmem:[#allocation52_spill] sm:$0xff] %v10143_v42  ;;  %v886_v48 = vld [vmem:[%s7063_s11 + $0xde0] sm:$0xff]  ;;  %v887_v49 = vld [vmem:[%s7063_s11 + $0xde8] sm:$0xff]  ;;  %v888_v41 = vld [vmem:[%s7063_s11 + $0xdf0] sm:$0xff]  ;;  %v1191_v47 = vmax.f32 %v10007_v28, %v935_v3  ;;  %v1192_v60 = vmax.f32 %v10010_v5, %v936_v18  ;;  %v1193_v2 = vmax.f32 %v10013_v9, %v937_v26  ;;  %v18920_v9 = vmax.f32 %v9855_v14, %v9967_v21 }
 0x1d3   : > { %v938_v44 = vld [vmem:[%s7063_s11 + $0xf80] sm:$0xff]  ;;  %v939_v23 = vld [vmem:[%s7063_s11 + $0xf88] sm:$0xff]  ;;  %v940_v51 = vld [vmem:[%s7063_s11 + $0xf90] sm:$0xff]  ;;  %v18922_v14 = vmax.f32 %v9874_v63, %v9987_v29  ;;  %v18925_v29 = vmax.f32 %v9849_v25, %v9961_v53  ;;  %v18927_v25 = vmax.f32 %v9929_v33, %v10048_v11  ;;  %v10235_v33 = vmax.f32 %v1186_v36, %v1190_v34 }
 0x1d4   : > { %v889_v40 = vld [vmem:[%s7063_s11 + $0xdf8] sm:$0xff]  ;;  %v942_v32 = vld [vmem:[%s7063_s11 + $0xfa0] sm:$0xff]  ;;  %v943_v37 = vld [vmem:[%s7063_s11 + $0xfa8] sm:$0xff]  ;;  %v1194_v42 = vmax.f32 %v10036_v17, %v938_v44  ;;  %v1195_v28 = vmax.f32 %v10039_v4, %v939_v23  ;;  %v1196_v5 = vmax.f32 %v10042_v10, %v940_v51  ;;  %v10172_v19 = vmax.f32 %v18921_v16, %v18920_v9 }
 0x1d5   : > { %v941_v56 = vld [vmem:[%s7063_s11 + $0xf98] sm:$0xff]  ;;  %v944_v6 = vld [vmem:[%s7063_s11 + $0xfb0] sm:$0xff]  ;;  %v946_v3 = vld [vmem:[%s7063_s11 + $0xfc0] sm:$0xff]  ;;  %v1198_v4 = vmax.f32 %v10065_v39, %v942_v32  ;;  %v1199_v10 = vmax.f32 %v10068_v46, %v943_v37  ;;  %v10186_v20 = vmax.f32 %v18923_v0, %v18922_v14  ;;  %v18924_v46 = vmax.f32 %v9877_v54, %v9990_v45 }
 0x1d6   : > { %v945_v18 = vld [vmem:[%s7063_s11 + $0xfb8] sm:$0xff]  ;;  %v1197_v17 = vmax.f32 %v10062_v57, %v941_v56  ;;  %v947_v21 = vld [vmem:[%s7063_s11 + $0xfc8] sm:$0xff]  ;;  %v948_v26 = vld [vmem:[%s7063_s11 + $0xfd0] sm:$0xff]  ;;  %v1200_v23 = vmax.f32 %v10091_v43, %v944_v6  ;;  %v1202_v39 = vmax.f32 %v10097_v15, %v946_v3  ;;  %v18928_v37 = vmax.f32 %v9900_v12, %v10016_v62 }
 0x1d7   : > { %v949_v44 = vld [vmem:[%s7063_s11 + $0xfd8] sm:$0xff]  ;;  %v1201_v57 = vmax.f32 %v10094_v30, %v945_v18  ;;  %v10200_v63 = vmax.f32 %v18925_v29, %v18924_v46  ;;  %v950_v50 = vld [vmem:[%s7063_s11 + $0xfe0] sm:$0xff]  ;;  %v951_v22 = vld [vmem:[%s7063_s11 + $0xfe8] sm:$0xff]  ;;  %v1203_v31 = vmax.f32 %v10120_v24, %v947_v21  ;;  %v1204_v56 = vmax.f32 %v10123_v58, %v948_v26 }
 0x1d8   : > { %v952_v51 = vld [vmem:[%s7063_s11 + $0xff0] sm:$0xff]  ;;  %v1205_v43 = vmax.f32 %v10126_v55, %v949_v44  ;;  %v18926_v30 = vmax.f32 %v9880_v61, %v9993_v27  ;;  %v953_v54 = vld [vmem:[%s7063_s11 + $0xff8] sm:$0xff]  ;;  %v1206_v45 = vmax.f32 %v886_v48, %v950_v50  ;;  %v1207_v32 = vmax.f32 %v887_v49, %v951_v22  ;;  %v18941_v3 = vld [vmem:[#allocation139_spill] sm:$0xff]  ;;  %s17465_s11 = scalar_lea.hbm %s20317_s6, %s6253_s3 }
 0x1d9   : > { %v1208_v53 = vmax.f32 %v888_v41, %v952_v51  ;;  %v10220_v24 = vmax.f32 %v18928_v37, %v18927_v25  ;;  %v1209_v58 = vmax.f32 %v889_v40, %v953_v54  ;;  %v18929_v55 = vmax.f32 %v9932_v38, %v10051_v7  ;;  %v18930_v9 = vld [vmem:[#allocation38_spill] sm:$0xff]  ;;  %v18946_v21 = vld [vmem:[#allocation52_spill] sm:$0xff]  ;;  %v18947_v26 = vld [vmem:[#allocation53_spill] sm:$0xff] }
 0x1da   : > { %v10211_v15 = vmax.f32 %v18926_v30, %v1182_v13  ;;  %v18931_v61 = vld [vmem:[#allocation54_spill] sm:$0xff]  ;;  %v10237_v11 = vmax.f32 %v1187_v8, %v1191_v47  ;;  %v10239_v62 = vmax.f32 %v1188_v52, %v1192_v60  ;;  %v10241_v12 = vmax.f32 %v1189_v35, %v1193_v2  ;;  %v18937_v47 = vld [vmem:[#allocation41_spill] sm:$0xff]  ;;  %v18938_v60 = vld [vmem:[#allocation47_spill] sm:$0xff] }
 0x1db   : > { %v18932_v27 = vmax.f32 %v18930_v9, %v18931_v61  ;;  %v18933_v48 = vld [vmem:[#allocation46_spill] sm:$0xff]  ;;  %v10243_v40 = vmax.f32 %v1194_v42, %v1198_v4  ;;  %v10245_v38 = vmax.f32 %v1195_v28, %v1199_v10  ;;  %v10247_v7 = vmax.f32 %v1196_v5, %v1200_v23  ;;  %v18939_v35 = vld [vmem:[#allocation48_spill] sm:$0xff]  ;;  %v18940_v42 = vld [vmem:[#allocation45_spill] sm:$0xff] }
 0x1dc   : > { %v18934_v49 = vld [vmem:[#allocation146_spill] sm:$0xff]  ;;  %v10249_v6 = vmax.f32 %v1197_v17, %v1201_v57  ;;  %v10251_v18 = vmax.f32 %v1202_v39, %v1206_v45  ;;  %v1336_v36 = vmax.f32 %v1204_v56, %v1208_v53  ;;  %v1337_v34 = vmax.f32 %v1205_v43, %v1209_v58  ;;  %v18942_v4 = vld [vmem:[#allocation49_spill] sm:$0xff]  ;;  %v18943_v5 = vld [vmem:[#allocation39_spill] sm:$0xff] }
 0x1dd   : > { %v10228_v13 = vmax.f32 %v18932_v27, %v18929_v55  ;;  %v18935_v41 = vmax.f32 %v18933_v48, %v18934_v49  ;;  %v18936_v8 = vld [vmem:[#allocation138_spill] sm:$0xff]  ;;  %v1387_v2 = vmax.f32 %v18939_v35, %v18938_v60  ;;  %v1388_v28 = vmax.f32 %v18941_v3, %v18940_v42  ;;  %v18944_v17 = vld [vmem:[#allocation147_spill] sm:$0xff]  ;;  %v18958_v25 = vld [vmem:[#allocation84_spill] sm:$0xff] }
 0x1de   : > { %v1386_v52 = vmax.f32 %v18937_v47, %v18936_v8  ;;  %v1389_v10 = vmax.f32 %v18943_v5, %v18942_v4  ;;  %v18945_v14 = vld [vmem:[#allocation142_spill] sm:$0xff]  ;;  %v1391_v44 = vmax.f32 %v18947_v26, %v18946_v21  ;;  %v1392_v23 = vmax.f32 %v10157_v59, %v10186_v20  ;;  %v18949_v51 = vld [vmem:[#allocation75_spill] sm:$0xff]  ;;  %v18960_v58 = vld [vmem:[#allocation92_spill] sm:$0xff] }
 0x1df   : > { %v10233_v16 = vmax.f32 %v18935_v41, %v1185_v1  ;;  %v10253_v1 = vmax.f32 %v1203_v31, %v1207_v32  ;;  %v1390_v0 = vmax.f32 %v18945_v14, %v18944_v17  ;;  %v1393_v57 = vmax.f32 %v10172_v19, %v10200_v63  ;;  %v18948_v63 = vld [vmem:[#allocation82_spill] sm:$0xff]  ;;  %v18951_v56 = vld [vmem:[#allocation71_spill] sm:$0xff]  ;;  %v18961_v55 = vld [vmem:[#allocation101_spill] sm:$0xff] }
 0x1e0   : > { %v1394_v39 = vmax.f32 %v10211_v15, %v10228_v13  ;;  %v1396_v29 = vmax.f32 %v10235_v33, %v10239_v62  ;;  %v1397_v50 = vmax.f32 %v10237_v11, %v10241_v12  ;;  %v1398_v22 = vmax.f32 %v10243_v40, %v10247_v7  ;;  %v18952_v43 = vld [vmem:[#allocation90_spill] sm:$0xff]  ;;  %v18954_v54 = vld [vmem:[#allocation79_spill] sm:$0xff]  ;;  %v18963_v61 = vld [vmem:[#allocation85_spill] sm:$0xff] }
 0x1e1   : > { %v1395_v46 = vmax.f32 %v10220_v24, %v10233_v16  ;;  %v1399_v59 = vmax.f32 %v10245_v38, %v10249_v6  ;;  %v1400_v19 = vmax.f32 %v10251_v18, %v1336_v36  ;;  %v1401_v20 = vmax.f32 %v10253_v1, %v1337_v34  ;;  %v18955_v45 = vld [vmem:[#allocation91_spill] sm:$0xff]  ;;  %v18964_v27 = vld [vmem:[#allocation93_spill] sm:$0xff]  ;;  %v18966_v49 = vld [vmem:[#allocation98_spill] sm:$0xff] }
 0x1e2   : > { %v18950_v31 = vmax.f32 %v18948_v63, %v18949_v51  ;;  %v18953_v30 = vmax.f32 %v18951_v56, %v18952_v43  ;;  %v18956_v32 = vmax.f32 %v18954_v54, %v18955_v45  ;;  %v18957_v53 = vld [vmem:[#allocation83_spill] sm:$0xff]  ;;  %v18962_v9 = vmax.f32 %v18960_v58, %v18961_v55  ;;  %v18967_v41 = vld [vmem:[#allocation100_spill] sm:$0xff]  ;;  %v18970_v11 = vld [vmem:[#allocation117_spill] sm:$0xff] }
 0x1e3   : > { %v18959_v37 = vmax.f32 %v18957_v53, %v18958_v25  ;;  %v18965_v13 = vmax.f32 %v18963_v61, %v18964_v27  ;;  %v18968_v16 = vmax.f32 %v18966_v49, %v18967_v41  ;;  %v18969_v33 = vld [vmem:[#allocation99_spill] sm:$0xff]  ;;  %v18972_v40 = vld [vmem:[#allocation118_spill] sm:$0xff]  ;;  %v18973_v38 = vld [vmem:[#allocation124_spill] sm:$0xff] }
 0x1e4   : > { %v6266_v15 = vpack.c.bf16 %v18953_v30, %v18950_v31  ;;  %v18971_v62 = vmax.f32 %v18969_v33, %v18970_v11  ;;  %v18974_v7 = vmax.f32 %v18972_v40, %v18973_v38  ;;  %v18975_v6 = vld [vmem:[#allocation111_spill] sm:$0xff]  ;;  %v18976_v18 = vld [vmem:[#allocation130_spill] sm:$0xff]  ;;  %v18978_v34 = vld [vmem:[#allocation88_spill] sm:$0xff] }
 0x1e5   : > { %v6267_v24 = vpack.c.bf16 %v18959_v37, %v18956_v32  ;;  %v6268_v48 = vpack.c.bf16 %v18965_v13, %v18962_v9  ;;  %v18977_v1 = vmax.f32 %v18975_v6, %v18976_v18  ;;  %v18979_v8 = vld [vmem:[#allocation87_spill] sm:$0xff]  ;;  %v18981_v60 = vld [vmem:[#allocation86_spill] sm:$0xff]  ;;  %v18982_v35 = vld [vmem:[#allocation28_spill] sm:$0xff] }
 0x1e6   : > { %v6269_v12 = vpack.c.bf16 %v18971_v62, %v18968_v16  ;;  %v18980_v47 = vmax.f32 %v18978_v34, %v18979_v8  ;;  %v18983_v42 = vmax.f32 %v18981_v60, %v18982_v35  ;;  %v18984_v4 = vld [vmem:[#allocation27_spill] sm:$0xff]  ;;  %v18985_v5 = vld [vmem:[#allocation106_spill] sm:$0xff]  ;;  %v18988_v21 = vld [vmem:[#allocation80_spill] sm:$0xff]  ;;  %1663 = vst [vmem:[%s8679_s1 + $0xb4] sm:$0xff] %v6266_v15 }
 0x1e7   : > { %v6270_v36 = vpack.c.bf16 %v18977_v1, %v18974_v7  ;;  %v18986_v17 = vmax.f32 %v18984_v4, %v18985_v5  ;;  %v18987_v14 = vld [vmem:[#allocation30_spill] sm:$0xff]  ;;  %v18990_v51 = vld [vmem:[#allocation105_spill] sm:$0xff]  ;;  %v18991_v31 = vld [vmem:[#allocation32_spill] sm:$0xff]  ;;  %1664 = vst [vmem:[%s8679_s1 + $0xd8] sm:$0xff] %v6267_v24 }
 0x1e8   : > { %v6271_v3 = vpack.c.bf16 %v18983_v42, %v18980_v47  ;;  %v18989_v26 = vmax.f32 %v18987_v14, %v18988_v21  ;;  %v18992_v56 = vmax.f32 %v18990_v51, %v18991_v31  ;;  %v18993_v43 = vld [vmem:[#allocation94_spill] sm:$0xff]  ;;  %v18994_v30 = vld [vmem:[#allocation31_spill] sm:$0xff]  ;;  %v18997_v53 = vld [vmem:[#allocation81_spill] sm:$0xff]  ;;  %1665 = vst [vmem:[%s8679_s1 + $0xfc] sm:$0xff] %v6268_v48 }
 0x1e9   : > { %v18995_v54 = vmax.f32 %v18993_v43, %v18994_v30  ;;  %v18996_v32 = vld [vmem:[#allocation103_spill] sm:$0xff]  ;;  %v19002_v61 = vld [vmem:[#allocation113_spill] sm:$0xff]  ;;  %v19005_v49 = vld [vmem:[#allocation34_spill] sm:$0xff]  ;;  %1666 = vst [vmem:[%s8679_s1 + $0x120] sm:$0xff] %v6269_v12 }
 0x1ea   : > { %v6272_v63 = vpack.c.bf16 %v18989_v26, %v18986_v17  ;;  %v18998_v25 = vmax.f32 %v18996_v32, %v18997_v53  ;;  %v18999_v37 = vld [vmem:[#allocation107_spill] sm:$0xff]  ;;  %v19003_v27 = vld [vmem:[#allocation33_spill] sm:$0xff]  ;;  %v19008_v11 = vld [vmem:[#allocation110_spill] sm:$0xff]  ;;  %1667 = vst [vmem:[%s8679_s1 + $0x144] sm:$0xff] %v6270_v36 }
 0x1eb   : > { %v6273_v45 = vpack.c.bf16 %v18995_v54, %v18992_v56  ;;  %v19000_v58 = vld [vmem:[#allocation95_spill] sm:$0xff]  ;;  %v19004_v13 = vmax.f32 %v19002_v61, %v19003_v27  ;;  %v19006_v41 = vld [vmem:[#allocation97_spill] sm:$0xff]  ;;  %v19009_v62 = vld [vmem:[#allocation114_spill] sm:$0xff]  ;;  %1668 = vst [vmem:[%s8679_s1 + $0x168] sm:$0xff] %v6271_v3 }
 0x1ec   : > { %v19001_v55 = vmax.f32 %v18999_v37, %v19000_v58  ;;  %v19007_v16 = vmax.f32 %v19005_v49, %v19006_v41  ;;  %v19010_v40 = vmax.f32 %v19008_v11, %v19009_v62  ;;  %v19011_v38 = vld [vmem:[#allocation102_spill] sm:$0xff]  ;;  %v19012_v7 = vld [vmem:[#allocation109_spill] sm:$0xff]  ;;  %v19015_v34 = vld [vmem:[#allocation36_spill] sm:$0xff]  ;;  %1669 = vst [vmem:[%s8679_s1 + $0x18c] sm:$0xff] %v6272_v63  ;;  %v6285_v63 = vpack.c.bf16 %v1387_v2, %v1386_v52 }
 0x1ed   : > { %v19013_v6 = vmax.f32 %v19011_v38, %v19012_v7  ;;  %v19014_v1 = vld [vmem:[#allocation58_spill] sm:$0xff]  ;;  %v19017_v47 = vld [vmem:[#allocation57_spill] sm:$0xff]  ;;  %v19018_v15 = vld [vmem:[#allocation128_spill] sm:$0xff]  ;;  %1670 = vst [vmem:[%s8679_s1 + $0x1b0] sm:$0xff] %v6273_v45  ;;  %v6286_v45 = vpack.c.bf16 %v1389_v10, %v1388_v28  ;;  %v6291_v52 = vpack.c.bf16 %v1399_v59, %v1398_v22  ;;  %v6292_v2 = vpack.c.bf16 %v1401_v20, %v1400_v19 }
 0x1ee   : > { %v6274_v9 = vpack.c.bf16 %v19001_v55, %v18998_v25  ;;  %v6275_v33 = vpack.c.bf16 %v19007_v16, %v19004_v13  ;;  %v19016_v8 = vmax.f32 %v19014_v1, %v19015_v34  ;;  %v19019_v60 = vmax.f32 %v19017_v47, %v19018_v15  ;;  %v19020_v42 = vld [vmem:[#allocation122_spill] sm:$0xff]  ;;  %v19021_v4 = vld [vmem:[#allocation35_spill] sm:$0xff]  ;;  %v19024_v14 = vld [vmem:[#allocation108_spill] sm:$0xff]  ;;  %1682 = vst [vmem:[%s8679_s1 + $0x360] sm:$0xff] %v6285_v63 }
 0x1ef   : > { %v6276_v18 = vpack.c.bf16 %v19013_v6, %v19010_v40  ;;  %v19022_v5 = vmax.f32 %v19020_v42, %v19021_v4  ;;  %v19023_v17 = vld [vmem:[#allocation119_spill] sm:$0xff]  ;;  %v19027_v31 = vld [vmem:[#allocation116_spill] sm:$0xff]  ;;  %v19032_v53 = vld [vmem:[#allocation121_spill] sm:$0xff]  ;;  %1683 = vst [vmem:[%s8679_s1 + $0x384] sm:$0xff] %v6286_v45 }
 0x1f0   : > { %v6277_v35 = vpack.c.bf16 %v19019_v60, %v19016_v8  ;;  %v19025_v21 = vmax.f32 %v19023_v17, %v19024_v14  ;;  %v19026_v51 = vld [vmem:[#allocation127_spill] sm:$0xff]  ;;  %v19029_v43 = vld [vmem:[#allocation120_spill] sm:$0xff]  ;;  %v19035_v58 = vld [vmem:[#allocation129_spill] sm:$0xff]  ;;  %1671 = vst [vmem:[%s8679_s1 + $0x1d4] sm:$0xff] %v6274_v9  ;;  %v6287_v9 = vpack.c.bf16 %v1391_v44, %v1390_v0 }
 0x1f1   : > { %v19028_v56 = vmax.f32 %v19026_v51, %v19027_v31  ;;  %v19030_v30 = vld [vmem:[#allocation131_spill] sm:$0xff]  ;;  %v19036_v55 = vld [vmem:[#allocation112_spill] sm:$0xff]  ;;  %v19039_v27 = vld [vmem:[#allocation37_spill] sm:$0xff]  ;;  %1672 = vst [vmem:[%s8679_s1 + $0x1f8] sm:$0xff] %v6275_v33  ;;  %v6288_v31 = vpack.c.bf16 %v1393_v57, %v1392_v23 }
 0x1f2   : > { %v6278_v26 = vpack.c.bf16 %v19025_v21, %v19022_v5  ;;  %v19031_v54 = vmax.f32 %v19029_v43, %v19030_v30  ;;  %v19033_v25 = vld [vmem:[#allocation135_spill] sm:$0xff]  ;;  %v19037_v24 = vmax.f32 %v19035_v58, %v19036_v55  ;;  %v19038_v48 = vld [vmem:[#allocation96_spill] sm:$0xff]  ;;  %v19048_v38 = vld [vmem:[#allocation126_spill] sm:$0xff]  ;;  %1673 = vst [vmem:[%s8679_s1 + $0x21c] sm:$0xff] %v6276_v18  ;;  %v6290_v43 = vpack.c.bf16 %v1397_v50, %v1396_v29 }
 0x1f3   : > { %v19034_v37 = vmax.f32 %v19032_v53, %v19033_v25  ;;  %v19040_v12 = vmax.f32 %v19038_v48, %v19039_v27  ;;  %v19041_v13 = vld [vmem:[#allocation123_spill] sm:$0xff]  ;;  %v19042_v36 = vld [vmem:[#allocation104_spill] sm:$0xff]  ;;  %v19050_v1 = vld [vmem:[#allocation134_spill] sm:$0xff]  ;;  %1674 = vst [vmem:[%s8679_s1 + $0x240] sm:$0xff] %v6277_v35 }
 0x1f4   : > { %v6279_v32 = vpack.c.bf16 %v19031_v54, %v19028_v56  ;;  %v19043_v49 = vmax.f32 %v19041_v13, %v19042_v36  ;;  %v19044_v16 = vld [vmem:[#allocation115_spill] sm:$0xff]  ;;  %v19045_v11 = vld [vmem:[#allocation40_spill] sm:$0xff]  ;;  %v19051_v34 = vld [vmem:[#allocation50_spill] sm:$0xff]  ;;  %1675 = vst [vmem:[%s8679_s1 + $0x264] sm:$0xff] %v6278_v26  ;;  %v6289_v56 = vpack.c.bf16 %v1395_v46, %v1394_v39 }
 0x1f5   : > { %v6280_v61 = vpack.c.bf16 %v19037_v24, %v19034_v37  ;;  %v19046_v62 = vmax.f32 %v19044_v16, %v19045_v11  ;;  %v19047_v40 = vld [vmem:[#allocation136_spill] sm:$0xff]  ;;  %v19052_v8 = vmax.f32 %v19050_v1, %v19051_v34  ;;  %v19054_v15 = vld [vmem:[#allocation125_spill] sm:$0xff]  ;;  %v19056_v4 = vld [vmem:[#allocation42_spill] sm:$0xff]  ;;  %1684 = vst [vmem:[%s8679_s1 + $0x3a8] sm:$0xff] %v6287_v9 }
 0x1f6   : > { %v6281_v41 = vpack.c.bf16 %v19043_v49, %v19040_v12  ;;  %v19049_v7 = vmax.f32 %v19047_v40, %v19048_v38  ;;  %v19053_v47 = vld [vmem:[#allocation44_spill] sm:$0xff]  ;;  %v19057_v5 = vld [vmem:[#allocation51_spill] sm:$0xff]  ;;  %v19060_v21 = vld [vmem:[#allocation89_spill] sm:$0xff]  ;;  %1676 = vst [vmem:[%s8679_s1 + $0x288] sm:$0xff] %v6279_v32 }
 0x1f7   : > { %v19055_v60 = vmax.f32 %v19053_v47, %v19054_v15  ;;  %v19058_v17 = vmax.f32 %v19056_v4, %v19057_v5  ;;  %v19059_v14 = vld [vmem:[#allocation43_spill] sm:$0xff]  ;;  %1677 = vst [vmem:[%s8679_s1 + $0x2ac] sm:$0xff] %v6280_v61  ;;  %1685 = vst [vmem:[%s8679_s1 + $0x3cc] sm:$0xff] %v6288_v31  ;;  %v10430_v10 = vld [vmem:[%s7070_s25 + $0x8] sm:$0xff] }
 0x1f8   : > { %v6282_v6 = vpack.c.bf16 %v19049_v7, %v19046_v62  ;;  %v19061_v3 = vmax.f32 %v19059_v14, %v19060_v21  ;;  %1678 = vst [vmem:[%s8679_s1 + $0x2d0] sm:$0xff] %v6281_v41  ;;  %1686 = vst [vmem:[%s8679_s1 + $0x3f0] sm:$0xff] %v6289_v56  ;;  %v10427_v28 = vld [vmem:[%s7070_s25] sm:$0xff]  ;;  %v10433_v0 = vld [vmem:[%s7070_s25 + $0x10] sm:$0xff] }
 0x1f9   : > { %v6283_v42 = vpack.c.bf16 %v19055_v60, %v19052_v8  ;;  %1687 = vst [vmem:[%s8679_s1 + $0x414] sm:$0xff] %v6290_v43  ;;  %1688 = vst [vmem:[%s8679_s1 + $0x438] sm:$0xff] %v6291_v52  ;;  %v10436_v44 = vld [vmem:[%s7070_s25 + $0x18] sm:$0xff]  ;;  %v10439_v23 = vld [vmem:[%s7070_s25 + $0x200] sm:$0xff] }
 0x1fa   : > { %v6284_v51 = vpack.c.bf16 %v19061_v3, %v19058_v17  ;;  %1679 = vst [vmem:[%s8679_s1 + $0x2f4] sm:$0xff] %v6282_v6  ;;  %1689 = vst [vmem:[%s8679_s1 + $0x45c] sm:$0xff] %v6292_v2  ;;  %v10442_v57 = vld [vmem:[%s7070_s25 + $0x208] sm:$0xff]  ;;  %v10445_v39 = vld [vmem:[%s7070_s25 + $0x210] sm:$0xff] }
 0x1fb   : > { %1680 = vst [vmem:[%s8679_s1 + $0x318] sm:$0xff] %v6283_v42  ;;  %19062 = vst [vmem:[#allocation143_spill] sm:$0xff] %v10433_v0  ;;  %v10448_v46 = vld [vmem:[%s7070_s25 + $0x218] sm:$0xff]  ;;  %v10451_v29 = vld [vmem:[%s7070_s25 + $0x20] sm:$0xff] }
 0x1fc   : > { %1681 = vst [vmem:[%s8679_s1 + $0x33c] sm:$0xff] %v6284_v51  ;;  %19063 = vst [vmem:[#allocation148_spill] sm:$0xff] %v10436_v44  ;;  %v10454_v50 = vld [vmem:[%s7070_s25 + $0x28] sm:$0xff]  ;;  %v10457_v22 = vld [vmem:[%s7070_s25 + $0x30] sm:$0xff] }
 0x1fd   : > { %19064 = vst [vmem:[#allocation152_spill] sm:$0xff] %v10445_v39  ;;  %19065 = vst [vmem:[#allocation140_spill] sm:$0xff] %v10448_v46  ;;  %v10460_v59 = vld [vmem:[%s7070_s25 + $0x38] sm:$0xff]  ;;  %v10463_v19 = vld [vmem:[%s7070_s25 + $0x220] sm:$0xff] }
 0x1fe   : > { %19066 = vst [vmem:[#allocation144_spill] sm:$0xff] %v10460_v59  ;;  %v10466_v20 = vld [vmem:[%s7070_s25 + $0x228] sm:$0xff]  ;;  %v10469_v33 = vld [vmem:[%s7070_s25 + $0x230] sm:$0xff]  ;;  %v10472_v18 = vld [vmem:[%s7070_s25 + $0x238] sm:$0xff] }
 0x1ff   : > { %19067 = vst [vmem:[#allocation149_spill] sm:$0xff] %v10472_v18  ;;  %v10475_v35 = vld [vmem:[%s7070_s25 + $0x40] sm:$0xff]  ;;  %v10478_v26 = vld [vmem:[%s7070_s25 + $0x48] sm:$0xff]  ;;  %v10481_v30 = vld [vmem:[%s7070_s25 + $0x50] sm:$0xff] }
 0x200   : > { %19068 = vst [vmem:[#allocation153_spill] sm:$0xff] %v10475_v35  ;;  %19069 = vst [vmem:[#allocation141_spill] sm:$0xff] %v10478_v26  ;;  %v10484_v54 = vld [vmem:[%s7070_s25 + $0x58] sm:$0xff]  ;;  %v10487_v32 = vld [vmem:[%s7070_s25 + $0x240] sm:$0xff] }
 0x201   : > { %19070 = vst [vmem:[#allocation145_spill] sm:$0xff] %v10481_v30  ;;  %19071 = vst [vmem:[#allocation150_spill] sm:$0xff] %v10484_v54  ;;  %v10490_v53 = vld [vmem:[%s7070_s25 + $0x248] sm:$0xff]  ;;  %v10493_v25 = vld [vmem:[%s7070_s25 + $0x250] sm:$0xff] }
 0x202   : > { %19072 = vst [vmem:[#allocation154_spill] sm:$0xff] %v10487_v32  ;;  %19073 = vst [vmem:[#allocation151_spill] sm:$0xff] %v10490_v53  ;;  %v10496_v37 = vld [vmem:[%s7070_s25 + $0x258] sm:$0xff]  ;;  %v10499_v58 = vld [vmem:[%s7070_s25 + $0x60] sm:$0xff] }
 0x203   : > { %19074 = vst [vmem:[#allocation155_spill] sm:$0xff] %v10493_v25  ;;  %19075 = vst [vmem:[#allocation56_spill] sm:$0xff] %v10496_v37  ;;  %v10502_v55 = vld [vmem:[%s7070_s25 + $0x68] sm:$0xff]  ;;  %v10505_v24 = vld [vmem:[%s7070_s25 + $0x70] sm:$0xff] }
 0x204   : > { %19076 = vst [vmem:[#allocation156_spill] sm:$0xff] %v10499_v58  ;;  %19077 = vst [vmem:[#allocation55_spill] sm:$0xff] %v10502_v55  ;;  %v10508_v61 = vld [vmem:[%s7070_s25 + $0x78] sm:$0xff]  ;;  %v10511_v48 = vld [vmem:[%s7070_s25 + $0x260] sm:$0xff] }
 0x205   : > { %19078 = vst [vmem:[#allocation157_spill] sm:$0xff] %v10505_v24  ;;  %19079 = vst [vmem:[#allocation132_spill] sm:$0xff] %v10508_v61  ;;  %v10514_v27 = vld [vmem:[%s7070_s25 + $0x268] sm:$0xff]  ;;  %v10517_v12 = vld [vmem:[%s7070_s25 + $0x270] sm:$0xff] }
 0x206   : > { %19080 = vst [vmem:[#allocation59_spill] sm:$0xff] %v10511_v48  ;;  %19081 = vst [vmem:[#allocation133_spill] sm:$0xff] %v10514_v27  ;;  %v10520_v13 = vld [vmem:[%s7070_s25 + $0x278] sm:$0xff]  ;;  %v10523_v36 = vld [vmem:[%s7070_s25 + $0x80] sm:$0xff] }
 0x207   : > { %19082 = vst [vmem:[#allocation60_spill] sm:$0xff] %v10517_v12  ;;  %19083 = vst [vmem:[#allocation63_spill] sm:$0xff] %v10520_v13  ;;  %v10526_v49 = vld [vmem:[%s7070_s25 + $0x88] sm:$0xff]  ;;  %v10529_v41 = vld [vmem:[%s7070_s25 + $0x90] sm:$0xff] }
 0x208   : > { %19084 = vst [vmem:[#allocation61_spill] sm:$0xff] %v10523_v36  ;;  %19085 = vst [vmem:[#allocation67_spill] sm:$0xff] %v10526_v49  ;;  %v10532_v16 = vld [vmem:[%s7070_s25 + $0x98] sm:$0xff]  ;;  %v10535_v11 = vld [vmem:[%s7070_s25 + $0x280] sm:$0xff] }
 0x209   : > { %19086 = vst [vmem:[#allocation62_spill] sm:$0xff] %v10529_v41  ;;  %19087 = vst [vmem:[#allocation72_spill] sm:$0xff] %v10532_v16  ;;  %v10538_v62 = vld [vmem:[%s7070_s25 + $0x288] sm:$0xff]  ;;  %v10541_v40 = vld [vmem:[%s7070_s25 + $0x290] sm:$0xff] }
 0x20a   : > { %19088 = vst [vmem:[#allocation64_spill] sm:$0xff] %v10535_v11  ;;  %19089 = vst [vmem:[#allocation76_spill] sm:$0xff] %v10538_v62  ;;  %v10544_v38 = vld [vmem:[%s7070_s25 + $0x298] sm:$0xff]  ;;  %v10547_v7 = vld [vmem:[%s7070_s25 + $0xa0] sm:$0xff] }
 0x20b   : > { %19090 = vst [vmem:[#allocation68_spill] sm:$0xff] %v10541_v40  ;;  %19091 = vst [vmem:[#allocation73_spill] sm:$0xff] %v10544_v38  ;;  %v10550_v6 = vld [vmem:[%s7070_s25 + $0xa8] sm:$0xff]  ;;  %v10553_v1 = vld [vmem:[%s7070_s25 + $0xb0] sm:$0xff] }
 0x20c   : > { %19092 = vst [vmem:[#allocation65_spill] sm:$0xff] %v10550_v6  ;;  %19093 = vst [vmem:[#allocation77_spill] sm:$0xff] %v10553_v1  ;;  %v10556_v34 = vld [vmem:[%s7070_s25 + $0xb8] sm:$0xff]  ;;  %v10559_v8 = vld [vmem:[%s7070_s25 + $0x2a0] sm:$0xff] }
 0x20d   : > { %19094 = vst [vmem:[#allocation69_spill] sm:$0xff] %v10556_v34  ;;  %v10562_v47 = vld [vmem:[%s7070_s25 + $0x2a8] sm:$0xff]  ;;  %v10565_v15 = vld [vmem:[%s7070_s25 + $0x2b0] sm:$0xff]  ;;  %v10568_v60 = vld [vmem:[%s7070_s25 + $0x2b8] sm:$0xff] }
 0x20e   : > { %19095 = vst [vmem:[#allocation74_spill] sm:$0xff] %v10562_v47  ;;  %19096 = vst [vmem:[#allocation66_spill] sm:$0xff] %v10565_v15  ;;  %v10579_v14 = vld [vmem:[%s7070_s25 + $0xc0] sm:$0xff]  ;;  %v10582_v21 = vld [vmem:[%s7070_s25 + $0xc8] sm:$0xff] }
 0x20f   : > { %19097 = vst [vmem:[#allocation78_spill] sm:$0xff] %v10568_v60  ;;  %19098 = vst [vmem:[#allocation70_spill] sm:$0xff] %v10579_v14  ;;  %v10585_v3 = vld [vmem:[%s7070_s25 + $0xd0] sm:$0xff]  ;;  %v10588_v51 = vld [vmem:[%s7070_s25 + $0xd8] sm:$0xff] }
 0x210   : > { %19099 = vst [vmem:[#allocation38_spill] sm:$0xff] %v10582_v21  ;;  %19100 = vst [vmem:[#allocation54_spill] sm:$0xff] %v10585_v3  ;;  %v10591_v63 = vld [vmem:[%s7070_s25 + $0x2c0] sm:$0xff]  ;;  %v10594_v45 = vld [vmem:[%s7070_s25 + $0x2c8] sm:$0xff] }
 0x211   : > { %19101 = vst [vmem:[#allocation46_spill] sm:$0xff] %v10588_v51  ;;  %19102 = vst [vmem:[#allocation146_spill] sm:$0xff] %v10591_v63  ;;  %v10597_v9 = vld [vmem:[%s7070_s25 + $0x2d0] sm:$0xff]  ;;  %v10600_v31 = vld [vmem:[%s7070_s25 + $0x2d8] sm:$0xff] }
 0x212   : > { %19103 = vst [vmem:[#allocation138_spill] sm:$0xff] %v10594_v45  ;;  %19104 = vst [vmem:[#allocation41_spill] sm:$0xff] %v10597_v9  ;;  %v10611_v17 = vld [vmem:[%s7070_s25 + $0xe0] sm:$0xff]  ;;  %v10614_v5 = vld [vmem:[%s7070_s25 + $0xe8] sm:$0xff] }
 0x213   : > { %19105 = vst [vmem:[#allocation47_spill] sm:$0xff] %v10600_v31  ;;  %19106 = vst [vmem:[#allocation48_spill] sm:$0xff] %v10614_v5  ;;  %v10617_v4 = vld [vmem:[%s7070_s25 + $0xf0] sm:$0xff]  ;;  %v10620_v42 = vld [vmem:[%s7070_s25 + $0xf8] sm:$0xff] }
 0x214   : > { %19107 = vst [vmem:[#allocation45_spill] sm:$0xff] %v10617_v4  ;;  %19108 = vst [vmem:[#allocation139_spill] sm:$0xff] %v10620_v42  ;;  %v10623_v43 = vld [vmem:[%s7070_s25 + $0x2e0] sm:$0xff]  ;;  %v10626_v52 = vld [vmem:[%s7070_s25 + $0x2e8] sm:$0xff] }
 0x215   : > { %19109 = vst [vmem:[#allocation49_spill] sm:$0xff] %v10623_v43  ;;  %19110 = vst [vmem:[#allocation39_spill] sm:$0xff] %v10626_v52  ;;  %v10629_v56 = vld [vmem:[%s7070_s25 + $0x2f0] sm:$0xff]  ;;  %v10632_v2 = vld [vmem:[%s7070_s25 + $0x2f8] sm:$0xff] }
 0x216   : > { %19111 = vst [vmem:[#allocation147_spill] sm:$0xff] %v10629_v56  ;;  %19112 = vst [vmem:[#allocation142_spill] sm:$0xff] %v10632_v2  ;;  %v10643_v39 = vld [vmem:[%s7070_s25 + $0x100] sm:$0xff]  ;;  %v10646_v0 = vld [vmem:[%s7070_s25 + $0x108] sm:$0xff] }
 0x217   : > { %19113 = vst [vmem:[#allocation52_spill] sm:$0xff] %v10643_v39  ;;  %19114 = vst [vmem:[#allocation53_spill] sm:$0xff] %v10646_v0  ;;  %v10649_v46 = vld [vmem:[%s7070_s25 + $0x110] sm:$0xff]  ;;  %v10652_v32 = vld [vmem:[%s7070_s25 + $0x118] sm:$0xff] }
 0x218   : > { %19115 = vst [vmem:[#allocation82_spill] sm:$0xff] %v10649_v46  ;;  %19116 = vst [vmem:[#allocation75_spill] sm:$0xff] %v10652_v32  ;;  %v10655_v44 = vld [vmem:[%s7070_s25 + $0x300] sm:$0xff]  ;;  %v10658_v18 = vld [vmem:[%s7070_s25 + $0x308] sm:$0xff] }
 0x219   : > { %19117 = vst [vmem:[#allocation71_spill] sm:$0xff] %v10655_v44  ;;  %19118 = vst [vmem:[#allocation90_spill] sm:$0xff] %v10658_v18  ;;  %v10661_v25 = vld [vmem:[%s7070_s25 + $0x310] sm:$0xff]  ;;  %v10664_v59 = vld [vmem:[%s7070_s25 + $0x318] sm:$0xff] }
 0x21a   : > { %19119 = vst [vmem:[#allocation79_spill] sm:$0xff] %v10661_v25  ;;  %19120 = vst [vmem:[#allocation91_spill] sm:$0xff] %v10664_v59  ;;  %v10675_v26 = vld [vmem:[%s7070_s25 + $0x120] sm:$0xff]  ;;  %v10678_v35 = vld [vmem:[%s7070_s25 + $0x128] sm:$0xff] }
 0x21b   : > { %19121 = vst [vmem:[#allocation83_spill] sm:$0xff] %v10678_v35  ;;  %v10681_v37 = vld [vmem:[%s7070_s25 + $0x130] sm:$0xff]  ;;  %v10684_v48 = vld [vmem:[%s7070_s25 + $0x138] sm:$0xff]  ;;  %v10687_v54 = vld [vmem:[%s7070_s25 + $0x320] sm:$0xff] }
 0x21c   : > { %19122 = vst [vmem:[#allocation84_spill] sm:$0xff] %v10681_v37  ;;  %19123 = vst [vmem:[#allocation92_spill] sm:$0xff] %v10684_v48  ;;  %v10690_v27 = vld [vmem:[%s7070_s25 + $0x328] sm:$0xff]  ;;  %v10693_v30 = vld [vmem:[%s7070_s25 + $0x330] sm:$0xff] }
 0x21d   : > { %19124 = vst [vmem:[#allocation101_spill] sm:$0xff] %v10687_v54  ;;  %19125 = vst [vmem:[#allocation85_spill] sm:$0xff] %v10690_v27  ;;  %v10696_v12 = vld [vmem:[%s7070_s25 + $0x338] sm:$0xff]  ;;  %v10707_v55 = vld [vmem:[%s7070_s25 + $0x140] sm:$0xff] }
 0x21e   : > { %19126 = vst [vmem:[#allocation93_spill] sm:$0xff] %v10693_v30  ;;  %19127 = vst [vmem:[#allocation98_spill] sm:$0xff] %v10696_v12  ;;  %v10710_v58 = vld [vmem:[%s7070_s25 + $0x148] sm:$0xff]  ;;  %v10713_v53 = vld [vmem:[%s7070_s25 + $0x150] sm:$0xff] }
 0x21f   : > { %v10716_v11 = vld [vmem:[%s7070_s25 + $0x158] sm:$0xff]  ;;  %v10719_v13 = vld [vmem:[%s7070_s25 + $0x340] sm:$0xff]  ;;  %v10722_v62 = vld [vmem:[%s7070_s25 + $0x348] sm:$0xff] }
 0x220   : > { %v10725_v61 = vld [vmem:[%s7070_s25 + $0x350] sm:$0xff]  ;;  %v10736_v41 = vld [vmem:[%s7070_s25 + $0x160] sm:$0xff]  ;;  %v10739_v49 = vld [vmem:[%s7070_s25 + $0x168] sm:$0xff]  ;;  %v2242_v25 = vmax.f32 %v10707_v55, %v10719_v13  ;;  %v2243_v32 = vmax.f32 %v10710_v58, %v10722_v62 }
 0x221   : > { %v10742_v24 = vld [vmem:[%s7070_s25 + $0x170] sm:$0xff]  ;;  %v10745_v36 = vld [vmem:[%s7070_s25 + $0x178] sm:$0xff]  ;;  %v10751_v47 = vld [vmem:[%s7070_s25 + $0x360] sm:$0xff]  ;;  %v2244_v12 = vmax.f32 %v10713_v53, %v10725_v61 }
 0x222   : > { %v10748_v38 = vld [vmem:[%s7070_s25 + $0x358] sm:$0xff]  ;;  %v10754_v16 = vld [vmem:[%s7070_s25 + $0x368] sm:$0xff]  ;;  %v10765_v1 = vld [vmem:[%s7070_s25 + $0x180] sm:$0xff]  ;;  %v2246_v54 = vmax.f32 %v10736_v41, %v10751_v47 }
 0x223   : > { %v10768_v6 = vld [vmem:[%s7070_s25 + $0x188] sm:$0xff]  ;;  %v10771_v40 = vld [vmem:[%s7070_s25 + $0x190] sm:$0xff]  ;;  %v10774_v63 = vld [vmem:[%s7070_s25 + $0x198] sm:$0xff]  ;;  %v2245_v48 = vmax.f32 %v10716_v11, %v10748_v38  ;;  %v2247_v55 = vmax.f32 %v10739_v49, %v10754_v16 }
 0x224   : > { %v10777_v60 = vld [vmem:[%s7070_s25 + $0x370] sm:$0xff]  ;;  %v10780_v45 = vld [vmem:[%s7070_s25 + $0x378] sm:$0xff]  ;;  %v10783_v34 = vld [vmem:[%s7070_s25 + $0x380] sm:$0xff] }
 0x225   : > { %v10794_v3 = vld [vmem:[%s7070_s25 + $0x1a0] sm:$0xff]  ;;  %v10797_v21 = vld [vmem:[%s7070_s25 + $0x1a8] sm:$0xff]  ;;  %v10800_v15 = vld [vmem:[%s7070_s25 + $0x1b0] sm:$0xff]  ;;  %v2248_v58 = vmax.f32 %v10742_v24, %v10777_v60  ;;  %v2249_v53 = vmax.f32 %v10745_v36, %v10780_v45  ;;  %v2250_v62 = vmax.f32 %v10765_v1, %v10783_v34  ;;  %v19128_v60 = vmax.f32 %v10451_v29, %v10463_v19 }
 0x226   : > { %v10803_v14 = vld [vmem:[%s7070_s25 + $0x1b8] sm:$0xff]  ;;  %v10806_v31 = vld [vmem:[%s7070_s25 + $0x388] sm:$0xff]  ;;  %v10809_v52 = vld [vmem:[%s7070_s25 + $0x390] sm:$0xff] }
 0x227   : > { %v10812_v51 = vld [vmem:[%s7070_s25 + $0x398] sm:$0xff]  ;;  %v10823_v4 = vld [vmem:[%s7070_s25 + $0x1c0] sm:$0xff]  ;;  %v10826_v5 = vld [vmem:[%s7070_s25 + $0x1c8] sm:$0xff]  ;;  %v2251_v41 = vmax.f32 %v10768_v6, %v10806_v31  ;;  %v2252_v49 = vmax.f32 %v10771_v40, %v10809_v52 }
 0x228   : > { %v10829_v9 = vld [vmem:[%s7070_s25 + $0x1d0] sm:$0xff]  ;;  %v10832_v44 = vld [vmem:[%s7070_s25 + $0x1d8] sm:$0xff]  ;;  %v10835_v2 = vld [vmem:[%s7070_s25 + $0x3a0] sm:$0xff]  ;;  %v2253_v24 = vmax.f32 %v10774_v63, %v10812_v51 }
 0x229   : > { %v10838_v18 = vld [vmem:[%s7070_s25 + $0x3a8] sm:$0xff]  ;;  %v10841_v42 = vld [vmem:[%s7070_s25 + $0x3b0] sm:$0xff]  ;;  %v10852_v46 = vld [vmem:[%s7070_s25 + $0x1e0] sm:$0xff]  ;;  %v2254_v36 = vmax.f32 %v10794_v3, %v10835_v2 }
 0x22a   : > { %v10855_v0 = vld [vmem:[%s7070_s25 + $0x1e8] sm:$0xff]  ;;  %v10858_v39 = vld [vmem:[%s7070_s25 + $0x1f0] sm:$0xff]  ;;  %v10861_v43 = vld [vmem:[%s7070_s25 + $0x1f8] sm:$0xff]  ;;  %v2255_v16 = vmax.f32 %v10797_v21, %v10838_v18  ;;  %v2256_v38 = vmax.f32 %v10800_v15, %v10841_v42  ;;  %v19129_v42 = vmax.f32 %v10427_v28, %v10439_v23 }
 0x22b   : > { %v10864_v56 = vld [vmem:[%s7070_s25 + $0x3b8] sm:$0xff]  ;;  %v10867_v59 = vld [vmem:[%s7070_s25 + $0x3c0] sm:$0xff]  ;;  %v10870_v27 = vld [vmem:[%s7070_s25 + $0x3c8] sm:$0xff] }
 0x22c   : > { %v10881_v30 = vld [vmem:[%s7070_s25 + $0x3d0] sm:$0xff]  ;;  %v10884_v37 = vld [vmem:[%s7070_s25 + $0x3d8] sm:$0xff]  ;;  %v10887_v35 = vld [vmem:[%s7070_s25 + $0x3e0] sm:$0xff]  ;;  %v2257_v1 = vmax.f32 %v10803_v14, %v10864_v56  ;;  %v2258_v6 = vmax.f32 %v10823_v4, %v10867_v59  ;;  %v2259_v40 = vmax.f32 %v10826_v5, %v10870_v27  ;;  %v10944_v4 = vmax.f32 %v19129_v42, %v19128_v60 }
 0x22d   : > { %v10898_v61 = vld [vmem:[%s7070_s25 + $0x3e8] sm:$0xff]  ;;  %v10901_v13 = vld [vmem:[%s7070_s25 + $0x3f0] sm:$0xff]  ;;  %v10904_v11 = vld [vmem:[%s7070_s25 + $0x3f8] sm:$0xff]  ;;  %v2262_v47 = vmax.f32 %v10852_v46, %v10887_v35  ;;  %v19131_v46 = vmax.f32 %v10454_v50, %v10466_v20  ;;  %v19134_v5 = vmax.f32 %v10457_v22, %v10469_v33 }
 0x22e   : > { %v2263_v15 = vmax.f32 %v10855_v0, %v10898_v61  ;;  %19130 = vst [vmem:[#allocation100_spill] sm:$0xff] %v10944_v4  ;;  %v19132_v0 = vmax.f32 %v10430_v10, %v10442_v57  ;;  %v19135_v14 = vld [vmem:[#allocation143_spill] sm:$0xff]  ;;  %v19136_v29 = vld [vmem:[#allocation152_spill] sm:$0xff]  ;;  %v19140_v23 = vld [vmem:[#allocation149_spill] sm:$0xff] }
 0x22f   : > { %v19137_v19 = vmax.f32 %v19135_v14, %v19136_v29  ;;  %v19139_v28 = vld [vmem:[#allocation144_spill] sm:$0xff]  ;;  %v19147_v57 = vld [vmem:[#allocation59_spill] sm:$0xff]  ;;  %v19149_v31 = vld [vmem:[#allocation153_spill] sm:$0xff] }
 0x230   : > { %v10952_v35 = vmax.f32 %v19132_v0, %v19131_v46  ;;  %v19141_v3 = vmax.f32 %v19139_v28, %v19140_v23  ;;  %v19142_v51 = vld [vmem:[#allocation148_spill] sm:$0xff]  ;;  %v19150_v56 = vld [vmem:[#allocation154_spill] sm:$0xff]  ;;  %v19153_v33 = vld [vmem:[#allocation55_spill] sm:$0xff] }
 0x231   : > { %v10960_v21 = vmax.f32 %v19137_v19, %v19134_v5  ;;  %v19143_v63 = vld [vmem:[#allocation140_spill] sm:$0xff]  ;;  %v19151_v52 = vmax.f32 %v19149_v31, %v19150_v56  ;;  %v19154_v2 = vld [vmem:[#allocation133_spill] sm:$0xff]  ;;  %v19157_v42 = vld [vmem:[#allocation151_spill] sm:$0xff] }
 0x232   : > { %19133 = vst [vmem:[#allocation99_spill] sm:$0xff] %v10952_v35  ;;  %v19144_v50 = vmax.f32 %v19142_v51, %v19143_v63  ;;  %v19146_v10 = vld [vmem:[#allocation156_spill] sm:$0xff]  ;;  %v19155_v61 = vmax.f32 %v19153_v33, %v19154_v2  ;;  %v19156_v60 = vld [vmem:[#allocation141_spill] sm:$0xff]  ;;  %v19164_v28 = vld [vmem:[#allocation155_spill] sm:$0xff]  ;;  %v19174_v33 = vmax.f32 %v10547_v7, %v10559_v8 }
 0x233   : > { %19138 = vst [vmem:[#allocation117_spill] sm:$0xff] %v10960_v21  ;;  %v19148_v45 = vmax.f32 %v19146_v10, %v19147_v57  ;;  %v19158_v46 = vmax.f32 %v19156_v60, %v19157_v42  ;;  %v19160_v5 = vld [vmem:[#allocation157_spill] sm:$0xff]  ;;  %v19161_v14 = vld [vmem:[#allocation60_spill] sm:$0xff]  ;;  %v19168_v63 = vld [vmem:[#allocation63_spill] sm:$0xff] }
 0x234   : > { %v10968_v20 = vmax.f32 %v19144_v50, %v19141_v3  ;;  %v19162_v29 = vmax.f32 %v19160_v5, %v19161_v14  ;;  %v19163_v19 = vld [vmem:[#allocation145_spill] sm:$0xff]  ;;  %v19167_v51 = vld [vmem:[#allocation132_spill] sm:$0xff]  ;;  %v19170_v10 = vld [vmem:[#allocation150_spill] sm:$0xff] }
 0x235   : > { %v10976_v22 = vmax.f32 %v19151_v52, %v19148_v45  ;;  %v10984_v0 = vmax.f32 %v19158_v46, %v19155_v61  ;;  %v19165_v23 = vmax.f32 %v19163_v19, %v19164_v28  ;;  %v19169_v50 = vmax.f32 %v19167_v51, %v19168_v63  ;;  %v19171_v57 = vld [vmem:[#allocation56_spill] sm:$0xff]  ;;  %v11003_v56 = vld [vmem:[%s7070_s25 + $0x400] sm:$0xff]  ;;  %v19175_v2 = vld [vmem:[#allocation61_spill] sm:$0xff] }
 0x236   : > { %19145 = vst [vmem:[#allocation118_spill] sm:$0xff] %v10968_v20  ;;  %v19172_v45 = vmax.f32 %v19170_v10, %v19171_v57  ;;  %v11006_v52 = vld [vmem:[%s7070_s25 + $0x408] sm:$0xff]  ;;  %v19179_v46 = vld [vmem:[#allocation65_spill] sm:$0xff]  ;;  %v19180_v5 = vld [vmem:[#allocation74_spill] sm:$0xff] }
 0x237   : > { %19152 = vst [vmem:[#allocation124_spill] sm:$0xff] %v10976_v22  ;;  %19159 = vst [vmem:[#allocation111_spill] sm:$0xff] %v10984_v0  ;;  %v10992_v3 = vmax.f32 %v19165_v23, %v19162_v29  ;;  %v19176_v61 = vld [vmem:[#allocation64_spill] sm:$0xff]  ;;  %v19181_v14 = vmax.f32 %v19179_v46, %v19180_v5  ;;  %v19182_v29 = vld [vmem:[#allocation67_spill] sm:$0xff] }
 0x238   : > { %v11000_v31 = vmax.f32 %v19172_v45, %v19169_v50  ;;  %v19177_v60 = vmax.f32 %v19175_v2, %v19176_v61  ;;  %v19183_v19 = vld [vmem:[#allocation76_spill] sm:$0xff]  ;;  %v19186_v51 = vld [vmem:[#allocation77_spill] sm:$0xff]  ;;  %v19187_v63 = vld [vmem:[#allocation66_spill] sm:$0xff] }
 0x239   : > { %19166 = vst [vmem:[#allocation130_spill] sm:$0xff] %v10992_v3  ;;  %v19184_v28 = vmax.f32 %v19182_v29, %v19183_v19  ;;  %v19188_v50 = vmax.f32 %v19186_v51, %v19187_v63  ;;  %v19189_v10 = vld [vmem:[#allocation62_spill] sm:$0xff]  ;;  %v19190_v57 = vld [vmem:[#allocation68_spill] sm:$0xff]  ;;  %v19193_v8 = vld [vmem:[#allocation69_spill] sm:$0xff] }
 0x23a   : > { %19173 = vst [vmem:[#allocation88_spill] sm:$0xff] %v11000_v31  ;;  %v11014_v42 = vmax.f32 %v19177_v60, %v19174_v33  ;;  %v19191_v45 = vmax.f32 %v19189_v10, %v19190_v57  ;;  %v19194_v2 = vld [vmem:[#allocation78_spill] sm:$0xff]  ;;  %v19196_v61 = vld [vmem:[#allocation72_spill] sm:$0xff]  ;;  %v19197_v60 = vld [vmem:[#allocation73_spill] sm:$0xff] }
 0x23b   : > { %v11022_v23 = vmax.f32 %v19184_v28, %v19181_v14  ;;  %v19195_v33 = vmax.f32 %v19193_v8, %v19194_v2  ;;  %v19198_v18 = vmax.f32 %v19196_v61, %v19197_v60  ;;  %v11041_v5 = vld [vmem:[%s7070_s25 + $0x410] sm:$0xff]  ;;  %v11044_v14 = vld [vmem:[%s7070_s25 + $0x418] sm:$0xff]  ;;  %v11047_v29 = vld [vmem:[%s7070_s25 + $0x420] sm:$0xff] }
 0x23c   : > { %19178 = vst [vmem:[#allocation87_spill] sm:$0xff] %v11014_v42  ;;  %v11030_v7 = vmax.f32 %v19191_v45, %v19188_v50  ;;  %v19200_v19 = vld [vmem:[#allocation49_spill] sm:$0xff]  ;;  %v19202_v51 = vld [vmem:[#allocation70_spill] sm:$0xff]  ;;  %v19206_v57 = vld [vmem:[#allocation48_spill] sm:$0xff] }
 0x23d   : > { %19185 = vst [vmem:[#allocation86_spill] sm:$0xff] %v11022_v23  ;;  %v11038_v46 = vmax.f32 %v19198_v18, %v19195_v33  ;;  %v19201_v28 = vmax.f32 %v10611_v17, %v19200_v19  ;;  %v19203_v63 = vld [vmem:[#allocation146_spill] sm:$0xff]  ;;  %v19207_v45 = vld [vmem:[#allocation39_spill] sm:$0xff]  ;;  %v19213_v60 = vld [vmem:[#allocation45_spill] sm:$0xff] }
 0x23e   : > { %19192 = vst [vmem:[#allocation28_spill] sm:$0xff] %v11030_v7  ;;  %v19204_v50 = vmax.f32 %v19202_v51, %v19203_v63  ;;  %v19208_v18 = vmax.f32 %v19206_v57, %v19207_v45  ;;  %v19209_v8 = vld [vmem:[#allocation38_spill] sm:$0xff]  ;;  %v19214_v27 = vld [vmem:[#allocation147_spill] sm:$0xff]  ;;  %v19217_v23 = vld [vmem:[#allocation41_spill] sm:$0xff] }
 0x23f   : > { %19199 = vst [vmem:[#allocation27_spill] sm:$0xff] %v11038_v46  ;;  %v19210_v2 = vld [vmem:[#allocation138_spill] sm:$0xff]  ;;  %v19215_v34 = vmax.f32 %v19213_v60, %v19214_v27  ;;  %v19220_v19 = vld [vmem:[#allocation139_spill] sm:$0xff]  ;;  %v11082_v45 = vld [vmem:[%s7070_s25 + $0x428] sm:$0xff] }
 0x240   : > { %v11055_v10 = vmax.f32 %v19204_v50, %v19201_v28  ;;  %v19211_v33 = vmax.f32 %v19209_v8, %v19210_v2  ;;  %v19216_v59 = vld [vmem:[#allocation54_spill] sm:$0xff]  ;;  %v19224_v50 = vld [vmem:[#allocation47_spill] sm:$0xff]  ;;  %v11463_v31 = vld [vmem:[%s7070_s25 + $0x730] sm:$0xff] }
 0x241   : > { %v19218_v46 = vmax.f32 %v19216_v59, %v19217_v23  ;;  %v19221_v51 = vld [vmem:[#allocation142_spill] sm:$0xff]  ;;  %v19229_v23 = vld [vmem:[#allocation52_spill] sm:$0xff]  ;;  %v19244_v42 = vld [vmem:[#allocation79_spill] sm:$0xff] }
 0x242   : > { %19205 = vst [vmem:[#allocation106_spill] sm:$0xff] %v11055_v10  ;;  %v11063_v61 = vmax.f32 %v19211_v33, %v19208_v18  ;;  %v19222_v28 = vmax.f32 %v19220_v19, %v19221_v51  ;;  %v19223_v63 = vld [vmem:[#allocation46_spill] sm:$0xff]  ;;  %v11085_v18 = vld [vmem:[%s7070_s25 + $0x430] sm:$0xff]  ;;  %v11460_v0 = vld [vmem:[%s7070_s25 + $0x5a0] sm:$0xff] }
 0x243   : > { %v11071_v17 = vmax.f32 %v19218_v46, %v19215_v34  ;;  %v19225_v10 = vmax.f32 %v19223_v63, %v19224_v50  ;;  %v11088_v27 = vld [vmem:[%s7070_s25 + $0x438] sm:$0xff]  ;;  %v19227_v34 = vld [vmem:[#allocation101_spill] sm:$0xff]  ;;  %v19230_v46 = vld [vmem:[#allocation71_spill] sm:$0xff] }
 0x244   : > { %19212 = vst [vmem:[#allocation30_spill] sm:$0xff] %v11063_v61  ;;  %v19228_v59 = vmax.f32 %v10675_v26, %v19227_v34  ;;  %v19231_v8 = vmax.f32 %v19229_v23, %v19230_v46  ;;  %v19234_v33 = vld [vmem:[#allocation85_spill] sm:$0xff]  ;;  %v19237_v51 = vld [vmem:[#allocation90_spill] sm:$0xff]  ;;  %v19240_v50 = vld [vmem:[#allocation84_spill] sm:$0xff] }
 0x245   : > { %19219 = vst [vmem:[#allocation80_spill] sm:$0xff] %v11071_v17  ;;  %v11079_v57 = vmax.f32 %v19225_v10, %v19222_v28  ;;  %v19233_v10 = vld [vmem:[#allocation83_spill] sm:$0xff]  ;;  %v19236_v19 = vld [vmem:[#allocation53_spill] sm:$0xff]  ;;  %v19243_v17 = vld [vmem:[#allocation82_spill] sm:$0xff] }
 0x246   : > { %v11096_v2 = vmax.f32 %v19231_v8, %v19228_v59  ;;  %v19235_v60 = vmax.f32 %v19233_v10, %v19234_v33  ;;  %v19238_v28 = vmax.f32 %v19236_v19, %v19237_v51  ;;  %v19241_v61 = vld [vmem:[#allocation93_spill] sm:$0xff]  ;;  %v19245_v26 = vmax.f32 %v19243_v17, %v19244_v42  ;;  %v19247_v23 = vld [vmem:[#allocation92_spill] sm:$0xff]  ;;  %v19248_v46 = vld [vmem:[#allocation98_spill] sm:$0xff] }
 0x247   : > { %19226 = vst [vmem:[#allocation105_spill] sm:$0xff] %v11079_v57  ;;  %v19242_v57 = vmax.f32 %v19240_v50, %v19241_v61  ;;  %v19249_v59 = vmax.f32 %v19247_v23, %v19248_v46  ;;  %v19250_v8 = vld [vmem:[#allocation75_spill] sm:$0xff]  ;;  %v11129_v61 = vld [vmem:[%s7070_s25 + $0x450] sm:$0xff]  ;;  %v11131_v42 = vmax.f32 %v2242_v25, %v2246_v54  ;;  %v11133_v17 = vmax.f32 %v2243_v32, %v2247_v55  ;;  %v11146_v51 = vld [vmem:[%s7070_s25 + $0x468] sm:$0xff] }
 0x248   : > { %19232 = vst [vmem:[#allocation32_spill] sm:$0xff] %v11096_v2  ;;  %v11104_v63 = vmax.f32 %v19238_v28, %v19235_v60  ;;  %v19251_v2 = vld [vmem:[#allocation91_spill] sm:$0xff]  ;;  %v11126_v60 = vld [vmem:[%s7070_s25 + $0x448] sm:$0xff]  ;;  %v11150_v54 = vmax.f32 %v2250_v62, %v2254_v36  ;;  %v11152_v32 = vmax.f32 %v2251_v41, %v2255_v16  ;;  %v11154_v25 = vmax.f32 %v2252_v49, %v2256_v38  ;;  %v11162_v55 = vld [vmem:[%s7070_s25 + $0x478] sm:$0xff] }
 0x249   : > { %v11112_v34 = vmax.f32 %v19245_v26, %v19242_v57  ;;  %v19252_v7 = vmax.f32 %v19250_v8, %v19251_v2  ;;  %v11123_v33 = vld [vmem:[%s7070_s25 + $0x440] sm:$0xff]  ;;  %19254 = vst [vmem:[#allocation81_spill] sm:$0xff] %v11131_v42  ;;  %19255 = vst [vmem:[#allocation107_spill] sm:$0xff] %v11133_v17  ;;  %v11135_v57 = vmax.f32 %v2244_v12, %v2248_v58  ;;  %v11140_v2 = vld [vmem:[%s7070_s25 + $0x458] sm:$0xff] }
 0x24a   : > { %19239 = vst [vmem:[#allocation94_spill] sm:$0xff] %v11104_v63  ;;  %v11143_v19 = vld [vmem:[%s7070_s25 + $0x460] sm:$0xff]  ;;  %v1883_v50 = vld [vmem:[%s7070_s25 + $0x608] sm:$0xff]  ;;  %19258 = vst [vmem:[#allocation33_spill] sm:$0xff] %v11150_v54  ;;  %v11176_v36 = vmax.f32 %v2259_v40, %v2263_v15  ;;  %v19265_v15 = vmax.f32 %v10829_v9, %v10881_v30 }
 0x24b   : > { %19246 = vst [vmem:[#allocation31_spill] sm:$0xff] %v11112_v34  ;;  %v11120_v10 = vmax.f32 %v19252_v7, %v19249_v59  ;;  %19256 = vst [vmem:[#allocation95_spill] sm:$0xff] %v11135_v57  ;;  %v11137_v7 = vmax.f32 %v2245_v48, %v2249_v53  ;;  %v1882_v28 = vld [vmem:[%s7070_s25 + $0x600] sm:$0xff]  ;;  %v11156_v48 = vmax.f32 %v2253_v24, %v2257_v1  ;;  %v11159_v12 = vld [vmem:[%s7070_s25 + $0x470] sm:$0xff] }
 0x24c   : > { %19259 = vst [vmem:[#allocation34_spill] sm:$0xff] %v11152_v32  ;;  %19260 = vst [vmem:[#allocation97_spill] sm:$0xff] %v11154_v25  ;;  %v11165_v58 = vld [vmem:[%s7070_s25 + $0x480] sm:$0xff]  ;;  %v1884_v53 = vld [vmem:[%s7070_s25 + $0x610] sm:$0xff]  ;;  %v2266_v41 = vmax.f32 %v11003_v56, %v1882_v28  ;;  %v2267_v49 = vmax.f32 %v11006_v52, %v1883_v50  ;;  %v11174_v24 = vmax.f32 %v2258_v6, %v2262_v47 }
 0x24d   : > { %19253 = vst [vmem:[#allocation103_spill] sm:$0xff] %v11120_v10  ;;  %19257 = vst [vmem:[#allocation113_spill] sm:$0xff] %v11137_v7  ;;  %v11169_v26 = vld [vmem:[%s7070_s25 + $0x618] sm:$0xff]  ;;  %v1886_v62 = vld [vmem:[%s7070_s25 + $0x620] sm:$0xff]  ;;  %v2268_v52 = vmax.f32 %v11041_v5, %v1884_v53  ;;  %v19264_v47 = vmax.f32 %v10858_v39, %v10901_v13  ;;  %v19267_v13 = vmax.f32 %v10861_v43, %v10904_v11 }
 0x24e   : > { %19261 = vst [vmem:[#allocation110_spill] sm:$0xff] %v11156_v48  ;;  %19262 = vst [vmem:[#allocation114_spill] sm:$0xff] %v11174_v24  ;;  %v11179_v16 = vld [vmem:[%s7070_s25 + $0x488] sm:$0xff]  ;;  %v11182_v38 = vld [vmem:[%s7070_s25 + $0x490] sm:$0xff]  ;;  %v2269_v6 = vmax.f32 %v11044_v14, %v11169_v26  ;;  %v2270_v40 = vmax.f32 %v11047_v29, %v1886_v62  ;;  %v19268_v53 = vmax.f32 %v10832_v44, %v10884_v37 }
 0x24f   : > { %19263 = vst [vmem:[#allocation102_spill] sm:$0xff] %v11176_v36  ;;  %v11185_v1 = vld [vmem:[%s7070_s25 + $0x498] sm:$0xff]  ;;  %v1887_v23 = vld [vmem:[%s7070_s25 + $0x628] sm:$0xff]  ;;  %v1888_v46 = vld [vmem:[%s7070_s25 + $0x630] sm:$0xff]  ;;  %v11200_v59 = vmax.f32 %v19265_v15, %v19264_v47 }
 0x250   : > { %v1889_v56 = vld [vmem:[%s7070_s25 + $0x638] sm:$0xff]  ;;  %v11203_v8 = vld [vmem:[%s7070_s25 + $0x4a0] sm:$0xff]  ;;  %v11206_v5 = vld [vmem:[%s7070_s25 + $0x4a8] sm:$0xff]  ;;  %v2271_v39 = vmax.f32 %v11082_v45, %v1887_v23  ;;  %v2272_v30 = vmax.f32 %v11085_v18, %v1888_v46  ;;  %v11227_v26 = vmax.f32 %v19268_v53, %v19267_v13  ;;  %v11248_v11 = vmax.f32 %v2266_v41, %v2270_v40 }
 0x251   : > { %19266 = vst [vmem:[#allocation109_spill] sm:$0xff] %v11200_v59  ;;  %v11209_v28 = vld [vmem:[%s7070_s25 + $0x4b0] sm:$0xff]  ;;  %v1890_v14 = vld [vmem:[%s7070_s25 + $0x640] sm:$0xff]  ;;  %v11213_v50 = vld [vmem:[%s7070_s25 + $0x648] sm:$0xff]  ;;  %v2273_v9 = vmax.f32 %v11088_v27, %v1889_v56 }
 0x252   : > { %v11216_v29 = vld [vmem:[%s7070_s25 + $0x650] sm:$0xff]  ;;  %19269 = vst [vmem:[#allocation58_spill] sm:$0xff] %v11227_v26  ;;  %v11230_v62 = vld [vmem:[%s7070_s25 + $0x4b8] sm:$0xff]  ;;  %v11233_v47 = vld [vmem:[%s7070_s25 + $0x4c0] sm:$0xff]  ;;  %v2274_v43 = vmax.f32 %v11123_v33, %v1890_v14  ;;  %v2275_v44 = vmax.f32 %v11126_v60, %v11213_v50  ;;  %v11270_v40 = vmax.f32 %v2267_v49, %v2271_v39  ;;  %v11295_v39 = vmax.f32 %v2268_v52, %v2272_v30 }
 0x253   : > { %v11236_v45 = vld [vmem:[%s7070_s25 + $0x4c8] sm:$0xff]  ;;  %v11239_v18 = vld [vmem:[%s7070_s25 + $0x658] sm:$0xff]  ;;  %v1894_v23 = vld [vmem:[%s7070_s25 + $0x660] sm:$0xff]  ;;  %v2276_v37 = vmax.f32 %v11129_v61, %v11216_v29  ;;  %19270 = vst [vmem:[#allocation36_spill] sm:$0xff] %v11248_v11  ;;  %v11319_v30 = vmax.f32 %v2269_v6, %v2273_v9 }
 0x254   : > { %v1895_v27 = vld [vmem:[%s7070_s25 + $0x668] sm:$0xff]  ;;  %v11251_v46 = vld [vmem:[%s7070_s25 + $0x4d0] sm:$0xff]  ;;  %v11254_v56 = vld [vmem:[%s7070_s25 + $0x4d8] sm:$0xff]  ;;  %v2278_v61 = vmax.f32 %v11143_v19, %v1894_v23  ;;  %19271 = vst [vmem:[#allocation57_spill] sm:$0xff] %v11270_v40 }
 0x255   : > { %v11257_v15 = vld [vmem:[%s7070_s25 + $0x4e0] sm:$0xff]  ;;  %v1896_v13 = vld [vmem:[%s7070_s25 + $0x670] sm:$0xff]  ;;  %v11261_v33 = vld [vmem:[%s7070_s25 + $0x678] sm:$0xff]  ;;  %v2279_v41 = vmax.f32 %v11146_v51, %v1895_v27  ;;  %19272 = vst [vmem:[#allocation128_spill] sm:$0xff] %v11295_v39 }
 0x256   : > { %v11264_v14 = vld [vmem:[%s7070_s25 + $0x680] sm:$0xff]  ;;  %v11273_v50 = vld [vmem:[%s7070_s25 + $0x4e8] sm:$0xff]  ;;  %v11276_v29 = vld [vmem:[%s7070_s25 + $0x4f0] sm:$0xff]  ;;  %v2280_v19 = vmax.f32 %v11159_v12, %v1896_v13  ;;  %v2281_v51 = vmax.f32 %v11162_v55, %v11261_v33  ;;  %19273 = vst [vmem:[#allocation122_spill] sm:$0xff] %v11319_v30  ;;  %v11344_v30 = vmax.f32 %v2274_v43, %v2278_v61 }
 0x257   : > { %v11279_v53 = vld [vmem:[%s7070_s25 + $0x4f8] sm:$0xff]  ;;  %v11282_v11 = vld [vmem:[%s7070_s25 + $0x688] sm:$0xff]  ;;  %v11285_v36 = vld [vmem:[%s7070_s25 + $0x690] sm:$0xff]  ;;  %v2282_v49 = vmax.f32 %v11165_v58, %v11264_v14  ;;  %v11370_v61 = vmax.f32 %v2275_v44, %v2279_v41 }
 0x258   : > { %v11288_v60 = vld [vmem:[%s7070_s25 + $0x698] sm:$0xff]  ;;  %v11298_v23 = vld [vmem:[%s7070_s25 + $0x500] sm:$0xff]  ;;  %v11301_v27 = vld [vmem:[%s7070_s25 + $0x508] sm:$0xff]  ;;  %19275 = vst [vmem:[#allocation119_spill] sm:$0xff] %v11344_v30 }
 0x259   : > { %v11304_v40 = vld [vmem:[%s7070_s25 + $0x510] sm:$0xff]  ;;  %v1902_v26 = vld [vmem:[%s7070_s25 + $0x6a0] sm:$0xff]  ;;  %v11308_v12 = vld [vmem:[%s7070_s25 + $0x6a8] sm:$0xff]  ;;  %19276 = vst [vmem:[#allocation108_spill] sm:$0xff] %v11370_v61  ;;  %v11396_v61 = vmax.f32 %v2276_v37, %v2280_v19 }
 0x25a   : > { %v11311_v13 = vld [vmem:[%s7070_s25 + $0x6b0] sm:$0xff]  ;;  %v11322_v33 = vld [vmem:[%s7070_s25 + $0x518] sm:$0xff]  ;;  %v11325_v14 = vld [vmem:[%s7070_s25 + $0x520] sm:$0xff]  ;;  %v2286_v52 = vmax.f32 %v11203_v8, %v1902_v26  ;;  %v2287_v6 = vmax.f32 %v11206_v5, %v11308_v12 }
 0x25b   : > { %19274 = vst [vmem:[#allocation35_spill] sm:$0xff] %v11322_v33  ;;  %v11328_v39 = vld [vmem:[%s7070_s25 + $0x528] sm:$0xff]  ;;  %v11331_v24 = vld [vmem:[%s7070_s25 + $0x6b8] sm:$0xff]  ;;  %v11334_v55 = vld [vmem:[%s7070_s25 + $0x6c0] sm:$0xff]  ;;  %v2288_v9 = vmax.f32 %v11209_v28, %v11311_v13 }
 0x25c   : > { %v11337_v58 = vld [vmem:[%s7070_s25 + $0x6c8] sm:$0xff]  ;;  %v11347_v59 = vld [vmem:[%s7070_s25 + $0x530] sm:$0xff]  ;;  %v11350_v32 = vld [vmem:[%s7070_s25 + $0x538] sm:$0xff]  ;;  %19277 = vst [vmem:[#allocation127_spill] sm:$0xff] %v11396_v61 }
 0x25d   : > { %v11353_v48 = vld [vmem:[%s7070_s25 + $0x540] sm:$0xff]  ;;  %v11356_v54 = vld [vmem:[%s7070_s25 + $0x6d0] sm:$0xff]  ;;  %v11359_v8 = vld [vmem:[%s7070_s25 + $0x6d8] sm:$0xff] }
 0x25e   : > { %v11362_v5 = vld [vmem:[%s7070_s25 + $0x6e0] sm:$0xff]  ;;  %v11373_v12 = vld [vmem:[%s7070_s25 + $0x548] sm:$0xff]  ;;  %v11376_v13 = vld [vmem:[%s7070_s25 + $0x550] sm:$0xff] }
 0x25f   : > { %v11379_v30 = vld [vmem:[%s7070_s25 + $0x558] sm:$0xff]  ;;  %v11382_v25 = vld [vmem:[%s7070_s25 + $0x6e8] sm:$0xff]  ;;  %v11385_v28 = vld [vmem:[%s7070_s25 + $0x6f0] sm:$0xff]  ;;  %v2294_v41 = vmax.f32 %v11257_v15, %v11362_v5  ;;  %v19278_v5 = vmax.f32 %v11140_v2, %v11239_v18 }
 0x260   : > { %v11388_v26 = vld [vmem:[%s7070_s25 + $0x6f8] sm:$0xff]  ;;  %v11399_v17 = vld [vmem:[%s7070_s25 + $0x560] sm:$0xff]  ;;  %v11402_v7 = vld [vmem:[%s7070_s25 + $0x568] sm:$0xff]  ;;  %v2295_v15 = vmax.f32 %v11273_v50, %v11382_v25 }
 0x261   : > { %v11405_v42 = vld [vmem:[%s7070_s25 + $0x570] sm:$0xff]  ;;  %v11408_v57 = vld [vmem:[%s7070_s25 + $0x700] sm:$0xff]  ;;  %v11411_v43 = vld [vmem:[%s7070_s25 + $0x708] sm:$0xff]  ;;  %v11425_v61 = vmax.f32 %v19278_v5, %v2281_v51  ;;  %v11451_v5 = vmax.f32 %v2282_v49, %v2286_v52 }
 0x262   : > { %v11414_v44 = vld [vmem:[%s7070_s25 + $0x710] sm:$0xff]  ;;  %v11428_v63 = vld [vmem:[%s7070_s25 + $0x578] sm:$0xff]  ;;  %v11431_v10 = vld [vmem:[%s7070_s25 + $0x580] sm:$0xff] }
 0x263   : > { %19279 = vst [vmem:[#allocation116_spill] sm:$0xff] %v11425_v61  ;;  %v11434_v25 = vld [vmem:[%s7070_s25 + $0x588] sm:$0xff]  ;;  %v11437_v50 = vld [vmem:[%s7070_s25 + $0x718] sm:$0xff]  ;;  %v11440_v37 = vld [vmem:[%s7070_s25 + $0x720] sm:$0xff] }
 0x264   : > { %19280 = vst [vmem:[#allocation120_spill] sm:$0xff] %v11437_v50  ;;  %v11443_v34 = vld [vmem:[%s7070_s25 + $0x728] sm:$0xff]  ;;  %19281 = vst [vmem:[#allocation131_spill] sm:$0xff] %v11451_v5  ;;  %v11454_v19 = vld [vmem:[%s7070_s25 + $0x590] sm:$0xff]  ;;  %v2302_v49 = vmax.f32 %v11325_v14, %v11440_v37  ;;  %v19282_v5 = vmax.f32 %v11179_v16, %v11282_v11  ;;  %v2304_v16 = vmax.f32 %v11347_v59, %v11463_v31 }
 0x265   : > { %v11457_v61 = vld [vmem:[%s7070_s25 + $0x598] sm:$0xff]  ;;  %v11469_v18 = vld [vmem:[%s7070_s25 + $0x740] sm:$0xff]  ;;  %v11483_v3 = vld [vmem:[%s7070_s25 + $0x5a8] sm:$0xff] }
 0x266   : > { %v11466_v2 = vld [vmem:[%s7070_s25 + $0x738] sm:$0xff]  ;;  %v11480_v22 = vmax.f32 %v19282_v5, %v2287_v6  ;;  %v11486_v35 = vld [vmem:[%s7070_s25 + $0x5b0] sm:$0xff]  ;;  %v11492_v20 = vld [vmem:[%s7070_s25 + $0x748] sm:$0xff]  ;;  %v2306_v6 = vmax.f32 %v11353_v48, %v11469_v18  ;;  %v19284_v5 = vmax.f32 %v11182_v38, %v11285_v36 }
 0x267   : > { %v11489_v51 = vld [vmem:[%s7070_s25 + $0x5b8] sm:$0xff]  ;;  %v11495_v14 = vld [vmem:[%s7070_s25 + $0x750] sm:$0xff]  ;;  %v2305_v11 = vmax.f32 %v11350_v32, %v11466_v2  ;;  %v11515_v4 = vld [vmem:[%s7070_s25 + $0x5c8] sm:$0xff]  ;;  %v2307_v48 = vmax.f32 %v11373_v12, %v11492_v20  ;;  %v19287_v2 = vmax.f32 %v11185_v1, %v11288_v60  ;;  %v19289_v1 = vmax.f32 %v11233_v47, %v11334_v55 }
 0x268   : > { %19283 = vst [vmem:[#allocation121_spill] sm:$0xff] %v11480_v22  ;;  %v11498_v37 = vld [vmem:[%s7070_s25 + $0x758] sm:$0xff]  ;;  %v11509_v52 = vmax.f32 %v19284_v5, %v2288_v9  ;;  %v11512_v22 = vld [vmem:[%s7070_s25 + $0x5c0] sm:$0xff]  ;;  %v11518_v31 = vld [vmem:[%s7070_s25 + $0x5d0] sm:$0xff]  ;;  %v2308_v36 = vmax.f32 %v11376_v13, %v11495_v14  ;;  %v19286_v9 = vmax.f32 %v11230_v62, %v11331_v24 }
 0x269   : > { %v1926_v59 = vld [vmem:[%s7070_s25 + $0x760] sm:$0xff]  ;;  %v1927_v21 = vld [vmem:[%s7070_s25 + $0x768] sm:$0xff]  ;;  %v1928_v32 = vld [vmem:[%s7070_s25 + $0x770] sm:$0xff]  ;;  %v2309_v38 = vmax.f32 %v11379_v30, %v11498_v37  ;;  %v11549_v62 = vmax.f32 %v19289_v1, %v2294_v41 }
 0x26a   : > { %19285 = vst [vmem:[#allocation135_spill] sm:$0xff] %v11509_v52  ;;  %v11535_v18 = vmax.f32 %v19287_v2, %v19286_v9  ;;  %v1877_v5 = vld [vmem:[%s7070_s25 + $0x5d8] sm:$0xff]  ;;  %v1878_v52 = vld [vmem:[%s7070_s25 + $0x5e0] sm:$0xff]  ;;  %v1879_v20 = vld [vmem:[%s7070_s25 + $0x5e8] sm:$0xff]  ;;  %v2310_v30 = vmax.f32 %v11399_v17, %v1926_v59  ;;  %v2311_v14 = vmax.f32 %v11402_v7, %v1927_v21  ;;  %v2312_v24 = vmax.f32 %v11405_v42, %v1928_v32 }
 0x26b   : > { %v1929_v12 = vld [vmem:[%s7070_s25 + $0x778] sm:$0xff]  ;;  %v1930_v50 = vld [vmem:[%s7070_s25 + $0x780] sm:$0xff]  ;;  %v1931_v13 = vld [vmem:[%s7070_s25 + $0x788] sm:$0xff]  ;;  %v19290_v42 = vmax.f32 %v11236_v45, %v11337_v58  ;;  %v19292_v45 = vmax.f32 %v11251_v46, %v11356_v54 }
 0x26c   : > { %19288 = vst [vmem:[#allocation129_spill] sm:$0xff] %v11535_v18  ;;  %v1880_v60 = vld [vmem:[%s7070_s25 + $0x5f0] sm:$0xff]  ;;  %v1881_v37 = vld [vmem:[%s7070_s25 + $0x5f8] sm:$0xff]  ;;  %v1934_v18 = vld [vmem:[%s7070_s25 + $0x7a0] sm:$0xff]  ;;  %v2313_v33 = vmax.f32 %v11428_v63, %v1929_v12  ;;  %v2314_v17 = vmax.f32 %v11431_v10, %v1930_v50  ;;  %v2315_v21 = vmax.f32 %v11434_v25, %v1931_v13  ;;  %v19291_v10 = vmax.f32 %v11276_v29, %v11385_v28 }
 0x26d   : > { %v1932_v9 = vld [vmem:[%s7070_s25 + $0x790] sm:$0xff]  ;;  %v1933_v2 = vld [vmem:[%s7070_s25 + $0x798] sm:$0xff]  ;;  %v11562_v7 = vmax.f32 %v19290_v42, %v2295_v15  ;;  %v1935_v47 = vld [vmem:[%s7070_s25 + $0x7a8] sm:$0xff]  ;;  %v2318_v63 = vmax.f32 %v11460_v0, %v1934_v18  ;;  %v19293_v0 = vmax.f32 %v11279_v53, %v11388_v26  ;;  %v19294_v29 = vmax.f32 %v11254_v56, %v11359_v8 }
 0x26e   : > { %v1936_v55 = vld [vmem:[%s7070_s25 + $0x7b0] sm:$0xff]  ;;  %v1937_v41 = vld [vmem:[%s7070_s25 + $0x7b8] sm:$0xff]  ;;  %v2316_v59 = vmax.f32 %v11454_v19, %v1932_v9  ;;  %v2317_v32 = vmax.f32 %v11457_v61, %v1933_v2  ;;  %v11576_v58 = vmax.f32 %v19292_v45, %v19291_v10  ;;  %v1938_v15 = vld [vmem:[%s7070_s25 + $0x7c0] sm:$0xff]  ;;  %v2319_v12 = vmax.f32 %v11483_v3, %v1935_v47 }
 0x26f   : > { %v1939_v25 = vld [vmem:[%s7070_s25 + $0x7c8] sm:$0xff]  ;;  %v1940_v50 = vld [vmem:[%s7070_s25 + $0x7d0] sm:$0xff]  ;;  %v2320_v19 = vmax.f32 %v11486_v35, %v1936_v55  ;;  %v2321_v61 = vmax.f32 %v11489_v51, %v1937_v41  ;;  %v11590_v54 = vmax.f32 %v19294_v29, %v19293_v0  ;;  %v1941_v46 = vld [vmem:[%s7070_s25 + $0x7d8] sm:$0xff]  ;;  %v2322_v13 = vmax.f32 %v11512_v22, %v1938_v15 }
 0x270   : > { %v1942_v28 = vld [vmem:[%s7070_s25 + $0x7e0] sm:$0xff]  ;;  %v1943_v18 = vld [vmem:[%s7070_s25 + $0x7e8] sm:$0xff]  ;;  %v2323_v1 = vmax.f32 %v11515_v4, %v1939_v25  ;;  %v2324_v3 = vmax.f32 %v11518_v31, %v1940_v50  ;;  %v19295_v35 = vmax.f32 %v11298_v23, %v11408_v57  ;;  %v1944_v53 = vld [vmem:[%s7070_s25 + $0x7f0] sm:$0xff]  ;;  %v2325_v9 = vmax.f32 %v1877_v5, %v1941_v46 }
 0x271   : > { %v1945_v26 = vld [vmem:[%s7070_s25 + $0x7f8] sm:$0xff]  ;;  %v2326_v56 = vmax.f32 %v1878_v52, %v1942_v28  ;;  %v2327_v8 = vmax.f32 %v1879_v20, %v1943_v18  ;;  %v19296_v2 = vmax.f32 %v11328_v39, %v11443_v34  ;;  %v19297_v22 = vmax.f32 %v11301_v27, %v11411_v43  ;;  %v19300_v47 = vld [vmem:[#allocation120_spill] sm:$0xff]  ;;  %v19302_v25 = vld [vmem:[#allocation117_spill] sm:$0xff] }
 0x272   : > { %v11601_v51 = vmax.f32 %v19295_v35, %v2302_v49  ;;  %v2328_v4 = vmax.f32 %v1880_v60, %v1944_v53  ;;  %v2329_v31 = vmax.f32 %v1881_v37, %v1945_v26  ;;  %v19298_v57 = vmax.f32 %v11304_v40, %v11414_v44  ;;  %v19299_v49 = vld [vmem:[#allocation35_spill] sm:$0xff]  ;;  %v19303_v40 = vld [vmem:[#allocation100_spill] sm:$0xff]  ;;  %v19306_v29 = vld [vmem:[#allocation130_spill] sm:$0xff] }
 0x273   : > { %v11611_v42 = vmax.f32 %v19297_v22, %v19296_v2  ;;  %v19301_v5 = vmax.f32 %v19299_v49, %v19300_v47  ;;  %v2510_v20 = vmax.f32 %v2306_v6, %v2310_v30  ;;  %v2511_v55 = vmax.f32 %v2307_v48, %v2311_v14  ;;  %v19305_v50 = vld [vmem:[#allocation99_spill] sm:$0xff]  ;;  %v19308_v48 = vld [vmem:[#allocation88_spill] sm:$0xff]  ;;  %v19323_v53 = vld [vmem:[#allocation81_spill] sm:$0xff] }
 0x274   : > { %v11616_v23 = vmax.f32 %v19298_v57, %v2304_v16  ;;  %v2512_v41 = vmax.f32 %v2308_v36, %v2312_v24  ;;  %v2513_v34 = vmax.f32 %v2309_v38, %v2313_v33  ;;  %v2514_v39 = vmax.f32 %v2314_v17, %v2318_v63  ;;  %v19304_v16 = vld [vmem:[#allocation118_spill] sm:$0xff]  ;;  %v19309_v36 = vld [vmem:[#allocation111_spill] sm:$0xff]  ;;  %v19310_v38 = vld [vmem:[#allocation28_spill] sm:$0xff] }
 0x275   : > { %v2509_v52 = vmax.f32 %v19301_v5, %v2305_v11  ;;  %v2515_v10 = vmax.f32 %v2315_v21, %v2319_v12  ;;  %v2516_v27 = vmax.f32 %v2316_v59, %v2320_v19  ;;  %v2517_v43 = vmax.f32 %v2317_v32, %v2321_v61  ;;  %v19307_v11 = vld [vmem:[#allocation124_spill] sm:$0xff]  ;;  %v19311_v30 = vld [vmem:[#allocation87_spill] sm:$0xff]  ;;  %v19313_v17 = vld [vmem:[#allocation86_spill] sm:$0xff] }
 0x276   : > { %v2518_v45 = vmax.f32 %v2322_v13, %v2326_v56  ;;  %v2519_v60 = vmax.f32 %v2323_v1, %v2327_v8  ;;  %v2520_v37 = vmax.f32 %v2324_v3, %v2328_v4  ;;  %v2521_v15 = vmax.f32 %v2325_v9, %v2329_v31  ;;  %v19312_v24 = vld [vmem:[#allocation27_spill] sm:$0xff]  ;;  %v19314_v59 = vld [vmem:[#allocation80_spill] sm:$0xff]  ;;  %v19315_v32 = vld [vmem:[#allocation106_spill] sm:$0xff] }
 0x277   : > { %v2586_v44 = vmax.f32 %v19303_v40, %v19302_v25  ;;  %v2587_v0 = vmax.f32 %v19305_v50, %v19304_v16  ;;  %v2588_v6 = vmax.f32 %v19307_v11, %v19306_v29  ;;  %v2589_v33 = vmax.f32 %v19309_v36, %v19308_v48  ;;  %v19316_v12 = vld [vmem:[#allocation105_spill] sm:$0xff]  ;;  %v19317_v19 = vld [vmem:[#allocation30_spill] sm:$0xff]  ;;  %v19318_v46 = vld [vmem:[#allocation31_spill] sm:$0xff] }
 0x278   : > { %v2590_v14 = vmax.f32 %v19311_v30, %v19310_v38  ;;  %v2591_v21 = vmax.f32 %v19313_v17, %v19312_v24  ;;  %v2592_v63 = vmax.f32 %v19315_v32, %v19314_v59  ;;  %v2593_v61 = vmax.f32 %v19317_v19, %v19316_v12  ;;  %v19319_v28 = vld [vmem:[#allocation32_spill] sm:$0xff]  ;;  %v19320_v13 = vld [vmem:[#allocation103_spill] sm:$0xff]  ;;  %v19321_v1 = vld [vmem:[#allocation94_spill] sm:$0xff] }
 0x279   : > { %v2594_v18 = vmax.f32 %v19319_v28, %v19318_v46  ;;  %v2595_v3 = vmax.f32 %v19321_v1, %v19320_v13  ;;  %v19322_v35 = vld [vmem:[#allocation95_spill] sm:$0xff]  ;;  %v19324_v9 = vld [vmem:[#allocation113_spill] sm:$0xff]  ;;  %v19328_v31 = vld [vmem:[#allocation110_spill] sm:$0xff] }
 0x27a   : > { %v2596_v26 = vmax.f32 %v19323_v53, %v19322_v35  ;;  %v19325_v56 = vld [vmem:[#allocation107_spill] sm:$0xff]  ;;  %v19326_v2 = vld [vmem:[#allocation97_spill] sm:$0xff]  ;;  %v19329_v57 = vld [vmem:[#allocation34_spill] sm:$0xff] }
 0x27b   : > { %v2597_v8 = vmax.f32 %v19325_v56, %v19324_v9  ;;  %v19327_v22 = vld [vmem:[#allocation33_spill] sm:$0xff]  ;;  %v2599_v49 = vmax.f32 %v19329_v57, %v19328_v31  ;;  %v19331_v5 = vld [vmem:[#allocation114_spill] sm:$0xff]  ;;  %v19334_v29 = vld [vmem:[#allocation128_spill] sm:$0xff]  ;;  %v2608_v9 = vmax.f32 %v11549_v62, %v11576_v58  ;;  %v2609_v56 = vmax.f32 %v11562_v7, %v11590_v54 }
 0x27c   : > { %v2598_v4 = vmax.f32 %v19327_v22, %v19326_v2  ;;  %v19330_v47 = vld [vmem:[#allocation109_spill] sm:$0xff]  ;;  %v19332_v40 = vld [vmem:[#allocation58_spill] sm:$0xff]  ;;  %v19335_v11 = vld [vmem:[#allocation36_spill] sm:$0xff]  ;;  %v2610_v2 = vmax.f32 %v11601_v51, %v11616_v23  ;;  %v2611_v22 = vmax.f32 %v11611_v42, %v2509_v52  ;;  %v2612_v31 = vmax.f32 %v2510_v20, %v2512_v41 }
 0x27d   : > { %v2600_v25 = vmax.f32 %v19331_v5, %v19330_v47  ;;  %v19333_v16 = vld [vmem:[#allocation102_spill] sm:$0xff]  ;;  %v2602_v48 = vmax.f32 %v19335_v11, %v19334_v29  ;;  %v19337_v38 = vld [vmem:[#allocation57_spill] sm:$0xff]  ;;  %v19338_v24 = vld [vmem:[#allocation127_spill] sm:$0xff]  ;;  %v2613_v57 = vmax.f32 %v2511_v55, %v2513_v34  ;;  %v2614_v47 = vmax.f32 %v2514_v39, %v2516_v27 }
 0x27e   : > { %v2601_v50 = vmax.f32 %v19333_v16, %v19332_v40  ;;  %v19336_v36 = vld [vmem:[#allocation122_spill] sm:$0xff]  ;;  %v19339_v17 = vld [vmem:[#allocation119_spill] sm:$0xff]  ;;  %v19340_v32 = vld [vmem:[#allocation116_spill] sm:$0xff]  ;;  %v2615_v5 = vmax.f32 %v2515_v10, %v2517_v43  ;;  %v2616_v40 = vmax.f32 %v2518_v45, %v2520_v37  ;;  %v2617_v16 = vmax.f32 %v2519_v60, %v2521_v15 }
 0x27f   : > { %v2603_v30 = vmax.f32 %v19337_v38, %v19336_v36  ;;  %v2604_v59 = vmax.f32 %v19339_v17, %v19338_v24  ;;  %v19341_v12 = vld [vmem:[#allocation108_spill] sm:$0xff]  ;;  %v19342_v46 = vld [vmem:[#allocation135_spill] sm:$0xff]  ;;  %v19344_v1 = vld [vmem:[#allocation129_spill] sm:$0xff]  ;;  %v6293_v29 = vpack.c.bf16 %v2587_v0, %v2586_v44  ;;  %v6294_v62 = vpack.c.bf16 %v2589_v33, %v2588_v6 }
 0x280   : > { %v2605_v19 = vmax.f32 %v19341_v12, %v19340_v32  ;;  %v19343_v28 = vld [vmem:[#allocation131_spill] sm:$0xff]  ;;  %v19345_v35 = vld [vmem:[#allocation121_spill] sm:$0xff]  ;;  %v6295_v58 = vpack.c.bf16 %v2591_v21, %v2590_v14  ;;  %v6296_v11 = vpack.c.bf16 %v2593_v61, %v2592_v63  ;;  %v6297_v7 = vpack.c.bf16 %v2595_v3, %v2594_v18  ;;  %v11686_v43 = vld [vmem:[%s7070_s25 + $0x808] sm:$0xff] }
 0x281   : > { %v2606_v13 = vmax.f32 %v19343_v28, %v19342_v46  ;;  %v2607_v53 = vmax.f32 %v19345_v35, %v19344_v1  ;;  %v6298_v54 = vpack.c.bf16 %v2597_v8, %v2596_v26  ;;  %v6299_v51 = vpack.c.bf16 %v2599_v49, %v2598_v4  ;;  %2906 = vst [vmem:[%s8679_s1 + $0x8] sm:$0xff] %v6293_v29  ;;  %v1946_v27 = vld [vmem:[%s7070_s25 + $0x800] sm:$0xff]  ;;  %v11693_v45 = vld [vmem:[%s7070_s25 + $0x810] sm:$0xff]  ;;  %v1951_v37 = vld [vmem:[%s7070_s25 + $0x828] sm:$0xff] }
 0x282   : > { %v6300_v42 = vpack.c.bf16 %v2601_v50, %v2600_v25  ;;  %v6301_v23 = vpack.c.bf16 %v2603_v30, %v2602_v48  ;;  %v6302_v52 = vpack.c.bf16 %v2605_v19, %v2604_v59  ;;  %v6304_v55 = vpack.c.bf16 %v2609_v56, %v2608_v9  ;;  %2907 = vst [vmem:[%s8679_s1 + $0x2c] sm:$0xff] %v6294_v62  ;;  %v1950_v60 = vld [vmem:[%s7070_s25 + $0x820] sm:$0xff]  ;;  %v11698_v15 = vld [vmem:[%s7070_s25 + $0x818] sm:$0xff]  ;;  %v11701_v44 = vld [vmem:[%s7070_s25 + $0x830] sm:$0xff] }
 0x283   : > { %v6303_v20 = vpack.c.bf16 %v2607_v53, %v2606_v13  ;;  %2908 = vst [vmem:[%s8679_s1 + $0x50] sm:$0xff] %v6295_v58  ;;  %2909 = vst [vmem:[%s8679_s1 + $0x74] sm:$0xff] %v6296_v11  ;;  %v6305_v41 = vpack.c.bf16 %v2611_v22, %v2610_v2  ;;  %v6306_v34 = vpack.c.bf16 %v2613_v57, %v2612_v31  ;;  %v11704_v0 = vld [vmem:[%s7070_s25 + $0x838] sm:$0xff]  ;;  %v11707_v6 = vld [vmem:[%s7070_s25 + $0x840] sm:$0xff] }
 0x284   : > { %v6307_v39 = vpack.c.bf16 %v2615_v5, %v2614_v47  ;;  %v6308_v10 = vpack.c.bf16 %v2617_v16, %v2616_v40  ;;  %2910 = vst [vmem:[%s8679_s1 + $0x98] sm:$0xff] %v6297_v7  ;;  %2911 = vst [vmem:[%s8679_s1 + $0xbc] sm:$0xff] %v6298_v54  ;;  %v11710_v33 = vld [vmem:[%s7070_s25 + $0x848] sm:$0xff]  ;;  %v11713_v14 = vld [vmem:[%s7070_s25 + $0x850] sm:$0xff] }
 0x285   : > { %2912 = vst [vmem:[%s8679_s1 + $0xe0] sm:$0xff] %v6299_v51  ;;  %2913 = vst [vmem:[%s8679_s1 + $0x104] sm:$0xff] %v6300_v42  ;;  %v11716_v21 = vld [vmem:[%s7070_s25 + $0x858] sm:$0xff]  ;;  %v11719_v63 = vld [vmem:[%s7070_s25 + $0x860] sm:$0xff] }
 0x286   : > { %2914 = vst [vmem:[%s8679_s1 + $0x128] sm:$0xff] %v6301_v23  ;;  %2915 = vst [vmem:[%s8679_s1 + $0x14c] sm:$0xff] %v6302_v52  ;;  %v11722_v61 = vld [vmem:[%s7070_s25 + $0x868] sm:$0xff]  ;;  %v11725_v18 = vld [vmem:[%s7070_s25 + $0x870] sm:$0xff] }
 0x287   : > { %2916 = vst [vmem:[%s8679_s1 + $0x170] sm:$0xff] %v6303_v20  ;;  %2917 = vst [vmem:[%s8679_s1 + $0x194] sm:$0xff] %v6304_v55  ;;  %v2010_v3 = vld [vmem:[%s7070_s25 + $0xa00] sm:$0xff]  ;;  %v2011_v26 = vld [vmem:[%s7070_s25 + $0xa08] sm:$0xff] }
 0x288   : > { %2918 = vst [vmem:[%s8679_s1 + $0x1b8] sm:$0xff] %v6305_v41  ;;  %2919 = vst [vmem:[%s8679_s1 + $0x1dc] sm:$0xff] %v6306_v34  ;;  %v2012_v8 = vld [vmem:[%s7070_s25 + $0xa10] sm:$0xff]  ;;  %v11731_v4 = vld [vmem:[%s7070_s25 + $0x878] sm:$0xff]  ;;  %v2330_v38 = vmax.f32 %v1946_v27, %v2010_v3  ;;  %v2331_v30 = vmax.f32 %v11686_v43, %v2011_v26 }
 0x289   : > { %2920 = vst [vmem:[%s8679_s1 + $0x200] sm:$0xff] %v6307_v39  ;;  %2921 = vst [vmem:[%s8679_s1 + $0x224] sm:$0xff] %v6308_v10  ;;  %v11734_v49 = vld [vmem:[%s7070_s25 + $0x880] sm:$0xff]  ;;  %v11737_v25 = vld [vmem:[%s7070_s25 + $0x888] sm:$0xff]  ;;  %v2332_v46 = vmax.f32 %v11693_v45, %v2012_v8 }
 0x28a   : > { %v11740_v50 = vld [vmem:[%s7070_s25 + $0xa18] sm:$0xff]  ;;  %v2014_v48 = vld [vmem:[%s7070_s25 + $0xa20] sm:$0xff]  ;;  %v2015_v36 = vld [vmem:[%s7070_s25 + $0xa28] sm:$0xff] }
 0x28b   : > { %v11746_v24 = vld [vmem:[%s7070_s25 + $0x890] sm:$0xff]  ;;  %v11749_v17 = vld [vmem:[%s7070_s25 + $0x898] sm:$0xff]  ;;  %v11752_v59 = vld [vmem:[%s7070_s25 + $0x8a0] sm:$0xff]  ;;  %v2334_v28 = vmax.f32 %v1950_v60, %v2014_v48  ;;  %v2335_v13 = vmax.f32 %v1951_v37, %v2015_v36  ;;  %v2333_v22 = vmax.f32 %v11698_v15, %v11740_v50 }
 0x28c   : > { %v2016_v32 = vld [vmem:[%s7070_s25 + $0xa30] sm:$0xff]  ;;  %v2017_v12 = vld [vmem:[%s7070_s25 + $0xa38] sm:$0xff]  ;;  %v11757_v19 = vld [vmem:[%s7070_s25 + $0xa40] sm:$0xff] }
 0x28d   : > { %v11761_v1 = vld [vmem:[%s7070_s25 + $0x8a8] sm:$0xff]  ;;  %v11764_v35 = vld [vmem:[%s7070_s25 + $0x8b0] sm:$0xff]  ;;  %v11767_v53 = vld [vmem:[%s7070_s25 + $0x8b8] sm:$0xff]  ;;  %v2336_v31 = vmax.f32 %v11701_v44, %v2016_v32  ;;  %v2337_v57 = vmax.f32 %v11704_v0, %v2017_v12  ;;  %v2338_v47 = vmax.f32 %v11707_v6, %v11757_v19  ;;  %v11804_v51 = vmax.f32 %v2330_v38, %v2334_v28 }
 0x28e   : > { %v11770_v9 = vld [vmem:[%s7070_s25 + $0xa48] sm:$0xff]  ;;  %v11773_v56 = vld [vmem:[%s7070_s25 + $0xa50] sm:$0xff]  ;;  %v11776_v2 = vld [vmem:[%s7070_s25 + $0xa58] sm:$0xff]  ;;  %v11828_v27 = vmax.f32 %v2331_v30, %v2335_v13 }
 0x28f   : > { %v11785_v5 = vld [vmem:[%s7070_s25 + $0x8c0] sm:$0xff]  ;;  %v11788_v40 = vld [vmem:[%s7070_s25 + $0x8c8] sm:$0xff]  ;;  %v11791_v16 = vld [vmem:[%s7070_s25 + $0x8d0] sm:$0xff]  ;;  %v2339_v11 = vmax.f32 %v11710_v33, %v11770_v9  ;;  %v2340_v7 = vmax.f32 %v11713_v14, %v11773_v56  ;;  %v2341_v54 = vmax.f32 %v11716_v21, %v11776_v2  ;;  %19346 = vst [vmem:[#allocation112_spill] sm:$0xff] %v11804_v51  ;;  %v11854_v14 = vmax.f32 %v2332_v46, %v2336_v31 }
 0x290   : > { %v2022_v29 = vld [vmem:[%s7070_s25 + $0xa60] sm:$0xff]  ;;  %v2023_v62 = vld [vmem:[%s7070_s25 + $0xa68] sm:$0xff]  ;;  %v11796_v58 = vld [vmem:[%s7070_s25 + $0xa70] sm:$0xff]  ;;  %19347 = vst [vmem:[#allocation96_spill] sm:$0xff] %v11828_v27  ;;  %v11880_v48 = vmax.f32 %v2333_v22, %v2337_v57 }
 0x291   : > { %v11807_v42 = vld [vmem:[%s7070_s25 + $0x8d8] sm:$0xff]  ;;  %v11810_v23 = vld [vmem:[%s7070_s25 + $0x8e0] sm:$0xff]  ;;  %v11813_v52 = vld [vmem:[%s7070_s25 + $0x8e8] sm:$0xff]  ;;  %v2342_v34 = vmax.f32 %v11719_v63, %v2022_v29  ;;  %v2343_v39 = vmax.f32 %v11722_v61, %v2023_v62  ;;  %v2344_v10 = vmax.f32 %v11725_v18, %v11796_v58  ;;  %19348 = vst [vmem:[#allocation37_spill] sm:$0xff] %v11854_v14 }
 0x292   : > { %v11816_v20 = vld [vmem:[%s7070_s25 + $0xa78] sm:$0xff]  ;;  %v11819_v55 = vld [vmem:[%s7070_s25 + $0xa80] sm:$0xff]  ;;  %v11822_v41 = vld [vmem:[%s7070_s25 + $0xa88] sm:$0xff]  ;;  %19351 = vst [vmem:[#allocation115_spill] sm:$0xff] %v11880_v48 }
 0x293   : > { %v11831_v43 = vld [vmem:[%s7070_s25 + $0x8f0] sm:$0xff]  ;;  %v11834_v45 = vld [vmem:[%s7070_s25 + $0x8f8] sm:$0xff]  ;;  %v11837_v60 = vld [vmem:[%s7070_s25 + $0x900] sm:$0xff]  ;;  %v2345_v0 = vmax.f32 %v11731_v4, %v11816_v20  ;;  %v2346_v6 = vmax.f32 %v11734_v49, %v11819_v55  ;;  %v11906_v13 = vmax.f32 %v2338_v47, %v2342_v34  ;;  %v11932_v62 = vmax.f32 %v2339_v11, %v2343_v39 }
 0x294   : > { %v11840_v37 = vld [vmem:[%s7070_s25 + $0xa90] sm:$0xff]  ;;  %v11843_v15 = vld [vmem:[%s7070_s25 + $0xa98] sm:$0xff]  ;;  %v11846_v44 = vld [vmem:[%s7070_s25 + $0xaa0] sm:$0xff]  ;;  %v11958_v29 = vmax.f32 %v2340_v7, %v2344_v10 }
 0x295   : > { %v11857_v63 = vld [vmem:[%s7070_s25 + $0x908] sm:$0xff]  ;;  %v11860_v61 = vld [vmem:[%s7070_s25 + $0x910] sm:$0xff]  ;;  %v11863_v18 = vld [vmem:[%s7070_s25 + $0x918] sm:$0xff]  ;;  %v2350_v50 = vmax.f32 %v11752_v59, %v11846_v44  ;;  %19352 = vst [vmem:[#allocation40_spill] sm:$0xff] %v11906_v13  ;;  %v11987_v39 = vmax.f32 %v2341_v54, %v2345_v0 }
 0x296   : > { %19349 = vst [vmem:[#allocation123_spill] sm:$0xff] %v11860_v61  ;;  %19350 = vst [vmem:[#allocation104_spill] sm:$0xff] %v11863_v18  ;;  %v11866_v3 = vld [vmem:[%s7070_s25 + $0xaa8] sm:$0xff]  ;;  %v11869_v26 = vld [vmem:[%s7070_s25 + $0xab0] sm:$0xff] }
 0x297   : > { %v11872_v8 = vld [vmem:[%s7070_s25 + $0xab8] sm:$0xff]  ;;  %v11883_v36 = vld [vmem:[%s7070_s25 + $0x920] sm:$0xff]  ;;  %v11886_v38 = vld [vmem:[%s7070_s25 + $0x928] sm:$0xff]  ;;  %v2351_v59 = vmax.f32 %v11761_v1, %v11866_v3  ;;  %v2352_v46 = vmax.f32 %v11764_v35, %v11869_v26  ;;  %19353 = vst [vmem:[#allocation136_spill] sm:$0xff] %v11932_v62  ;;  %v12013_v0 = vmax.f32 %v2346_v6, %v2350_v50 }
 0x298   : > { %v11889_v30 = vld [vmem:[%s7070_s25 + $0x930] sm:$0xff]  ;;  %v11892_v32 = vld [vmem:[%s7070_s25 + $0xac0] sm:$0xff]  ;;  %v11895_v12 = vld [vmem:[%s7070_s25 + $0xac8] sm:$0xff]  ;;  %19354 = vst [vmem:[#allocation126_spill] sm:$0xff] %v11958_v29 }
 0x299   : > { %v11898_v19 = vld [vmem:[%s7070_s25 + $0xad0] sm:$0xff]  ;;  %v11909_v9 = vld [vmem:[%s7070_s25 + $0x938] sm:$0xff]  ;;  %v11912_v56 = vld [vmem:[%s7070_s25 + $0x940] sm:$0xff]  ;;  %19357 = vst [vmem:[#allocation44_spill] sm:$0xff] %v11987_v39 }
 0x29a   : > { %v11915_v22 = vld [vmem:[%s7070_s25 + $0x948] sm:$0xff]  ;;  %v11918_v31 = vld [vmem:[%s7070_s25 + $0xad8] sm:$0xff]  ;;  %v11921_v1 = vld [vmem:[%s7070_s25 + $0xae0] sm:$0xff]  ;;  %19358 = vst [vmem:[#allocation125_spill] sm:$0xff] %v12013_v0  ;;  %v19359_v0 = vmax.f32 %v11737_v25, %v11822_v41 }
 0x29b   : > { %v11924_v35 = vld [vmem:[%s7070_s25 + $0xae8] sm:$0xff]  ;;  %v11935_v58 = vld [vmem:[%s7070_s25 + $0x950] sm:$0xff]  ;;  %v11938_v20 = vld [vmem:[%s7070_s25 + $0x958] sm:$0xff]  ;;  %v2358_v11 = vmax.f32 %v11810_v23, %v11921_v1 }
 0x29c   : > { %v11941_v55 = vld [vmem:[%s7070_s25 + $0x960] sm:$0xff]  ;;  %v11944_v34 = vld [vmem:[%s7070_s25 + $0xaf0] sm:$0xff]  ;;  %v11947_v44 = vld [vmem:[%s7070_s25 + $0xaf8] sm:$0xff]  ;;  %v12042_v48 = vmax.f32 %v19359_v0, %v2351_v59  ;;  %v19361_v0 = vmax.f32 %v11746_v24, %v11840_v37 }
 0x29d   : > { %v11950_v3 = vld [vmem:[%s7070_s25 + $0xb00] sm:$0xff]  ;;  %v11961_v47 = vld [vmem:[%s7070_s25 + $0x968] sm:$0xff]  ;;  %v11964_v57 = vld [vmem:[%s7070_s25 + $0x970] sm:$0xff] }
 0x29e   : > { %v11967_v49 = vld [vmem:[%s7070_s25 + $0x978] sm:$0xff]  ;;  %v11970_v28 = vld [vmem:[%s7070_s25 + $0xb08] sm:$0xff]  ;;  %v11973_v26 = vld [vmem:[%s7070_s25 + $0xb10] sm:$0xff]  ;;  %19360 = vst [vmem:[#allocation42_spill] sm:$0xff] %v12042_v48  ;;  %v12071_v50 = vmax.f32 %v19361_v0, %v2352_v46  ;;  %v19363_v46 = vmax.f32 %v11767_v53, %v11872_v8 }
 0x29f   : > { %19355 = vst [vmem:[#allocation134_spill] sm:$0xff] %v11973_v26  ;;  %v11976_v23 = vld [vmem:[%s7070_s25 + $0xb18] sm:$0xff]  ;;  %v11990_v4 = vld [vmem:[%s7070_s25 + $0x980] sm:$0xff]  ;;  %v11993_v33 = vld [vmem:[%s7070_s25 + $0x988] sm:$0xff] }
 0x2a0   : > { %19356 = vst [vmem:[#allocation50_spill] sm:$0xff] %v11976_v23  ;;  %v11996_v1 = vld [vmem:[%s7070_s25 + $0x990] sm:$0xff]  ;;  %v11999_v62 = vld [vmem:[%s7070_s25 + $0xb20] sm:$0xff]  ;;  %v12002_v7 = vld [vmem:[%s7070_s25 + $0xb28] sm:$0xff] }
 0x2a1   : > { %v12005_v13 = vld [vmem:[%s7070_s25 + $0xb30] sm:$0xff]  ;;  %v12016_v10 = vld [vmem:[%s7070_s25 + $0x998] sm:$0xff]  ;;  %v12019_v39 = vld [vmem:[%s7070_s25 + $0x9a0] sm:$0xff]  ;;  %v2366_v54 = vmax.f32 %v11883_v36, %v11999_v62  ;;  %19362 = vst [vmem:[#allocation51_spill] sm:$0xff] %v12071_v50 }
 0x2a2   : > { %v12022_v29 = vld [vmem:[%s7070_s25 + $0x9a8] sm:$0xff]  ;;  %v12025_v27 = vld [vmem:[%s7070_s25 + $0xb38] sm:$0xff]  ;;  %v12028_v21 = vld [vmem:[%s7070_s25 + $0xb40] sm:$0xff] }
 0x2a3   : > { %v12031_v2 = vld [vmem:[%s7070_s25 + $0xb48] sm:$0xff]  ;;  %v12045_v51 = vld [vmem:[%s7070_s25 + $0x9b0] sm:$0xff]  ;;  %v12048_v14 = vld [vmem:[%s7070_s25 + $0x9b8] sm:$0xff]  ;;  %v2369_v25 = vmax.f32 %v11909_v9, %v12025_v27  ;;  %v2370_v41 = vmax.f32 %v11912_v56, %v12028_v21  ;;  %v19364_v21 = vmax.f32 %v11749_v17, %v11843_v15  ;;  %v19366_v17 = vmax.f32 %v11785_v5, %v11892_v32 }
 0x2a4   : > { %v12051_v36 = vld [vmem:[%s7070_s25 + $0x9c0] sm:$0xff]  ;;  %v12054_v62 = vld [vmem:[%s7070_s25 + $0xb50] sm:$0xff]  ;;  %v12057_v6 = vld [vmem:[%s7070_s25 + $0xb58] sm:$0xff]  ;;  %v2371_v59 = vmax.f32 %v11915_v22, %v12031_v2  ;;  %v19368_v5 = vmax.f32 %v11788_v40, %v11895_v12 }
 0x2a5   : > { %v12060_v23 = vld [vmem:[%s7070_s25 + $0xb60] sm:$0xff]  ;;  %v12074_v48 = vld [vmem:[%s7070_s25 + $0x9c8] sm:$0xff]  ;;  %v12077_v18 = vld [vmem:[%s7070_s25 + $0x9d0] sm:$0xff]  ;;  %v2372_v22 = vmax.f32 %v11935_v58, %v12054_v62  ;;  %v2373_v24 = vmax.f32 %v11938_v20, %v12057_v6  ;;  %v12097_v2 = vmax.f32 %v19364_v21, %v19363_v46  ;;  %v12111_v15 = vmax.f32 %v19366_v17, %v2358_v11 }
 0x2a6   : > { %v12080_v27 = vld [vmem:[%s7070_s25 + $0x9d8] sm:$0xff]  ;;  %v2055_v9 = vld [vmem:[%s7070_s25 + $0xb68] sm:$0xff]  ;;  %v2056_v26 = vld [vmem:[%s7070_s25 + $0xb70] sm:$0xff]  ;;  %v2374_v37 = vmax.f32 %v11941_v55, %v12060_v23 }
 0x2a7   : > { %v2057_v56 = vld [vmem:[%s7070_s25 + $0xb78] sm:$0xff]  ;;  %19365 = vst [vmem:[#allocation43_spill] sm:$0xff] %v12097_v2  ;;  %v2006_v0 = vld [vmem:[%s7070_s25 + $0x9e0] sm:$0xff]  ;;  %v2007_v50 = vld [vmem:[%s7070_s25 + $0x9e8] sm:$0xff]  ;;  %v2375_v6 = vmax.f32 %v11961_v47, %v2055_v9  ;;  %v2376_v55 = vmax.f32 %v11964_v57, %v2056_v26 }
 0x2a8   : > { %v2008_v61 = vld [vmem:[%s7070_s25 + $0x9f0] sm:$0xff]  ;;  %v2058_v58 = vld [vmem:[%s7070_s25 + $0xb80] sm:$0xff]  ;;  %v2059_v62 = vld [vmem:[%s7070_s25 + $0xb88] sm:$0xff]  ;;  %v2377_v53 = vmax.f32 %v11967_v49, %v2057_v56  ;;  %v19367_v49 = vmax.f32 %v11813_v52, %v11924_v35  ;;  %v19370_v52 = vmax.f32 %v11791_v16, %v11898_v19 }
 0x2a9   : > { %v2060_v20 = vld [vmem:[%s7070_s25 + $0xb90] sm:$0xff]  ;;  %v2009_v8 = vld [vmem:[%s7070_s25 + $0x9f8] sm:$0xff]  ;;  %v2062_v46 = vld [vmem:[%s7070_s25 + $0xba0] sm:$0xff]  ;;  %v2378_v2 = vmax.f32 %v11990_v4, %v2058_v58  ;;  %v2379_v47 = vmax.f32 %v11993_v33, %v2059_v62 }
 0x2aa   : > { %v2061_v23 = vld [vmem:[%s7070_s25 + $0xb98] sm:$0xff]  ;;  %v2063_v21 = vld [vmem:[%s7070_s25 + $0xba8] sm:$0xff]  ;;  %v2380_v57 = vmax.f32 %v11996_v1, %v2060_v20  ;;  %v2535_v32 = vmax.f32 %v19368_v5, %v19367_v49  ;;  %v2064_v26 = vld [vmem:[%s7070_s25 + $0xbb0] sm:$0xff]  ;;  %v2382_v4 = vmax.f32 %v12019_v39, %v2062_v46  ;;  %v19369_v1 = vmax.f32 %v11831_v43, %v11944_v34 }
 0x2ab   : > { %v2065_v11 = vld [vmem:[%s7070_s25 + $0xbb8] sm:$0xff]  ;;  %v2066_v9 = vld [vmem:[%s7070_s25 + $0xbc0] sm:$0xff]  ;;  %v2381_v56 = vmax.f32 %v12016_v10, %v2061_v23  ;;  %v2383_v33 = vmax.f32 %v12022_v29, %v2063_v21  ;;  %v2067_v12 = vld [vmem:[%s7070_s25 + $0xbc8] sm:$0xff]  ;;  %v2384_v62 = vmax.f32 %v12045_v51, %v2064_v26  ;;  %v19371_v29 = vmax.f32 %v11834_v45, %v11947_v44 }
 0x2ac   : > { %v2536_v40 = vmax.f32 %v19370_v52, %v19369_v1  ;;  %v2068_v35 = vld [vmem:[%s7070_s25 + $0xbd0] sm:$0xff]  ;;  %v2069_v58 = vld [vmem:[%s7070_s25 + $0xbd8] sm:$0xff]  ;;  %v2385_v20 = vmax.f32 %v12048_v14, %v2065_v11  ;;  %v2386_v10 = vmax.f32 %v12051_v36, %v2066_v9  ;;  %v19372_v43 = vmax.f32 %v11807_v42, %v11918_v31  ;;  %v2070_v39 = vld [vmem:[%s7070_s25 + $0xbe0] sm:$0xff] }
 0x2ad   : > { %v2071_v16 = vld [vmem:[%s7070_s25 + $0xbe8] sm:$0xff]  ;;  %v2072_v19 = vld [vmem:[%s7070_s25 + $0xbf0] sm:$0xff]  ;;  %v2387_v17 = vmax.f32 %v12074_v48, %v2067_v12  ;;  %v2388_v23 = vmax.f32 %v12077_v18, %v2068_v35  ;;  %v2389_v51 = vmax.f32 %v12080_v27, %v2069_v58  ;;  %v19373_v14 = vmax.f32 %v11837_v60, %v11950_v3  ;;  %v2073_v46 = vld [vmem:[%s7070_s25 + $0xbf8] sm:$0xff] }
 0x2ae   : > { %v2537_v34 = vmax.f32 %v19372_v43, %v19371_v29  ;;  %v2390_v21 = vmax.f32 %v2006_v0, %v2070_v39  ;;  %v2391_v45 = vmax.f32 %v2007_v50, %v2071_v16  ;;  %v2392_v44 = vmax.f32 %v2008_v61, %v2072_v19  ;;  %v19377_v27 = vld [vmem:[#allocation123_spill] sm:$0xff]  ;;  %v19378_v5 = vld [vmem:[#allocation134_spill] sm:$0xff]  ;;  %v19380_v3 = vld [vmem:[#allocation104_spill] sm:$0xff] }
 0x2af   : > { %v2538_v36 = vmax.f32 %v19373_v14, %v2366_v54  ;;  %v19374_v42 = vmax.f32 %v11886_v38, %v12002_v7  ;;  %v19375_v31 = vmax.f32 %v11857_v63, %v11970_v28  ;;  %v2393_v48 = vmax.f32 %v2009_v8, %v2073_v46  ;;  %v19381_v54 = vld [vmem:[#allocation50_spill] sm:$0xff]  ;;  %v19384_v35 = vld [vmem:[#allocation112_spill] sm:$0xff]  ;;  %v19385_v29 = vld [vmem:[#allocation115_spill] sm:$0xff] }
 0x2b0   : > { %v19376_v18 = vmax.f32 %v11889_v30, %v12005_v13  ;;  %v19379_v26 = vmax.f32 %v19377_v27, %v19378_v5  ;;  %v19382_v0 = vmax.f32 %v19380_v3, %v19381_v54  ;;  %v2542_v61 = vmax.f32 %v2370_v41, %v2374_v37  ;;  %v19383_v13 = vld [vmem:[#allocation37_spill] sm:$0xff]  ;;  %v19386_v43 = vld [vmem:[#allocation96_spill] sm:$0xff]  ;;  %v19387_v16 = vld [vmem:[#allocation126_spill] sm:$0xff] }
 0x2b1   : > { %v2539_v49 = vmax.f32 %v19375_v31, %v19374_v42  ;;  %v2543_v11 = vmax.f32 %v2371_v59, %v2375_v6  ;;  %v2544_v9 = vmax.f32 %v2372_v22, %v2376_v55  ;;  %v2545_v38 = vmax.f32 %v2373_v24, %v2377_v53  ;;  %v19389_v59 = vld [vmem:[#allocation44_spill] sm:$0xff]  ;;  %v19391_v37 = vld [vmem:[#allocation51_spill] sm:$0xff]  ;;  %v19394_v53 = vld [vmem:[#allocation42_spill] sm:$0xff] }
 0x2b2   : > { %v2540_v60 = vmax.f32 %v19379_v26, %v19376_v18  ;;  %v2541_v50 = vmax.f32 %v19382_v0, %v2369_v25  ;;  %v2546_v7 = vmax.f32 %v2378_v2, %v2382_v4  ;;  %v2547_v1 = vmax.f32 %v2379_v47, %v2383_v33  ;;  %v19388_v25 = vld [vmem:[#allocation40_spill] sm:$0xff]  ;;  %v19392_v2 = vld [vmem:[#allocation125_spill] sm:$0xff]  ;;  %v19393_v55 = vld [vmem:[#allocation43_spill] sm:$0xff] }
 0x2b3   : > { %v2548_v63 = vmax.f32 %v2380_v57, %v2384_v62  ;;  %v2549_v28 = vmax.f32 %v2381_v56, %v2385_v20  ;;  %v2550_v8 = vmax.f32 %v2386_v10, %v2390_v21  ;;  %v2551_v52 = vmax.f32 %v2387_v17, %v2391_v45  ;;  %v19390_v22 = vld [vmem:[#allocation136_spill] sm:$0xff]  ;;  %v2074_v21 = vld [vmem:[%s7070_s25 + $0xc00] sm:$0xff]  ;;  %v12214_v18 = vld [vmem:[%s7070_s25 + $0xc38] sm:$0xff] }
 0x2b4   : > { %v2552_v12 = vmax.f32 %v2388_v23, %v2392_v44  ;;  %v2553_v30 = vmax.f32 %v2389_v51, %v2393_v48  ;;  %v2618_v58 = vmax.f32 %v19384_v35, %v19383_v13  ;;  %v2619_v39 = vmax.f32 %v19386_v43, %v19385_v29  ;;  %v12198_v45 = vld [vmem:[%s7070_s25 + $0xc08] sm:$0xff]  ;;  %v12201_v44 = vld [vmem:[%s7070_s25 + $0xc10] sm:$0xff]  ;;  %v2078_v42 = vld [vmem:[%s7070_s25 + $0xc20] sm:$0xff] }
 0x2b5   : > { %v2620_v41 = vmax.f32 %v19388_v25, %v19387_v16  ;;  %v2621_v24 = vmax.f32 %v19390_v22, %v19389_v59  ;;  %v2622_v6 = vmax.f32 %v19392_v2, %v19391_v37  ;;  %v2623_v47 = vmax.f32 %v19394_v53, %v19393_v55  ;;  %v12205_v31 = vld [vmem:[%s7070_s25 + $0xc28] sm:$0xff]  ;;  %v12211_v48 = vld [vmem:[%s7070_s25 + $0xc18] sm:$0xff]  ;;  %v12217_v27 = vld [vmem:[%s7070_s25 + $0xc40] sm:$0xff] }
 0x2b6   : > { %v2624_v57 = vmax.f32 %v12111_v15, %v2536_v40  ;;  %v2625_v56 = vmax.f32 %v2535_v32, %v2537_v34  ;;  %v2626_v4 = vmax.f32 %v2538_v36, %v2540_v60  ;;  %v2627_v33 = vmax.f32 %v2539_v49, %v2541_v50  ;;  %v12208_v49 = vld [vmem:[%s7070_s25 + $0xc30] sm:$0xff]  ;;  %v12220_v5 = vld [vmem:[%s7070_s25 + $0xc48] sm:$0xff]  ;;  %v12226_v60 = vld [vmem:[%s7070_s25 + $0xc58] sm:$0xff] }
 0x2b7   : > { %v2628_v62 = vmax.f32 %v2542_v61, %v2544_v9  ;;  %v2629_v20 = vmax.f32 %v2543_v11, %v2545_v38  ;;  %v2630_v10 = vmax.f32 %v2546_v7, %v2548_v63  ;;  %v2631_v19 = vmax.f32 %v2547_v1, %v2549_v28  ;;  %v12223_v26 = vld [vmem:[%s7070_s25 + $0xc50] sm:$0xff]  ;;  %v12229_v3 = vld [vmem:[%s7070_s25 + $0xc60] sm:$0xff]  ;;  %v12233_v0 = vld [vmem:[%s7070_s25 + $0xc68] sm:$0xff] }
 0x2b8   : > { %v2632_v17 = vmax.f32 %v2550_v8, %v2552_v12  ;;  %v2633_v23 = vmax.f32 %v2551_v52, %v2553_v30  ;;  %v6309_v51 = vpack.c.bf16 %v2619_v39, %v2618_v58  ;;  %v6310_v15 = vpack.c.bf16 %v2621_v24, %v2620_v41  ;;  %v2138_v54 = vld [vmem:[%s7070_s25 + $0xe00] sm:$0xff]  ;;  %v12236_v50 = vld [vmem:[%s7070_s25 + $0xc70] sm:$0xff]  ;;  %v12239_v61 = vld [vmem:[%s7070_s25 + $0xc78] sm:$0xff] }
 0x2b9   : > { %v6311_v32 = vpack.c.bf16 %v2623_v47, %v2622_v6  ;;  %v6312_v40 = vpack.c.bf16 %v2625_v56, %v2624_v57  ;;  %v6313_v34 = vpack.c.bf16 %v2627_v33, %v2626_v4  ;;  %v6314_v14 = vpack.c.bf16 %v2629_v20, %v2628_v62  ;;  %v2139_v11 = vld [vmem:[%s7070_s25 + $0xe08] sm:$0xff]  ;;  %v2140_v9 = vld [vmem:[%s7070_s25 + $0xe10] sm:$0xff]  ;;  %v12244_v38 = vld [vmem:[%s7070_s25 + $0xe18] sm:$0xff] }
 0x2ba   : > { %v6315_v36 = vpack.c.bf16 %v2631_v19, %v2630_v10  ;;  %v6316_v46 = vpack.c.bf16 %v2633_v23, %v2632_v17  ;;  %2922 = vst [vmem:[%s8679_s1 + $0x248] sm:$0xff] %v6309_v51  ;;  %2923 = vst [vmem:[%s8679_s1 + $0x26c] sm:$0xff] %v6310_v15  ;;  %v2394_v7 = vmax.f32 %v2074_v21, %v2138_v54  ;;  %v12247_v1 = vld [vmem:[%s7070_s25 + $0xc80] sm:$0xff]  ;;  %v12250_v63 = vld [vmem:[%s7070_s25 + $0xc88] sm:$0xff] }
 0x2bb   : > { %2924 = vst [vmem:[%s8679_s1 + $0x290] sm:$0xff] %v6311_v32  ;;  %2925 = vst [vmem:[%s8679_s1 + $0x2b4] sm:$0xff] %v6312_v40  ;;  %v12253_v28 = vld [vmem:[%s7070_s25 + $0xc90] sm:$0xff]  ;;  %v2142_v8 = vld [vmem:[%s7070_s25 + $0xe20] sm:$0xff]  ;;  %v2395_v30 = vmax.f32 %v12198_v45, %v2139_v11  ;;  %v2396_v16 = vmax.f32 %v12201_v44, %v2140_v9  ;;  %v2397_v53 = vmax.f32 %v12211_v48, %v12244_v38 }
 0x2bc   : > { %2926 = vst [vmem:[%s8679_s1 + $0x2d8] sm:$0xff] %v6313_v34  ;;  %2927 = vst [vmem:[%s8679_s1 + $0x2fc] sm:$0xff] %v6314_v14  ;;  %v2143_v52 = vld [vmem:[%s7070_s25 + $0xe28] sm:$0xff]  ;;  %v2144_v12 = vld [vmem:[%s7070_s25 + $0xe30] sm:$0xff]  ;;  %v2398_v25 = vmax.f32 %v2078_v42, %v2142_v8 }
 0x2bd   : > { %2928 = vst [vmem:[%s8679_s1 + $0x320] sm:$0xff] %v6315_v36  ;;  %2929 = vst [vmem:[%s8679_s1 + $0x344] sm:$0xff] %v6316_v46  ;;  %v12260_v13 = vld [vmem:[%s7070_s25 + $0xc98] sm:$0xff]  ;;  %v12263_v35 = vld [vmem:[%s7070_s25 + $0xca0] sm:$0xff]  ;;  %v2399_v41 = vmax.f32 %v12205_v31, %v2143_v52  ;;  %v2400_v59 = vmax.f32 %v12208_v49, %v2144_v12 }
 0x2be   : > { %v12266_v58 = vld [vmem:[%s7070_s25 + $0xca8] sm:$0xff]  ;;  %v2145_v29 = vld [vmem:[%s7070_s25 + $0xe38] sm:$0xff]  ;;  %v12270_v43 = vld [vmem:[%s7070_s25 + $0xe40] sm:$0xff]  ;;  %v12322_v15 = vmax.f32 %v2394_v7, %v2398_v25 }
 0x2bf   : > { %v12273_v39 = vld [vmem:[%s7070_s25 + $0xe48] sm:$0xff]  ;;  %v12279_v22 = vld [vmem:[%s7070_s25 + $0xcb0] sm:$0xff]  ;;  %v12282_v24 = vld [vmem:[%s7070_s25 + $0xcb8] sm:$0xff]  ;;  %v2401_v47 = vmax.f32 %v12214_v18, %v2145_v29  ;;  %v2402_v57 = vmax.f32 %v12217_v27, %v12270_v43  ;;  %v12347_v42 = vmax.f32 %v2395_v30, %v2399_v41 }
 0x2c0   : > { %v12285_v37 = vld [vmem:[%s7070_s25 + $0xcc0] sm:$0xff]  ;;  %v12288_v2 = vld [vmem:[%s7070_s25 + $0xe50] sm:$0xff]  ;;  %v12291_v6 = vld [vmem:[%s7070_s25 + $0xe58] sm:$0xff]  ;;  %v2403_v56 = vmax.f32 %v12220_v5, %v12273_v39  ;;  %19395 = vst [vmem:[#allocation89_spill] sm:$0xff] %v12322_v15 }
 0x2c1   : > { %v2150_v55 = vld [vmem:[%s7070_s25 + $0xe60] sm:$0xff]  ;;  %v12302_v4 = vld [vmem:[%s7070_s25 + $0xcc8] sm:$0xff]  ;;  %v12305_v33 = vld [vmem:[%s7070_s25 + $0xcd0] sm:$0xff]  ;;  %v2404_v17 = vmax.f32 %v12223_v26, %v12288_v2  ;;  %19396 = vst [vmem:[#allocation143_spill] sm:$0xff] %v12347_v42  ;;  %v12399_v29 = vmax.f32 %v2397_v53, %v2401_v47 }
 0x2c2   : > { %v12308_v62 = vld [vmem:[%s7070_s25 + $0xcd8] sm:$0xff]  ;;  %v2151_v20 = vld [vmem:[%s7070_s25 + $0xe68] sm:$0xff]  ;;  %v12312_v10 = vld [vmem:[%s7070_s25 + $0xe70] sm:$0xff]  ;;  %v2406_v51 = vmax.f32 %v12229_v3, %v2150_v55 }
 0x2c3   : > { %v12315_v19 = vld [vmem:[%s7070_s25 + $0xe78] sm:$0xff]  ;;  %v12325_v32 = vld [vmem:[%s7070_s25 + $0xce0] sm:$0xff]  ;;  %v12328_v40 = vld [vmem:[%s7070_s25 + $0xce8] sm:$0xff]  ;;  %v2407_v21 = vmax.f32 %v12233_v0, %v2151_v20  ;;  %v2408_v45 = vmax.f32 %v12236_v50, %v12312_v10  ;;  %v12373_v50 = vmax.f32 %v2396_v16, %v2400_v59  ;;  %19400 = vst [vmem:[#allocation148_spill] sm:$0xff] %v12399_v29 }
 0x2c4   : > { %v12331_v34 = vld [vmem:[%s7070_s25 + $0xcf0] sm:$0xff]  ;;  %v12334_v14 = vld [vmem:[%s7070_s25 + $0xe80] sm:$0xff]  ;;  %v12337_v36 = vld [vmem:[%s7070_s25 + $0xe88] sm:$0xff]  ;;  %v2409_v44 = vmax.f32 %v12239_v61, %v12315_v19  ;;  %v12425_v53 = vmax.f32 %v2402_v57, %v2406_v51 }
 0x2c5   : > { %v12340_v46 = vld [vmem:[%s7070_s25 + $0xe90] sm:$0xff]  ;;  %v12350_v31 = vld [vmem:[%s7070_s25 + $0xcf8] sm:$0xff]  ;;  %v12353_v49 = vld [vmem:[%s7070_s25 + $0xd00] sm:$0xff]  ;;  %19397 = vst [vmem:[#allocation152_spill] sm:$0xff] %v12373_v50  ;;  %v12451_v52 = vmax.f32 %v2403_v56, %v2407_v21  ;;  %v12480_v3 = vmax.f32 %v2404_v17, %v2408_v45  ;;  %v19409_v45 = vmax.f32 %v12226_v60, %v12291_v6 }
 0x2c6   : > { %v12356_v48 = vld [vmem:[%s7070_s25 + $0xd08] sm:$0xff]  ;;  %v12359_v18 = vld [vmem:[%s7070_s25 + $0xe98] sm:$0xff]  ;;  %v12362_v27 = vld [vmem:[%s7070_s25 + $0xea0] sm:$0xff]  ;;  %19403 = vst [vmem:[#allocation59_spill] sm:$0xff] %v12425_v53 }
 0x2c7   : > { %v12365_v5 = vld [vmem:[%s7070_s25 + $0xea8] sm:$0xff]  ;;  %v12376_v61 = vld [vmem:[%s7070_s25 + $0xd10] sm:$0xff]  ;;  %v12379_v11 = vld [vmem:[%s7070_s25 + $0xd18] sm:$0xff]  ;;  %v2414_v12 = vmax.f32 %v12263_v35, %v12362_v27  ;;  %19404 = vst [vmem:[#allocation153_spill] sm:$0xff] %v12451_v52  ;;  %v12509_v21 = vmax.f32 %v19409_v45, %v2409_v44  ;;  %v19413_v45 = vmax.f32 %v12247_v1, %v12334_v14 }
 0x2c8   : > { %19398 = vst [vmem:[#allocation144_spill] sm:$0xff] %v12376_v61  ;;  %19399 = vst [vmem:[#allocation149_spill] sm:$0xff] %v12379_v11  ;;  %v12382_v9 = vld [vmem:[%s7070_s25 + $0xd20] sm:$0xff]  ;;  %v12385_v38 = vld [vmem:[%s7070_s25 + $0xeb0] sm:$0xff]  ;;  %v2415_v30 = vmax.f32 %v12266_v58, %v12365_v5 }
 0x2c9   : > { %v12388_v7 = vld [vmem:[%s7070_s25 + $0xeb8] sm:$0xff]  ;;  %v12391_v8 = vld [vmem:[%s7070_s25 + $0xec0] sm:$0xff]  ;;  %v12402_v43 = vld [vmem:[%s7070_s25 + $0xd28] sm:$0xff]  ;;  %19406 = vst [vmem:[#allocation55_spill] sm:$0xff] %v12480_v3  ;;  %v12538_v17 = vmax.f32 %v19413_v45, %v2414_v12  ;;  %v19415_v45 = vmax.f32 %v12250_v63, %v12337_v36 }
 0x2ca   : > { %v12405_v39 = vld [vmem:[%s7070_s25 + $0xd30] sm:$0xff]  ;;  %v12408_v16 = vld [vmem:[%s7070_s25 + $0xd38] sm:$0xff]  ;;  %v12411_v25 = vld [vmem:[%s7070_s25 + $0xec8] sm:$0xff]  ;;  %19410 = vst [vmem:[#allocation151_spill] sm:$0xff] %v12509_v21 }
 0x2cb   : > { %19401 = vst [vmem:[#allocation140_spill] sm:$0xff] %v12405_v39  ;;  %19402 = vst [vmem:[#allocation156_spill] sm:$0xff] %v12408_v16  ;;  %v12414_v41 = vld [vmem:[%s7070_s25 + $0xed0] sm:$0xff]  ;;  %v12417_v35 = vld [vmem:[%s7070_s25 + $0xed8] sm:$0xff]  ;;  %v12567_v44 = vmax.f32 %v19415_v45, %v2415_v30  ;;  %v19417_v30 = vmax.f32 %v12279_v22, %v12385_v38  ;;  %v19418_v45 = vmax.f32 %v12253_v28, %v12340_v46 }
 0x2cc   : > { %v12428_v47 = vld [vmem:[%s7070_s25 + $0xd40] sm:$0xff]  ;;  %v12431_v20 = vld [vmem:[%s7070_s25 + $0xd48] sm:$0xff]  ;;  %v12434_v10 = vld [vmem:[%s7070_s25 + $0xd50] sm:$0xff]  ;;  %19414 = vst [vmem:[#allocation145_spill] sm:$0xff] %v12538_v17  ;;  %v19420_v38 = vmax.f32 %v12282_v24, %v12388_v7 }
 0x2cd   : > { %v12437_v19 = vld [vmem:[%s7070_s25 + $0xee0] sm:$0xff]  ;;  %v12440_v27 = vld [vmem:[%s7070_s25 + $0xee8] sm:$0xff]  ;;  %v12443_v5 = vld [vmem:[%s7070_s25 + $0xef0] sm:$0xff]  ;;  %19416 = vst [vmem:[#allocation155_spill] sm:$0xff] %v12567_v44  ;;  %v12595_v44 = vmax.f32 %v19418_v45, %v19417_v30 }
 0x2ce   : > { %v12454_v59 = vld [vmem:[%s7070_s25 + $0xd58] sm:$0xff]  ;;  %v12457_v0 = vld [vmem:[%s7070_s25 + $0xd60] sm:$0xff]  ;;  %v12460_v58 = vld [vmem:[%s7070_s25 + $0xd68] sm:$0xff] }
 0x2cf   : > { %v12463_v54 = vld [vmem:[%s7070_s25 + $0xef8] sm:$0xff]  ;;  %v12466_v55 = vld [vmem:[%s7070_s25 + $0xf00] sm:$0xff]  ;;  %v12469_v57 = vld [vmem:[%s7070_s25 + $0xf08] sm:$0xff]  ;;  %19419 = vst [vmem:[#allocation132_spill] sm:$0xff] %v12595_v44 }
 0x2d0   : > { %19405 = vst [vmem:[#allocation154_spill] sm:$0xff] %v12469_v57  ;;  %v12483_v23 = vld [vmem:[%s7070_s25 + $0xd70] sm:$0xff]  ;;  %v12486_v52 = vld [vmem:[%s7070_s25 + $0xd78] sm:$0xff]  ;;  %v12489_v51 = vld [vmem:[%s7070_s25 + $0xd80] sm:$0xff] }
 0x2d1   : > { %v12492_v53 = vld [vmem:[%s7070_s25 + $0xf10] sm:$0xff]  ;;  %v12495_v56 = vld [vmem:[%s7070_s25 + $0xf18] sm:$0xff]  ;;  %v12498_v42 = vld [vmem:[%s7070_s25 + $0xf20] sm:$0xff] }
 0x2d2   : > { %19407 = vst [vmem:[#allocation133_spill] sm:$0xff] %v12492_v53  ;;  %19408 = vst [vmem:[#allocation141_spill] sm:$0xff] %v12495_v56  ;;  %v12512_v3 = vld [vmem:[%s7070_s25 + $0xd88] sm:$0xff]  ;;  %v12515_v29 = vld [vmem:[%s7070_s25 + $0xd90] sm:$0xff] }
 0x2d3   : > { %v12518_v26 = vld [vmem:[%s7070_s25 + $0xd98] sm:$0xff]  ;;  %v12521_v15 = vld [vmem:[%s7070_s25 + $0xf28] sm:$0xff]  ;;  %v12524_v2 = vld [vmem:[%s7070_s25 + $0xf30] sm:$0xff] }
 0x2d4   : > { %19411 = vst [vmem:[#allocation157_spill] sm:$0xff] %v12524_v2  ;;  %v12527_v50 = vld [vmem:[%s7070_s25 + $0xf38] sm:$0xff]  ;;  %v12541_v21 = vld [vmem:[%s7070_s25 + $0xda0] sm:$0xff]  ;;  %v12544_v57 = vld [vmem:[%s7070_s25 + $0xda8] sm:$0xff] }
 0x2d5   : > { %19412 = vst [vmem:[#allocation60_spill] sm:$0xff] %v12527_v50  ;;  %v12547_v60 = vld [vmem:[%s7070_s25 + $0xdb0] sm:$0xff]  ;;  %v12550_v53 = vld [vmem:[%s7070_s25 + $0xf40] sm:$0xff]  ;;  %v12553_v6 = vld [vmem:[%s7070_s25 + $0xf48] sm:$0xff] }
 0x2d6   : > { %v12556_v56 = vld [vmem:[%s7070_s25 + $0xf50] sm:$0xff]  ;;  %v12570_v17 = vld [vmem:[%s7070_s25 + $0xdb8] sm:$0xff]  ;;  %v12573_v11 = vld [vmem:[%s7070_s25 + $0xdc0] sm:$0xff]  ;;  %v2434_v12 = vmax.f32 %v12428_v47, %v12550_v53  ;;  %v2435_v63 = vmax.f32 %v12431_v20, %v12553_v6 }
 0x2d7   : > { %v12576_v1 = vld [vmem:[%s7070_s25 + $0xdc8] sm:$0xff]  ;;  %v12579_v61 = vld [vmem:[%s7070_s25 + $0xf58] sm:$0xff]  ;;  %v2182_v14 = vld [vmem:[%s7070_s25 + $0xf60] sm:$0xff]  ;;  %v2436_v36 = vmax.f32 %v12434_v10, %v12556_v56  ;;  %v19421_v10 = vmax.f32 %v12260_v13, %v12359_v18  ;;  %v19422_v13 = vmax.f32 %v12325_v32, %v12437_v19  ;;  %v19423_v18 = vmax.f32 %v12285_v37, %v12391_v8 }
 0x2d8   : > { %v2183_v2 = vld [vmem:[%s7070_s25 + $0xf68] sm:$0xff]  ;;  %v12598_v50 = vld [vmem:[%s7070_s25 + $0xdd0] sm:$0xff]  ;;  %v12601_v53 = vld [vmem:[%s7070_s25 + $0xdd8] sm:$0xff]  ;;  %v2437_v22 = vmax.f32 %v12454_v59, %v12579_v61  ;;  %v2438_v28 = vmax.f32 %v12457_v0, %v2182_v14  ;;  %v19424_v32 = vmax.f32 %v12328_v40, %v12440_v27  ;;  %v19425_v37 = vmax.f32 %v12302_v4, %v12411_v25 }
 0x2d9   : > { %v2134_v47 = vld [vmem:[%s7070_s25 + $0xde0] sm:$0xff]  ;;  %v2184_v20 = vld [vmem:[%s7070_s25 + $0xf70] sm:$0xff]  ;;  %v2185_v6 = vld [vmem:[%s7070_s25 + $0xf78] sm:$0xff]  ;;  %v2439_v46 = vmax.f32 %v12460_v58, %v2183_v2  ;;  %v12617_v56 = vmax.f32 %v19421_v10, %v19420_v38  ;;  %v12634_v7 = vmax.f32 %v19423_v18, %v19422_v13  ;;  %v19427_v40 = vmax.f32 %v12305_v33, %v12414_v41 }
 0x2da   : > { %v2186_v16 = vld [vmem:[%s7070_s25 + $0xf80] sm:$0xff]  ;;  %v2135_v30 = vld [vmem:[%s7070_s25 + $0xde8] sm:$0xff]  ;;  %v2136_v45 = vld [vmem:[%s7070_s25 + $0xdf0] sm:$0xff]  ;;  %v2440_v0 = vmax.f32 %v12483_v23, %v2184_v20  ;;  %v2441_v58 = vmax.f32 %v12486_v52, %v2185_v6  ;;  %v2567_v8 = vmax.f32 %v19425_v37, %v19424_v32 }
 0x2db   : > { %v2137_v44 = vld [vmem:[%s7070_s25 + $0xdf8] sm:$0xff]  ;;  %v2187_v39 = vld [vmem:[%s7070_s25 + $0xf88] sm:$0xff]  ;;  %v2188_v61 = vld [vmem:[%s7070_s25 + $0xf90] sm:$0xff]  ;;  %v2442_v24 = vmax.f32 %v12489_v51, %v2186_v16 }
 0x2dc   : > { %v2189_v59 = vld [vmem:[%s7070_s25 + $0xf98] sm:$0xff]  ;;  %v2190_v2 = vld [vmem:[%s7070_s25 + $0xfa0] sm:$0xff]  ;;  %v2191_v14 = vld [vmem:[%s7070_s25 + $0xfa8] sm:$0xff]  ;;  %v2443_v23 = vmax.f32 %v12512_v3, %v2187_v39  ;;  %v2444_v52 = vmax.f32 %v12515_v29, %v2188_v61  ;;  %v19426_v39 = vmax.f32 %v12331_v34, %v12443_v5 }
 0x2dd   : > { %v2192_v38 = vld [vmem:[%s7070_s25 + $0xfb0] sm:$0xff]  ;;  %v2445_v16 = vmax.f32 %v12518_v26, %v2189_v59  ;;  %v2193_v19 = vld [vmem:[%s7070_s25 + $0xfb8] sm:$0xff]  ;;  %v2194_v51 = vld [vmem:[%s7070_s25 + $0xfc0] sm:$0xff]  ;;  %v2446_v6 = vmax.f32 %v12541_v21, %v2190_v2  ;;  %v2447_v3 = vmax.f32 %v12544_v57, %v2191_v14  ;;  %v19428_v57 = vmax.f32 %v12350_v31, %v12463_v54 }
 0x2de   : > { %v2195_v20 = vld [vmem:[%s7070_s25 + $0xfc8] sm:$0xff]  ;;  %v2448_v29 = vmax.f32 %v12547_v60, %v2192_v38  ;;  %v2568_v4 = vmax.f32 %v19427_v40, %v19426_v39  ;;  %v2196_v25 = vld [vmem:[%s7070_s25 + $0xfd0] sm:$0xff]  ;;  %v2197_v27 = vld [vmem:[%s7070_s25 + $0xfd8] sm:$0xff]  ;;  %v2449_v10 = vmax.f32 %v12570_v17, %v2193_v19  ;;  %v2450_v61 = vmax.f32 %v12573_v11, %v2194_v51 }
 0x2df   : > { %v2198_v26 = vld [vmem:[%s7070_s25 + $0xfe0] sm:$0xff]  ;;  %v2451_v21 = vmax.f32 %v12576_v1, %v2195_v20  ;;  %v19429_v60 = vmax.f32 %v12308_v62, %v12417_v35  ;;  %v2199_v5 = vld [vmem:[%s7070_s25 + $0xfe8] sm:$0xff]  ;;  %v2200_v59 = vld [vmem:[%s7070_s25 + $0xff0] sm:$0xff]  ;;  %v2452_v41 = vmax.f32 %v12598_v50, %v2196_v25  ;;  %v2453_v13 = vmax.f32 %v12601_v53, %v2197_v27 }
 0x2e0   : > { %v2201_v33 = vld [vmem:[%s7070_s25 + $0xff8] sm:$0xff]  ;;  %v2454_v18 = vmax.f32 %v2134_v47, %v2198_v26  ;;  %v19430_v11 = vmax.f32 %v12382_v9, %v12498_v42  ;;  %v19431_v17 = vmax.f32 %v12353_v49, %v12466_v55  ;;  %v2455_v31 = vmax.f32 %v2135_v30, %v2199_v5  ;;  %v19435_v38 = vld [vmem:[#allocation140_spill] sm:$0xff]  ;;  %v19436_v53 = vld [vmem:[#allocation157_spill] sm:$0xff]  ;;  %s6721_s25 = sshll.u32 %s6833_s14, 4  ;;  %s6722_s25 = int_to_ptr.vmem [resolvable:$false] %s6721_s25 }
 0x2e1   : > { %v2569_v34 = vmax.f32 %v19429_v60, %v19428_v57  ;;  %v2456_v54 = vmax.f32 %v2136_v45, %v2200_v59  ;;  %v2457_v2 = vmax.f32 %v2137_v44, %v2201_v33  ;;  %v19432_v62 = vmax.f32 %v12402_v43, %v12521_v15  ;;  %v19433_v35 = vld [vmem:[#allocation154_spill] sm:$0xff]  ;;  %v19438_v32 = vld [vmem:[#allocation144_spill] sm:$0xff]  ;;  %v19439_v37 = vld [vmem:[#allocation133_spill] sm:$0xff]  ;;  %p6724_p3 = scmp.lt.s32.totalorder %s17460_s5, %s6722_s25 }
 0x2e2   : > { %v2570_v1 = vmax.f32 %v19431_v17, %v19430_v11  ;;  %v19434_v14 = vmax.f32 %v12356_v48, %v19433_v35  ;;  %v19437_v47 = vmax.f32 %v19435_v38, %v19436_v53  ;;  %v19440_v42 = vmax.f32 %v19438_v32, %v19439_v37  ;;  %v19441_v19 = vld [vmem:[#allocation156_spill] sm:$0xff]  ;;  %v19444_v30 = vld [vmem:[#allocation149_spill] sm:$0xff]  ;;  %v19452_v38 = vld [vmem:[#allocation59_spill] sm:$0xff] }
 0x2e3   : > { %v19442_v49 = vld [vmem:[#allocation60_spill] sm:$0xff]  ;;  %v19445_v45 = vld [vmem:[#allocation141_spill] sm:$0xff]  ;;  %v2574_v20 = vmax.f32 %v2434_v12, %v2438_v28  ;;  %v2575_v15 = vmax.f32 %v2435_v63, %v2439_v46  ;;  %v2576_v43 = vmax.f32 %v2436_v36, %v2440_v0  ;;  %v2577_v39 = vmax.f32 %v2437_v22, %v2441_v58  ;;  %v19453_v63 = vld [vmem:[#allocation151_spill] sm:$0xff] }
 0x2e4   : > { %v2571_v50 = vmax.f32 %v19434_v14, %v19432_v62  ;;  %v2572_v9 = vmax.f32 %v19440_v42, %v19437_v47  ;;  %v19443_v55 = vmax.f32 %v19441_v19, %v19442_v49  ;;  %v19446_v44 = vmax.f32 %v19444_v30, %v19445_v45  ;;  %v19447_v59 = vld [vmem:[#allocation152_spill] sm:$0xff]  ;;  %v19448_v33 = vld [vmem:[#allocation89_spill] sm:$0xff]  ;;  %v19450_v62 = vld [vmem:[#allocation143_spill] sm:$0xff] }
 0x2e5   : > { %v2578_v48 = vmax.f32 %v2442_v24, %v2446_v6  ;;  %v2579_v40 = vmax.f32 %v2443_v23, %v2447_v3  ;;  %v2580_v25 = vmax.f32 %v2444_v52, %v2448_v29  ;;  %v2581_v27 = vmax.f32 %v2445_v16, %v2449_v10  ;;  %v19449_v17 = vld [vmem:[#allocation148_spill] sm:$0xff]  ;;  %v19451_v14 = vld [vmem:[#allocation55_spill] sm:$0xff]  ;;  %v19454_v36 = vld [vmem:[#allocation153_spill] sm:$0xff] }
 0x2e6   : > { %v2573_v51 = vmax.f32 %v19446_v44, %v19443_v55  ;;  %v2582_v26 = vmax.f32 %v2450_v61, %v2454_v18  ;;  %v2583_v57 = vmax.f32 %v2451_v21, %v2455_v31  ;;  %v2584_v60 = vmax.f32 %v2452_v41, %v2456_v54  ;;  %v19455_v28 = vld [vmem:[#allocation132_spill] sm:$0xff]  ;;  %v19456_v46 = vld [vmem:[#allocation145_spill] sm:$0xff]  ;;  %v19457_v58 = vld [vmem:[#allocation155_spill] sm:$0xff] }
 0x2e7   : > { %v2585_v5 = vmax.f32 %v2453_v13, %v2457_v2  ;;  %v2634_v11 = vmax.f32 %v19448_v33, %v19447_v59  ;;  %v2635_v35 = vmax.f32 %v19450_v62, %v19449_v17  ;;  %v2636_v12 = vmax.f32 %v19452_v38, %v19451_v14  ;;  %v12723_v31 = vld [vmem:[%s7076_s13] sm:$0xff]  ;;  %v12726_v54 = vld [vmem:[%s7076_s13 + $0x8] sm:$0xff]  ;;  %v12729_v2 = vld [vmem:[%s7076_s13 + $0x10] sm:$0xff] }
 0x2e8   : > { %v2637_v22 = vmax.f32 %v19454_v36, %v19453_v63  ;;  %v2638_v0 = vmax.f32 %v19456_v46, %v19455_v28  ;;  %v2639_v24 = vmax.f32 %v19457_v58, %v12617_v56  ;;  %v2640_v23 = vmax.f32 %v12634_v7, %v2568_v4  ;;  %19458 = vst [vmem:[#allocation63_spill] sm:$0xff] %v12729_v2  ;;  %v12735_v53 = vld [vmem:[%s7076_s13 + $0x200] sm:$0xff]  ;;  %v12738_v47 = vld [vmem:[%s7076_s13 + $0x208] sm:$0xff]  ;;  %v12741_v32 = vld [vmem:[%s7076_s13 + $0x210] sm:$0xff] }
 0x2e9   : > { %v2641_v52 = vmax.f32 %v2567_v8, %v2569_v34  ;;  %v2642_v16 = vmax.f32 %v2570_v1, %v2572_v9  ;;  %v2643_v6 = vmax.f32 %v2571_v50, %v2573_v51  ;;  %v2644_v3 = vmax.f32 %v2574_v20, %v2576_v43  ;;  %v12732_v50 = vld [vmem:[%s7076_s13 + $0x18] sm:$0xff]  ;;  %19460 = vst [vmem:[#allocation56_spill] sm:$0xff] %v12741_v32  ;;  %v12747_v42 = vld [vmem:[%s7076_s13 + $0x20] sm:$0xff]  ;;  %v12750_v9 = vld [vmem:[%s7076_s13 + $0x28] sm:$0xff] }
 0x2ea   : > { %v2645_v29 = vmax.f32 %v2575_v15, %v2577_v39  ;;  %v2646_v10 = vmax.f32 %v2578_v48, %v2580_v25  ;;  %v2647_v61 = vmax.f32 %v2579_v40, %v2581_v27  ;;  %v2648_v21 = vmax.f32 %v2582_v26, %v2584_v60  ;;  %19459 = vst [vmem:[#allocation150_spill] sm:$0xff] %v12732_v50  ;;  %v12744_v37 = vld [vmem:[%s7076_s13 + $0x218] sm:$0xff]  ;;  %v12753_v19 = vld [vmem:[%s7076_s13 + $0x30] sm:$0xff]  ;;  %v12759_v55 = vld [vmem:[%s7076_s13 + $0x220] sm:$0xff] }
 0x2eb   : > { %v2649_v41 = vmax.f32 %v2583_v57, %v2585_v5  ;;  %v6317_v56 = vpack.c.bf16 %v2635_v35, %v2634_v11  ;;  %v6318_v7 = vpack.c.bf16 %v2637_v22, %v2636_v12  ;;  %v6319_v8 = vpack.c.bf16 %v2639_v24, %v2638_v0  ;;  %19461 = vst [vmem:[#allocation61_spill] sm:$0xff] %v12744_v37  ;;  %v12756_v49 = vld [vmem:[%s7076_s13 + $0x38] sm:$0xff]  ;;  %v12762_v30 = vld [vmem:[%s7076_s13 + $0x228] sm:$0xff]  ;;  %v12765_v45 = vld [vmem:[%s7076_s13 + $0x230] sm:$0xff] }
 0x2ec   : > { %v6320_v4 = vpack.c.bf16 %v2641_v52, %v2640_v23  ;;  %v6321_v34 = vpack.c.bf16 %v2643_v6, %v2642_v16  ;;  %v6322_v13 = vpack.c.bf16 %v2645_v29, %v2644_v3  ;;  %v6323_v18 = vpack.c.bf16 %v2647_v61, %v2646_v10  ;;  %19462 = vst [vmem:[#allocation64_spill] sm:$0xff] %v12756_v49  ;;  %v12768_v44 = vld [vmem:[%s7076_s13 + $0x238] sm:$0xff]  ;;  %v12771_v51 = vld [vmem:[%s7076_s13 + $0x40] sm:$0xff]  ;;  %v12774_v20 = vld [vmem:[%s7076_s13 + $0x48] sm:$0xff] }
 0x2ed   : > { %v6324_v1 = vpack.c.bf16 %v2649_v41, %v2648_v21  ;;  %2930 = vst [vmem:[%s8679_s1 + $0x368] sm:$0xff] %v6317_v56  ;;  %2931 = vst [vmem:[%s8679_s1 + $0x38c] sm:$0xff] %v6318_v7  ;;  %v12777_v15 = vld [vmem:[%s7076_s13 + $0x50] sm:$0xff]  ;;  %v12780_v43 = vld [vmem:[%s7076_s13 + $0x58] sm:$0xff] }
 0x2ee   : > { %2932 = vst [vmem:[%s8679_s1 + $0x3b0] sm:$0xff] %v6319_v8  ;;  %2933 = vst [vmem:[%s8679_s1 + $0x3d4] sm:$0xff] %v6320_v4  ;;  %v12783_v39 = vld [vmem:[%s7076_s13 + $0x240] sm:$0xff]  ;;  %v12786_v48 = vld [vmem:[%s7076_s13 + $0x248] sm:$0xff] }
 0x2ef   : > { %2934 = vst [vmem:[%s8679_s1 + $0x3f8] sm:$0xff] %v6321_v34  ;;  %2935 = vst [vmem:[%s8679_s1 + $0x41c] sm:$0xff] %v6322_v13  ;;  %v12789_v40 = vld [vmem:[%s7076_s13 + $0x250] sm:$0xff]  ;;  %v12792_v25 = vld [vmem:[%s7076_s13 + $0x258] sm:$0xff] }
 0x2f0   : > { %2936 = vst [vmem:[%s8679_s1 + $0x440] sm:$0xff] %v6323_v18  ;;  %2937 = vst [vmem:[%s8679_s1 + $0x464] sm:$0xff] %v6324_v1  ;;  %v12795_v27 = vld [vmem:[%s7076_s13 + $0x60] sm:$0xff]  ;;  %v12798_v26 = vld [vmem:[%s7076_s13 + $0x68] sm:$0xff] }
 0x2f1   : > { %19463 = vst [vmem:[#allocation65_spill] sm:$0xff] %v12768_v44  ;;  %19464 = vst [vmem:[#allocation74_spill] sm:$0xff] %v12771_v51  ;;  %v12801_v57 = vld [vmem:[%s7076_s13 + $0x70] sm:$0xff]  ;;  %v12804_v60 = vld [vmem:[%s7076_s13 + $0x78] sm:$0xff] }
 0x2f2   : > { %19465 = vst [vmem:[#allocation67_spill] sm:$0xff] %v12774_v20  ;;  %19466 = vst [vmem:[#allocation76_spill] sm:$0xff] %v12777_v15  ;;  %v12807_v5 = vld [vmem:[%s7076_s13 + $0x260] sm:$0xff]  ;;  %v12810_v59 = vld [vmem:[%s7076_s13 + $0x268] sm:$0xff] }
 0x2f3   : > { %19467 = vst [vmem:[#allocation77_spill] sm:$0xff] %v12780_v43  ;;  %19468 = vst [vmem:[#allocation66_spill] sm:$0xff] %v12783_v39  ;;  %v12813_v33 = vld [vmem:[%s7076_s13 + $0x270] sm:$0xff]  ;;  %v12816_v11 = vld [vmem:[%s7076_s13 + $0x278] sm:$0xff] }
 0x2f4   : > { %19469 = vst [vmem:[#allocation62_spill] sm:$0xff] %v12786_v48  ;;  %19470 = vst [vmem:[#allocation68_spill] sm:$0xff] %v12789_v40  ;;  %v12819_v17 = vld [vmem:[%s7076_s13 + $0x80] sm:$0xff]  ;;  %v12822_v62 = vld [vmem:[%s7076_s13 + $0x88] sm:$0xff] }
 0x2f5   : > { %19471 = vst [vmem:[#allocation69_spill] sm:$0xff] %v12792_v25  ;;  %19472 = vst [vmem:[#allocation78_spill] sm:$0xff] %v12795_v27  ;;  %v12825_v35 = vld [vmem:[%s7076_s13 + $0x90] sm:$0xff]  ;;  %v12828_v14 = vld [vmem:[%s7076_s13 + $0x98] sm:$0xff] }
 0x2f6   : > { %19473 = vst [vmem:[#allocation72_spill] sm:$0xff] %v12798_v26  ;;  %19474 = vst [vmem:[#allocation73_spill] sm:$0xff] %v12801_v57  ;;  %v12831_v38 = vld [vmem:[%s7076_s13 + $0x280] sm:$0xff]  ;;  %v12834_v12 = vld [vmem:[%s7076_s13 + $0x288] sm:$0xff] }
 0x2f7   : > { %19475 = vst [vmem:[#allocation49_spill] sm:$0xff] %v12804_v60  ;;  %19476 = vst [vmem:[#allocation70_spill] sm:$0xff] %v12807_v5  ;;  %v12837_v63 = vld [vmem:[%s7076_s13 + $0x290] sm:$0xff]  ;;  %v12840_v36 = vld [vmem:[%s7076_s13 + $0x298] sm:$0xff] }
 0x2f8   : > { %19477 = vst [vmem:[#allocation146_spill] sm:$0xff] %v12810_v59  ;;  %19478 = vst [vmem:[#allocation48_spill] sm:$0xff] %v12813_v33  ;;  %v12843_v22 = vld [vmem:[%s7076_s13 + $0xa0] sm:$0xff]  ;;  %v12846_v28 = vld [vmem:[%s7076_s13 + $0xa8] sm:$0xff] }
 0x2f9   : > { %19479 = vst [vmem:[#allocation39_spill] sm:$0xff] %v12816_v11  ;;  %19480 = vst [vmem:[#allocation38_spill] sm:$0xff] %v12819_v17  ;;  %v12849_v46 = vld [vmem:[%s7076_s13 + $0xb0] sm:$0xff]  ;;  %v12852_v0 = vld [vmem:[%s7076_s13 + $0xb8] sm:$0xff] }
 0x2fa   : > { %19481 = vst [vmem:[#allocation138_spill] sm:$0xff] %v12822_v62  ;;  %19482 = vst [vmem:[#allocation45_spill] sm:$0xff] %v12825_v35  ;;  %v12855_v58 = vld [vmem:[%s7076_s13 + $0x2a0] sm:$0xff]  ;;  %v12858_v24 = vld [vmem:[%s7076_s13 + $0x2a8] sm:$0xff] }
 0x2fb   : > { %19483 = vst [vmem:[#allocation147_spill] sm:$0xff] %v12828_v14  ;;  %19484 = vst [vmem:[#allocation54_spill] sm:$0xff] %v12831_v38  ;;  %v12861_v23 = vld [vmem:[%s7076_s13 + $0x2b0] sm:$0xff]  ;;  %v12864_v52 = vld [vmem:[%s7076_s13 + $0x2b8] sm:$0xff] }
 0x2fc   : > { %19485 = vst [vmem:[#allocation41_spill] sm:$0xff] %v12834_v12  ;;  %19486 = vst [vmem:[#allocation139_spill] sm:$0xff] %v12837_v63  ;;  %v12875_v10 = vld [vmem:[%s7076_s13 + $0xc0] sm:$0xff]  ;;  %v12878_v61 = vld [vmem:[%s7076_s13 + $0xc8] sm:$0xff] }
 0x2fd   : > { %19487 = vst [vmem:[#allocation142_spill] sm:$0xff] %v12840_v36  ;;  %19488 = vst [vmem:[#allocation46_spill] sm:$0xff] %v12846_v28  ;;  %v12881_v21 = vld [vmem:[%s7076_s13 + $0xd0] sm:$0xff]  ;;  %v12884_v41 = vld [vmem:[%s7076_s13 + $0xd8] sm:$0xff] }
 0x2fe   : > { %19489 = vst [vmem:[#allocation47_spill] sm:$0xff] %v12849_v46  ;;  %19490 = vst [vmem:[#allocation101_spill] sm:$0xff] %v12852_v0  ;;  %v12887_v56 = vld [vmem:[%s7076_s13 + $0x2c0] sm:$0xff]  ;;  %v12890_v7 = vld [vmem:[%s7076_s13 + $0x2c8] sm:$0xff] }
 0x2ff   : > { %19491 = vst [vmem:[#allocation52_spill] sm:$0xff] %v12858_v24  ;;  %19492 = vst [vmem:[#allocation71_spill] sm:$0xff] %v12861_v23  ;;  %v12893_v8 = vld [vmem:[%s7076_s13 + $0x2d0] sm:$0xff]  ;;  %v12896_v4 = vld [vmem:[%s7076_s13 + $0x2d8] sm:$0xff] }
 0x300   : > { %19493 = vst [vmem:[#allocation83_spill] sm:$0xff] %v12864_v52  ;;  %19494 = vst [vmem:[#allocation85_spill] sm:$0xff] %v12875_v10  ;;  %v12907_v29 = vld [vmem:[%s7076_s13 + $0xe0] sm:$0xff]  ;;  %v12910_v3 = vld [vmem:[%s7076_s13 + $0xe8] sm:$0xff] }
 0x301   : > { %19495 = vst [vmem:[#allocation53_spill] sm:$0xff] %v12878_v61  ;;  %19496 = vst [vmem:[#allocation90_spill] sm:$0xff] %v12881_v21  ;;  %v12913_v6 = vld [vmem:[%s7076_s13 + $0xf0] sm:$0xff]  ;;  %v12916_v16 = vld [vmem:[%s7076_s13 + $0xf8] sm:$0xff] }
 0x302   : > { %19497 = vst [vmem:[#allocation84_spill] sm:$0xff] %v12884_v41  ;;  %19498 = vst [vmem:[#allocation93_spill] sm:$0xff] %v12887_v56  ;;  %v12919_v13 = vld [vmem:[%s7076_s13 + $0x2e0] sm:$0xff]  ;;  %v12922_v18 = vld [vmem:[%s7076_s13 + $0x2e8] sm:$0xff] }
 0x303   : > { %19499 = vst [vmem:[#allocation82_spill] sm:$0xff] %v12890_v7  ;;  %19500 = vst [vmem:[#allocation79_spill] sm:$0xff] %v12893_v8  ;;  %v12925_v34 = vld [vmem:[%s7076_s13 + $0x2f0] sm:$0xff]  ;;  %v12928_v1 = vld [vmem:[%s7076_s13 + $0x2f8] sm:$0xff] }
 0x304   : > { %19501 = vst [vmem:[#allocation92_spill] sm:$0xff] %v12896_v4  ;;  %19502 = vst [vmem:[#allocation98_spill] sm:$0xff] %v12910_v3  ;;  %v12939_v32 = vld [vmem:[%s7076_s13 + $0x100] sm:$0xff]  ;;  %v12942_v2 = vld [vmem:[%s7076_s13 + $0x108] sm:$0xff] }
 0x305   : > { %19503 = vst [vmem:[#allocation75_spill] sm:$0xff] %v12913_v6  ;;  %19504 = vst [vmem:[#allocation91_spill] sm:$0xff] %v12916_v16  ;;  %v12945_v37 = vld [vmem:[%s7076_s13 + $0x110] sm:$0xff]  ;;  %v12948_v39 = vld [vmem:[%s7076_s13 + $0x118] sm:$0xff] }
 0x306   : > { %19505 = vst [vmem:[#allocation35_spill] sm:$0xff] %v12919_v13  ;;  %19506 = vst [vmem:[#allocation120_spill] sm:$0xff] %v12922_v18  ;;  %v12951_v50 = vld [vmem:[%s7076_s13 + $0x300] sm:$0xff]  ;;  %v12954_v44 = vld [vmem:[%s7076_s13 + $0x308] sm:$0xff] }
 0x307   : > { %19507 = vst [vmem:[#allocation117_spill] sm:$0xff] %v12925_v34  ;;  %19508 = vst [vmem:[#allocation100_spill] sm:$0xff] %v12928_v1  ;;  %v12957_v40 = vld [vmem:[%s7076_s13 + $0x310] sm:$0xff]  ;;  %v12960_v49 = vld [vmem:[%s7076_s13 + $0x318] sm:$0xff] }
 0x308   : > { %19509 = vst [vmem:[#allocation118_spill] sm:$0xff] %v12939_v32  ;;  %19510 = vst [vmem:[#allocation99_spill] sm:$0xff] %v12942_v2  ;;  %v12971_v20 = vld [vmem:[%s7076_s13 + $0x120] sm:$0xff]  ;;  %v12974_v51 = vld [vmem:[%s7076_s13 + $0x128] sm:$0xff] }
 0x309   : > { %19511 = vst [vmem:[#allocation130_spill] sm:$0xff] %v12945_v37  ;;  %19512 = vst [vmem:[#allocation124_spill] sm:$0xff] %v12948_v39  ;;  %v12977_v25 = vld [vmem:[%s7076_s13 + $0x130] sm:$0xff]  ;;  %v12980_v5 = vld [vmem:[%s7076_s13 + $0x138] sm:$0xff] }
 0x30a   : > { %19513 = vst [vmem:[#allocation88_spill] sm:$0xff] %v12951_v50  ;;  %19514 = vst [vmem:[#allocation111_spill] sm:$0xff] %v12954_v44  ;;  %v12983_v43 = vld [vmem:[%s7076_s13 + $0x320] sm:$0xff]  ;;  %v12986_v59 = vld [vmem:[%s7076_s13 + $0x328] sm:$0xff] }
 0x30b   : > { %19515 = vst [vmem:[#allocation28_spill] sm:$0xff] %v12957_v40  ;;  %19516 = vst [vmem:[#allocation87_spill] sm:$0xff] %v12960_v49  ;;  %v12989_v15 = vld [vmem:[%s7076_s13 + $0x330] sm:$0xff]  ;;  %v12992_v33 = vld [vmem:[%s7076_s13 + $0x338] sm:$0xff] }
 0x30c   : > { %19517 = vst [vmem:[#allocation27_spill] sm:$0xff] %v12974_v51  ;;  %19518 = vst [vmem:[#allocation86_spill] sm:$0xff] %v12977_v25  ;;  %v13003_v26 = vld [vmem:[%s7076_s13 + $0x140] sm:$0xff]  ;;  %v13006_v27 = vld [vmem:[%s7076_s13 + $0x148] sm:$0xff] }
 0x30d   : > { %19519 = vst [vmem:[#allocation80_spill] sm:$0xff] %v12980_v5  ;;  %19520 = vst [vmem:[#allocation106_spill] sm:$0xff] %v12983_v43  ;;  %v13009_v48 = vld [vmem:[%s7076_s13 + $0x150] sm:$0xff]  ;;  %v13012_v38 = vld [vmem:[%s7076_s13 + $0x158] sm:$0xff] }
 0x30e   : > { %19521 = vst [vmem:[#allocation105_spill] sm:$0xff] %v12986_v59  ;;  %19522 = vst [vmem:[#allocation30_spill] sm:$0xff] %v12989_v15  ;;  %v13015_v11 = vld [vmem:[%s7076_s13 + $0x340] sm:$0xff]  ;;  %v13018_v12 = vld [vmem:[%s7076_s13 + $0x348] sm:$0xff] }
 0x30f   : > { %19523 = vst [vmem:[#allocation31_spill] sm:$0xff] %v12992_v33  ;;  %v13021_v60 = vld [vmem:[%s7076_s13 + $0x350] sm:$0xff]  ;;  %v13032_v35 = vld [vmem:[%s7076_s13 + $0x160] sm:$0xff]  ;;  %v13035_v62 = vld [vmem:[%s7076_s13 + $0x168] sm:$0xff]  ;;  %v3490_v40 = vmax.f32 %v13003_v26, %v13015_v11  ;;  %v3491_v39 = vmax.f32 %v13006_v27, %v13018_v12 }
 0x310   : > { %v13038_v57 = vld [vmem:[%s7076_s13 + $0x170] sm:$0xff]  ;;  %v13041_v17 = vld [vmem:[%s7076_s13 + $0x178] sm:$0xff]  ;;  %v13047_v24 = vld [vmem:[%s7076_s13 + $0x360] sm:$0xff]  ;;  %v3492_v33 = vmax.f32 %v13009_v48, %v13021_v60 }
 0x311   : > { %v13044_v36 = vld [vmem:[%s7076_s13 + $0x358] sm:$0xff]  ;;  %v13050_v14 = vld [vmem:[%s7076_s13 + $0x368] sm:$0xff]  ;;  %v13061_v46 = vld [vmem:[%s7076_s13 + $0x180] sm:$0xff]  ;;  %v3494_v43 = vmax.f32 %v13032_v35, %v13047_v24 }
 0x312   : > { %v13064_v28 = vld [vmem:[%s7076_s13 + $0x188] sm:$0xff]  ;;  %v13067_v63 = vld [vmem:[%s7076_s13 + $0x190] sm:$0xff]  ;;  %v13070_v56 = vld [vmem:[%s7076_s13 + $0x198] sm:$0xff]  ;;  %v3493_v5 = vmax.f32 %v13012_v38, %v13044_v36  ;;  %v3495_v26 = vmax.f32 %v13035_v62, %v13050_v14 }
 0x313   : > { %v13073_v52 = vld [vmem:[%s7076_s13 + $0x370] sm:$0xff]  ;;  %v13076_v7 = vld [vmem:[%s7076_s13 + $0x378] sm:$0xff]  ;;  %v13079_v0 = vld [vmem:[%s7076_s13 + $0x380] sm:$0xff] }
 0x314   : > { %v13090_v21 = vld [vmem:[%s7076_s13 + $0x1a0] sm:$0xff]  ;;  %v13093_v61 = vld [vmem:[%s7076_s13 + $0x1a8] sm:$0xff]  ;;  %v13096_v23 = vld [vmem:[%s7076_s13 + $0x1b0] sm:$0xff]  ;;  %v3496_v27 = vmax.f32 %v13038_v57, %v13073_v52  ;;  %v3497_v48 = vmax.f32 %v13041_v17, %v13076_v7  ;;  %v3498_v12 = vmax.f32 %v13061_v46, %v13079_v0 }
 0x315   : > { %v13099_v10 = vld [vmem:[%s7076_s13 + $0x1b8] sm:$0xff]  ;;  %v13102_v4 = vld [vmem:[%s7076_s13 + $0x388] sm:$0xff]  ;;  %v13105_v18 = vld [vmem:[%s7076_s13 + $0x390] sm:$0xff] }
 0x316   : > { %v13108_v41 = vld [vmem:[%s7076_s13 + $0x398] sm:$0xff]  ;;  %v13119_v6 = vld [vmem:[%s7076_s13 + $0x1c0] sm:$0xff]  ;;  %v13122_v3 = vld [vmem:[%s7076_s13 + $0x1c8] sm:$0xff]  ;;  %v3499_v35 = vmax.f32 %v13064_v28, %v13102_v4  ;;  %v3500_v62 = vmax.f32 %v13067_v63, %v13105_v18 }
 0x317   : > { %v13125_v8 = vld [vmem:[%s7076_s13 + $0x1d0] sm:$0xff]  ;;  %v13128_v50 = vld [vmem:[%s7076_s13 + $0x1d8] sm:$0xff]  ;;  %v13131_v1 = vld [vmem:[%s7076_s13 + $0x3a0] sm:$0xff]  ;;  %v3501_v57 = vmax.f32 %v13070_v56, %v13108_v41  ;;  %v19530_v56 = vmax.f32 %v12753_v19, %v12765_v45 }
 0x318   : > { %v13134_v44 = vld [vmem:[%s7076_s13 + $0x3a8] sm:$0xff]  ;;  %v13137_v16 = vld [vmem:[%s7076_s13 + $0x3b0] sm:$0xff]  ;;  %v13148_v37 = vld [vmem:[%s7076_s13 + $0x1e0] sm:$0xff]  ;;  %v3502_v17 = vmax.f32 %v13090_v21, %v13131_v1 }
 0x319   : > { %v13151_v2 = vld [vmem:[%s7076_s13 + $0x1e8] sm:$0xff]  ;;  %v13154_v32 = vld [vmem:[%s7076_s13 + $0x1f0] sm:$0xff]  ;;  %v13157_v13 = vld [vmem:[%s7076_s13 + $0x1f8] sm:$0xff]  ;;  %v3503_v14 = vmax.f32 %v13093_v61, %v13134_v44  ;;  %v3504_v36 = vmax.f32 %v13096_v23, %v13137_v16  ;;  %v19525_v61 = vmax.f32 %v12723_v31, %v12735_v53 }
 0x31a   : > { %v13160_v34 = vld [vmem:[%s7076_s13 + $0x3b8] sm:$0xff]  ;;  %v13163_v49 = vld [vmem:[%s7076_s13 + $0x3c0] sm:$0xff]  ;;  %v13166_v59 = vld [vmem:[%s7076_s13 + $0x3c8] sm:$0xff] }
 0x31b   : > { %v13177_v15 = vld [vmem:[%s7076_s13 + $0x3d0] sm:$0xff]  ;;  %v13180_v25 = vld [vmem:[%s7076_s13 + $0x3d8] sm:$0xff]  ;;  %v13183_v51 = vld [vmem:[%s7076_s13 + $0x3e0] sm:$0xff]  ;;  %v3505_v46 = vmax.f32 %v13099_v10, %v13160_v34  ;;  %v19524_v10 = vmax.f32 %v12747_v42, %v12759_v55 }
 0x31c   : > { %v13194_v60 = vld [vmem:[%s7076_s13 + $0x3e8] sm:$0xff]  ;;  %v13197_v11 = vld [vmem:[%s7076_s13 + $0x3f0] sm:$0xff]  ;;  %v13200_v38 = vld [vmem:[%s7076_s13 + $0x3f8] sm:$0xff]  ;;  %v3510_v24 = vmax.f32 %v13148_v37, %v13183_v51  ;;  %v19527_v37 = vmax.f32 %v12750_v9, %v12762_v30  ;;  %v19528_v51 = vmax.f32 %v12726_v54, %v12738_v47 }
 0x31d   : > { %v13240_v21 = vmax.f32 %v19525_v61, %v19524_v10  ;;  %v19531_v7 = vld [vmem:[#allocation63_spill] sm:$0xff]  ;;  %v19532_v42 = vld [vmem:[#allocation56_spill] sm:$0xff]  ;;  %v19536_v4 = vld [vmem:[#allocation65_spill] sm:$0xff] }
 0x31e   : > { %v13248_v41 = vmax.f32 %v19528_v51, %v19527_v37  ;;  %v19533_v55 = vmax.f32 %v19531_v7, %v19532_v42  ;;  %v19535_v53 = vld [vmem:[#allocation64_spill] sm:$0xff]  ;;  %v19538_v18 = vld [vmem:[#allocation150_spill] sm:$0xff]  ;;  %v19539_v9 = vld [vmem:[#allocation61_spill] sm:$0xff] }
 0x31f   : > { %19526 = vst [vmem:[#allocation32_spill] sm:$0xff] %v13240_v21  ;;  %v19537_v34 = vmax.f32 %v19535_v53, %v19536_v4  ;;  %v19540_v30 = vmax.f32 %v19538_v18, %v19539_v9  ;;  %v19542_v54 = vld [vmem:[#allocation78_spill] sm:$0xff]  ;;  %v19549_v51 = vld [vmem:[#allocation72_spill] sm:$0xff]  ;;  %v19552_v42 = vld [vmem:[#allocation67_spill] sm:$0xff] }
 0x320   : > { %19529 = vst [vmem:[#allocation103_spill] sm:$0xff] %v13248_v41  ;;  %v13256_v31 = vmax.f32 %v19533_v55, %v19530_v56  ;;  %v19543_v47 = vld [vmem:[#allocation70_spill] sm:$0xff]  ;;  %v19556_v4 = vld [vmem:[#allocation73_spill] sm:$0xff]  ;;  %v19557_v18 = vld [vmem:[#allocation48_spill] sm:$0xff] }
 0x321   : > { %v13264_v1 = vmax.f32 %v19540_v30, %v19537_v34  ;;  %v19544_v10 = vmax.f32 %v19542_v54, %v19543_v47  ;;  %v19545_v61 = vld [vmem:[#allocation74_spill] sm:$0xff]  ;;  %v19558_v34 = vmax.f32 %v19556_v4, %v19557_v18  ;;  %v19559_v9 = vld [vmem:[#allocation76_spill] sm:$0xff]  ;;  %v19563_v47 = vld [vmem:[#allocation49_spill] sm:$0xff] }
 0x322   : > { %19534 = vst [vmem:[#allocation94_spill] sm:$0xff] %v13256_v31  ;;  %v19546_v37 = vld [vmem:[#allocation66_spill] sm:$0xff]  ;;  %v19560_v30 = vld [vmem:[#allocation68_spill] sm:$0xff]  ;;  %v19585_v63 = vld [vmem:[#allocation45_spill] sm:$0xff] }
 0x323   : > { %19541 = vst [vmem:[#allocation95_spill] sm:$0xff] %v13264_v1  ;;  %v19547_v19 = vmax.f32 %v19545_v61, %v19546_v37  ;;  %v19550_v7 = vld [vmem:[#allocation146_spill] sm:$0xff]  ;;  %v19561_v16 = vmax.f32 %v19559_v9, %v19560_v30  ;;  %v19564_v61 = vld [vmem:[#allocation39_spill] sm:$0xff]  ;;  %v19566_v37 = vld [vmem:[#allocation77_spill] sm:$0xff] }
 0x324   : > { %v19551_v56 = vmax.f32 %v19549_v51, %v19550_v7  ;;  %v19553_v55 = vld [vmem:[#allocation62_spill] sm:$0xff]  ;;  %v13302_v7 = vld [vmem:[%s7076_s13 + $0x408] sm:$0xff]  ;;  %v19586_v23 = vld [vmem:[#allocation139_spill] sm:$0xff] }
 0x325   : > { %v13272_v45 = vmax.f32 %v19547_v19, %v19544_v10  ;;  %v19554_v44 = vmax.f32 %v19552_v42, %v19553_v55  ;;  %v13288_v54 = vmax.f32 %v19561_v16, %v19558_v34  ;;  %v19565_v10 = vmax.f32 %v19563_v47, %v19564_v61  ;;  %v19567_v19 = vld [vmem:[#allocation69_spill] sm:$0xff]  ;;  %v19571_v42 = vld [vmem:[#allocation38_spill] sm:$0xff]  ;;  %v19576_v9 = vld [vmem:[#allocation52_spill] sm:$0xff] }
 0x326   : > { %v19568_v0 = vmax.f32 %v19566_v37, %v19567_v19  ;;  %v19570_v16 = vmax.f32 %v12843_v22, %v12855_v58  ;;  %v19572_v55 = vld [vmem:[#allocation54_spill] sm:$0xff]  ;;  %v19579_v47 = vld [vmem:[#allocation41_spill] sm:$0xff]  ;;  %v19582_v37 = vld [vmem:[#allocation47_spill] sm:$0xff]  ;;  %v19587_v28 = vmax.f32 %v19585_v63, %v19586_v23 }
 0x327   : > { %19548 = vst [vmem:[#allocation81_spill] sm:$0xff] %v13272_v45  ;;  %v13280_v53 = vmax.f32 %v19554_v44, %v19551_v56  ;;  %19562 = vst [vmem:[#allocation107_spill] sm:$0xff] %v13288_v54  ;;  %v13299_v44 = vld [vmem:[%s7076_s13 + $0x400] sm:$0xff]  ;;  %v13305_v56 = vld [vmem:[%s7076_s13 + $0x410] sm:$0xff]  ;;  %v19573_v4 = vmax.f32 %v19571_v42, %v19572_v55 }
 0x328   : > { %v13296_v51 = vmax.f32 %v19568_v0, %v19565_v10  ;;  %v19575_v34 = vld [vmem:[#allocation46_spill] sm:$0xff]  ;;  %v19583_v19 = vld [vmem:[#allocation71_spill] sm:$0xff]  ;;  %v19589_v58 = vld [vmem:[#allocation101_spill] sm:$0xff] }
 0x329   : > { %19555 = vst [vmem:[#allocation113_spill] sm:$0xff] %v13280_v53  ;;  %v13313_v18 = vmax.f32 %v19573_v4, %v19570_v16  ;;  %v19577_v0 = vmax.f32 %v19575_v34, %v19576_v9  ;;  %v19578_v30 = vld [vmem:[#allocation138_spill] sm:$0xff]  ;;  %v19584_v52 = vmax.f32 %v19582_v37, %v19583_v19  ;;  %v19590_v42 = vld [vmem:[#allocation83_spill] sm:$0xff]  ;;  %v19598_v23 = vld [vmem:[#allocation85_spill] sm:$0xff] }
 0x32a   : > { %19569 = vst [vmem:[#allocation97_spill] sm:$0xff] %v13296_v51  ;;  %v19580_v61 = vmax.f32 %v19578_v30, %v19579_v47  ;;  %v19591_v16 = vmax.f32 %v19589_v58, %v19590_v42  ;;  %v19592_v55 = vld [vmem:[#allocation147_spill] sm:$0xff]  ;;  %v19593_v4 = vld [vmem:[#allocation142_spill] sm:$0xff]  ;;  %v13346_v30 = vld [vmem:[%s7076_s13 + $0x428] sm:$0xff] }
 0x32b   : > { %19574 = vst [vmem:[#allocation33_spill] sm:$0xff] %v13313_v18  ;;  %v13329_v22 = vmax.f32 %v19587_v28, %v19584_v52  ;;  %v19594_v18 = vmax.f32 %v19592_v55, %v19593_v4  ;;  %v13340_v9 = vld [vmem:[%s7076_s13 + $0x418] sm:$0xff]  ;;  %v19596_v28 = vld [vmem:[#allocation35_spill] sm:$0xff]  ;;  %v19599_v52 = vld [vmem:[#allocation93_spill] sm:$0xff] }
 0x32c   : > { %v13321_v10 = vmax.f32 %v19580_v61, %v19577_v0  ;;  %v13343_v0 = vld [vmem:[%s7076_s13 + $0x420] sm:$0xff]  ;;  %v19597_v63 = vmax.f32 %v12907_v29, %v19596_v28  ;;  %v19600_v47 = vmax.f32 %v19598_v23, %v19599_v52  ;;  %v19602_v37 = vld [vmem:[#allocation98_spill] sm:$0xff]  ;;  %v19603_v19 = vld [vmem:[#allocation120_spill] sm:$0xff] }
 0x32d   : > { %19588 = vst [vmem:[#allocation34_spill] sm:$0xff] %v13329_v22  ;;  %v13337_v34 = vmax.f32 %v19594_v18, %v19591_v16  ;;  %v19604_v18 = vmax.f32 %v19602_v37, %v19603_v19  ;;  %v19605_v58 = vld [vmem:[#allocation53_spill] sm:$0xff]  ;;  %v19606_v42 = vld [vmem:[#allocation82_spill] sm:$0xff]  ;;  %v19609_v4 = vld [vmem:[#allocation75_spill] sm:$0xff] }
 0x32e   : > { %19581 = vst [vmem:[#allocation110_spill] sm:$0xff] %v13321_v10  ;;  %v13354_v61 = vmax.f32 %v19600_v47, %v19597_v63  ;;  %v19607_v16 = vmax.f32 %v19605_v58, %v19606_v42  ;;  %v19610_v10 = vld [vmem:[#allocation117_spill] sm:$0xff]  ;;  %v19612_v22 = vld [vmem:[#allocation90_spill] sm:$0xff]  ;;  %v19613_v53 = vld [vmem:[#allocation79_spill] sm:$0xff] }
 0x32f   : > { %19595 = vst [vmem:[#allocation109_spill] sm:$0xff] %v13337_v34  ;;  %v19611_v34 = vmax.f32 %v19609_v4, %v19610_v10  ;;  %v19614_v51 = vmax.f32 %v19612_v22, %v19613_v53  ;;  %v19616_v28 = vld [vmem:[#allocation91_spill] sm:$0xff]  ;;  %v19617_v23 = vld [vmem:[#allocation100_spill] sm:$0xff]  ;;  %v13381_v19 = vld [vmem:[%s7076_s13 + $0x430] sm:$0xff] }
 0x330   : > { %19601 = vst [vmem:[#allocation114_spill] sm:$0xff] %v13354_v61  ;;  %v13362_v55 = vmax.f32 %v19607_v16, %v19604_v18  ;;  %v19618_v63 = vmax.f32 %v19616_v28, %v19617_v23  ;;  %v19619_v52 = vld [vmem:[#allocation84_spill] sm:$0xff]  ;;  %v13384_v18 = vld [vmem:[%s7076_s13 + $0x438] sm:$0xff]  ;;  %v13387_v10 = vld [vmem:[%s7076_s13 + $0x440] sm:$0xff] }
 0x331   : > { %v13370_v29 = vmax.f32 %v19614_v51, %v19611_v34  ;;  %v19620_v47 = vld [vmem:[#allocation92_spill] sm:$0xff]  ;;  %v19623_v53 = vld [vmem:[#allocation106_spill] sm:$0xff]  ;;  %v19630_v16 = vld [vmem:[#allocation105_spill] sm:$0xff] }
 0x332   : > { %19608 = vst [vmem:[#allocation58_spill] sm:$0xff] %v13362_v55  ;;  %v19621_v61 = vmax.f32 %v19619_v52, %v19620_v47  ;;  %v19624_v51 = vmax.f32 %v12971_v20, %v19623_v53  ;;  %v19625_v22 = vld [vmem:[#allocation118_spill] sm:$0xff]  ;;  %v19626_v34 = vld [vmem:[#allocation88_spill] sm:$0xff]  ;;  %v19632_v28 = vld [vmem:[#allocation99_spill] sm:$0xff] }
 0x333   : > { %19615 = vst [vmem:[#allocation102_spill] sm:$0xff] %v13370_v29  ;;  %v19627_v58 = vmax.f32 %v19625_v22, %v19626_v34  ;;  %v19633_v23 = vld [vmem:[#allocation111_spill] sm:$0xff]  ;;  %v19636_v47 = vld [vmem:[#allocation86_spill] sm:$0xff]  ;;  %v19640_v20 = vld [vmem:[#allocation28_spill] sm:$0xff] }
 0x334   : > { %v13378_v37 = vmax.f32 %v19621_v61, %v19618_v63  ;;  %v19629_v61 = vld [vmem:[#allocation27_spill] sm:$0xff]  ;;  %v19634_v63 = vmax.f32 %v19632_v28, %v19633_v23  ;;  %v19637_v55 = vld [vmem:[#allocation30_spill] sm:$0xff]  ;;  %v19643_v22 = vld [vmem:[#allocation80_spill] sm:$0xff] }
 0x335   : > { %v13395_v42 = vmax.f32 %v19627_v58, %v19624_v51  ;;  %v19631_v4 = vmax.f32 %v19629_v61, %v19630_v16  ;;  %v19639_v29 = vld [vmem:[#allocation130_spill] sm:$0xff]  ;;  %v19644_v51 = vld [vmem:[#allocation31_spill] sm:$0xff]  ;;  %v19646_v58 = vld [vmem:[#allocation124_spill] sm:$0xff] }
 0x336   : > { %19622 = vst [vmem:[#allocation128_spill] sm:$0xff] %v13378_v37  ;;  %v19638_v37 = vmax.f32 %v19636_v47, %v19637_v55  ;;  %v19641_v53 = vmax.f32 %v19639_v29, %v19640_v20  ;;  %v19645_v34 = vmax.f32 %v19643_v22, %v19644_v51  ;;  %v13422_v28 = vld [vmem:[%s7076_s13 + $0x448] sm:$0xff]  ;;  %v13428_v23 = vld [vmem:[%s7076_s13 + $0x458] sm:$0xff]  ;;  %v13430_v55 = vmax.f32 %v3490_v40, %v3494_v43  ;;  %v13445_v20 = vld [vmem:[%s7076_s13 + $0x470] sm:$0xff] }
 0x337   : > { %19628 = vst [vmem:[#allocation36_spill] sm:$0xff] %v13395_v42  ;;  %v13403_v52 = vmax.f32 %v19634_v63, %v19631_v4  ;;  %v19647_v42 = vld [vmem:[#allocation87_spill] sm:$0xff]  ;;  %v13425_v4 = vld [vmem:[%s7076_s13 + $0x450] sm:$0xff]  ;;  %v13432_v29 = vmax.f32 %v3491_v39, %v3495_v26  ;;  %v13442_v47 = vld [vmem:[%s7076_s13 + $0x468] sm:$0xff]  ;;  %v13454_v39 = vmax.f32 %v3498_v12, %v3502_v17  ;;  %v13456_v40 = vmax.f32 %v3499_v35, %v3503_v14 }
 0x338   : > { %v13411_v45 = vmax.f32 %v19641_v53, %v19638_v37  ;;  %v19648_v61 = vmax.f32 %v19646_v58, %v19647_v42  ;;  %19650 = vst [vmem:[#allocation119_spill] sm:$0xff] %v13430_v55  ;;  %v13434_v37 = vmax.f32 %v3492_v33, %v3496_v27  ;;  %v13436_v42 = vmax.f32 %v3493_v5, %v3497_v48  ;;  %v13439_v63 = vld [vmem:[%s7076_s13 + $0x460] sm:$0xff]  ;;  %v13449_v22 = vld [vmem:[%s7076_s13 + $0x608] sm:$0xff]  ;;  %v13452_v43 = vld [vmem:[%s7076_s13 + $0x610] sm:$0xff] }
 0x339   : > { %19635 = vst [vmem:[#allocation122_spill] sm:$0xff] %v13403_v52  ;;  %19651 = vst [vmem:[#allocation116_spill] sm:$0xff] %v13432_v29  ;;  %v3130_v53 = vld [vmem:[%s7076_s13 + $0x600] sm:$0xff]  ;;  %v13458_v5 = vmax.f32 %v3500_v62, %v3504_v36  ;;  %v13460_v33 = vmax.f32 %v3501_v57, %v3505_v46  ;;  %v13463_v26 = vld [vmem:[%s7076_s13 + $0x478] sm:$0xff]  ;;  %v3515_v62 = vmax.f32 %v13302_v7, %v13449_v22 }
 0x33a   : > { %19642 = vst [vmem:[#allocation57_spill] sm:$0xff] %v13411_v45  ;;  %v13419_v16 = vmax.f32 %v19648_v61, %v19645_v34  ;;  %19652 = vst [vmem:[#allocation108_spill] sm:$0xff] %v13434_v37  ;;  %v13466_v27 = vld [vmem:[%s7076_s13 + $0x480] sm:$0xff]  ;;  %v13469_v48 = vld [vmem:[%s7076_s13 + $0x488] sm:$0xff]  ;;  %v3514_v35 = vmax.f32 %v13299_v44, %v3130_v53  ;;  %v3516_v57 = vmax.f32 %v13305_v56, %v13452_v43 }
 0x33b   : > { %19653 = vst [vmem:[#allocation135_spill] sm:$0xff] %v13436_v42  ;;  %19654 = vst [vmem:[#allocation131_spill] sm:$0xff] %v13454_v39  ;;  %v13472_v51 = vld [vmem:[%s7076_s13 + $0x618] sm:$0xff]  ;;  %v3134_v12 = vld [vmem:[%s7076_s13 + $0x620] sm:$0xff]  ;;  %v19658_v14 = vmax.f32 %v13119_v6, %v13163_v49  ;;  %v19660_v56 = vmax.f32 %v13151_v2, %v13194_v60  ;;  %v19661_v53 = vmax.f32 %v13122_v3, %v13166_v59 }
 0x33c   : > { %19649 = vst [vmem:[#allocation127_spill] sm:$0xff] %v13419_v16  ;;  %19655 = vst [vmem:[#allocation129_spill] sm:$0xff] %v13456_v40  ;;  %v3135_v17 = vld [vmem:[%s7076_s13 + $0x628] sm:$0xff]  ;;  %v13487_v46 = vld [vmem:[%s7076_s13 + $0x490] sm:$0xff]  ;;  %v3518_v6 = vmax.f32 %v13343_v0, %v3134_v12  ;;  %v19663_v60 = vmax.f32 %v13154_v32, %v13197_v11  ;;  %v19666_v11 = vmax.f32 %v13157_v13, %v13200_v38 }
 0x33d   : > { %19656 = vst [vmem:[#allocation121_spill] sm:$0xff] %v13458_v5  ;;  %19657 = vst [vmem:[#allocation123_spill] sm:$0xff] %v13460_v33  ;;  %v13484_v36 = vmax.f32 %v19658_v14, %v3510_v24  ;;  %v13490_v34 = vld [vmem:[%s7076_s13 + $0x498] sm:$0xff]  ;;  %v13493_v44 = vld [vmem:[%s7076_s13 + $0x4a0] sm:$0xff]  ;;  %v3519_v24 = vmax.f32 %v13346_v30, %v3135_v17  ;;  %v13512_v22 = vmax.f32 %v19661_v53, %v19660_v56 }
 0x33e   : > { %v3136_v58 = vld [vmem:[%s7076_s13 + $0x630] sm:$0xff]  ;;  %v13497_v61 = vld [vmem:[%s7076_s13 + $0x638] sm:$0xff]  ;;  %v13500_v7 = vld [vmem:[%s7076_s13 + $0x640] sm:$0xff]  ;;  %v19664_v17 = vmax.f32 %v13125_v8, %v13177_v15  ;;  %v13598_v38 = vmax.f32 %v3514_v35, %v3518_v6 }
 0x33f   : > { %19659 = vst [vmem:[#allocation134_spill] sm:$0xff] %v13484_v36  ;;  %19662 = vst [vmem:[#allocation104_spill] sm:$0xff] %v13512_v22  ;;  %v13515_v43 = vld [vmem:[%s7076_s13 + $0x4a8] sm:$0xff]  ;;  %v13518_v14 = vld [vmem:[%s7076_s13 + $0x4b0] sm:$0xff]  ;;  %v3520_v2 = vmax.f32 %v13381_v19, %v3136_v58  ;;  %v3521_v59 = vmax.f32 %v13384_v18, %v13497_v61  ;;  %v3522_v3 = vmax.f32 %v13387_v10, %v13500_v7 }
 0x340   : > { %v13521_v49 = vld [vmem:[%s7076_s13 + $0x4b8] sm:$0xff]  ;;  %v13524_v0 = vld [vmem:[%s7076_s13 + $0x648] sm:$0xff]  ;;  %v13527_v12 = vld [vmem:[%s7076_s13 + $0x650] sm:$0xff]  ;;  %v13543_v56 = vmax.f32 %v19664_v17, %v19663_v60  ;;  %v19667_v7 = vmax.f32 %v13128_v50, %v13180_v25  ;;  %19670 = vst [vmem:[#allocation115_spill] sm:$0xff] %v13598_v38 }
 0x341   : > { %v13530_v30 = vld [vmem:[%s7076_s13 + $0x658] sm:$0xff]  ;;  %v13546_v53 = vld [vmem:[%s7076_s13 + $0x4c0] sm:$0xff]  ;;  %v13549_v19 = vld [vmem:[%s7076_s13 + $0x4c8] sm:$0xff] }
 0x342   : > { %19665 = vst [vmem:[#allocation50_spill] sm:$0xff] %v13543_v56  ;;  %v13552_v58 = vld [vmem:[%s7076_s13 + $0x4d0] sm:$0xff]  ;;  %v3142_v18 = vld [vmem:[%s7076_s13 + $0x660] sm:$0xff]  ;;  %v13556_v61 = vld [vmem:[%s7076_s13 + $0x668] sm:$0xff]  ;;  %v13573_v60 = vmax.f32 %v19667_v7, %v19666_v11 }
 0x343   : > { %v13559_v10 = vld [vmem:[%s7076_s13 + $0x670] sm:$0xff]  ;;  %v13576_v17 = vld [vmem:[%s7076_s13 + $0x4d8] sm:$0xff]  ;;  %v13579_v32 = vld [vmem:[%s7076_s13 + $0x4e0] sm:$0xff]  ;;  %v3526_v50 = vmax.f32 %v13439_v63, %v3142_v18  ;;  %v3527_v25 = vmax.f32 %v13442_v47, %v13556_v61  ;;  %v13624_v18 = vmax.f32 %v3515_v62, %v3519_v24 }
 0x344   : > { %19668 = vst [vmem:[#allocation37_spill] sm:$0xff] %v13573_v60  ;;  %19669 = vst [vmem:[#allocation112_spill] sm:$0xff] %v13576_v17  ;;  %v13582_v22 = vld [vmem:[%s7076_s13 + $0x4e8] sm:$0xff]  ;;  %v13585_v15 = vld [vmem:[%s7076_s13 + $0x678] sm:$0xff]  ;;  %v3528_v13 = vmax.f32 %v13445_v20, %v13559_v10 }
 0x345   : > { %v13588_v36 = vld [vmem:[%s7076_s13 + $0x680] sm:$0xff]  ;;  %v13591_v8 = vld [vmem:[%s7076_s13 + $0x688] sm:$0xff]  ;;  %v13601_v11 = vld [vmem:[%s7076_s13 + $0x4f0] sm:$0xff]  ;;  %19671 = vst [vmem:[#allocation96_spill] sm:$0xff] %v13624_v18  ;;  %v13650_v18 = vmax.f32 %v3516_v57, %v3520_v2 }
 0x346   : > { %v13604_v7 = vld [vmem:[%s7076_s13 + $0x4f8] sm:$0xff]  ;;  %v13607_v60 = vld [vmem:[%s7076_s13 + $0x500] sm:$0xff]  ;;  %v13610_v56 = vld [vmem:[%s7076_s13 + $0x690] sm:$0xff] }
 0x347   : > { %v13613_v63 = vld [vmem:[%s7076_s13 + $0x698] sm:$0xff]  ;;  %v13616_v47 = vld [vmem:[%s7076_s13 + $0x6a0] sm:$0xff]  ;;  %v13627_v61 = vld [vmem:[%s7076_s13 + $0x508] sm:$0xff]  ;;  %19674 = vst [vmem:[#allocation44_spill] sm:$0xff] %v13650_v18 }
 0x348   : > { %v13630_v10 = vld [vmem:[%s7076_s13 + $0x510] sm:$0xff]  ;;  %v13633_v38 = vld [vmem:[%s7076_s13 + $0x518] sm:$0xff]  ;;  %v13636_v40 = vld [vmem:[%s7076_s13 + $0x6a8] sm:$0xff]  ;;  %v3534_v24 = vmax.f32 %v13493_v44, %v13616_v47  ;;  %v19675_v47 = vmax.f32 %v13340_v9, %v13472_v51 }
 0x349   : > { %19672 = vst [vmem:[#allocation126_spill] sm:$0xff] %v13630_v10  ;;  %19673 = vst [vmem:[#allocation40_spill] sm:$0xff] %v13633_v38  ;;  %v13639_v20 = vld [vmem:[%s7076_s13 + $0x6b0] sm:$0xff]  ;;  %v13642_v35 = vld [vmem:[%s7076_s13 + $0x6b8] sm:$0xff] }
 0x34a   : > { %v13653_v33 = vld [vmem:[%s7076_s13 + $0x520] sm:$0xff]  ;;  %v13656_v39 = vld [vmem:[%s7076_s13 + $0x528] sm:$0xff]  ;;  %v13659_v5 = vld [vmem:[%s7076_s13 + $0x530] sm:$0xff]  ;;  %v13679_v18 = vmax.f32 %v19675_v47, %v3521_v59  ;;  %v13705_v47 = vmax.f32 %v3522_v3, %v3526_v50 }
 0x34b   : > { %v13662_v29 = vld [vmem:[%s7076_s13 + $0x6c0] sm:$0xff]  ;;  %v13665_v6 = vld [vmem:[%s7076_s13 + $0x6c8] sm:$0xff]  ;;  %v13668_v62 = vld [vmem:[%s7076_s13 + $0x6d0] sm:$0xff] }
 0x34c   : > { %19676 = vst [vmem:[#allocation136_spill] sm:$0xff] %v13679_v18  ;;  %v13682_v42 = vld [vmem:[%s7076_s13 + $0x538] sm:$0xff]  ;;  %v13685_v55 = vld [vmem:[%s7076_s13 + $0x540] sm:$0xff]  ;;  %v13688_v44 = vld [vmem:[%s7076_s13 + $0x548] sm:$0xff] }
 0x34d   : > { %v13691_v37 = vld [vmem:[%s7076_s13 + $0x6d8] sm:$0xff]  ;;  %v13694_v57 = vld [vmem:[%s7076_s13 + $0x6e0] sm:$0xff]  ;;  %v13697_v52 = vld [vmem:[%s7076_s13 + $0x6e8] sm:$0xff]  ;;  %19678 = vst [vmem:[#allocation125_spill] sm:$0xff] %v13705_v47  ;;  %v19681_v47 = vmax.f32 %v13422_v28, %v13524_v0 }
 0x34e   : > { %19677 = vst [vmem:[#allocation51_spill] sm:$0xff] %v13691_v37  ;;  %v13708_v2 = vld [vmem:[%s7076_s13 + $0x550] sm:$0xff]  ;;  %v13711_v18 = vld [vmem:[%s7076_s13 + $0x558] sm:$0xff]  ;;  %v13714_v16 = vld [vmem:[%s7076_s13 + $0x560] sm:$0xff] }
 0x34f   : > { %v13717_v45 = vld [vmem:[%s7076_s13 + $0x6f0] sm:$0xff]  ;;  %v13720_v9 = vld [vmem:[%s7076_s13 + $0x6f8] sm:$0xff]  ;;  %v13723_v51 = vld [vmem:[%s7076_s13 + $0x700] sm:$0xff]  ;;  %v13734_v54 = vmax.f32 %v19681_v47, %v3527_v25  ;;  %v19686_v47 = vmax.f32 %v13425_v4, %v13527_v12  ;;  %v19690_v25 = vmax.f32 %v13428_v23, %v13530_v30  ;;  %v19695_v30 = vmax.f32 %v13469_v48, %v13591_v8 }
 0x350   : > { %19679 = vst [vmem:[#allocation43_spill] sm:$0xff] %v13720_v9  ;;  %19680 = vst [vmem:[#allocation42_spill] sm:$0xff] %v13723_v51  ;;  %v13737_v41 = vld [vmem:[%s7076_s13 + $0x568] sm:$0xff]  ;;  %v13740_v1 = vld [vmem:[%s7076_s13 + $0x570] sm:$0xff]  ;;  %v19697_v8 = vmax.f32 %v13518_v14, %v13639_v20 }
 0x351   : > { %19682 = vst [vmem:[#allocation154_spill] sm:$0xff] %v13734_v54  ;;  %v13743_v59 = vld [vmem:[%s7076_s13 + $0x578] sm:$0xff]  ;;  %v13746_v21 = vld [vmem:[%s7076_s13 + $0x708] sm:$0xff]  ;;  %v13749_v3 = vld [vmem:[%s7076_s13 + $0x710] sm:$0xff]  ;;  %v13763_v50 = vmax.f32 %v19686_v47, %v3528_v13  ;;  %v19689_v47 = vmax.f32 %v13463_v26, %v13585_v15  ;;  %v19692_v15 = vmax.f32 %v13466_v27, %v13588_v36 }
 0x352   : > { %19683 = vst [vmem:[#allocation140_spill] sm:$0xff] %v13746_v21  ;;  %19684 = vst [vmem:[#allocation157_spill] sm:$0xff] %v13749_v3  ;;  %v13752_v31 = vld [vmem:[%s7076_s13 + $0x718] sm:$0xff]  ;;  %v13766_v54 = vld [vmem:[%s7076_s13 + $0x580] sm:$0xff] }
 0x353   : > { %19685 = vst [vmem:[#allocation144_spill] sm:$0xff] %v13752_v31  ;;  %19687 = vst [vmem:[#allocation133_spill] sm:$0xff] %v13763_v50  ;;  %v13769_v37 = vld [vmem:[%s7076_s13 + $0x588] sm:$0xff]  ;;  %v13772_v28 = vld [vmem:[%s7076_s13 + $0x590] sm:$0xff]  ;;  %v13795_v50 = vmax.f32 %v19690_v25, %v19689_v47  ;;  %v13824_v25 = vmax.f32 %v19692_v15, %v3534_v24  ;;  %v19694_v15 = vmax.f32 %v13515_v43, %v13636_v40 }
 0x354   : > { %v13775_v17 = vld [vmem:[%s7076_s13 + $0x720] sm:$0xff]  ;;  %v13778_v0 = vld [vmem:[%s7076_s13 + $0x728] sm:$0xff]  ;;  %v13781_v9 = vld [vmem:[%s7076_s13 + $0x730] sm:$0xff] }
 0x355   : > { %19688 = vst [vmem:[#allocation156_spill] sm:$0xff] %v13781_v9  ;;  %19691 = vst [vmem:[#allocation60_spill] sm:$0xff] %v13795_v50  ;;  %v13798_v51 = vld [vmem:[%s7076_s13 + $0x598] sm:$0xff]  ;;  %v13801_v4 = vld [vmem:[%s7076_s13 + $0x5a0] sm:$0xff] }
 0x356   : > { %v13804_v21 = vld [vmem:[%s7076_s13 + $0x5a8] sm:$0xff]  ;;  %v13807_v12 = vld [vmem:[%s7076_s13 + $0x738] sm:$0xff]  ;;  %v13810_v3 = vld [vmem:[%s7076_s13 + $0x740] sm:$0xff]  ;;  %19693 = vst [vmem:[#allocation149_spill] sm:$0xff] %v13824_v25  ;;  %v13856_v25 = vmax.f32 %v19695_v30, %v19694_v15 }
 0x357   : > { %v13813_v13 = vld [vmem:[%s7076_s13 + $0x748] sm:$0xff]  ;;  %v13827_v47 = vld [vmem:[%s7076_s13 + $0x5b0] sm:$0xff]  ;;  %v13830_v50 = vld [vmem:[%s7076_s13 + $0x5b8] sm:$0xff]  ;;  %v3553_v27 = vmax.f32 %v13682_v42, %v13807_v12  ;;  %v3554_v36 = vmax.f32 %v13685_v55, %v13810_v3 }
 0x358   : > { %v13833_v23 = vld [vmem:[%s7076_s13 + $0x5c0] sm:$0xff]  ;;  %v13836_v31 = vld [vmem:[%s7076_s13 + $0x750] sm:$0xff]  ;;  %v13839_v26 = vld [vmem:[%s7076_s13 + $0x758] sm:$0xff]  ;;  %v3555_v24 = vmax.f32 %v13688_v44, %v13813_v13  ;;  %19696 = vst [vmem:[#allocation141_spill] sm:$0xff] %v13856_v25  ;;  %v19698_v13 = vmax.f32 %v13487_v46, %v13610_v56  ;;  %v19700_v46 = vmax.f32 %v13521_v49, %v13642_v35  ;;  %v19701_v56 = vmax.f32 %v13490_v34, %v13613_v63 }
 0x359   : > { %v13842_v38 = vld [vmem:[%s7076_s13 + $0x760] sm:$0xff]  ;;  %v13859_v10 = vld [vmem:[%s7076_s13 + $0x5c8] sm:$0xff]  ;;  %v13862_v42 = vld [vmem:[%s7076_s13 + $0x5d0] sm:$0xff]  ;;  %v3556_v40 = vmax.f32 %v13708_v2, %v13836_v31  ;;  %v3557_v48 = vmax.f32 %v13711_v18, %v13839_v26  ;;  %v19702_v49 = vmax.f32 %v13579_v32, %v13694_v57  ;;  %v19703_v34 = vmax.f32 %v13546_v53, %v13662_v29 }
 0x35a   : > { %v13865_v12 = vld [vmem:[%s7076_s13 + $0x5d8] sm:$0xff]  ;;  %v3175_v55 = vld [vmem:[%s7076_s13 + $0x768] sm:$0xff]  ;;  %v3176_v3 = vld [vmem:[%s7076_s13 + $0x770] sm:$0xff]  ;;  %v3558_v43 = vmax.f32 %v13714_v16, %v13842_v38  ;;  %v13882_v30 = vmax.f32 %v19698_v13, %v19697_v8  ;;  %v13899_v38 = vmax.f32 %v19701_v56, %v19700_v46  ;;  %v19704_v32 = vmax.f32 %v13582_v22, %v13697_v52 }
 0x35b   : > { %v3177_v44 = vld [vmem:[%s7076_s13 + $0x778] sm:$0xff]  ;;  %v3126_v15 = vld [vmem:[%s7076_s13 + $0x5e0] sm:$0xff]  ;;  %v3127_v25 = vld [vmem:[%s7076_s13 + $0x5e8] sm:$0xff]  ;;  %v3559_v26 = vmax.f32 %v13737_v41, %v3175_v55  ;;  %v3560_v16 = vmax.f32 %v13740_v1, %v3176_v3  ;;  %v13914_v63 = vmax.f32 %v19703_v34, %v19702_v49  ;;  %v19705_v29 = vmax.f32 %v13549_v19, %v13665_v6 }
 0x35c   : > { %19699 = vst [vmem:[#allocation152_spill] sm:$0xff] %v13882_v30  ;;  %v3128_v9 = vld [vmem:[%s7076_s13 + $0x5f0] sm:$0xff]  ;;  %v3178_v31 = vld [vmem:[%s7076_s13 + $0x780] sm:$0xff]  ;;  %v3179_v2 = vld [vmem:[%s7076_s13 + $0x788] sm:$0xff]  ;;  %v3561_v14 = vmax.f32 %v13743_v59, %v3177_v44  ;;  %v19707_v52 = vmax.f32 %v13552_v58, %v13668_v62  ;;  %v19713_v34 = vmax.f32 %v13653_v33, %v13775_v17 }
 0x35d   : > { %v3180_v18 = vld [vmem:[%s7076_s13 + $0x790] sm:$0xff]  ;;  %v3129_v20 = vld [vmem:[%s7076_s13 + $0x5f8] sm:$0xff]  ;;  %v3182_v13 = vld [vmem:[%s7076_s13 + $0x7a0] sm:$0xff]  ;;  %v3562_v41 = vmax.f32 %v13766_v54, %v3178_v31  ;;  %v3563_v1 = vmax.f32 %v13769_v37, %v3179_v2  ;;  %v13928_v53 = vmax.f32 %v19705_v29, %v19704_v32 }
 0x35e   : > { %v3181_v8 = vld [vmem:[%s7076_s13 + $0x798] sm:$0xff]  ;;  %v3183_v30 = vld [vmem:[%s7076_s13 + $0x7a8] sm:$0xff]  ;;  %v3564_v59 = vmax.f32 %v13772_v28, %v3180_v18  ;;  %v3184_v35 = vld [vmem:[%s7076_s13 + $0x7b0] sm:$0xff]  ;;  %v3566_v37 = vmax.f32 %v13801_v4, %v3182_v13 }
 0x35f   : > { %v3185_v55 = vld [vmem:[%s7076_s13 + $0x7b8] sm:$0xff]  ;;  %v3186_v3 = vld [vmem:[%s7076_s13 + $0x7c0] sm:$0xff]  ;;  %v3565_v54 = vmax.f32 %v13798_v51, %v3181_v8  ;;  %v3567_v28 = vmax.f32 %v13804_v21, %v3183_v30  ;;  %v3187_v57 = vld [vmem:[%s7076_s13 + $0x7c8] sm:$0xff]  ;;  %v3568_v2 = vmax.f32 %v13827_v47, %v3184_v35  ;;  %v19706_v21 = vmax.f32 %v13601_v11, %v13717_v45 }
 0x360   : > { %v3188_v44 = vld [vmem:[%s7076_s13 + $0x7d0] sm:$0xff]  ;;  %v3189_v31 = vld [vmem:[%s7076_s13 + $0x7d8] sm:$0xff]  ;;  %v3569_v51 = vmax.f32 %v13830_v50, %v3185_v55  ;;  %v3570_v4 = vmax.f32 %v13833_v23, %v3186_v3  ;;  %v3190_v19 = vld [vmem:[%s7076_s13 + $0x7e0] sm:$0xff]  ;;  %v3571_v18 = vmax.f32 %v13859_v10, %v3187_v57 }
 0x361   : > { %v13942_v22 = vmax.f32 %v19707_v52, %v19706_v21  ;;  %v3191_v6 = vld [vmem:[%s7076_s13 + $0x7e8] sm:$0xff]  ;;  %v3192_v30 = vld [vmem:[%s7076_s13 + $0x7f0] sm:$0xff]  ;;  %v3572_v46 = vmax.f32 %v13862_v42, %v3188_v44  ;;  %v3573_v47 = vmax.f32 %v13865_v12, %v3189_v31  ;;  %v19708_v50 = vld [vmem:[#allocation43_spill] sm:$0xff]  ;;  %v3574_v62 = vmax.f32 %v3126_v15, %v3190_v19 }
 0x362   : > { %v19709_v23 = vmax.f32 %v13604_v7, %v19708_v50  ;;  %v19710_v56 = vld [vmem:[#allocation112_spill] sm:$0xff]  ;;  %v19711_v8 = vld [vmem:[#allocation51_spill] sm:$0xff]  ;;  %v3193_v58 = vld [vmem:[%s7076_s13 + $0x7f8] sm:$0xff]  ;;  %v3575_v13 = vmax.f32 %v3127_v25, %v3191_v6  ;;  %v3576_v49 = vmax.f32 %v3128_v9, %v3192_v30  ;;  %v19716_v7 = vmax.f32 %v13656_v39, %v13778_v0 }
 0x363   : > { %v19712_v45 = vmax.f32 %v19710_v56, %v19711_v8  ;;  %v19714_v10 = vld [vmem:[#allocation42_spill] sm:$0xff]  ;;  %v3577_v12 = vmax.f32 %v3129_v20, %v3193_v58  ;;  %v19717_v55 = vld [vmem:[#allocation140_spill] sm:$0xff]  ;;  %v19722_v29 = vld [vmem:[#allocation157_spill] sm:$0xff]  ;;  %v3758_v31 = vmax.f32 %v3554_v36, %v3558_v43  ;;  %v3759_v21 = vmax.f32 %v3555_v24, %v3559_v26 }
 0x364   : > { %v19715_v42 = vmax.f32 %v13607_v60, %v19714_v10  ;;  %v19718_v3 = vmax.f32 %v13627_v61, %v19717_v55  ;;  %v19719_v25 = vld [vmem:[#allocation156_spill] sm:$0xff]  ;;  %v19721_v15 = vld [vmem:[#allocation126_spill] sm:$0xff]  ;;  %v3760_v39 = vmax.f32 %v3556_v40, %v3560_v16  ;;  %v3761_v0 = vmax.f32 %v3557_v48, %v3561_v14  ;;  %v19729_v58 = vld [vmem:[#allocation95_spill] sm:$0xff] }
 0x365   : > { %v13956_v11 = vmax.f32 %v19712_v45, %v19709_v23  ;;  %v19720_v9 = vmax.f32 %v13659_v5, %v19719_v25  ;;  %v19723_v33 = vmax.f32 %v19721_v15, %v19722_v29  ;;  %v19724_v60 = vld [vmem:[#allocation40_spill] sm:$0xff]  ;;  %v3762_v52 = vmax.f32 %v3562_v41, %v3566_v37  ;;  %v19727_v56 = vld [vmem:[#allocation94_spill] sm:$0xff]  ;;  %v19733_v24 = vld [vmem:[#allocation97_spill] sm:$0xff] }
 0x366   : > { %v13965_v35 = vmax.f32 %v19715_v42, %v19713_v34  ;;  %v13973_v32 = vmax.f32 %v19718_v3, %v19716_v7  ;;  %v19725_v57 = vld [vmem:[#allocation144_spill] sm:$0xff]  ;;  %v3763_v61 = vmax.f32 %v3563_v1, %v3567_v28  ;;  %v3764_v19 = vmax.f32 %v3564_v59, %v3568_v2  ;;  %v19730_v34 = vld [vmem:[#allocation103_spill] sm:$0xff]  ;;  %v19734_v40 = vld [vmem:[#allocation113_spill] sm:$0xff] }
 0x367   : > { %v13981_v17 = vmax.f32 %v19723_v33, %v19720_v9  ;;  %v19726_v44 = vmax.f32 %v19724_v60, %v19725_v57  ;;  %v3765_v6 = vmax.f32 %v3565_v54, %v3569_v51  ;;  %v3766_v30 = vmax.f32 %v3570_v4, %v3574_v62  ;;  %v19728_v8 = vld [vmem:[#allocation32_spill] sm:$0xff]  ;;  %v19731_v42 = vld [vmem:[#allocation107_spill] sm:$0xff]  ;;  %v19735_v43 = vld [vmem:[#allocation34_spill] sm:$0xff] }
 0x368   : > { %v3767_v50 = vmax.f32 %v3571_v18, %v3575_v13  ;;  %v3768_v5 = vmax.f32 %v3572_v46, %v3576_v49  ;;  %v3769_v23 = vmax.f32 %v3573_v47, %v3577_v12  ;;  %v3834_v45 = vmax.f32 %v19728_v8, %v19727_v56  ;;  %v19736_v26 = vld [vmem:[#allocation33_spill] sm:$0xff]  ;;  %v19738_v41 = vld [vmem:[#allocation110_spill] sm:$0xff]  ;;  %v19741_v28 = vld [vmem:[#allocation128_spill] sm:$0xff] }
 0x369   : > { %v3757_v20 = vmax.f32 %v19726_v44, %v3553_v27  ;;  %v3835_v10 = vmax.f32 %v19730_v34, %v19729_v58  ;;  %v19732_v27 = vld [vmem:[#allocation81_spill] sm:$0xff]  ;;  %v3837_v48 = vmax.f32 %v19734_v40, %v19733_v24  ;;  %v3838_v16 = vmax.f32 %v19736_v26, %v19735_v43  ;;  %v19739_v59 = vld [vmem:[#allocation102_spill] sm:$0xff]  ;;  %v19744_v18 = vld [vmem:[#allocation36_spill] sm:$0xff] }
 0x36a   : > { %v3836_v36 = vmax.f32 %v19732_v27, %v19731_v42  ;;  %v19737_v14 = vld [vmem:[#allocation109_spill] sm:$0xff]  ;;  %v19740_v54 = vld [vmem:[#allocation114_spill] sm:$0xff]  ;;  %v19745_v47 = vld [vmem:[#allocation127_spill] sm:$0xff] }
 0x36b   : > { %v3839_v1 = vmax.f32 %v19738_v41, %v19737_v14  ;;  %v3840_v37 = vmax.f32 %v19740_v54, %v19739_v59  ;;  %v19742_v2 = vld [vmem:[#allocation58_spill] sm:$0xff]  ;;  %v19743_v4 = vld [vmem:[#allocation57_spill] sm:$0xff]  ;;  %v19747_v49 = vld [vmem:[#allocation108_spill] sm:$0xff] }
 0x36c   : > { %v3841_v51 = vmax.f32 %v19742_v2, %v19741_v28  ;;  %v3842_v46 = vmax.f32 %v19744_v18, %v19743_v4  ;;  %v19746_v62 = vld [vmem:[#allocation122_spill] sm:$0xff]  ;;  %v19748_v12 = vld [vmem:[#allocation119_spill] sm:$0xff]  ;;  %v19750_v3 = vld [vmem:[#allocation116_spill] sm:$0xff] }
 0x36d   : > { %v3843_v13 = vmax.f32 %v19746_v62, %v19745_v47  ;;  %v3844_v7 = vmax.f32 %v19748_v12, %v19747_v49  ;;  %v19749_v55 = vld [vmem:[#allocation135_spill] sm:$0xff]  ;;  %v19751_v9 = vld [vmem:[#allocation121_spill] sm:$0xff]  ;;  %v19755_v44 = vld [vmem:[#allocation50_spill] sm:$0xff] }
 0x36e   : > { %v3845_v25 = vmax.f32 %v19750_v3, %v19749_v55  ;;  %v19752_v15 = vld [vmem:[#allocation131_spill] sm:$0xff]  ;;  %v19754_v60 = vld [vmem:[#allocation129_spill] sm:$0xff]  ;;  %v19756_v56 = vld [vmem:[#allocation134_spill] sm:$0xff]  ;;  %v3856_v55 = vmax.f32 %v13914_v63, %v13942_v22  ;;  %v3857_v3 = vmax.f32 %v13928_v53, %v13956_v11  ;;  %v6326_v63 = vpack.c.bf16 %v3837_v48, %v3836_v36 }
 0x36f   : > { %v3846_v29 = vmax.f32 %v19752_v15, %v19751_v9  ;;  %v19753_v33 = vld [vmem:[#allocation123_spill] sm:$0xff]  ;;  %v3848_v8 = vmax.f32 %v19756_v56, %v19755_v44  ;;  %v19757_v58 = vld [vmem:[#allocation37_spill] sm:$0xff]  ;;  %v19758_v34 = vld [vmem:[#allocation104_spill] sm:$0xff]  ;;  %v3858_v9 = vmax.f32 %v13965_v35, %v13981_v17  ;;  %v3859_v15 = vmax.f32 %v13973_v32, %v3757_v20 }
 0x370   : > { %v3847_v57 = vmax.f32 %v19754_v60, %v19753_v33  ;;  %v3849_v42 = vmax.f32 %v19758_v34, %v19757_v58  ;;  %v19759_v27 = vld [vmem:[#allocation44_spill] sm:$0xff]  ;;  %v19760_v24 = vld [vmem:[#allocation115_spill] sm:$0xff]  ;;  %v19763_v41 = vld [vmem:[#allocation133_spill] sm:$0xff]  ;;  %v3860_v33 = vmax.f32 %v3758_v31, %v3760_v39  ;;  %v3861_v60 = vmax.f32 %v3759_v21, %v3761_v0  ;;  %4155 = vst [vmem:[%s8679_s1 + $0x34] sm:$0xff] %v6326_v63 }
 0x371   : > { %v3850_v40 = vmax.f32 %v19760_v24, %v19759_v27  ;;  %v19761_v43 = vld [vmem:[#allocation136_spill] sm:$0xff]  ;;  %v19764_v59 = vld [vmem:[#allocation125_spill] sm:$0xff]  ;;  %v19766_v2 = vld [vmem:[#allocation154_spill] sm:$0xff]  ;;  %v3862_v44 = vmax.f32 %v3762_v52, %v3764_v19  ;;  %v3863_v56 = vmax.f32 %v3763_v61, %v3765_v6  ;;  %v3864_v58 = vmax.f32 %v3766_v30, %v3768_v5 }
 0x372   : > { %v19762_v26 = vld [vmem:[#allocation96_spill] sm:$0xff]  ;;  %v3852_v54 = vmax.f32 %v19764_v59, %v19763_v41  ;;  %v19768_v47 = vld [vmem:[#allocation149_spill] sm:$0xff]  ;;  %v6325_v34 = vpack.c.bf16 %v3835_v10, %v3834_v45  ;;  %v6327_v22 = vpack.c.bf16 %v3839_v1, %v3838_v16  ;;  %v6328_v27 = vpack.c.bf16 %v3841_v51, %v3840_v37  ;;  %v3194_v19 = vld [vmem:[%s7076_s13 + $0x800] sm:$0xff] }
 0x373   : > { %v3851_v14 = vmax.f32 %v19762_v26, %v19761_v43  ;;  %v19765_v28 = vld [vmem:[#allocation60_spill] sm:$0xff]  ;;  %v19769_v49 = vld [vmem:[#allocation141_spill] sm:$0xff]  ;;  %v6329_v53 = vpack.c.bf16 %v3843_v13, %v3842_v46  ;;  %v6330_v11 = vpack.c.bf16 %v3845_v25, %v3844_v7  ;;  %v6331_v35 = vpack.c.bf16 %v3847_v57, %v3846_v29  ;;  %v14068_v45 = vld [vmem:[%s7076_s13 + $0x818] sm:$0xff] }
 0x374   : > { %v3853_v4 = vmax.f32 %v19766_v2, %v19765_v28  ;;  %v19767_v18 = vld [vmem:[#allocation152_spill] sm:$0xff]  ;;  %v3855_v12 = vmax.f32 %v19769_v49, %v13899_v38  ;;  %v3865_v38 = vmax.f32 %v3767_v50, %v3769_v23  ;;  %v6332_v32 = vpack.c.bf16 %v3849_v42, %v3848_v8  ;;  %4154 = vst [vmem:[%s8679_s1 + $0x10] sm:$0xff] %v6325_v34  ;;  %v14058_v30 = vld [vmem:[%s7076_s13 + $0x810] sm:$0xff]  ;;  %v3198_v50 = vld [vmem:[%s7076_s13 + $0x820] sm:$0xff] }
 0x375   : > { %v3854_v62 = vmax.f32 %v19768_v47, %v19767_v18  ;;  %v6333_v17 = vpack.c.bf16 %v3851_v14, %v3850_v40  ;;  %v6336_v21 = vpack.c.bf16 %v3857_v3, %v3856_v55  ;;  %4156 = vst [vmem:[%s8679_s1 + $0x58] sm:$0xff] %v6327_v22  ;;  %4157 = vst [vmem:[%s8679_s1 + $0x7c] sm:$0xff] %v6328_v27  ;;  %v14051_v6 = vld [vmem:[%s7076_s13 + $0x808] sm:$0xff]  ;;  %v14065_v23 = vld [vmem:[%s7076_s13 + $0x830] sm:$0xff] }
 0x376   : > { %v6334_v20 = vpack.c.bf16 %v3853_v4, %v3852_v54  ;;  %v6337_v39 = vpack.c.bf16 %v3859_v15, %v3858_v9  ;;  %v6338_v0 = vpack.c.bf16 %v3861_v60, %v3860_v33  ;;  %v6339_v52 = vpack.c.bf16 %v3863_v56, %v3862_v44  ;;  %4158 = vst [vmem:[%s8679_s1 + $0xa0] sm:$0xff] %v6329_v53  ;;  %v14062_v5 = vld [vmem:[%s7076_s13 + $0x828] sm:$0xff]  ;;  %v14071_v10 = vld [vmem:[%s7076_s13 + $0x838] sm:$0xff]  ;;  %v14074_v36 = vld [vmem:[%s7076_s13 + $0x840] sm:$0xff] }
 0x377   : > { %v6335_v31 = vpack.c.bf16 %v3855_v12, %v3854_v62  ;;  %v6340_v61 = vpack.c.bf16 %v3865_v38, %v3864_v58  ;;  %4159 = vst [vmem:[%s8679_s1 + $0xc4] sm:$0xff] %v6330_v11  ;;  %4160 = vst [vmem:[%s8679_s1 + $0xe8] sm:$0xff] %v6331_v35  ;;  %v14077_v48 = vld [vmem:[%s7076_s13 + $0x848] sm:$0xff]  ;;  %v14080_v16 = vld [vmem:[%s7076_s13 + $0x850] sm:$0xff] }
 0x378   : > { %4161 = vst [vmem:[%s8679_s1 + $0x10c] sm:$0xff] %v6332_v32  ;;  %4162 = vst [vmem:[%s8679_s1 + $0x130] sm:$0xff] %v6333_v17  ;;  %v14083_v1 = vld [vmem:[%s7076_s13 + $0x858] sm:$0xff]  ;;  %v14086_v37 = vld [vmem:[%s7076_s13 + $0x860] sm:$0xff] }
 0x379   : > { %4163 = vst [vmem:[%s8679_s1 + $0x154] sm:$0xff] %v6334_v20  ;;  %4164 = vst [vmem:[%s8679_s1 + $0x178] sm:$0xff] %v6335_v31  ;;  %v3258_v51 = vld [vmem:[%s7076_s13 + $0xa00] sm:$0xff]  ;;  %v14090_v46 = vld [vmem:[%s7076_s13 + $0x868] sm:$0xff] }
 0x37a   : > { %4165 = vst [vmem:[%s8679_s1 + $0x19c] sm:$0xff] %v6336_v21  ;;  %4166 = vst [vmem:[%s8679_s1 + $0x1c0] sm:$0xff] %v6337_v39  ;;  %v14093_v13 = vld [vmem:[%s7076_s13 + $0x870] sm:$0xff]  ;;  %v14096_v7 = vld [vmem:[%s7076_s13 + $0x878] sm:$0xff]  ;;  %v3578_v8 = vmax.f32 %v3194_v19, %v3258_v51 }
 0x37b   : > { %4167 = vst [vmem:[%s8679_s1 + $0x1e4] sm:$0xff] %v6338_v0  ;;  %4168 = vst [vmem:[%s8679_s1 + $0x208] sm:$0xff] %v6339_v52  ;;  %v3259_v25 = vld [vmem:[%s7076_s13 + $0xa08] sm:$0xff]  ;;  %v3260_v29 = vld [vmem:[%s7076_s13 + $0xa10] sm:$0xff] }
 0x37c   : > { %4169 = vst [vmem:[%s8679_s1 + $0x22c] sm:$0xff] %v6340_v61  ;;  %v14101_v57 = vld [vmem:[%s7076_s13 + $0xa18] sm:$0xff]  ;;  %v14104_v42 = vld [vmem:[%s7076_s13 + $0x880] sm:$0xff]  ;;  %v14107_v24 = vld [vmem:[%s7076_s13 + $0x888] sm:$0xff]  ;;  %v3579_v41 = vmax.f32 %v14051_v6, %v3259_v25  ;;  %v3580_v47 = vmax.f32 %v14058_v30, %v3260_v29 }
 0x37d   : > { %v14110_v40 = vld [vmem:[%s7076_s13 + $0x890] sm:$0xff]  ;;  %v3262_v43 = vld [vmem:[%s7076_s13 + $0xa20] sm:$0xff]  ;;  %v3263_v26 = vld [vmem:[%s7076_s13 + $0xa28] sm:$0xff]  ;;  %v3581_v44 = vmax.f32 %v14068_v45, %v14101_v57 }
 0x37e   : > { %v3264_v14 = vld [vmem:[%s7076_s13 + $0xa30] sm:$0xff]  ;;  %v14117_v59 = vld [vmem:[%s7076_s13 + $0x898] sm:$0xff]  ;;  %v14120_v54 = vld [vmem:[%s7076_s13 + $0x8a0] sm:$0xff]  ;;  %v3582_v62 = vmax.f32 %v3198_v50, %v3262_v43  ;;  %v3583_v49 = vmax.f32 %v14062_v5, %v3263_v26 }
 0x37f   : > { %v14123_v28 = vld [vmem:[%s7076_s13 + $0x8a8] sm:$0xff]  ;;  %v3265_v2 = vld [vmem:[%s7076_s13 + $0xa38] sm:$0xff]  ;;  %v14127_v4 = vld [vmem:[%s7076_s13 + $0xa40] sm:$0xff]  ;;  %v3584_v12 = vmax.f32 %v14065_v23, %v3264_v14 }
 0x380   : > { %v14130_v18 = vld [vmem:[%s7076_s13 + $0xa48] sm:$0xff]  ;;  %v14136_v55 = vld [vmem:[%s7076_s13 + $0x8b0] sm:$0xff]  ;;  %v14139_v3 = vld [vmem:[%s7076_s13 + $0x8b8] sm:$0xff]  ;;  %v3585_v56 = vmax.f32 %v14071_v10, %v3265_v2  ;;  %v3586_v58 = vmax.f32 %v14074_v36, %v14127_v4  ;;  %v14179_v20 = vmax.f32 %v3578_v8, %v3582_v62  ;;  %v14204_v50 = vmax.f32 %v3579_v41, %v3583_v49 }
 0x381   : > { %v14142_v9 = vld [vmem:[%s7076_s13 + $0x8c0] sm:$0xff]  ;;  %v14145_v15 = vld [vmem:[%s7076_s13 + $0xa50] sm:$0xff]  ;;  %v14148_v33 = vld [vmem:[%s7076_s13 + $0xa58] sm:$0xff]  ;;  %v3587_v38 = vmax.f32 %v14077_v48, %v14130_v18 }
 0x382   : > { %v3270_v60 = vld [vmem:[%s7076_s13 + $0xa60] sm:$0xff]  ;;  %v14159_v34 = vld [vmem:[%s7076_s13 + $0x8c8] sm:$0xff]  ;;  %v14162_v63 = vld [vmem:[%s7076_s13 + $0x8d0] sm:$0xff]  ;;  %v3588_v35 = vmax.f32 %v14080_v16, %v14145_v15  ;;  %19770 = vst [vmem:[#allocation89_spill] sm:$0xff] %v14179_v20  ;;  %v14256_v2 = vmax.f32 %v3581_v44, %v3585_v56 }
 0x383   : > { %v14165_v22 = vld [vmem:[%s7076_s13 + $0x8d8] sm:$0xff]  ;;  %v3271_v27 = vld [vmem:[%s7076_s13 + $0xa68] sm:$0xff]  ;;  %v14169_v53 = vld [vmem:[%s7076_s13 + $0xa70] sm:$0xff]  ;;  %v3590_v17 = vmax.f32 %v14086_v37, %v3270_v60  ;;  %19771 = vst [vmem:[#allocation148_spill] sm:$0xff] %v14204_v50 }
 0x384   : > { %v14172_v11 = vld [vmem:[%s7076_s13 + $0xa78] sm:$0xff]  ;;  %v14182_v31 = vld [vmem:[%s7076_s13 + $0x8e0] sm:$0xff]  ;;  %v14185_v21 = vld [vmem:[%s7076_s13 + $0x8e8] sm:$0xff]  ;;  %v3591_v19 = vmax.f32 %v14090_v46, %v3271_v27  ;;  %v3592_v6 = vmax.f32 %v14093_v13, %v14169_v53  ;;  %v14230_v13 = vmax.f32 %v3580_v47, %v3584_v12  ;;  %19775 = vst [vmem:[#allocation151_spill] sm:$0xff] %v14256_v2 }
 0x385   : > { %v14188_v39 = vld [vmem:[%s7076_s13 + $0x8f0] sm:$0xff]  ;;  %v14191_v0 = vld [vmem:[%s7076_s13 + $0xa80] sm:$0xff]  ;;  %v14194_v52 = vld [vmem:[%s7076_s13 + $0xa88] sm:$0xff]  ;;  %v3593_v30 = vmax.f32 %v14096_v7, %v14172_v11  ;;  %v14282_v44 = vmax.f32 %v3586_v58, %v3590_v17 }
 0x386   : > { %v14197_v61 = vld [vmem:[%s7076_s13 + $0xa90] sm:$0xff]  ;;  %v14207_v5 = vld [vmem:[%s7076_s13 + $0x8f8] sm:$0xff]  ;;  %v14210_v23 = vld [vmem:[%s7076_s13 + $0x900] sm:$0xff]  ;;  %19772 = vst [vmem:[#allocation143_spill] sm:$0xff] %v14230_v13  ;;  %v14308_v26 = vmax.f32 %v3587_v38, %v3591_v19  ;;  %v14337_v37 = vmax.f32 %v3588_v35, %v3592_v6  ;;  %v19784_v6 = vmax.f32 %v14083_v1, %v14148_v33 }
 0x387   : > { %v14213_v45 = vld [vmem:[%s7076_s13 + $0x908] sm:$0xff]  ;;  %v14216_v10 = vld [vmem:[%s7076_s13 + $0xa98] sm:$0xff]  ;;  %v14219_v36 = vld [vmem:[%s7076_s13 + $0xaa0] sm:$0xff]  ;;  %19778 = vst [vmem:[#allocation145_spill] sm:$0xff] %v14282_v44 }
 0x388   : > { %v14222_v48 = vld [vmem:[%s7076_s13 + $0xaa8] sm:$0xff]  ;;  %v14233_v7 = vld [vmem:[%s7076_s13 + $0x910] sm:$0xff]  ;;  %v14236_v25 = vld [vmem:[%s7076_s13 + $0x918] sm:$0xff]  ;;  %v3598_v14 = vmax.f32 %v14120_v54, %v14219_v36  ;;  %19779 = vst [vmem:[#allocation155_spill] sm:$0xff] %v14308_v26  ;;  %v14366_v19 = vmax.f32 %v19784_v6, %v3593_v30  ;;  %v19788_v6 = vmax.f32 %v14104_v42, %v14191_v0 }
 0x389   : > { %19773 = vst [vmem:[#allocation55_spill] sm:$0xff] %v14233_v7  ;;  %19774 = vst [vmem:[#allocation59_spill] sm:$0xff] %v14236_v25  ;;  %v14239_v29 = vld [vmem:[%s7076_s13 + $0x920] sm:$0xff]  ;;  %v14242_v57 = vld [vmem:[%s7076_s13 + $0xab0] sm:$0xff]  ;;  %v3599_v41 = vmax.f32 %v14123_v28, %v14222_v48 }
 0x38a   : > { %v14245_v8 = vld [vmem:[%s7076_s13 + $0xab8] sm:$0xff]  ;;  %v14248_v43 = vld [vmem:[%s7076_s13 + $0xac0] sm:$0xff]  ;;  %v14259_v4 = vld [vmem:[%s7076_s13 + $0x928] sm:$0xff]  ;;  %19781 = vst [vmem:[#allocation56_spill] sm:$0xff] %v14337_v37  ;;  %v14395_v35 = vmax.f32 %v19788_v6, %v3598_v14  ;;  %v19790_v6 = vmax.f32 %v14107_v24, %v14194_v52 }
 0x38b   : > { %v14262_v18 = vld [vmem:[%s7076_s13 + $0x930] sm:$0xff]  ;;  %v14265_v47 = vld [vmem:[%s7076_s13 + $0x938] sm:$0xff]  ;;  %v14268_v62 = vld [vmem:[%s7076_s13 + $0xac8] sm:$0xff]  ;;  %19785 = vst [vmem:[#allocation150_spill] sm:$0xff] %v14366_v19 }
 0x38c   : > { %19776 = vst [vmem:[#allocation153_spill] sm:$0xff] %v14262_v18  ;;  %19777 = vst [vmem:[#allocation132_spill] sm:$0xff] %v14265_v47  ;;  %v14271_v49 = vld [vmem:[%s7076_s13 + $0xad0] sm:$0xff]  ;;  %v14274_v54 = vld [vmem:[%s7076_s13 + $0xad8] sm:$0xff]  ;;  %v14424_v30 = vmax.f32 %v19790_v6, %v3599_v41  ;;  %v19792_v41 = vmax.f32 %v14136_v55, %v14242_v57  ;;  %v19793_v6 = vmax.f32 %v14110_v40, %v14197_v61 }
 0x38d   : > { %v14285_v56 = vld [vmem:[%s7076_s13 + $0x940] sm:$0xff]  ;;  %v14288_v27 = vld [vmem:[%s7076_s13 + $0x948] sm:$0xff]  ;;  %v14291_v53 = vld [vmem:[%s7076_s13 + $0x950] sm:$0xff]  ;;  %19789 = vst [vmem:[#allocation70_spill] sm:$0xff] %v14395_v35  ;;  %v19795_v57 = vmax.f32 %v14139_v3, %v14245_v8 }
 0x38e   : > { %v14294_v11 = vld [vmem:[%s7076_s13 + $0xae0] sm:$0xff]  ;;  %v14297_v36 = vld [vmem:[%s7076_s13 + $0xae8] sm:$0xff]  ;;  %v14300_v48 = vld [vmem:[%s7076_s13 + $0xaf0] sm:$0xff]  ;;  %19791 = vst [vmem:[#allocation74_spill] sm:$0xff] %v14424_v30  ;;  %v14452_v30 = vmax.f32 %v19793_v6, %v19792_v41 }
 0x38f   : > { %v14311_v12 = vld [vmem:[%s7076_s13 + $0x958] sm:$0xff]  ;;  %v14314_v46 = vld [vmem:[%s7076_s13 + $0x960] sm:$0xff]  ;;  %v14317_v28 = vld [vmem:[%s7076_s13 + $0x968] sm:$0xff] }
 0x390   : > { %v14320_v51 = vld [vmem:[%s7076_s13 + $0xaf8] sm:$0xff]  ;;  %v14323_v60 = vld [vmem:[%s7076_s13 + $0xb00] sm:$0xff]  ;;  %v14326_v58 = vld [vmem:[%s7076_s13 + $0xb08] sm:$0xff]  ;;  %19794 = vst [vmem:[#allocation66_spill] sm:$0xff] %v14452_v30 }
 0x391   : > { %19780 = vst [vmem:[#allocation63_spill] sm:$0xff] %v14326_v58  ;;  %v14340_v32 = vld [vmem:[%s7076_s13 + $0x970] sm:$0xff]  ;;  %v14343_v26 = vld [vmem:[%s7076_s13 + $0x978] sm:$0xff]  ;;  %v14346_v17 = vld [vmem:[%s7076_s13 + $0x980] sm:$0xff] }
 0x392   : > { %v14349_v44 = vld [vmem:[%s7076_s13 + $0xb10] sm:$0xff]  ;;  %v14352_v38 = vld [vmem:[%s7076_s13 + $0xb18] sm:$0xff]  ;;  %v14355_v50 = vld [vmem:[%s7076_s13 + $0xb20] sm:$0xff] }
 0x393   : > { %19782 = vst [vmem:[#allocation64_spill] sm:$0xff] %v14349_v44  ;;  %19783 = vst [vmem:[#allocation65_spill] sm:$0xff] %v14352_v38  ;;  %v14369_v37 = vld [vmem:[%s7076_s13 + $0x988] sm:$0xff]  ;;  %v14372_v2 = vld [vmem:[%s7076_s13 + $0x990] sm:$0xff] }
 0x394   : > { %v14375_v16 = vld [vmem:[%s7076_s13 + $0x998] sm:$0xff]  ;;  %v14378_v20 = vld [vmem:[%s7076_s13 + $0xb28] sm:$0xff]  ;;  %v14381_v15 = vld [vmem:[%s7076_s13 + $0xb30] sm:$0xff] }
 0x395   : > { %19786 = vst [vmem:[#allocation61_spill] sm:$0xff] %v14381_v15  ;;  %v14384_v13 = vld [vmem:[%s7076_s13 + $0xb38] sm:$0xff]  ;;  %v14398_v19 = vld [vmem:[%s7076_s13 + $0x9a0] sm:$0xff]  ;;  %v14401_v58 = vld [vmem:[%s7076_s13 + $0x9a8] sm:$0xff] }
 0x396   : > { %19787 = vst [vmem:[#allocation78_spill] sm:$0xff] %v14384_v13  ;;  %v14404_v1 = vld [vmem:[%s7076_s13 + $0x9b0] sm:$0xff]  ;;  %v14407_v44 = vld [vmem:[%s7076_s13 + $0xb40] sm:$0xff]  ;;  %v14410_v33 = vld [vmem:[%s7076_s13 + $0xb48] sm:$0xff] }
 0x397   : > { %v14413_v38 = vld [vmem:[%s7076_s13 + $0xb50] sm:$0xff]  ;;  %v14427_v35 = vld [vmem:[%s7076_s13 + $0x9b8] sm:$0xff]  ;;  %v14430_v25 = vld [vmem:[%s7076_s13 + $0x9c0] sm:$0xff]  ;;  %v3618_v14 = vmax.f32 %v14285_v56, %v14407_v44  ;;  %v3619_v24 = vmax.f32 %v14288_v27, %v14410_v33 }
 0x398   : > { %v14433_v42 = vld [vmem:[%s7076_s13 + $0x9c8] sm:$0xff]  ;;  %v14436_v7 = vld [vmem:[%s7076_s13 + $0xb58] sm:$0xff]  ;;  %v3302_v0 = vld [vmem:[%s7076_s13 + $0xb60] sm:$0xff]  ;;  %v3620_v52 = vmax.f32 %v14291_v53, %v14413_v38  ;;  %v19796_v53 = vmax.f32 %v14117_v59, %v14216_v10  ;;  %v19797_v59 = vmax.f32 %v14182_v31, %v14294_v11  ;;  %v19798_v10 = vmax.f32 %v14142_v9, %v14248_v43 }
 0x399   : > { %v3303_v15 = vld [vmem:[%s7076_s13 + $0xb68] sm:$0xff]  ;;  %v14455_v13 = vld [vmem:[%s7076_s13 + $0x9d0] sm:$0xff]  ;;  %v14458_v44 = vld [vmem:[%s7076_s13 + $0x9d8] sm:$0xff]  ;;  %v3621_v55 = vmax.f32 %v14311_v12, %v14436_v7  ;;  %v3622_v40 = vmax.f32 %v14314_v46, %v3302_v0  ;;  %v19799_v31 = vmax.f32 %v14185_v21, %v14297_v36  ;;  %v19800_v9 = vmax.f32 %v14159_v34, %v14268_v62 }
 0x39a   : > { %v3254_v56 = vld [vmem:[%s7076_s13 + $0x9e0] sm:$0xff]  ;;  %v3304_v27 = vld [vmem:[%s7076_s13 + $0xb70] sm:$0xff]  ;;  %v3305_v33 = vld [vmem:[%s7076_s13 + $0xb78] sm:$0xff]  ;;  %v3623_v61 = vmax.f32 %v14317_v28, %v3303_v15  ;;  %v14474_v38 = vmax.f32 %v19796_v53, %v19795_v57  ;;  %v14491_v8 = vmax.f32 %v19798_v10, %v19797_v59  ;;  %v19802_v21 = vmax.f32 %v14162_v63, %v14271_v49 }
 0x39b   : > { %v3306_v47 = vld [vmem:[%s7076_s13 + $0xb80] sm:$0xff]  ;;  %v3255_v41 = vld [vmem:[%s7076_s13 + $0x9e8] sm:$0xff]  ;;  %v3256_v6 = vld [vmem:[%s7076_s13 + $0x9f0] sm:$0xff]  ;;  %v3624_v46 = vmax.f32 %v14340_v32, %v3304_v27  ;;  %v3625_v28 = vmax.f32 %v14343_v26, %v3305_v33  ;;  %v3783_v43 = vmax.f32 %v19800_v9, %v19799_v31 }
 0x39c   : > { %v3257_v30 = vld [vmem:[%s7076_s13 + $0x9f8] sm:$0xff]  ;;  %v3307_v18 = vld [vmem:[%s7076_s13 + $0xb88] sm:$0xff]  ;;  %v3308_v7 = vld [vmem:[%s7076_s13 + $0xb90] sm:$0xff]  ;;  %v3626_v3 = vmax.f32 %v14346_v17, %v3306_v47 }
 0x39d   : > { %v3309_v12 = vld [vmem:[%s7076_s13 + $0xb98] sm:$0xff]  ;;  %v3310_v15 = vld [vmem:[%s7076_s13 + $0xba0] sm:$0xff]  ;;  %v3311_v0 = vld [vmem:[%s7076_s13 + $0xba8] sm:$0xff]  ;;  %v3627_v32 = vmax.f32 %v14369_v37, %v3307_v18  ;;  %v3628_v26 = vmax.f32 %v14372_v2, %v3308_v7  ;;  %v19801_v18 = vmax.f32 %v14188_v39, %v14300_v48 }
 0x39e   : > { %v3312_v57 = vld [vmem:[%s7076_s13 + $0xbb0] sm:$0xff]  ;;  %v3629_v47 = vmax.f32 %v14375_v16, %v3309_v12  ;;  %v3313_v11 = vld [vmem:[%s7076_s13 + $0xbb8] sm:$0xff]  ;;  %v3314_v17 = vld [vmem:[%s7076_s13 + $0xbc0] sm:$0xff]  ;;  %v3630_v33 = vmax.f32 %v14398_v19, %v3310_v15  ;;  %v3631_v37 = vmax.f32 %v14401_v58, %v3311_v0  ;;  %v19803_v58 = vmax.f32 %v14207_v5, %v14320_v51 }
 0x39f   : > { %v3315_v27 = vld [vmem:[%s7076_s13 + $0xbc8] sm:$0xff]  ;;  %v3632_v2 = vmax.f32 %v14404_v1, %v3312_v57  ;;  %v3784_v34 = vmax.f32 %v19802_v21, %v19801_v18  ;;  %v3316_v62 = vld [vmem:[%s7076_s13 + $0xbd0] sm:$0xff]  ;;  %v3317_v36 = vld [vmem:[%s7076_s13 + $0xbd8] sm:$0xff]  ;;  %v3633_v53 = vmax.f32 %v14427_v35, %v3313_v11  ;;  %v3634_v7 = vmax.f32 %v14430_v25, %v3314_v17 }
 0x3a0   : > { %v3318_v16 = vld [vmem:[%s7076_s13 + $0xbe0] sm:$0xff]  ;;  %v3635_v19 = vmax.f32 %v14433_v42, %v3315_v27  ;;  %v19804_v1 = vmax.f32 %v14165_v22, %v14274_v54  ;;  %v3319_v48 = vld [vmem:[%s7076_s13 + $0xbe8] sm:$0xff]  ;;  %v3320_v12 = vld [vmem:[%s7076_s13 + $0xbf0] sm:$0xff]  ;;  %v3636_v49 = vmax.f32 %v14455_v13, %v3316_v62  ;;  %v3637_v59 = vmax.f32 %v14458_v44, %v3317_v36 }
 0x3a1   : > { %v3321_v63 = vld [vmem:[%s7076_s13 + $0xbf8] sm:$0xff]  ;;  %v3638_v10 = vmax.f32 %v3254_v56, %v3318_v16  ;;  %v19805_v25 = vmax.f32 %v14239_v29, %v14355_v50  ;;  %v19806_v35 = vmax.f32 %v14210_v23, %v14323_v60  ;;  %v3639_v5 = vmax.f32 %v3255_v41, %v3319_v48  ;;  %v19808_v54 = vld [vmem:[#allocation63_spill] sm:$0xff]  ;;  %v19810_v57 = vld [vmem:[#allocation153_spill] sm:$0xff] }
 0x3a2   : > { %v3785_v39 = vmax.f32 %v19804_v1, %v19803_v58  ;;  %v3640_v51 = vmax.f32 %v3256_v6, %v3320_v12  ;;  %v3641_v15 = vmax.f32 %v3257_v30, %v3321_v63  ;;  %v19807_v22 = vmax.f32 %v14259_v4, %v14378_v20  ;;  %v19811_v44 = vld [vmem:[#allocation61_spill] sm:$0xff]  ;;  %v19813_v31 = vld [vmem:[#allocation55_spill] sm:$0xff]  ;;  %v19814_v9 = vld [vmem:[#allocation64_spill] sm:$0xff] }
 0x3a3   : > { %v3786_v42 = vmax.f32 %v19806_v35, %v19805_v25  ;;  %v19809_v0 = vmax.f32 %v14213_v45, %v19808_v54  ;;  %v19812_v56 = vmax.f32 %v19810_v57, %v19811_v44  ;;  %v19815_v50 = vmax.f32 %v19813_v31, %v19814_v9  ;;  %v19816_v11 = vld [vmem:[#allocation132_spill] sm:$0xff]  ;;  %v19817_v23 = vld [vmem:[#allocation78_spill] sm:$0xff]  ;;  %v19819_v41 = vld [vmem:[#allocation59_spill] sm:$0xff] }
 0x3a4   : > { %v19818_v60 = vmax.f32 %v19816_v11, %v19817_v23  ;;  %v19820_v6 = vld [vmem:[#allocation65_spill] sm:$0xff]  ;;  %v3790_v27 = vmax.f32 %v3618_v14, %v3622_v40  ;;  %v3791_v20 = vmax.f32 %v3619_v24, %v3623_v61  ;;  %v3792_v4 = vmax.f32 %v3620_v52, %v3624_v46  ;;  %v19822_v12 = vld [vmem:[#allocation143_spill] sm:$0xff]  ;;  %v19828_v24 = vld [vmem:[#allocation150_spill] sm:$0xff] }
 0x3a5   : > { %v3787_v13 = vmax.f32 %v19809_v0, %v19807_v22  ;;  %v3788_v29 = vmax.f32 %v19815_v50, %v19812_v56  ;;  %v19821_v30 = vmax.f32 %v19819_v41, %v19820_v6  ;;  %v3793_v18 = vmax.f32 %v3621_v55, %v3625_v28  ;;  %v19823_v63 = vld [vmem:[#allocation89_spill] sm:$0xff]  ;;  %v19824_v35 = vld [vmem:[#allocation151_spill] sm:$0xff]  ;;  %v19825_v22 = vld [vmem:[#allocation148_spill] sm:$0xff] }
 0x3a6   : > { %v3794_v45 = vmax.f32 %v3626_v3, %v3630_v33  ;;  %v3795_v21 = vmax.f32 %v3627_v32, %v3631_v37  ;;  %v3796_v62 = vmax.f32 %v3628_v26, %v3632_v2  ;;  %v3797_v36 = vmax.f32 %v3629_v47, %v3633_v53  ;;  %v19826_v0 = vld [vmem:[#allocation56_spill] sm:$0xff]  ;;  %v19827_v57 = vld [vmem:[#allocation145_spill] sm:$0xff]  ;;  %v19829_v52 = vld [vmem:[#allocation155_spill] sm:$0xff] }
 0x3a7   : > { %v3789_v17 = vmax.f32 %v19821_v30, %v19818_v60  ;;  %v3798_v16 = vmax.f32 %v3634_v7, %v3638_v10  ;;  %v3799_v58 = vmax.f32 %v3635_v19, %v3639_v5  ;;  %v3800_v1 = vmax.f32 %v3636_v49, %v3640_v51  ;;  %v19830_v40 = vld [vmem:[#allocation66_spill] sm:$0xff]  ;;  %v3322_v5 = vld [vmem:[%s7076_s13 + $0xc00] sm:$0xff]  ;;  %v3323_v51 = vld [vmem:[%s7076_s13 + $0xc08] sm:$0xff] }
 0x3a8   : > { %v3801_v48 = vmax.f32 %v3637_v59, %v3641_v15  ;;  %v3866_v25 = vmax.f32 %v19823_v63, %v19822_v12  ;;  %v3867_v54 = vmax.f32 %v19825_v22, %v19824_v35  ;;  %v3868_v14 = vmax.f32 %v19827_v57, %v19826_v0  ;;  %v19831_v61 = vld [vmem:[#allocation70_spill] sm:$0xff]  ;;  %v14582_v15 = vld [vmem:[%s7076_s13 + $0xc10] sm:$0xff]  ;;  %v3327_v56 = vld [vmem:[%s7076_s13 + $0xc28] sm:$0xff] }
 0x3a9   : > { %v3869_v55 = vmax.f32 %v19829_v52, %v19828_v24  ;;  %v3870_v46 = vmax.f32 %v19831_v61, %v19830_v40  ;;  %v19832_v28 = vld [vmem:[#allocation74_spill] sm:$0xff]  ;;  %v3872_v32 = vmax.f32 %v14491_v8, %v3784_v34  ;;  %v3873_v26 = vmax.f32 %v3783_v43, %v3785_v39  ;;  %v14590_v31 = vld [vmem:[%s7076_s13 + $0xc30] sm:$0xff]  ;;  %v14596_v50 = vld [vmem:[%s7076_s13 + $0xc40] sm:$0xff] }
 0x3aa   : > { %v3871_v3 = vmax.f32 %v19832_v28, %v14474_v38  ;;  %v3874_v47 = vmax.f32 %v3786_v42, %v3788_v29  ;;  %v3875_v33 = vmax.f32 %v3787_v13, %v3789_v17  ;;  %v3876_v37 = vmax.f32 %v3790_v27, %v3792_v4  ;;  %v3326_v13 = vld [vmem:[%s7076_s13 + $0xc20] sm:$0xff]  ;;  %v14586_v44 = vld [vmem:[%s7076_s13 + $0xc18] sm:$0xff]  ;;  %v14599_v29 = vld [vmem:[%s7076_s13 + $0xc48] sm:$0xff] }
 0x3ab   : > { %v3877_v2 = vmax.f32 %v3791_v20, %v3793_v18  ;;  %v3878_v53 = vmax.f32 %v3794_v45, %v3796_v62  ;;  %v3879_v7 = vmax.f32 %v3795_v21, %v3797_v36  ;;  %v3880_v19 = vmax.f32 %v3798_v16, %v3800_v1  ;;  %v14593_v9 = vld [vmem:[%s7076_s13 + $0xc38] sm:$0xff]  ;;  %v14602_v11 = vld [vmem:[%s7076_s13 + $0xc50] sm:$0xff]  ;;  %v14608_v60 = vld [vmem:[%s7076_s13 + $0xc60] sm:$0xff] }
 0x3ac   : > { %v3881_v49 = vmax.f32 %v3799_v58, %v3801_v48  ;;  %v6341_v38 = vpack.c.bf16 %v3867_v54, %v3866_v25  ;;  %v6342_v8 = vpack.c.bf16 %v3869_v55, %v3868_v14  ;;  %v6343_v43 = vpack.c.bf16 %v3871_v3, %v3870_v46  ;;  %v14605_v23 = vld [vmem:[%s7076_s13 + $0xc58] sm:$0xff]  ;;  %v14611_v41 = vld [vmem:[%s7076_s13 + $0xc68] sm:$0xff]  ;;  %v3386_v6 = vld [vmem:[%s7076_s13 + $0xe00] sm:$0xff] }
 0x3ad   : > { %v6344_v34 = vpack.c.bf16 %v3873_v26, %v3872_v32  ;;  %v6345_v39 = vpack.c.bf16 %v3875_v33, %v3874_v47  ;;  %v6346_v59 = vpack.c.bf16 %v3877_v2, %v3876_v37  ;;  %v6347_v10 = vpack.c.bf16 %v3879_v7, %v3878_v53  ;;  %v3387_v30 = vld [vmem:[%s7076_s13 + $0xe08] sm:$0xff]  ;;  %v14616_v17 = vld [vmem:[%s7076_s13 + $0xc70] sm:$0xff]  ;;  %v14619_v27 = vld [vmem:[%s7076_s13 + $0xc78] sm:$0xff] }
 0x3ae   : > { %v6348_v42 = vpack.c.bf16 %v3881_v49, %v3880_v19  ;;  %4170 = vst [vmem:[%s8679_s1 + $0x250] sm:$0xff] %v6341_v38  ;;  %4171 = vst [vmem:[%s8679_s1 + $0x274] sm:$0xff] %v6342_v8  ;;  %v14622_v20 = vld [vmem:[%s7076_s13 + $0xc80] sm:$0xff]  ;;  %v3388_v4 = vld [vmem:[%s7076_s13 + $0xe10] sm:$0xff]  ;;  %v3642_v21 = vmax.f32 %v3322_v5, %v3386_v6  ;;  %v3643_v62 = vmax.f32 %v3323_v51, %v3387_v30 }
 0x3af   : > { %4172 = vst [vmem:[%s8679_s1 + $0x298] sm:$0xff] %v6343_v43  ;;  %4173 = vst [vmem:[%s8679_s1 + $0x2bc] sm:$0xff] %v6344_v34  ;;  %v3389_v18 = vld [vmem:[%s7076_s13 + $0xe18] sm:$0xff]  ;;  %v3390_v45 = vld [vmem:[%s7076_s13 + $0xe20] sm:$0xff]  ;;  %v3644_v63 = vmax.f32 %v14582_v15, %v3388_v4 }
 0x3b0   : > { %4174 = vst [vmem:[%s8679_s1 + $0x2e0] sm:$0xff] %v6345_v39  ;;  %4175 = vst [vmem:[%s8679_s1 + $0x304] sm:$0xff] %v6346_v59  ;;  %v14628_v36 = vld [vmem:[%s7076_s13 + $0xc88] sm:$0xff]  ;;  %v14631_v16 = vld [vmem:[%s7076_s13 + $0xc90] sm:$0xff]  ;;  %v3646_v25 = vmax.f32 %v3326_v13, %v3390_v45  ;;  %v3645_v24 = vmax.f32 %v14586_v44, %v3389_v18 }
 0x3b1   : > { %4176 = vst [vmem:[%s8679_s1 + $0x328] sm:$0xff] %v6347_v10  ;;  %4177 = vst [vmem:[%s8679_s1 + $0x34c] sm:$0xff] %v6348_v42  ;;  %v14634_v58 = vld [vmem:[%s7076_s13 + $0xc98] sm:$0xff]  ;;  %v3391_v1 = vld [vmem:[%s7076_s13 + $0xe28] sm:$0xff] }
 0x3b2   : > { %v3392_v48 = vld [vmem:[%s7076_s13 + $0xe30] sm:$0xff]  ;;  %v3393_v12 = vld [vmem:[%s7076_s13 + $0xe38] sm:$0xff]  ;;  %v14641_v35 = vld [vmem:[%s7076_s13 + $0xca0] sm:$0xff]  ;;  %v3647_v52 = vmax.f32 %v3327_v56, %v3391_v1  ;;  %v14678_v2 = vmax.f32 %v3642_v21, %v3646_v25 }
 0x3b3   : > { %v14644_v22 = vld [vmem:[%s7076_s13 + $0xca8] sm:$0xff]  ;;  %v14647_v54 = vld [vmem:[%s7076_s13 + $0xcb0] sm:$0xff]  ;;  %v3394_v0 = vld [vmem:[%s7076_s13 + $0xe40] sm:$0xff]  ;;  %v3648_v55 = vmax.f32 %v14590_v31, %v3392_v48  ;;  %v3649_v40 = vmax.f32 %v14593_v9, %v3393_v12 }
 0x3b4   : > { %v14651_v57 = vld [vmem:[%s7076_s13 + $0xe48] sm:$0xff]  ;;  %v14654_v14 = vld [vmem:[%s7076_s13 + $0xe50] sm:$0xff]  ;;  %v14660_v61 = vld [vmem:[%s7076_s13 + $0xcb8] sm:$0xff]  ;;  %v3650_v47 = vmax.f32 %v14596_v50, %v3394_v0  ;;  %19833 = vst [vmem:[#allocation72_spill] sm:$0xff] %v14678_v2  ;;  %v14700_v59 = vmax.f32 %v3643_v62, %v3647_v52 }
 0x3b5   : > { %v14663_v46 = vld [vmem:[%s7076_s13 + $0xcc0] sm:$0xff]  ;;  %v14666_v28 = vld [vmem:[%s7076_s13 + $0xcc8] sm:$0xff]  ;;  %v14669_v3 = vld [vmem:[%s7076_s13 + $0xe58] sm:$0xff]  ;;  %v3651_v33 = vmax.f32 %v14599_v29, %v14651_v57  ;;  %v3652_v37 = vmax.f32 %v14602_v11, %v14654_v14  ;;  %v14725_v9 = vmax.f32 %v3644_v63, %v3648_v55 }
 0x3b6   : > { %v3398_v32 = vld [vmem:[%s7076_s13 + $0xe60] sm:$0xff]  ;;  %v3399_v26 = vld [vmem:[%s7076_s13 + $0xe68] sm:$0xff]  ;;  %v14681_v53 = vld [vmem:[%s7076_s13 + $0xcd0] sm:$0xff]  ;;  %v3653_v43 = vmax.f32 %v14605_v23, %v14669_v3  ;;  %19834 = vst [vmem:[#allocation146_spill] sm:$0xff] %v14700_v59 }
 0x3b7   : > { %v14684_v7 = vld [vmem:[%s7076_s13 + $0xcd8] sm:$0xff]  ;;  %v14687_v19 = vld [vmem:[%s7076_s13 + $0xce0] sm:$0xff]  ;;  %v3400_v49 = vld [vmem:[%s7076_s13 + $0xe70] sm:$0xff]  ;;  %v3654_v34 = vmax.f32 %v14608_v60, %v3398_v32  ;;  %v3655_v39 = vmax.f32 %v14611_v41, %v3399_v26  ;;  %19835 = vst [vmem:[#allocation67_spill] sm:$0xff] %v14725_v9 }
 0x3b8   : > { %v14691_v38 = vld [vmem:[%s7076_s13 + $0xe78] sm:$0xff]  ;;  %v14694_v8 = vld [vmem:[%s7076_s13 + $0xe80] sm:$0xff]  ;;  %v14703_v10 = vld [vmem:[%s7076_s13 + $0xce8] sm:$0xff]  ;;  %v3656_v44 = vmax.f32 %v14616_v17, %v3400_v49 }
 0x3b9   : > { %v14706_v42 = vld [vmem:[%s7076_s13 + $0xcf0] sm:$0xff]  ;;  %v14709_v5 = vld [vmem:[%s7076_s13 + $0xcf8] sm:$0xff]  ;;  %v14712_v51 = vld [vmem:[%s7076_s13 + $0xe88] sm:$0xff]  ;;  %v3657_v56 = vmax.f32 %v14619_v27, %v14691_v38  ;;  %v3658_v31 = vmax.f32 %v14622_v20, %v14694_v8  ;;  %v14749_v20 = vmax.f32 %v3645_v24, %v3649_v40  ;;  %v14774_v25 = vmax.f32 %v3650_v47, %v3654_v34 }
 0x3ba   : > { %v14715_v15 = vld [vmem:[%s7076_s13 + $0xe90] sm:$0xff]  ;;  %v14718_v13 = vld [vmem:[%s7076_s13 + $0xe98] sm:$0xff]  ;;  %v14728_v50 = vld [vmem:[%s7076_s13 + $0xd00] sm:$0xff]  ;;  %v14800_v40 = vmax.f32 %v3651_v33, %v3655_v39 }
 0x3bb   : > { %v14731_v29 = vld [vmem:[%s7076_s13 + $0xd08] sm:$0xff]  ;;  %v14734_v11 = vld [vmem:[%s7076_s13 + $0xd10] sm:$0xff]  ;;  %v3406_v60 = vld [vmem:[%s7076_s13 + $0xea0] sm:$0xff]  ;;  %19836 = vst [vmem:[#allocation62_spill] sm:$0xff] %v14749_v20 }
 0x3bc   : > { %v14738_v41 = vld [vmem:[%s7076_s13 + $0xea8] sm:$0xff]  ;;  %v14741_v6 = vld [vmem:[%s7076_s13 + $0xeb0] sm:$0xff]  ;;  %v14752_v4 = vld [vmem:[%s7076_s13 + $0xd18] sm:$0xff]  ;;  %v3662_v48 = vmax.f32 %v14641_v35, %v3406_v60  ;;  %19838 = vst [vmem:[#allocation48_spill] sm:$0xff] %v14774_v25  ;;  %v14826_v60 = vmax.f32 %v3652_v37, %v3656_v44 }
 0x3bd   : > { %19837 = vst [vmem:[#allocation73_spill] sm:$0xff] %v14752_v4  ;;  %v14755_v18 = vld [vmem:[%s7076_s13 + $0xd20] sm:$0xff]  ;;  %v14758_v45 = vld [vmem:[%s7076_s13 + $0xd28] sm:$0xff]  ;;  %v14761_v21 = vld [vmem:[%s7076_s13 + $0xeb8] sm:$0xff]  ;;  %v3663_v12 = vmax.f32 %v14644_v22, %v14738_v41  ;;  %v3664_v63 = vmax.f32 %v14647_v54, %v14741_v6 }
 0x3be   : > { %v14764_v62 = vld [vmem:[%s7076_s13 + $0xec0] sm:$0xff]  ;;  %v14767_v1 = vld [vmem:[%s7076_s13 + $0xec8] sm:$0xff]  ;;  %v14777_v0 = vld [vmem:[%s7076_s13 + $0xd30] sm:$0xff]  ;;  %19839 = vst [vmem:[#allocation76_spill] sm:$0xff] %v14800_v40 }
 0x3bf   : > { %v14780_v57 = vld [vmem:[%s7076_s13 + $0xd38] sm:$0xff]  ;;  %v14783_v14 = vld [vmem:[%s7076_s13 + $0xd40] sm:$0xff]  ;;  %v14786_v24 = vld [vmem:[%s7076_s13 + $0xed0] sm:$0xff]  ;;  %19840 = vst [vmem:[#allocation68_spill] sm:$0xff] %v14826_v60 }
 0x3c0   : > { %v14789_v35 = vld [vmem:[%s7076_s13 + $0xed8] sm:$0xff]  ;;  %v14792_v22 = vld [vmem:[%s7076_s13 + $0xee0] sm:$0xff]  ;;  %v14803_v32 = vld [vmem:[%s7076_s13 + $0xd48] sm:$0xff] }
 0x3c1   : > { %v14806_v26 = vld [vmem:[%s7076_s13 + $0xd50] sm:$0xff]  ;;  %v14809_v47 = vld [vmem:[%s7076_s13 + $0xd58] sm:$0xff]  ;;  %v14812_v49 = vld [vmem:[%s7076_s13 + $0xee8] sm:$0xff]  ;;  %v3670_v39 = vmax.f32 %v14687_v19, %v14792_v22  ;;  %v14855_v22 = vmax.f32 %v3653_v43, %v3657_v56  ;;  %v14881_v56 = vmax.f32 %v3658_v31, %v3662_v48 }
 0x3c2   : > { %v14815_v38 = vld [vmem:[%s7076_s13 + $0xef0] sm:$0xff]  ;;  %v14818_v8 = vld [vmem:[%s7076_s13 + $0xef8] sm:$0xff]  ;;  %v14829_v41 = vld [vmem:[%s7076_s13 + $0xd60] sm:$0xff]  ;;  %v3671_v19 = vmax.f32 %v14703_v10, %v14812_v49 }
 0x3c3   : > { %v14832_v6 = vld [vmem:[%s7076_s13 + $0xd68] sm:$0xff]  ;;  %v14835_v55 = vld [vmem:[%s7076_s13 + $0xd70] sm:$0xff]  ;;  %v14838_v52 = vld [vmem:[%s7076_s13 + $0xf00] sm:$0xff]  ;;  %19841 = vst [vmem:[#allocation49_spill] sm:$0xff] %v14855_v22 }
 0x3c4   : > { %v14841_v34 = vld [vmem:[%s7076_s13 + $0xf08] sm:$0xff]  ;;  %v14844_v33 = vld [vmem:[%s7076_s13 + $0xf10] sm:$0xff]  ;;  %v14858_v27 = vld [vmem:[%s7076_s13 + $0xd78] sm:$0xff]  ;;  %19843 = vst [vmem:[#allocation77_spill] sm:$0xff] %v14881_v56  ;;  %v19844_v56 = vmax.f32 %v14628_v36, %v14712_v51 }
 0x3c5   : > { %v14861_v54 = vld [vmem:[%s7076_s13 + $0xd80] sm:$0xff]  ;;  %v14864_v10 = vld [vmem:[%s7076_s13 + $0xd88] sm:$0xff]  ;;  %v14867_v49 = vld [vmem:[%s7076_s13 + $0xf18] sm:$0xff] }
 0x3c6   : > { %19842 = vst [vmem:[#allocation39_spill] sm:$0xff] %v14867_v49  ;;  %v14870_v37 = vld [vmem:[%s7076_s13 + $0xf20] sm:$0xff]  ;;  %v14873_v17 = vld [vmem:[%s7076_s13 + $0xf28] sm:$0xff]  ;;  %v14884_v44 = vld [vmem:[%s7076_s13 + $0xd90] sm:$0xff]  ;;  %v14910_v25 = vmax.f32 %v19844_v56, %v3663_v12  ;;  %v19846_v56 = vmax.f32 %v14631_v16, %v14715_v15 }
 0x3c7   : > { %v14887_v30 = vld [vmem:[%s7076_s13 + $0xd98] sm:$0xff]  ;;  %v14890_v40 = vld [vmem:[%s7076_s13 + $0xda0] sm:$0xff]  ;;  %v14893_v22 = vld [vmem:[%s7076_s13 + $0xf30] sm:$0xff]  ;;  %v3678_v31 = vmax.f32 %v14755_v18, %v14870_v37 }
 0x3c8   : > { %v14896_v23 = vld [vmem:[%s7076_s13 + $0xf38] sm:$0xff]  ;;  %v14899_v3 = vld [vmem:[%s7076_s13 + $0xf40] sm:$0xff]  ;;  %19845 = vst [vmem:[#allocation69_spill] sm:$0xff] %v14910_v25  ;;  %v14913_v60 = vld [vmem:[%s7076_s13 + $0xda8] sm:$0xff]  ;;  %v3680_v36 = vmax.f32 %v14777_v0, %v14893_v22  ;;  %v14939_v48 = vmax.f32 %v19846_v56, %v3664_v63  ;;  %v19848_v63 = vmax.f32 %v14660_v61, %v14761_v21 }
 0x3c9   : > { %v14916_v59 = vld [vmem:[%s7076_s13 + $0xdb0] sm:$0xff]  ;;  %v14919_v43 = vld [vmem:[%s7076_s13 + $0xdb8] sm:$0xff]  ;;  %v14922_v20 = vld [vmem:[%s7076_s13 + $0xf48] sm:$0xff]  ;;  %v3681_v51 = vmax.f32 %v14780_v57, %v14896_v23  ;;  %v3682_v12 = vmax.f32 %v14783_v14, %v14899_v3  ;;  %v19849_v23 = vmax.f32 %v14634_v58, %v14718_v13  ;;  %v19851_v58 = vmax.f32 %v14663_v46, %v14764_v62 }
 0x3ca   : > { %v14925_v18 = vld [vmem:[%s7076_s13 + $0xf50] sm:$0xff]  ;;  %v14928_v37 = vld [vmem:[%s7076_s13 + $0xf58] sm:$0xff]  ;;  %19847 = vst [vmem:[#allocation38_spill] sm:$0xff] %v14939_v48  ;;  %v14942_v25 = vld [vmem:[%s7076_s13 + $0xdc0] sm:$0xff]  ;;  %v3683_v14 = vmax.f32 %v14803_v32, %v14922_v20 }
 0x3cb   : > { %v14945_v2 = vld [vmem:[%s7076_s13 + $0xdc8] sm:$0xff]  ;;  %v14948_v0 = vld [vmem:[%s7076_s13 + $0xdd0] sm:$0xff]  ;;  %v3430_v22 = vld [vmem:[%s7076_s13 + $0xf60] sm:$0xff]  ;;  %v3684_v16 = vmax.f32 %v14806_v26, %v14925_v18  ;;  %v3685_v15 = vmax.f32 %v14809_v47, %v14928_v37  ;;  %v14965_v3 = vmax.f32 %v19849_v23, %v19848_v63  ;;  %v14979_v13 = vmax.f32 %v19851_v58, %v3670_v39 }
 0x3cc   : > { %v3431_v9 = vld [vmem:[%s7076_s13 + $0xf68] sm:$0xff]  ;;  %v3432_v57 = vld [vmem:[%s7076_s13 + $0xf70] sm:$0xff]  ;;  %v3381_v56 = vld [vmem:[%s7076_s13 + $0xdd8] sm:$0xff]  ;;  %v3686_v47 = vmax.f32 %v14829_v41, %v3430_v22 }
 0x3cd   : > { %19850 = vst [vmem:[#allocation54_spill] sm:$0xff] %v14965_v3  ;;  %v3382_v48 = vld [vmem:[%s7076_s13 + $0xde0] sm:$0xff]  ;;  %v3383_v20 = vld [vmem:[%s7076_s13 + $0xde8] sm:$0xff]  ;;  %v3433_v32 = vld [vmem:[%s7076_s13 + $0xf78] sm:$0xff]  ;;  %v3687_v18 = vmax.f32 %v14832_v6, %v3431_v9  ;;  %v3688_v61 = vmax.f32 %v14835_v55, %v3432_v57  ;;  %v19852_v55 = vmax.f32 %v14666_v28, %v14767_v1  ;;  %v19854_v28 = vmax.f32 %v14681_v53, %v14786_v24 }
 0x3ce   : > { %v3434_v49 = vld [vmem:[%s7076_s13 + $0xf80] sm:$0xff]  ;;  %v3435_v26 = vld [vmem:[%s7076_s13 + $0xf88] sm:$0xff]  ;;  %v3384_v21 = vld [vmem:[%s7076_s13 + $0xdf0] sm:$0xff]  ;;  %v3689_v4 = vmax.f32 %v14858_v27, %v3433_v32 }
 0x3cf   : > { %v3385_v37 = vld [vmem:[%s7076_s13 + $0xdf8] sm:$0xff]  ;;  %v3436_v63 = vld [vmem:[%s7076_s13 + $0xf90] sm:$0xff]  ;;  %v3438_v3 = vld [vmem:[%s7076_s13 + $0xfa0] sm:$0xff]  ;;  %v3690_v41 = vmax.f32 %v14861_v54, %v3434_v49  ;;  %v3691_v9 = vmax.f32 %v14864_v10, %v3435_v26  ;;  %v14992_v46 = vmax.f32 %v19852_v55, %v3671_v19  ;;  %v19853_v54 = vmax.f32 %v14706_v42, %v14815_v38 }
 0x3d0   : > { %v3437_v23 = vld [vmem:[%s7076_s13 + $0xf98] sm:$0xff]  ;;  %v3439_v62 = vld [vmem:[%s7076_s13 + $0xfa8] sm:$0xff]  ;;  %v3440_v39 = vld [vmem:[%s7076_s13 + $0xfb0] sm:$0xff]  ;;  %v3692_v22 = vmax.f32 %v14884_v44, %v3436_v63  ;;  %v3694_v27 = vmax.f32 %v14890_v40, %v3438_v3  ;;  %v19855_v40 = vmax.f32 %v14709_v5, %v14818_v8  ;;  %v19856_v42 = vmax.f32 %v14684_v7, %v14789_v35 }
 0x3d1   : > { %v3441_v6 = vld [vmem:[%s7076_s13 + $0xfb8] sm:$0xff]  ;;  %v3693_v57 = vmax.f32 %v14887_v30, %v3437_v23  ;;  %v3816_v1 = vmax.f32 %v19854_v28, %v19853_v54  ;;  %v3442_v19 = vld [vmem:[%s7076_s13 + $0xfc0] sm:$0xff]  ;;  %v3443_v10 = vld [vmem:[%s7076_s13 + $0xfc8] sm:$0xff]  ;;  %v3695_v32 = vmax.f32 %v14913_v60, %v3439_v62  ;;  %v3696_v44 = vmax.f32 %v14916_v59, %v3440_v39 }
 0x3d2   : > { %v3444_v49 = vld [vmem:[%s7076_s13 + $0xfd0] sm:$0xff]  ;;  %v3697_v30 = vmax.f32 %v14919_v43, %v3441_v6  ;;  %v3817_v38 = vmax.f32 %v19856_v42, %v19855_v40  ;;  %v3445_v53 = vld [vmem:[%s7076_s13 + $0xfd8] sm:$0xff]  ;;  %v3446_v24 = vld [vmem:[%s7076_s13 + $0xfe0] sm:$0xff]  ;;  %v3698_v26 = vmax.f32 %v14942_v25, %v3442_v19  ;;  %v3699_v58 = vmax.f32 %v14945_v2, %v3443_v10 }
 0x3d3   : > { %v3447_v3 = vld [vmem:[%s7076_s13 + $0xfe8] sm:$0xff]  ;;  %v3700_v60 = vmax.f32 %v14948_v0, %v3444_v49  ;;  %v19857_v59 = vmax.f32 %v14728_v50, %v14838_v52  ;;  %v3448_v63 = vld [vmem:[%s7076_s13 + $0xff0] sm:$0xff]  ;;  %v3449_v23 = vld [vmem:[%s7076_s13 + $0xff8] sm:$0xff]  ;;  %v3701_v5 = vmax.f32 %v3381_v56, %v3445_v53  ;;  %v3702_v8 = vmax.f32 %v3382_v48, %v3446_v24  ;;  %s6723_s13 = scalar_lea.vmem %s6722_s25, 36864 }
 0x3d4   : > { %v3703_v55 = vmax.f32 %v3383_v20, %v3447_v3  ;;  %v19858_v7 = vmax.f32 %v14758_v45, %v14873_v17  ;;  %v19859_v35 = vmax.f32 %v14731_v29, %v14841_v34  ;;  %v3704_v62 = vmax.f32 %v3384_v21, %v3448_v63  ;;  %v19861_v50 = vld [vmem:[#allocation73_spill] sm:$0xff]  ;;  %v19862_v52 = vld [vmem:[#allocation39_spill] sm:$0xff]  ;;  %v19865_v49 = vld [vmem:[#allocation72_spill] sm:$0xff]  ;;  %p6725_p1 = scmp.lt.s32.totalorder %s6723_s13, %s6717_s9 }
 0x3d5   : > { %v3818_v43 = vmax.f32 %v19857_v59, %v3678_v31  ;;  %v3705_v2 = vmax.f32 %v3385_v37, %v3449_v23  ;;  %v19860_v0 = vmax.f32 %v14734_v11, %v14844_v33  ;;  %v19863_v31 = vmax.f32 %v19861_v50, %v19862_v52  ;;  %v19864_v10 = vld [vmem:[#allocation67_spill] sm:$0xff]  ;;  %v19866_v33 = vld [vmem:[#allocation62_spill] sm:$0xff]  ;;  %v19868_v42 = vld [vmem:[#allocation68_spill] sm:$0xff] }
 0x3d6   : > { %v3819_v25 = vmax.f32 %v19859_v35, %v19858_v7  ;;  %v3822_v56 = vmax.f32 %v3682_v12, %v3686_v47  ;;  %v3823_v48 = vmax.f32 %v3683_v14, %v3687_v18  ;;  %v3824_v20 = vmax.f32 %v3684_v16, %v3688_v61  ;;  %v19870_v14 = vld [vmem:[#allocation49_spill] sm:$0xff]  ;;  %v19871_v16 = vld [vmem:[#allocation76_spill] sm:$0xff]  ;;  %v19874_v61 = vld [vmem:[#allocation54_spill] sm:$0xff]  ;;  %p6726_p10 = por %p6725_p1, %p6724_p3 }
 0x3d7   : > { %v3820_v39 = vmax.f32 %v19860_v0, %v3680_v36  ;;  %v3821_v6 = vmax.f32 %v19863_v31, %v3681_v51  ;;  %v3825_v54 = vmax.f32 %v3685_v15, %v3689_v4  ;;  %v3826_v28 = vmax.f32 %v3690_v41, %v3694_v27  ;;  %v19867_v36 = vld [vmem:[#allocation146_spill] sm:$0xff]  ;;  %v19869_v51 = vld [vmem:[#allocation48_spill] sm:$0xff]  ;;  %v19873_v47 = vld [vmem:[#allocation77_spill] sm:$0xff] }
 0x3d8   : > { %v3827_v17 = vmax.f32 %v3691_v9, %v3695_v32  ;;  %v3828_v45 = vmax.f32 %v3692_v22, %v3696_v44  ;;  %v3829_v19 = vmax.f32 %v3693_v57, %v3697_v30  ;;  %v3830_v29 = vmax.f32 %v3698_v26, %v3702_v8  ;;  %v19872_v15 = vld [vmem:[#allocation38_spill] sm:$0xff]  ;;  %v19875_v41 = vld [vmem:[#allocation69_spill] sm:$0xff]  ;;  %v15068_v7 = vld [vmem:[%s7078_s28] sm:$0xff]  ;;  %p6727_p11 = pnand %p6726_p10, %p6720_p2 }
 0x3d9   : > { %v3831_v34 = vmax.f32 %v3699_v58, %v3703_v55  ;;  %v3832_v21 = vmax.f32 %v3700_v60, %v3704_v62  ;;  %v3833_v37 = vmax.f32 %v3701_v5, %v3705_v2  ;;  %v3882_v11 = vmax.f32 %v19865_v49, %v19864_v10  ;;  %v19876_v63 = vld [vmem:[#allocation137_spill] sm:$0xff]  ;;  %v15071_v35 = vld [vmem:[%s7078_s28 + $0x8] sm:$0xff]  ;;  %v15077_v62 = vld [vmem:[%s7078_s28 + $0x18] sm:$0xff] }
 0x3da   : > { %v3883_v40 = vmax.f32 %v19867_v36, %v19866_v33  ;;  %v3884_v12 = vmax.f32 %v19869_v51, %v19868_v42  ;;  %v3885_v4 = vmax.f32 %v19871_v16, %v19870_v14  ;;  %v3886_v18 = vmax.f32 %v19873_v47, %v19872_v15  ;;  %v19877_v5 = vld [vmem:[#allocation29_spill] sm:$0xff]  ;;  %19879 = vst [vmem:[#allocation52_spill] sm:$0xff] %v15077_v62  ;;  %v15080_v2 = vld [vmem:[%s7078_s28 + $0x200] sm:$0xff]  ;;  %v15083_v0 = vld [vmem:[%s7078_s28 + $0x208] sm:$0xff] }
 0x3db   : > { %v3887_v9 = vmax.f32 %v19875_v41, %v19874_v61  ;;  %v3888_v22 = vmax.f32 %v14979_v13, %v3816_v1  ;;  %v3889_v57 = vmax.f32 %v14992_v46, %v3817_v38  ;;  %v3890_v27 = vmax.f32 %v3818_v43, %v3820_v39  ;;  %v15086_v39 = vld [vmem:[%s7078_s28 + $0x210] sm:$0xff]  ;;  %v15089_v50 = vld [vmem:[%s7078_s28 + $0x218] sm:$0xff]  ;;  %v15092_v52 = vld [vmem:[%s7078_s28 + $0x20] sm:$0xff] }
 0x3dc   : > { %v3891_v32 = vmax.f32 %v3819_v25, %v3821_v6  ;;  %v3892_v44 = vmax.f32 %v3822_v56, %v3824_v20  ;;  %v3893_v30 = vmax.f32 %v3823_v48, %v3825_v54  ;;  %v3894_v53 = vmax.f32 %v3826_v28, %v3828_v45  ;;  %v15074_v25 = vld [vmem:[%s7078_s28 + $0x10] sm:$0xff]  ;;  %19880 = vst [vmem:[#allocation138_spill] sm:$0xff] %v15086_v39  ;;  %v15095_v31 = vld [vmem:[%s7078_s28 + $0x28] sm:$0xff]  ;;  %v15101_v56 = vld [vmem:[%s7078_s28 + $0x38] sm:$0xff] }
 0x3dd   : > { %v3895_v24 = vmax.f32 %v3827_v17, %v3829_v19  ;;  %v3896_v3 = vmax.f32 %v3830_v29, %v3832_v21  ;;  %v3897_v26 = vmax.f32 %v3831_v34, %v3833_v37  ;;  %v6349_v58 = vpack.c.bf16 %v3883_v40, %v3882_v11  ;;  %19878 = vst [vmem:[#allocation46_spill] sm:$0xff] %v15074_v25  ;;  %v15098_v6 = vld [vmem:[%s7078_s28 + $0x30] sm:$0xff]  ;;  %v15104_v48 = vld [vmem:[%s7078_s28 + $0x220] sm:$0xff]  ;;  %v15107_v20 = vld [vmem:[%s7078_s28 + $0x228] sm:$0xff] }
 0x3de   : > { %v6350_v13 = vpack.c.bf16 %v3885_v4, %v3884_v12  ;;  %v6351_v1 = vpack.c.bf16 %v3887_v9, %v3886_v18  ;;  %v6352_v46 = vpack.c.bf16 %v3889_v57, %v3888_v22  ;;  %v6353_v38 = vpack.c.bf16 %v3891_v32, %v3890_v27  ;;  %19881 = vst [vmem:[#allocation41_spill] sm:$0xff] %v15089_v50  ;;  %v15110_v54 = vld [vmem:[%s7078_s28 + $0x230] sm:$0xff]  ;;  %v15113_v28 = vld [vmem:[%s7078_s28 + $0x238] sm:$0xff]  ;;  %v15116_v17 = vld [vmem:[%s7078_s28 + $0x40] sm:$0xff] }
 0x3df   : > { %v6354_v60 = vpack.c.bf16 %v3893_v30, %v3892_v44  ;;  %v6355_v59 = vpack.c.bf16 %v3895_v24, %v3894_v53  ;;  %v6356_v43 = vpack.c.bf16 %v3897_v26, %v3896_v3  ;;  %4178 = vst [vmem:[%s8679_s1 + $0x370] sm:$0xff] %v6349_v58  ;;  %v6500_v23 = vunpack.i.l.bf16 %v19876_v63  ;;  %19882 = vst [vmem:[#allocation47_spill] sm:$0xff] %v15101_v56  ;;  %v15119_v45 = vld [vmem:[%s7078_s28 + $0x48] sm:$0xff]  ;;  %v15122_v19 = vld [vmem:[%s7078_s28 + $0x50] sm:$0xff] }
 0x3e0   : > { %4179 = vst [vmem:[%s8679_s1 + $0x394] sm:$0xff] %v6350_v13  ;;  %4180 = vst [vmem:[%s8679_s1 + $0x3b8] sm:$0xff] %v6351_v1  ;;  %v15125_v29 = vld [vmem:[%s7078_s28 + $0x58] sm:$0xff]  ;;  %v15128_v34 = vld [vmem:[%s7078_s28 + $0x240] sm:$0xff] }
 0x3e1   : > { %4181 = vst [vmem:[%s8679_s1 + $0x3dc] sm:$0xff] %v6352_v46  ;;  %4182 = vst [vmem:[%s8679_s1 + $0x400] sm:$0xff] %v6353_v38  ;;  %v5786_v8 = vmax.f32 %v19877_v5, %v6500_v23  ;;  %v15131_v21 = vld [vmem:[%s7078_s28 + $0x248] sm:$0xff]  ;;  %v15134_v37 = vld [vmem:[%s7078_s28 + $0x250] sm:$0xff] }
 0x3e2   : > { %4183 = vst [vmem:[%s8679_s1 + $0x424] sm:$0xff] %v6354_v60  ;;  %4184 = vst [vmem:[%s8679_s1 + $0x448] sm:$0xff] %v6355_v59  ;;  %v15137_v10 = vld [vmem:[%s7078_s28 + $0x258] sm:$0xff]  ;;  %v15140_v49 = vld [vmem:[%s7078_s28 + $0x60] sm:$0xff] }
 0x3e3   : > { %4185 = vst [vmem:[%s8679_s1 + $0x46c] sm:$0xff] %v6356_v43  ;;  %v5818_v55 = vpack.c.bf16 %v5786_v8, %v5786_v8  ;;  %19883 = vst [vmem:[#allocation71_spill] sm:$0xff] %v15113_v28  ;;  %v15143_v11 = vld [vmem:[%s7078_s28 + $0x68] sm:$0xff]  ;;  %v15146_v33 = vld [vmem:[%s7078_s28 + $0x70] sm:$0xff] }
 0x3e4   : > { %19884 = vst [vmem:[#allocation45_spill] sm:$0xff] %v15116_v17  ;;  %19885 = vst [vmem:[#allocation139_spill] sm:$0xff] %v15119_v45  ;;  %v15149_v36 = vld [vmem:[%s7078_s28 + $0x78] sm:$0xff]  ;;  %v15152_v40 = vld [vmem:[%s7078_s28 + $0x260] sm:$0xff] }
 0x3e5   : > { %5851 = vst.msk [vmem:[%s8679_s1 + $0x20] sm:$0xf] %vm5850_vm0, %v5818_v55  ;;  %19886 = vst [vmem:[#allocation101_spill] sm:$0xff] %v15122_v19  ;;  %v15155_v42 = vld [vmem:[%s7078_s28 + $0x268] sm:$0xff]  ;;  %v15158_v51 = vld [vmem:[%s7078_s28 + $0x270] sm:$0xff] }
 0x3e6   : > { %19887 = vst [vmem:[#allocation83_spill] sm:$0xff] %v15125_v29  ;;  %19888 = vst [vmem:[#allocation147_spill] sm:$0xff] %v15128_v34  ;;  %v15161_v12 = vld [vmem:[%s7078_s28 + $0x278] sm:$0xff]  ;;  %v15164_v14 = vld [vmem:[%s7078_s28 + $0x80] sm:$0xff] }
 0x3e7   : > { %19889 = vst [vmem:[#allocation142_spill] sm:$0xff] %v15131_v21  ;;  %19890 = vst [vmem:[#allocation35_spill] sm:$0xff] %v15134_v37  ;;  %v15167_v16 = vld [vmem:[%s7078_s28 + $0x88] sm:$0xff]  ;;  %v15170_v4 = vld [vmem:[%s7078_s28 + $0x90] sm:$0xff] }
 0x3e8   : > { %19891 = vst [vmem:[#allocation85_spill] sm:$0xff] %v15137_v10  ;;  %19892 = vst [vmem:[#allocation93_spill] sm:$0xff] %v15140_v49  ;;  %v15173_v15 = vld [vmem:[%s7078_s28 + $0x98] sm:$0xff]  ;;  %v15176_v47 = vld [vmem:[%s7078_s28 + $0x280] sm:$0xff] }
 0x3e9   : > { %19893 = vst [vmem:[#allocation98_spill] sm:$0xff] %v15143_v11  ;;  %19894 = vst [vmem:[#allocation120_spill] sm:$0xff] %v15146_v33  ;;  %v15179_v18 = vld [vmem:[%s7078_s28 + $0x288] sm:$0xff]  ;;  %v15182_v61 = vld [vmem:[%s7078_s28 + $0x290] sm:$0xff] }
 0x3ea   : > { %19895 = vst [vmem:[#allocation53_spill] sm:$0xff] %v15149_v36  ;;  %19896 = vst [vmem:[#allocation82_spill] sm:$0xff] %v15152_v40  ;;  %v15185_v41 = vld [vmem:[%s7078_s28 + $0x298] sm:$0xff]  ;;  %v15188_v9 = vld [vmem:[%s7078_s28 + $0xa0] sm:$0xff] }
 0x3eb   : > { %19897 = vst [vmem:[#allocation75_spill] sm:$0xff] %v15155_v42  ;;  %19898 = vst [vmem:[#allocation117_spill] sm:$0xff] %v15158_v51  ;;  %v15191_v22 = vld [vmem:[%s7078_s28 + $0xa8] sm:$0xff]  ;;  %v15194_v57 = vld [vmem:[%s7078_s28 + $0xb0] sm:$0xff] }
 0x3ec   : > { %19899 = vst [vmem:[#allocation90_spill] sm:$0xff] %v15161_v12  ;;  %19900 = vst [vmem:[#allocation79_spill] sm:$0xff] %v15164_v14  ;;  %v15197_v27 = vld [vmem:[%s7078_s28 + $0xb8] sm:$0xff]  ;;  %v15200_v32 = vld [vmem:[%s7078_s28 + $0x2a0] sm:$0xff] }
 0x3ed   : > { %19901 = vst [vmem:[#allocation91_spill] sm:$0xff] %v15167_v16  ;;  %19902 = vst [vmem:[#allocation100_spill] sm:$0xff] %v15170_v4  ;;  %v15203_v44 = vld [vmem:[%s7078_s28 + $0x2a8] sm:$0xff]  ;;  %v15206_v30 = vld [vmem:[%s7078_s28 + $0x2b0] sm:$0xff] }
 0x3ee   : > { %19903 = vst [vmem:[#allocation84_spill] sm:$0xff] %v15173_v15  ;;  %19904 = vst [vmem:[#allocation92_spill] sm:$0xff] %v15176_v47  ;;  %v15209_v53 = vld [vmem:[%s7078_s28 + $0x2b8] sm:$0xff]  ;;  %v15220_v13 = vld [vmem:[%s7078_s28 + $0xc0] sm:$0xff] }
 0x3ef   : > { %19905 = vst [vmem:[#allocation106_spill] sm:$0xff] %v15179_v18  ;;  %19906 = vst [vmem:[#allocation118_spill] sm:$0xff] %v15182_v61  ;;  %v15223_v1 = vld [vmem:[%s7078_s28 + $0xc8] sm:$0xff]  ;;  %v15226_v46 = vld [vmem:[%s7078_s28 + $0xd0] sm:$0xff] }
 0x3f0   : > { %19907 = vst [vmem:[#allocation88_spill] sm:$0xff] %v15185_v41  ;;  %19908 = vst [vmem:[#allocation27_spill] sm:$0xff] %v15191_v22  ;;  %v15229_v38 = vld [vmem:[%s7078_s28 + $0xd8] sm:$0xff]  ;;  %v15232_v60 = vld [vmem:[%s7078_s28 + $0x2c0] sm:$0xff] }
 0x3f1   : > { %19909 = vst [vmem:[#allocation105_spill] sm:$0xff] %v15194_v57  ;;  %19910 = vst [vmem:[#allocation99_spill] sm:$0xff] %v15197_v27  ;;  %v15235_v59 = vld [vmem:[%s7078_s28 + $0x2c8] sm:$0xff]  ;;  %v15238_v43 = vld [vmem:[%s7078_s28 + $0x2d0] sm:$0xff] }
 0x3f2   : > { %19911 = vst [vmem:[#allocation111_spill] sm:$0xff] %v15203_v44  ;;  %19912 = vst [vmem:[#allocation86_spill] sm:$0xff] %v15206_v30  ;;  %v15241_v63 = vld [vmem:[%s7078_s28 + $0x2d8] sm:$0xff]  ;;  %v15252_v58 = vld [vmem:[%s7078_s28 + $0xe0] sm:$0xff] }
 0x3f3   : > { %19913 = vst [vmem:[#allocation30_spill] sm:$0xff] %v15209_v53  ;;  %19914 = vst [vmem:[#allocation130_spill] sm:$0xff] %v15220_v13  ;;  %v15255_v26 = vld [vmem:[%s7078_s28 + $0xe8] sm:$0xff]  ;;  %v15258_v3 = vld [vmem:[%s7078_s28 + $0xf0] sm:$0xff] }
 0x3f4   : > { %19915 = vst [vmem:[#allocation28_spill] sm:$0xff] %v15223_v1  ;;  %19916 = vst [vmem:[#allocation80_spill] sm:$0xff] %v15226_v46  ;;  %v15261_v24 = vld [vmem:[%s7078_s28 + $0xf8] sm:$0xff]  ;;  %v15264_v5 = vld [vmem:[%s7078_s28 + $0x2e0] sm:$0xff] }
 0x3f5   : > { %19917 = vst [vmem:[#allocation31_spill] sm:$0xff] %v15229_v38  ;;  %19918 = vst [vmem:[#allocation124_spill] sm:$0xff] %v15232_v60  ;;  %v15267_v8 = vld [vmem:[%s7078_s28 + $0x2e8] sm:$0xff]  ;;  %v15270_v23 = vld [vmem:[%s7078_s28 + $0x2f0] sm:$0xff] }
 0x3f6   : > { %19919 = vst [vmem:[#allocation87_spill] sm:$0xff] %v15235_v59  ;;  %19920 = vst [vmem:[#allocation43_spill] sm:$0xff] %v15238_v43  ;;  %v15273_v55 = vld [vmem:[%s7078_s28 + $0x2f8] sm:$0xff]  ;;  %v15284_v39 = vld [vmem:[%s7078_s28 + $0x100] sm:$0xff] }
 0x3f7   : > { %19921 = vst [vmem:[#allocation112_spill] sm:$0xff] %v15241_v63  ;;  %19922 = vst [vmem:[#allocation51_spill] sm:$0xff] %v15255_v26  ;;  %v15287_v25 = vld [vmem:[%s7078_s28 + $0x108] sm:$0xff]  ;;  %v15290_v50 = vld [vmem:[%s7078_s28 + $0x110] sm:$0xff] }
 0x3f8   : > { %19923 = vst [vmem:[#allocation42_spill] sm:$0xff] %v15258_v3  ;;  %19924 = vst [vmem:[#allocation140_spill] sm:$0xff] %v15261_v24  ;;  %v15293_v34 = vld [vmem:[%s7078_s28 + $0x118] sm:$0xff]  ;;  %v15296_v62 = vld [vmem:[%s7078_s28 + $0x300] sm:$0xff] }
 0x3f9   : > { %19925 = vst [vmem:[#allocation156_spill] sm:$0xff] %v15264_v5  ;;  %19926 = vst [vmem:[#allocation126_spill] sm:$0xff] %v15267_v8  ;;  %v15299_v28 = vld [vmem:[%s7078_s28 + $0x308] sm:$0xff]  ;;  %v15302_v37 = vld [vmem:[%s7078_s28 + $0x310] sm:$0xff] }
 0x3fa   : > { %19927 = vst [vmem:[#allocation157_spill] sm:$0xff] %v15270_v23  ;;  %19928 = vst [vmem:[#allocation40_spill] sm:$0xff] %v15273_v55  ;;  %v15305_v56 = vld [vmem:[%s7078_s28 + $0x318] sm:$0xff]  ;;  %v15316_v45 = vld [vmem:[%s7078_s28 + $0x120] sm:$0xff] }
 0x3fb   : > { %19929 = vst [vmem:[#allocation144_spill] sm:$0xff] %v15284_v39  ;;  %19930 = vst [vmem:[#allocation94_spill] sm:$0xff] %v15287_v25  ;;  %v15319_v17 = vld [vmem:[%s7078_s28 + $0x128] sm:$0xff]  ;;  %v15322_v10 = vld [vmem:[%s7078_s28 + $0x130] sm:$0xff] }
 0x3fc   : > { %19931 = vst [vmem:[#allocation32_spill] sm:$0xff] %v15290_v50  ;;  %19932 = vst [vmem:[#allocation95_spill] sm:$0xff] %v15293_v34  ;;  %v15325_v40 = vld [vmem:[%s7078_s28 + $0x138] sm:$0xff]  ;;  %v15328_v29 = vld [vmem:[%s7078_s28 + $0x320] sm:$0xff] }
 0x3fd   : > { %19933 = vst [vmem:[#allocation103_spill] sm:$0xff] %v15296_v62  ;;  %19934 = vst [vmem:[#allocation107_spill] sm:$0xff] %v15299_v28  ;;  %v15331_v42 = vld [vmem:[%s7078_s28 + $0x328] sm:$0xff]  ;;  %v15334_v19 = vld [vmem:[%s7078_s28 + $0x330] sm:$0xff] }
 0x3fe   : > { %19935 = vst [vmem:[#allocation81_spill] sm:$0xff] %v15302_v37  ;;  %19936 = vst [vmem:[#allocation97_spill] sm:$0xff] %v15305_v56  ;;  %v15337_v51 = vld [vmem:[%s7078_s28 + $0x338] sm:$0xff]  ;;  %v15348_v11 = vld [vmem:[%s7078_s28 + $0x140] sm:$0xff] }
 0x3ff   : > { %19937 = vst [vmem:[#allocation113_spill] sm:$0xff] %v15319_v17  ;;  %19938 = vst [vmem:[#allocation34_spill] sm:$0xff] %v15322_v10  ;;  %v15351_v49 = vld [vmem:[%s7078_s28 + $0x148] sm:$0xff]  ;;  %v15354_v21 = vld [vmem:[%s7078_s28 + $0x150] sm:$0xff] }
 0x400   : > { %19939 = vst [vmem:[#allocation33_spill] sm:$0xff] %v15325_v40  ;;  %19940 = vst [vmem:[#allocation109_spill] sm:$0xff] %v15328_v29  ;;  %v15357_v47 = vld [vmem:[%s7078_s28 + $0x158] sm:$0xff]  ;;  %v15360_v12 = vld [vmem:[%s7078_s28 + $0x340] sm:$0xff] }
 0x401   : > { %19941 = vst [vmem:[#allocation110_spill] sm:$0xff] %v15331_v42  ;;  %19942 = vst [vmem:[#allocation102_spill] sm:$0xff] %v15334_v19  ;;  %v15363_v18 = vld [vmem:[%s7078_s28 + $0x348] sm:$0xff]  ;;  %v15366_v36 = vld [vmem:[%s7078_s28 + $0x350] sm:$0xff] }
 0x402   : > { %19943 = vst [vmem:[#allocation114_spill] sm:$0xff] %v15337_v51  ;;  %19944 = vst [vmem:[#allocation128_spill] sm:$0xff] %v15357_v47  ;;  %v15377_v4 = vld [vmem:[%s7078_s28 + $0x160] sm:$0xff]  ;;  %v15380_v16 = vld [vmem:[%s7078_s28 + $0x168] sm:$0xff] }
 0x403   : > { %19945 = vst [vmem:[#allocation58_spill] sm:$0xff] %v15366_v36  ;;  %v15383_v33 = vld [vmem:[%s7078_s28 + $0x170] sm:$0xff]  ;;  %v15386_v14 = vld [vmem:[%s7078_s28 + $0x178] sm:$0xff]  ;;  %v15392_v44 = vld [vmem:[%s7078_s28 + $0x360] sm:$0xff] }
 0x404   : > { %v15389_v41 = vld [vmem:[%s7078_s28 + $0x358] sm:$0xff]  ;;  %v15395_v15 = vld [vmem:[%s7078_s28 + $0x368] sm:$0xff]  ;;  %v15406_v57 = vld [vmem:[%s7078_s28 + $0x180] sm:$0xff]  ;;  %v4742_v29 = vmax.f32 %v15377_v4, %v15392_v44 }
 0x405   : > { %19946 = vst [vmem:[#allocation57_spill] sm:$0xff] %v15389_v41  ;;  %v15409_v22 = vld [vmem:[%s7078_s28 + $0x188] sm:$0xff]  ;;  %v15412_v61 = vld [vmem:[%s7078_s28 + $0x190] sm:$0xff]  ;;  %v15415_v60 = vld [vmem:[%s7078_s28 + $0x198] sm:$0xff]  ;;  %v4743_v37 = vmax.f32 %v15380_v16, %v15395_v15 }
 0x406   : > { %v15418_v53 = vld [vmem:[%s7078_s28 + $0x370] sm:$0xff]  ;;  %v15421_v59 = vld [vmem:[%s7078_s28 + $0x378] sm:$0xff]  ;;  %v15424_v27 = vld [vmem:[%s7078_s28 + $0x380] sm:$0xff] }
 0x407   : > { %v15435_v46 = vld [vmem:[%s7078_s28 + $0x1a0] sm:$0xff]  ;;  %v15438_v1 = vld [vmem:[%s7078_s28 + $0x1a8] sm:$0xff]  ;;  %v15441_v30 = vld [vmem:[%s7078_s28 + $0x1b0] sm:$0xff]  ;;  %v4744_v34 = vmax.f32 %v15383_v33, %v15418_v53  ;;  %v4745_v51 = vmax.f32 %v15386_v14, %v15421_v59  ;;  %v4746_v47 = vmax.f32 %v15406_v57, %v15424_v27  ;;  %v19948_v59 = vmax.f32 %v15068_v7, %v15080_v2 }
 0x408   : > { %v15444_v13 = vld [vmem:[%s7078_s28 + $0x1b8] sm:$0xff]  ;;  %v15447_v63 = vld [vmem:[%s7078_s28 + $0x388] sm:$0xff]  ;;  %v15450_v8 = vld [vmem:[%s7078_s28 + $0x390] sm:$0xff] }
 0x409   : > { %v15453_v38 = vld [vmem:[%s7078_s28 + $0x398] sm:$0xff]  ;;  %v15464_v3 = vld [vmem:[%s7078_s28 + $0x1c0] sm:$0xff]  ;;  %v15467_v26 = vld [vmem:[%s7078_s28 + $0x1c8] sm:$0xff]  ;;  %v4747_v4 = vmax.f32 %v15409_v22, %v15447_v63  ;;  %v4748_v16 = vmax.f32 %v15412_v61, %v15450_v8  ;;  %v19950_v8 = vmax.f32 %v15095_v31, %v15107_v20 }
 0x40a   : > { %v15470_v43 = vld [vmem:[%s7078_s28 + $0x1d0] sm:$0xff]  ;;  %v15473_v62 = vld [vmem:[%s7078_s28 + $0x1d8] sm:$0xff]  ;;  %v15476_v55 = vld [vmem:[%s7078_s28 + $0x3a0] sm:$0xff] }
 0x40b   : > { %v15479_v28 = vld [vmem:[%s7078_s28 + $0x3a8] sm:$0xff]  ;;  %v15482_v24 = vld [vmem:[%s7078_s28 + $0x3b0] sm:$0xff]  ;;  %v15493_v50 = vld [vmem:[%s7078_s28 + $0x1e0] sm:$0xff]  ;;  %v4750_v14 = vmax.f32 %v15435_v46, %v15476_v55  ;;  %v19947_v46 = vmax.f32 %v15092_v52, %v15104_v48  ;;  %v19951_v55 = vmax.f32 %v15071_v35, %v15083_v0 }
 0x40c   : > { %v15496_v25 = vld [vmem:[%s7078_s28 + $0x1e8] sm:$0xff]  ;;  %v15499_v39 = vld [vmem:[%s7078_s28 + $0x1f0] sm:$0xff]  ;;  %v15502_v5 = vld [vmem:[%s7078_s28 + $0x1f8] sm:$0xff]  ;;  %v4751_v15 = vmax.f32 %v15438_v1, %v15479_v28  ;;  %v4752_v44 = vmax.f32 %v15441_v30, %v15482_v24  ;;  %v19953_v1 = vmax.f32 %v15098_v6, %v15110_v54 }
 0x40d   : > { %v15505_v23 = vld [vmem:[%s7078_s28 + $0x3b8] sm:$0xff]  ;;  %v15508_v56 = vld [vmem:[%s7078_s28 + $0x3c0] sm:$0xff]  ;;  %v15511_v42 = vld [vmem:[%s7078_s28 + $0x3c8] sm:$0xff]  ;;  %v15585_v63 = vmax.f32 %v19948_v59, %v19947_v46  ;;  %v15593_v28 = vmax.f32 %v19951_v55, %v19950_v8 }
 0x40e   : > { %v15522_v19 = vld [vmem:[%s7078_s28 + $0x3d0] sm:$0xff]  ;;  %v15525_v10 = vld [vmem:[%s7078_s28 + $0x3d8] sm:$0xff]  ;;  %v15528_v17 = vld [vmem:[%s7078_s28 + $0x3e0] sm:$0xff] }
 0x40f   : > { %v15539_v36 = vld [vmem:[%s7078_s28 + $0x3e8] sm:$0xff]  ;;  %v15542_v40 = vld [vmem:[%s7078_s28 + $0x3f0] sm:$0xff]  ;;  %v15545_v41 = vld [vmem:[%s7078_s28 + $0x3f8] sm:$0xff]  ;;  %19949 = vst [vmem:[#allocation36_spill] sm:$0xff] %v15585_v63 }
 0x410   : > { %19952 = vst [vmem:[#allocation127_spill] sm:$0xff] %v15593_v28  ;;  %v19954_v27 = vld [vmem:[#allocation46_spill] sm:$0xff]  ;;  %v19958_v7 = vld [vmem:[#allocation47_spill] sm:$0xff]  ;;  %v19961_v59 = vld [vmem:[#allocation52_spill] sm:$0xff] }
 0x411   : > { %v19955_v24 = vld [vmem:[#allocation138_spill] sm:$0xff]  ;;  %v19959_v2 = vld [vmem:[#allocation71_spill] sm:$0xff]  ;;  %v19962_v31 = vld [vmem:[#allocation41_spill] sm:$0xff] }
 0x412   : > { %v19956_v52 = vmax.f32 %v19954_v27, %v19955_v24  ;;  %v19960_v46 = vmax.f32 %v19958_v7, %v19959_v2  ;;  %v19963_v20 = vmax.f32 %v19961_v59, %v19962_v31  ;;  %v15612_v0 = vld [vmem:[%s7078_s28 + $0x400] sm:$0xff]  ;;  %v19965_v8 = vld [vmem:[#allocation93_spill] sm:$0xff]  ;;  %v19966_v55 = vld [vmem:[#allocation82_spill] sm:$0xff] }
 0x413   : > { %v19967_v6 = vmax.f32 %v19965_v8, %v19966_v55  ;;  %v19968_v54 = vld [vmem:[#allocation45_spill] sm:$0xff]  ;;  %v19969_v61 = vld [vmem:[#allocation147_spill] sm:$0xff]  ;;  %v19976_v2 = vld [vmem:[#allocation142_spill] sm:$0xff] }
 0x414   : > { %v15601_v48 = vmax.f32 %v19956_v52, %v19953_v1  ;;  %v15609_v35 = vmax.f32 %v19963_v20, %v19960_v46  ;;  %v19970_v27 = vmax.f32 %v19968_v54, %v19969_v61  ;;  %v19972_v1 = vld [vmem:[#allocation98_spill] sm:$0xff]  ;;  %v19973_v52 = vld [vmem:[#allocation75_spill] sm:$0xff]  ;;  %v19979_v46 = vld [vmem:[#allocation120_spill] sm:$0xff] }
 0x415   : > { %v19974_v53 = vmax.f32 %v19972_v1, %v19973_v52  ;;  %v19975_v7 = vld [vmem:[#allocation139_spill] sm:$0xff]  ;;  %v19980_v31 = vld [vmem:[#allocation117_spill] sm:$0xff]  ;;  %v19987_v61 = vld [vmem:[#allocation90_spill] sm:$0xff] }
 0x416   : > { %19957 = vst [vmem:[#allocation122_spill] sm:$0xff] %v15601_v48  ;;  %19964 = vst [vmem:[#allocation108_spill] sm:$0xff] %v15609_v35  ;;  %v15620_v24 = vmax.f32 %v19970_v27, %v19967_v6  ;;  %v19977_v22 = vmax.f32 %v19975_v7, %v19976_v2  ;;  %v19981_v20 = vmax.f32 %v19979_v46, %v19980_v31  ;;  %v19982_v30 = vld [vmem:[#allocation101_spill] sm:$0xff]  ;;  %v19983_v33 = vld [vmem:[#allocation35_spill] sm:$0xff] }
 0x417   : > { %v19984_v57 = vmax.f32 %v19982_v30, %v19983_v33  ;;  %v19986_v55 = vld [vmem:[#allocation53_spill] sm:$0xff]  ;;  %v19989_v54 = vld [vmem:[#allocation83_spill] sm:$0xff]  ;;  %v15653_v52 = vld [vmem:[%s7078_s28 + $0x418] sm:$0xff]  ;;  %v19993_v33 = vmax.f32 %v15188_v9, %v15200_v32 }
 0x418   : > { %19971 = vst [vmem:[#allocation119_spill] sm:$0xff] %v15620_v24  ;;  %v15628_v59 = vmax.f32 %v19977_v22, %v19974_v53  ;;  %v19988_v6 = vmax.f32 %v19986_v55, %v19987_v61  ;;  %v19990_v27 = vld [vmem:[#allocation85_spill] sm:$0xff]  ;;  %v15647_v22 = vld [vmem:[%s7078_s28 + $0x408] sm:$0xff]  ;;  %v19998_v46 = vld [vmem:[#allocation27_spill] sm:$0xff] }
 0x419   : > { %v15636_v8 = vmax.f32 %v19984_v57, %v19981_v20  ;;  %v19991_v24 = vmax.f32 %v19989_v54, %v19990_v27  ;;  %v15650_v53 = vld [vmem:[%s7078_s28 + $0x410] sm:$0xff]  ;;  %v19994_v57 = vld [vmem:[#allocation79_spill] sm:$0xff]  ;;  %v19995_v30 = vld [vmem:[#allocation92_spill] sm:$0xff] }
 0x41a   : > { %19978 = vst [vmem:[#allocation135_spill] sm:$0xff] %v15628_v59  ;;  %v19996_v7 = vmax.f32 %v19994_v57, %v19995_v30  ;;  %v19999_v31 = vld [vmem:[#allocation111_spill] sm:$0xff]  ;;  %v20002_v55 = vld [vmem:[#allocation106_spill] sm:$0xff]  ;;  %v20005_v54 = vld [vmem:[#allocation105_spill] sm:$0xff] }
 0x41b   : > { %19985 = vst [vmem:[#allocation116_spill] sm:$0xff] %v15636_v8  ;;  %v15644_v1 = vmax.f32 %v19991_v24, %v19988_v6  ;;  %v20000_v24 = vmax.f32 %v19998_v46, %v19999_v31  ;;  %v20001_v20 = vld [vmem:[#allocation91_spill] sm:$0xff]  ;;  %v20006_v27 = vld [vmem:[#allocation86_spill] sm:$0xff]  ;;  %v20015_v30 = vld [vmem:[#allocation84_spill] sm:$0xff] }
 0x41c   : > { %v15661_v2 = vmax.f32 %v19996_v7, %v19993_v33  ;;  %v20003_v61 = vmax.f32 %v20001_v20, %v20002_v55  ;;  %v20007_v59 = vmax.f32 %v20005_v54, %v20006_v27  ;;  %v20009_v8 = vld [vmem:[#allocation118_spill] sm:$0xff]  ;;  %v20012_v32 = vld [vmem:[#allocation99_spill] sm:$0xff]  ;;  %v20016_v7 = vld [vmem:[#allocation88_spill] sm:$0xff] }
 0x41d   : > { %19992 = vst [vmem:[#allocation121_spill] sm:$0xff] %v15644_v1  ;;  %v20008_v1 = vld [vmem:[#allocation100_spill] sm:$0xff]  ;;  %v20013_v57 = vld [vmem:[#allocation30_spill] sm:$0xff]  ;;  %v15688_v31 = vld [vmem:[%s7078_s28 + $0x420] sm:$0xff] }
 0x41e   : > { %19997 = vst [vmem:[#allocation131_spill] sm:$0xff] %v15661_v2  ;;  %v15669_v6 = vmax.f32 %v20003_v61, %v20000_v24  ;;  %v20010_v28 = vmax.f32 %v20008_v1, %v20009_v8  ;;  %v20014_v33 = vmax.f32 %v20012_v32, %v20013_v57  ;;  %v20017_v2 = vmax.f32 %v20015_v30, %v20016_v7  ;;  %v15691_v24 = vld [vmem:[%s7078_s28 + $0x428] sm:$0xff]  ;;  %v15694_v20 = vld [vmem:[%s7078_s28 + $0x430] sm:$0xff]  ;;  %v20021_v8 = vld [vmem:[#allocation130_spill] sm:$0xff] }
 0x41f   : > { %v20022_v1 = vld [vmem:[#allocation124_spill] sm:$0xff]  ;;  %v20025_v54 = vld [vmem:[#allocation51_spill] sm:$0xff]  ;;  %v20032_v7 = vld [vmem:[#allocation42_spill] sm:$0xff] }
 0x420   : > { %20004 = vst [vmem:[#allocation123_spill] sm:$0xff] %v15669_v6  ;;  %v15677_v9 = vmax.f32 %v20010_v28, %v20007_v59  ;;  %v15685_v46 = vmax.f32 %v20017_v2, %v20014_v33  ;;  %v20019_v28 = vld [vmem:[#allocation156_spill] sm:$0xff]  ;;  %v20023_v55 = vmax.f32 %v20021_v8, %v20022_v1  ;;  %v20026_v2 = vld [vmem:[#allocation126_spill] sm:$0xff]  ;;  %v20029_v57 = vld [vmem:[#allocation87_spill] sm:$0xff] }
 0x421   : > { %v20020_v59 = vmax.f32 %v15252_v58, %v20019_v28  ;;  %v20027_v27 = vmax.f32 %v20025_v54, %v20026_v2  ;;  %v20028_v32 = vld [vmem:[#allocation28_spill] sm:$0xff]  ;;  %v20033_v6 = vld [vmem:[#allocation157_spill] sm:$0xff]  ;;  %v20036_v35 = vld [vmem:[#allocation43_spill] sm:$0xff] }
 0x422   : > { %20011 = vst [vmem:[#allocation129_spill] sm:$0xff] %v15677_v9  ;;  %20018 = vst [vmem:[#allocation50_spill] sm:$0xff] %v15685_v46  ;;  %v20030_v33 = vmax.f32 %v20028_v32, %v20029_v57  ;;  %v20034_v46 = vmax.f32 %v20032_v7, %v20033_v6  ;;  %v20035_v9 = vld [vmem:[#allocation80_spill] sm:$0xff]  ;;  %v20042_v1 = vld [vmem:[#allocation31_spill] sm:$0xff] }
 0x423   : > { %v15702_v61 = vmax.f32 %v20023_v55, %v20020_v59  ;;  %v20037_v63 = vmax.f32 %v20035_v9, %v20036_v35  ;;  %v20039_v28 = vld [vmem:[#allocation140_spill] sm:$0xff]  ;;  %v15729_v2 = vld [vmem:[%s7078_s28 + $0x438] sm:$0xff] }
 0x424   : > { %v15710_v30 = vmax.f32 %v20030_v33, %v20027_v27  ;;  %v20040_v8 = vld [vmem:[#allocation40_spill] sm:$0xff]  ;;  %v15732_v27 = vld [vmem:[%s7078_s28 + $0x440] sm:$0xff]  ;;  %v20053_v33 = vld [vmem:[#allocation110_spill] sm:$0xff] }
 0x425   : > { %20024 = vst [vmem:[#allocation134_spill] sm:$0xff] %v15702_v61  ;;  %v15718_v58 = vmax.f32 %v20037_v63, %v20034_v46  ;;  %v20041_v59 = vmax.f32 %v20039_v28, %v20040_v8  ;;  %v20043_v55 = vld [vmem:[#allocation112_spill] sm:$0xff]  ;;  %v20046_v63 = vld [vmem:[#allocation109_spill] sm:$0xff]  ;;  %v20049_v46 = vld [vmem:[#allocation103_spill] sm:$0xff] }
 0x426   : > { %20031 = vst [vmem:[#allocation37_spill] sm:$0xff] %v15710_v30  ;;  %v20044_v61 = vmax.f32 %v20042_v1, %v20043_v55  ;;  %v15735_v6 = vld [vmem:[%s7078_s28 + $0x448] sm:$0xff]  ;;  %v20047_v35 = vmax.f32 %v15316_v45, %v20046_v63  ;;  %v20055_v28 = vld [vmem:[#allocation94_spill] sm:$0xff]  ;;  %v20056_v8 = vld [vmem:[#allocation107_spill] sm:$0xff] }
 0x427   : > { %20038 = vst [vmem:[#allocation104_spill] sm:$0xff] %v15718_v58  ;;  %v20048_v9 = vld [vmem:[#allocation144_spill] sm:$0xff]  ;;  %v20059_v55 = vld [vmem:[#allocation34_spill] sm:$0xff]  ;;  %v20063_v45 = vld [vmem:[#allocation81_spill] sm:$0xff] }
 0x428   : > { %v15726_v54 = vmax.f32 %v20044_v61, %v20041_v59  ;;  %v20050_v32 = vmax.f32 %v20048_v9, %v20049_v46  ;;  %v20052_v61 = vld [vmem:[#allocation113_spill] sm:$0xff]  ;;  %v20057_v59 = vmax.f32 %v20055_v28, %v20056_v8  ;;  %v20060_v30 = vld [vmem:[#allocation102_spill] sm:$0xff]  ;;  %v20062_v58 = vld [vmem:[#allocation32_spill] sm:$0xff] }
 0x429   : > { %v20054_v7 = vmax.f32 %v20052_v61, %v20053_v33  ;;  %v20064_v63 = vmax.f32 %v20062_v58, %v20063_v45  ;;  %v20067_v46 = vld [vmem:[#allocation114_spill] sm:$0xff]  ;;  %v20070_v61 = vld [vmem:[#allocation97_spill] sm:$0xff]  ;;  %v15776_v8 = vld [vmem:[%s7078_s28 + $0x460] sm:$0xff]  ;;  %v20073_v58 = vmax.f32 %v15348_v11, %v15360_v12 }
 0x42a   : > { %20045 = vst [vmem:[#allocation44_spill] sm:$0xff] %v15726_v54  ;;  %v15743_v57 = vmax.f32 %v20050_v32, %v20047_v35  ;;  %v20061_v54 = vmax.f32 %v20059_v55, %v20060_v30  ;;  %v20066_v35 = vld [vmem:[#allocation33_spill] sm:$0xff]  ;;  %v15779_v30 = vld [vmem:[%s7078_s28 + $0x600] sm:$0xff]  ;;  %v20077_v55 = vld [vmem:[#allocation58_spill] sm:$0xff] }
 0x42b   : > { %v15751_v1 = vmax.f32 %v20057_v59, %v20054_v7  ;;  %v20068_v32 = vmax.f32 %v20066_v35, %v20067_v46  ;;  %v15770_v28 = vld [vmem:[%s7078_s28 + $0x450] sm:$0xff]  ;;  %v15773_v7 = vld [vmem:[%s7078_s28 + $0x458] sm:$0xff]  ;;  %v20078_v45 = vmax.f32 %v15354_v21, %v20077_v55  ;;  %v20080_v35 = vld [vmem:[#allocation128_spill] sm:$0xff] }
 0x42c   : > { %20051 = vst [vmem:[#allocation115_spill] sm:$0xff] %v15743_v57  ;;  %v15759_v9 = vmax.f32 %v20064_v63, %v20061_v54  ;;  %v20069_v57 = vld [vmem:[#allocation95_spill] sm:$0xff]  ;;  %v15784_v54 = vmax.f32 %v20073_v58, %v4742_v29  ;;  %v20081_v46 = vld [vmem:[#allocation57_spill] sm:$0xff]  ;;  %v15802_v29 = vld [vmem:[%s7078_s28 + $0x468] sm:$0xff] }
 0x42d   : > { %20058 = vst [vmem:[#allocation136_spill] sm:$0xff] %v15751_v1  ;;  %v20071_v33 = vmax.f32 %v20069_v57, %v20070_v61  ;;  %v20075_v57 = vmax.f32 %v15351_v49, %v15363_v18  ;;  %v15794_v63 = vmax.f32 %v20078_v45, %v4744_v34  ;;  %v15805_v12 = vld [vmem:[%s7078_s28 + $0x470] sm:$0xff]  ;;  %v15808_v49 = vld [vmem:[%s7078_s28 + $0x478] sm:$0xff]  ;;  %v15823_v61 = vmax.f32 %v4747_v4, %v4751_v15  ;;  %v15828_v58 = vld [vmem:[%s7078_s28 + $0x480] sm:$0xff] }
 0x42e   : > { %20065 = vst [vmem:[#allocation96_spill] sm:$0xff] %v15759_v9  ;;  %20074 = vst [vmem:[#allocation125_spill] sm:$0xff] %v15784_v54  ;;  %v15814_v18 = vld [vmem:[%s7078_s28 + $0x610] sm:$0xff]  ;;  %v15817_v34 = vld [vmem:[%s7078_s28 + $0x618] sm:$0xff]  ;;  %v20088_v15 = vmax.f32 %v15415_v60, %v15453_v38 }
 0x42f   : > { %v15767_v48 = vmax.f32 %v20071_v33, %v20068_v32  ;;  %v15789_v59 = vmax.f32 %v20075_v57, %v4743_v37  ;;  %20079 = vst [vmem:[#allocation154_spill] sm:$0xff] %v15794_v63  ;;  %v20082_v32 = vmax.f32 %v20080_v35, %v20081_v46  ;;  %v15811_v37 = vld [vmem:[%s7078_s28 + $0x608] sm:$0xff]  ;;  %20085 = vst [vmem:[#allocation141_spill] sm:$0xff] %v15823_v61  ;;  %v15834_v55 = vld [vmem:[%s7078_s28 + $0x490] sm:$0xff] }
 0x430   : > { %v15825_v33 = vmax.f32 %v4748_v16, %v4752_v44  ;;  %v15831_v57 = vld [vmem:[%s7078_s28 + $0x488] sm:$0xff]  ;;  %v4382_v45 = vld [vmem:[%s7078_s28 + $0x620] sm:$0xff]  ;;  %v15841_v46 = vld [vmem:[%s7078_s28 + $0x630] sm:$0xff] }
 0x431   : > { %20072 = vst [vmem:[#allocation133_spill] sm:$0xff] %v15767_v48  ;;  %20076 = vst [vmem:[#allocation60_spill] sm:$0xff] %v15789_v59  ;;  %v15799_v11 = vmax.f32 %v20082_v32, %v4745_v51  ;;  %v15821_v51 = vmax.f32 %v4746_v47, %v4750_v14  ;;  %v15838_v35 = vld [vmem:[%s7078_s28 + $0x628] sm:$0xff]  ;;  %v20087_v14 = vmax.f32 %v15444_v13, %v15505_v23  ;;  %v15858_v32 = vld [vmem:[%s7078_s28 + $0x498] sm:$0xff] }
 0x432   : > { %20086 = vst [vmem:[#allocation63_spill] sm:$0xff] %v15825_v33  ;;  %20090 = vst [vmem:[#allocation61_spill] sm:$0xff] %v15858_v32  ;;  %v15861_v47 = vld [vmem:[%s7078_s28 + $0x4a0] sm:$0xff]  ;;  %v15864_v21 = vld [vmem:[%s7078_s28 + $0x4a8] sm:$0xff]  ;;  %v4766_v13 = vmax.f32 %v15688_v31, %v4382_v45  ;;  %v4767_v38 = vmax.f32 %v15691_v24, %v15838_v35  ;;  %v4768_v60 = vmax.f32 %v15694_v20, %v15841_v46 }
 0x433   : > { %20083 = vst [vmem:[#allocation152_spill] sm:$0xff] %v15799_v11  ;;  %20084 = vst [vmem:[#allocation149_spill] sm:$0xff] %v15821_v51  ;;  %v15855_v44 = vmax.f32 %v20088_v15, %v20087_v14  ;;  %v15867_v4 = vld [vmem:[%s7078_s28 + $0x638] sm:$0xff]  ;;  %v15870_v61 = vld [vmem:[%s7078_s28 + $0x640] sm:$0xff]  ;;  %v20091_v23 = vmax.f32 %v15493_v50, %v15528_v17  ;;  %v20092_v14 = vmax.f32 %v15464_v3, %v15508_v56 }
 0x434   : > { %v15873_v16 = vld [vmem:[%s7078_s28 + $0x648] sm:$0xff]  ;;  %v15892_v31 = vld [vmem:[%s7078_s28 + $0x4b8] sm:$0xff]  ;;  %v15895_v45 = vld [vmem:[%s7078_s28 + $0x4c0] sm:$0xff]  ;;  %v20094_v3 = vmax.f32 %v15496_v25, %v15539_v36  ;;  %v20095_v46 = vmax.f32 %v15467_v26, %v15511_v42  ;;  %v20099_v26 = vmax.f32 %v15499_v39, %v15542_v40 }
 0x435   : > { %20089 = vst [vmem:[#allocation153_spill] sm:$0xff] %v15855_v44  ;;  %v15886_v15 = vmax.f32 %v20092_v14, %v20091_v23  ;;  %v15889_v44 = vld [vmem:[%s7078_s28 + $0x4b0] sm:$0xff]  ;;  %v15901_v35 = vld [vmem:[%s7078_s28 + $0x658] sm:$0xff]  ;;  %v15904_v20 = vld [vmem:[%s7078_s28 + $0x660] sm:$0xff] }
 0x436   : > { %v15898_v24 = vld [vmem:[%s7078_s28 + $0x650] sm:$0xff]  ;;  %v15918_v23 = vmax.f32 %v20095_v46, %v20094_v3  ;;  %v15921_v14 = vld [vmem:[%s7078_s28 + $0x4c8] sm:$0xff]  ;;  %v15936_v17 = vld [vmem:[%s7078_s28 + $0x678] sm:$0xff]  ;;  %v4774_v42 = vmax.f32 %v15776_v8, %v15904_v20  ;;  %v20100_v3 = vmax.f32 %v15470_v43, %v15522_v19  ;;  %v20102_v43 = vmax.f32 %v15502_v5, %v15545_v41 }
 0x437   : > { %20093 = vst [vmem:[#allocation55_spill] sm:$0xff] %v15886_v15  ;;  %v15924_v50 = vld [vmem:[%s7078_s28 + $0x4d0] sm:$0xff]  ;;  %v15927_v15 = vld [vmem:[%s7078_s28 + $0x4d8] sm:$0xff]  ;;  %v15930_v56 = vld [vmem:[%s7078_s28 + $0x668] sm:$0xff]  ;;  %v20103_v20 = vmax.f32 %v15473_v62, %v15525_v10  ;;  %v20106_v5 = vmax.f32 %v15612_v0, %v15779_v30 }
 0x438   : > { %20096 = vst [vmem:[#allocation64_spill] sm:$0xff] %v15918_v23  ;;  %20097 = vst [vmem:[#allocation132_spill] sm:$0xff] %v15924_v50  ;;  %v15933_v51 = vld [vmem:[%s7078_s28 + $0x670] sm:$0xff]  ;;  %v15950_v46 = vmax.f32 %v20100_v3, %v20099_v26  ;;  %v15953_v23 = vld [vmem:[%s7078_s28 + $0x4e0] sm:$0xff] }
 0x439   : > { %20098 = vst [vmem:[#allocation78_spill] sm:$0xff] %v15927_v15  ;;  %v15956_v25 = vld [vmem:[%s7078_s28 + $0x4e8] sm:$0xff]  ;;  %v15959_v33 = vld [vmem:[%s7078_s28 + $0x4f0] sm:$0xff]  ;;  %v15962_v36 = vld [vmem:[%s7078_s28 + $0x680] sm:$0xff]  ;;  %v15982_v26 = vmax.f32 %v20103_v20, %v20102_v43  ;;  %v16011_v43 = vmax.f32 %v20106_v5, %v4766_v13  ;;  %v20112_v5 = vmax.f32 %v15647_v22, %v15811_v37 }
 0x43a   : > { %20101 = vst [vmem:[#allocation59_spill] sm:$0xff] %v15950_v46  ;;  %v15965_v59 = vld [vmem:[%s7078_s28 + $0x688] sm:$0xff]  ;;  %v15968_v8 = vld [vmem:[%s7078_s28 + $0x690] sm:$0xff]  ;;  %v15985_v3 = vld [vmem:[%s7078_s28 + $0x4f8] sm:$0xff] }
 0x43b   : > { %20104 = vst [vmem:[#allocation65_spill] sm:$0xff] %v15982_v26  ;;  %v15988_v39 = vld [vmem:[%s7078_s28 + $0x500] sm:$0xff]  ;;  %v15991_v46 = vld [vmem:[%s7078_s28 + $0x508] sm:$0xff]  ;;  %v15994_v19 = vld [vmem:[%s7078_s28 + $0x698] sm:$0xff]  ;;  %v16040_v41 = vmax.f32 %v20112_v5, %v4767_v38  ;;  %v20117_v5 = vmax.f32 %v15650_v53, %v15814_v18  ;;  %v20120_v38 = vmax.f32 %v15653_v52, %v15817_v34  ;;  %v20129_v34 = vmax.f32 %v15735_v6, %v15873_v16 }
 0x43c   : > { %20105 = vst [vmem:[#allocation143_spill] sm:$0xff] %v15994_v19  ;;  %v15997_v11 = vld [vmem:[%s7078_s28 + $0x6a0] sm:$0xff]  ;;  %v16000_v40 = vld [vmem:[%s7078_s28 + $0x6a8] sm:$0xff]  ;;  %20107 = vst [vmem:[#allocation89_spill] sm:$0xff] %v16011_v43 }
 0x43d   : > { %v16014_v20 = vld [vmem:[%s7078_s28 + $0x510] sm:$0xff]  ;;  %v16017_v26 = vld [vmem:[%s7078_s28 + $0x518] sm:$0xff]  ;;  %v16020_v62 = vld [vmem:[%s7078_s28 + $0x520] sm:$0xff]  ;;  %20113 = vst [vmem:[#allocation150_spill] sm:$0xff] %v16040_v41  ;;  %v16069_v13 = vmax.f32 %v20117_v5, %v4768_v60  ;;  %v20119_v5 = vmax.f32 %v15729_v2, %v15867_v4  ;;  %v20124_v4 = vmax.f32 %v15732_v27, %v15870_v61 }
 0x43e   : > { %20108 = vst [vmem:[#allocation151_spill] sm:$0xff] %v16014_v20  ;;  %20109 = vst [vmem:[#allocation148_spill] sm:$0xff] %v16017_v26  ;;  %v16023_v54 = vld [vmem:[%s7078_s28 + $0x6b0] sm:$0xff]  ;;  %v16026_v10 = vld [vmem:[%s7078_s28 + $0x6b8] sm:$0xff] }
 0x43f   : > { %20110 = vst [vmem:[#allocation56_spill] sm:$0xff] %v16026_v10  ;;  %v16029_v63 = vld [vmem:[%s7078_s28 + $0x6c0] sm:$0xff]  ;;  %v16043_v43 = vld [vmem:[%s7078_s28 + $0x528] sm:$0xff]  ;;  %v16046_v1 = vld [vmem:[%s7078_s28 + $0x530] sm:$0xff] }
 0x440   : > { %20111 = vst [vmem:[#allocation145_spill] sm:$0xff] %v16029_v63  ;;  %v16049_v0 = vld [vmem:[%s7078_s28 + $0x538] sm:$0xff]  ;;  %v16052_v48 = vld [vmem:[%s7078_s28 + $0x6c8] sm:$0xff]  ;;  %v16055_v30 = vld [vmem:[%s7078_s28 + $0x6d0] sm:$0xff] }
 0x441   : > { %20114 = vst [vmem:[#allocation155_spill] sm:$0xff] %v16052_v48  ;;  %20115 = vst [vmem:[#allocation66_spill] sm:$0xff] %v16055_v30  ;;  %v16058_v9 = vld [vmem:[%s7078_s28 + $0x6d8] sm:$0xff]  ;;  %v16072_v41 = vld [vmem:[%s7078_s28 + $0x540] sm:$0xff] }
 0x442   : > { %20116 = vst [vmem:[#allocation70_spill] sm:$0xff] %v16058_v9  ;;  %20118 = vst [vmem:[#allocation74_spill] sm:$0xff] %v16069_v13  ;;  %v16075_v19 = vld [vmem:[%s7078_s28 + $0x548] sm:$0xff]  ;;  %v16078_v22 = vld [vmem:[%s7078_s28 + $0x550] sm:$0xff]  ;;  %v16101_v13 = vmax.f32 %v20120_v38, %v20119_v5  ;;  %v16130_v38 = vmax.f32 %v20124_v4, %v4774_v42  ;;  %v20128_v4 = vmax.f32 %v15802_v29, %v15930_v56 }
 0x443   : > { %v16081_v32 = vld [vmem:[%s7078_s28 + $0x6e0] sm:$0xff]  ;;  %v16084_v37 = vld [vmem:[%s7078_s28 + $0x6e8] sm:$0xff]  ;;  %v16087_v10 = vld [vmem:[%s7078_s28 + $0x6f0] sm:$0xff]  ;;  %v20132_v56 = vmax.f32 %v15805_v12, %v15933_v51 }
 0x444   : > { %20121 = vst [vmem:[#allocation73_spill] sm:$0xff] %v16101_v13  ;;  %v16104_v63 = vld [vmem:[%s7078_s28 + $0x558] sm:$0xff]  ;;  %v16107_v53 = vld [vmem:[%s7078_s28 + $0x560] sm:$0xff]  ;;  %v16110_v48 = vld [vmem:[%s7078_s28 + $0x568] sm:$0xff] }
 0x445   : > { %v16113_v18 = vld [vmem:[%s7078_s28 + $0x6f8] sm:$0xff]  ;;  %v16116_v30 = vld [vmem:[%s7078_s28 + $0x700] sm:$0xff]  ;;  %v16119_v60 = vld [vmem:[%s7078_s28 + $0x708] sm:$0xff]  ;;  %20125 = vst [vmem:[#allocation72_spill] sm:$0xff] %v16130_v38  ;;  %v16162_v38 = vmax.f32 %v20129_v34, %v20128_v4  ;;  %v20133_v34 = vmax.f32 %v15770_v28, %v15898_v24  ;;  %v20135_v24 = vmax.f32 %v15808_v49, %v15936_v17  ;;  %v20138_v17 = vmax.f32 %v15861_v47, %v15997_v11 }
 0x446   : > { %20122 = vst [vmem:[#allocation39_spill] sm:$0xff] %v16113_v18  ;;  %20123 = vst [vmem:[#allocation67_spill] sm:$0xff] %v16116_v30  ;;  %v16133_v5 = vld [vmem:[%s7078_s28 + $0x570] sm:$0xff]  ;;  %v16136_v13 = vld [vmem:[%s7078_s28 + $0x578] sm:$0xff] }
 0x447   : > { %v16139_v52 = vld [vmem:[%s7078_s28 + $0x580] sm:$0xff]  ;;  %v16142_v9 = vld [vmem:[%s7078_s28 + $0x710] sm:$0xff]  ;;  %v16145_v2 = vld [vmem:[%s7078_s28 + $0x718] sm:$0xff]  ;;  %20130 = vst [vmem:[#allocation68_spill] sm:$0xff] %v16162_v38  ;;  %v16194_v4 = vmax.f32 %v20133_v34, %v20132_v56  ;;  %v20136_v56 = vmax.f32 %v15773_v7, %v15901_v35 }
 0x448   : > { %20126 = vst [vmem:[#allocation62_spill] sm:$0xff] %v16142_v9  ;;  %20127 = vst [vmem:[#allocation146_spill] sm:$0xff] %v16145_v2  ;;  %v16148_v15 = vld [vmem:[%s7078_s28 + $0x720] sm:$0xff]  ;;  %v16165_v50 = vld [vmem:[%s7078_s28 + $0x588] sm:$0xff] }
 0x449   : > { %v16168_v27 = vld [vmem:[%s7078_s28 + $0x590] sm:$0xff]  ;;  %v16171_v18 = vld [vmem:[%s7078_s28 + $0x598] sm:$0xff]  ;;  %v16174_v61 = vld [vmem:[%s7078_s28 + $0x728] sm:$0xff]  ;;  %20134 = vst [vmem:[#allocation49_spill] sm:$0xff] %v16194_v4  ;;  %v16226_v34 = vmax.f32 %v20136_v56, %v20135_v24  ;;  %v20139_v24 = vmax.f32 %v15828_v58, %v15962_v36  ;;  %v20141_v36 = vmax.f32 %v15864_v21, %v16000_v40 }
 0x44a   : > { %v16177_v30 = vld [vmem:[%s7078_s28 + $0x730] sm:$0xff]  ;;  %v16180_v42 = vld [vmem:[%s7078_s28 + $0x738] sm:$0xff]  ;;  %v16197_v38 = vld [vmem:[%s7078_s28 + $0x5a0] sm:$0xff] }
 0x44b   : > { %20131 = vst [vmem:[#allocation48_spill] sm:$0xff] %v16180_v42  ;;  %v16200_v6 = vld [vmem:[%s7078_s28 + $0x5a8] sm:$0xff]  ;;  %v16203_v9 = vld [vmem:[%s7078_s28 + $0x5b0] sm:$0xff]  ;;  %v16206_v29 = vld [vmem:[%s7078_s28 + $0x740] sm:$0xff]  ;;  %v16258_v56 = vmax.f32 %v20139_v24, %v20138_v17 }
 0x44c   : > { %v16209_v2 = vld [vmem:[%s7078_s28 + $0x748] sm:$0xff]  ;;  %v16212_v16 = vld [vmem:[%s7078_s28 + $0x750] sm:$0xff]  ;;  %20137 = vst [vmem:[#allocation76_spill] sm:$0xff] %v16226_v34  ;;  %v16229_v4 = vld [vmem:[%s7078_s28 + $0x5b8] sm:$0xff]  ;;  %v4802_v7 = vmax.f32 %v16072_v41, %v16206_v29 }
 0x44d   : > { %v16232_v28 = vld [vmem:[%s7078_s28 + $0x5c0] sm:$0xff]  ;;  %v16235_v26 = vld [vmem:[%s7078_s28 + $0x5c8] sm:$0xff]  ;;  %v16238_v12 = vld [vmem:[%s7078_s28 + $0x758] sm:$0xff]  ;;  %v4803_v49 = vmax.f32 %v16075_v19, %v16209_v2  ;;  %v4804_v35 = vmax.f32 %v16078_v22, %v16212_v16  ;;  %20140 = vst [vmem:[#allocation38_spill] sm:$0xff] %v16258_v56  ;;  %v20142_v16 = vmax.f32 %v15831_v57, %v15965_v59  ;;  %v20143_v59 = vmax.f32 %v15889_v44, %v16023_v54 }
 0x44e   : > { %v16241_v20 = vld [vmem:[%s7078_s28 + $0x760] sm:$0xff]  ;;  %v16244_v51 = vld [vmem:[%s7078_s28 + $0x768] sm:$0xff]  ;;  %v16261_v34 = vld [vmem:[%s7078_s28 + $0x5d0] sm:$0xff]  ;;  %v4805_v11 = vmax.f32 %v16104_v63, %v16238_v12  ;;  %v20144_v57 = vmax.f32 %v15834_v55, %v15968_v8 }
 0x44f   : > { %v16264_v41 = vld [vmem:[%s7078_s28 + $0x5d8] sm:$0xff]  ;;  %v16267_v29 = vld [vmem:[%s7078_s28 + $0x5e0] sm:$0xff]  ;;  %v4424_v19 = vld [vmem:[%s7078_s28 + $0x770] sm:$0xff]  ;;  %v4806_v58 = vmax.f32 %v16107_v53, %v16241_v20  ;;  %v4807_v47 = vmax.f32 %v16110_v48, %v16244_v51  ;;  %v16284_v17 = vmax.f32 %v20142_v16, %v20141_v36 }
 0x450   : > { %v4425_v2 = vld [vmem:[%s7078_s28 + $0x778] sm:$0xff]  ;;  %v4426_v22 = vld [vmem:[%s7078_s28 + $0x780] sm:$0xff]  ;;  %v4375_v24 = vld [vmem:[%s7078_s28 + $0x5e8] sm:$0xff]  ;;  %v4808_v53 = vmax.f32 %v16133_v5, %v4424_v19  ;;  %v16301_v40 = vmax.f32 %v20144_v57, %v20143_v59 }
 0x451   : > { %v4376_v56 = vld [vmem:[%s7078_s28 + $0x5f0] sm:$0xff]  ;;  %v4377_v42 = vld [vmem:[%s7078_s28 + $0x5f8] sm:$0xff]  ;;  %v4427_v63 = vld [vmem:[%s7078_s28 + $0x788] sm:$0xff]  ;;  %v4809_v48 = vmax.f32 %v16136_v13, %v4425_v2  ;;  %v4810_v21 = vmax.f32 %v16139_v52, %v4426_v22 }
 0x452   : > { %v4428_v12 = vld [vmem:[%s7078_s28 + $0x790] sm:$0xff]  ;;  %v4429_v20 = vld [vmem:[%s7078_s28 + $0x798] sm:$0xff]  ;;  %v4430_v51 = vld [vmem:[%s7078_s28 + $0x7a0] sm:$0xff]  ;;  %v4811_v5 = vmax.f32 %v16165_v50, %v4427_v63 }
 0x453   : > { %v4431_v36 = vld [vmem:[%s7078_s28 + $0x7a8] sm:$0xff]  ;;  %v4432_v16 = vld [vmem:[%s7078_s28 + $0x7b0] sm:$0xff]  ;;  %v4812_v13 = vmax.f32 %v16168_v27, %v4428_v12  ;;  %v4813_v52 = vmax.f32 %v16171_v18, %v4429_v20  ;;  %v20148_v2 = vld [vmem:[#allocation143_spill] sm:$0xff]  ;;  %v4814_v50 = vmax.f32 %v16197_v38, %v4430_v51 }
 0x454   : > { %v20145_v19 = vld [vmem:[#allocation56_spill] sm:$0xff]  ;;  %v20147_v44 = vld [vmem:[#allocation61_spill] sm:$0xff]  ;;  %v4433_v22 = vld [vmem:[%s7078_s28 + $0x7b8] sm:$0xff]  ;;  %v4815_v27 = vmax.f32 %v16200_v6, %v4431_v36  ;;  %v4816_v18 = vmax.f32 %v16203_v9, %v4432_v16  ;;  %v20153_v9 = vmax.f32 %v15956_v25, %v16084_v37 }
 0x455   : > { %v20146_v54 = vmax.f32 %v15892_v31, %v20145_v19  ;;  %v20149_v55 = vmax.f32 %v20147_v44, %v20148_v2  ;;  %v4434_v59 = vld [vmem:[%s7078_s28 + $0x7c0] sm:$0xff]  ;;  %v4435_v57 = vld [vmem:[%s7078_s28 + $0x7c8] sm:$0xff]  ;;  %v20150_v31 = vmax.f32 %v15953_v23, %v16081_v32  ;;  %v20151_v63 = vld [vmem:[#allocation145_spill] sm:$0xff]  ;;  %v4817_v2 = vmax.f32 %v16229_v4, %v4433_v22 }
 0x456   : > { %v20152_v12 = vmax.f32 %v15895_v45, %v20151_v63  ;;  %v4436_v19 = vld [vmem:[%s7078_s28 + $0x7d0] sm:$0xff]  ;;  %v4438_v44 = vld [vmem:[%s7078_s28 + $0x7e0] sm:$0xff]  ;;  %v4819_v38 = vmax.f32 %v16235_v26, %v4435_v57  ;;  %v4439_v45 = vld [vmem:[%s7078_s28 + $0x7e8] sm:$0xff]  ;;  %v20156_v26 = vmax.f32 %v15959_v33, %v16087_v10 }
 0x457   : > { %v16315_v8 = vmax.f32 %v20149_v55, %v20146_v54  ;;  %v4437_v54 = vld [vmem:[%s7078_s28 + $0x7d8] sm:$0xff]  ;;  %v4818_v55 = vmax.f32 %v16232_v28, %v4434_v59  ;;  %v20154_v6 = vld [vmem:[#allocation155_spill] sm:$0xff]  ;;  %v4440_v51 = vld [vmem:[%s7078_s28 + $0x7f0] sm:$0xff]  ;;  %v4820_v16 = vmax.f32 %v16261_v34, %v4436_v19  ;;  %v4822_v4 = vmax.f32 %v16267_v29, %v4438_v44 }
 0x458   : > { %v16329_v20 = vmax.f32 %v20152_v12, %v20150_v31  ;;  %v20155_v32 = vmax.f32 %v15921_v14, %v20154_v6  ;;  %v4441_v36 = vld [vmem:[%s7078_s28 + $0x7f8] sm:$0xff]  ;;  %v4821_v31 = vmax.f32 %v16264_v41, %v4437_v54  ;;  %v20157_v28 = vld [vmem:[#allocation132_spill] sm:$0xff]  ;;  %v4823_v14 = vmax.f32 %v4375_v24, %v4439_v45  ;;  %v20160_v63 = vld [vmem:[#allocation39_spill] sm:$0xff] }
 0x459   : > { %v20158_v22 = vld [vmem:[#allocation66_spill] sm:$0xff]  ;;  %v4824_v59 = vmax.f32 %v4376_v56, %v4440_v51  ;;  %v4825_v57 = vmax.f32 %v4377_v42, %v4441_v36  ;;  %v20161_v12 = vmax.f32 %v15985_v3, %v20160_v63  ;;  %v20165_v29 = vmax.f32 %v16020_v62, %v16148_v15  ;;  %v20166_v33 = vld [vmem:[#allocation67_spill] sm:$0xff]  ;;  %v20176_v45 = vld [vmem:[#allocation148_spill] sm:$0xff] }
 0x45a   : > { %v16343_v23 = vmax.f32 %v20155_v32, %v20153_v9  ;;  %v20159_v25 = vmax.f32 %v20157_v28, %v20158_v22  ;;  %v20162_v9 = vld [vmem:[#allocation78_spill] sm:$0xff]  ;;  %v20167_v10 = vmax.f32 %v15988_v39, %v20166_v33  ;;  %v20168_v24 = vmax.f32 %v16043_v43, %v16174_v61  ;;  %v20171_v44 = vld [vmem:[#allocation151_spill] sm:$0xff]  ;;  %v20174_v39 = vld [vmem:[#allocation48_spill] sm:$0xff] }
 0x45b   : > { %v20163_v34 = vld [vmem:[#allocation70_spill] sm:$0xff]  ;;  %v20169_v42 = vmax.f32 %v15991_v46, %v16119_v60  ;;  %v20170_v3 = vmax.f32 %v16046_v1, %v16177_v30  ;;  %v20175_v62 = vmax.f32 %v16049_v0, %v20174_v39  ;;  %v5006_v61 = vmax.f32 %v4802_v7, %v4806_v58  ;;  %v20181_v0 = vld [vmem:[#allocation108_spill] sm:$0xff]  ;;  %v20182_v33 = vld [vmem:[#allocation127_spill] sm:$0xff] }
 0x45c   : > { %v16357_v37 = vmax.f32 %v20159_v25, %v20156_v26  ;;  %v20164_v19 = vmax.f32 %v20162_v9, %v20163_v34  ;;  %v16371_v54 = vmax.f32 %v20167_v10, %v20165_v29  ;;  %v20172_v6 = vld [vmem:[#allocation62_spill] sm:$0xff]  ;;  %v5007_v26 = vmax.f32 %v4803_v49, %v4807_v47  ;;  %v20185_v49 = vld [vmem:[#allocation121_spill] sm:$0xff]  ;;  %v20188_v47 = vld [vmem:[#allocation131_spill] sm:$0xff] }
 0x45d   : > { %v16379_v56 = vmax.f32 %v20169_v42, %v20168_v24  ;;  %v20173_v32 = vmax.f32 %v20171_v44, %v20172_v6  ;;  %v20177_v51 = vld [vmem:[#allocation146_spill] sm:$0xff]  ;;  %v5008_v46 = vmax.f32 %v4804_v35, %v4808_v53  ;;  %v5009_v60 = vmax.f32 %v4805_v11, %v4809_v48  ;;  %v20183_v24 = vld [vmem:[#allocation116_spill] sm:$0xff]  ;;  %v20184_v42 = vld [vmem:[#allocation119_spill] sm:$0xff] }
 0x45e   : > { %v5001_v41 = vmax.f32 %v20164_v19, %v20161_v12  ;;  %v20178_v36 = vmax.f32 %v20176_v45, %v20177_v51  ;;  %v5010_v28 = vmax.f32 %v4810_v21, %v4814_v50  ;;  %v5011_v22 = vmax.f32 %v4811_v5, %v4815_v27  ;;  %v20179_v34 = vld [vmem:[#allocation122_spill] sm:$0xff]  ;;  %v20180_v19 = vld [vmem:[#allocation36_spill] sm:$0xff]  ;;  %v20186_v35 = vld [vmem:[#allocation135_spill] sm:$0xff] }
 0x45f   : > { %v16387_v15 = vmax.f32 %v20173_v32, %v20170_v3  ;;  %v5012_v25 = vmax.f32 %v4812_v13, %v4816_v18  ;;  %v5013_v1 = vmax.f32 %v4813_v52, %v4817_v2  ;;  %v5014_v30 = vmax.f32 %v4818_v55, %v4822_v4  ;;  %v20187_v58 = vld [vmem:[#allocation129_spill] sm:$0xff]  ;;  %v20189_v48 = vld [vmem:[#allocation50_spill] sm:$0xff]  ;;  %v20190_v21 = vld [vmem:[#allocation123_spill] sm:$0xff] }
 0x460   : > { %v5005_v43 = vmax.f32 %v20178_v36, %v20175_v62  ;;  %v5015_v63 = vmax.f32 %v4819_v38, %v4823_v14  ;;  %v5016_v12 = vmax.f32 %v4820_v16, %v4824_v59  ;;  %v5017_v9 = vmax.f32 %v4821_v31, %v4825_v57  ;;  %v20191_v13 = vld [vmem:[#allocation104_spill] sm:$0xff]  ;;  %v20192_v52 = vld [vmem:[#allocation134_spill] sm:$0xff]  ;;  %v20194_v18 = vld [vmem:[#allocation37_spill] sm:$0xff] }
 0x461   : > { %v5082_v29 = vmax.f32 %v20180_v19, %v20179_v34  ;;  %v5083_v10 = vmax.f32 %v20182_v33, %v20181_v0  ;;  %v5084_v7 = vmax.f32 %v20184_v42, %v20183_v24  ;;  %v5085_v11 = vmax.f32 %v20186_v35, %v20185_v49  ;;  %v20193_v27 = vld [vmem:[#allocation44_spill] sm:$0xff]  ;;  %v20196_v38 = vld [vmem:[#allocation115_spill] sm:$0xff]  ;;  %v20197_v31 = vld [vmem:[#allocation133_spill] sm:$0xff] }
 0x462   : > { %v5086_v53 = vmax.f32 %v20188_v47, %v20187_v58  ;;  %v5087_v5 = vmax.f32 %v20190_v21, %v20189_v48  ;;  %v5088_v50 = vmax.f32 %v20192_v52, %v20191_v13  ;;  %v5089_v2 = vmax.f32 %v20194_v18, %v20193_v27  ;;  %v20195_v55 = vld [vmem:[#allocation96_spill] sm:$0xff]  ;;  %v20199_v59 = vld [vmem:[#allocation154_spill] sm:$0xff]  ;;  %v20200_v57 = vld [vmem:[#allocation125_spill] sm:$0xff] }
 0x463   : > { %v5090_v16 = vmax.f32 %v20196_v38, %v20195_v55  ;;  %v20198_v4 = vld [vmem:[#allocation136_spill] sm:$0xff]  ;;  %v5092_v3 = vmax.f32 %v20200_v57, %v20199_v59  ;;  %v20203_v39 = vld [vmem:[#allocation63_spill] sm:$0xff]  ;;  %v20204_v62 = vld [vmem:[#allocation149_spill] sm:$0xff]  ;;  %v5103_v57 = vmax.f32 %v16284_v17, %v16315_v8  ;;  %v6357_v17 = vpack.c.bf16 %v5083_v10, %v5082_v29 }
 0x464   : > { %v5091_v14 = vmax.f32 %v20198_v4, %v20197_v31  ;;  %v20201_v44 = vld [vmem:[#allocation152_spill] sm:$0xff]  ;;  %v5094_v45 = vmax.f32 %v20204_v62, %v20203_v39  ;;  %v20205_v51 = vld [vmem:[#allocation153_spill] sm:$0xff]  ;;  %v20207_v19 = vld [vmem:[#allocation59_spill] sm:$0xff]  ;;  %v5106_v39 = vmax.f32 %v16371_v54, %v16387_v15  ;;  %v5107_v62 = vmax.f32 %v16379_v56, %v5005_v43 }
 0x465   : > { %v20202_v6 = vld [vmem:[#allocation60_spill] sm:$0xff]  ;;  %v20206_v36 = vld [vmem:[#allocation141_spill] sm:$0xff]  ;;  %v20208_v0 = vld [vmem:[#allocation55_spill] sm:$0xff]  ;;  %v6358_v8 = vpack.c.bf16 %v5085_v11, %v5084_v7  ;;  %5402 = vst [vmem:[%s8679_s1 + $0x18] sm:$0xff] %v6357_v17 }
 0x466   : > { %v5093_v32 = vmax.f32 %v20202_v6, %v20201_v44  ;;  %v5095_v34 = vmax.f32 %v20206_v36, %v20205_v51  ;;  %v5096_v33 = vmax.f32 %v20208_v0, %v20207_v19  ;;  %v20209_v24 = vld [vmem:[#allocation65_spill] sm:$0xff]  ;;  %v20210_v42 = vld [vmem:[#allocation64_spill] sm:$0xff]  ;;  %v20211_v35 = vld [vmem:[#allocation74_spill] sm:$0xff]  ;;  %v5104_v44 = vmax.f32 %v16329_v20, %v16357_v37 }
 0x467   : > { %v5097_v49 = vmax.f32 %v20210_v42, %v20209_v24  ;;  %v20212_v58 = vld [vmem:[#allocation89_spill] sm:$0xff]  ;;  %v20214_v21 = vld [vmem:[#allocation150_spill] sm:$0xff]  ;;  %v20216_v27 = vld [vmem:[#allocation72_spill] sm:$0xff]  ;;  %v5105_v6 = vmax.f32 %v16343_v23, %v5001_v41  ;;  %v5108_v51 = vmax.f32 %v5006_v61, %v5008_v46  ;;  %v5109_v36 = vmax.f32 %v5007_v26, %v5009_v60  ;;  %5403 = vst [vmem:[%s8679_s1 + $0x3c] sm:$0xff] %v6358_v8 }
 0x468   : > { %v5098_v47 = vmax.f32 %v20212_v58, %v20211_v35  ;;  %v20213_v48 = vld [vmem:[#allocation73_spill] sm:$0xff]  ;;  %v20217_v55 = vld [vmem:[#allocation76_spill] sm:$0xff]  ;;  %v20219_v4 = vld [vmem:[#allocation38_spill] sm:$0xff]  ;;  %v5110_v19 = vmax.f32 %v5010_v28, %v5012_v25  ;;  %v5111_v0 = vmax.f32 %v5011_v22, %v5013_v1  ;;  %v5113_v24 = vmax.f32 %v5015_v63, %v5017_v9 }
 0x469   : > { %v5099_v13 = vmax.f32 %v20214_v21, %v20213_v48  ;;  %v20215_v52 = vld [vmem:[#allocation49_spill] sm:$0xff]  ;;  %v20218_v38 = vld [vmem:[#allocation68_spill] sm:$0xff]  ;;  %v5102_v59 = vmax.f32 %v20219_v4, %v16301_v40  ;;  %v5112_v40 = vmax.f32 %v5014_v30, %v5016_v12  ;;  %v6359_v20 = vpack.c.bf16 %v5087_v5, %v5086_v53  ;;  %v4442_v25 = vld [vmem:[%s7078_s28 + $0x800] sm:$0xff] }
 0x46a   : > { %v5100_v18 = vmax.f32 %v20216_v27, %v20215_v52  ;;  %v5101_v31 = vmax.f32 %v20218_v38, %v20217_v55  ;;  %v6360_v37 = vpack.c.bf16 %v5089_v2, %v5088_v50  ;;  %v6361_v23 = vpack.c.bf16 %v5091_v14, %v5090_v16  ;;  %v16459_v1 = vld [vmem:[%s7078_s28 + $0x808] sm:$0xff]  ;;  %v16462_v30 = vld [vmem:[%s7078_s28 + $0x810] sm:$0xff]  ;;  %v4446_v63 = vld [vmem:[%s7078_s28 + $0x820] sm:$0xff] }
 0x46b   : > { %v6362_v41 = vpack.c.bf16 %v5093_v32, %v5092_v3  ;;  %v6363_v54 = vpack.c.bf16 %v5095_v34, %v5094_v45  ;;  %v6364_v56 = vpack.c.bf16 %v5097_v49, %v5096_v33  ;;  %v6365_v15 = vpack.c.bf16 %v5099_v13, %v5098_v47  ;;  %5404 = vst [vmem:[%s8679_s1 + $0x60] sm:$0xff] %v6359_v20  ;;  %v16470_v12 = vld [vmem:[%s7078_s28 + $0x818] sm:$0xff]  ;;  %v4447_v9 = vld [vmem:[%s7078_s28 + $0x828] sm:$0xff]  ;;  %v16474_v29 = vld [vmem:[%s7078_s28 + $0x830] sm:$0xff] }
 0x46c   : > { %v6366_v43 = vpack.c.bf16 %v5101_v31, %v5100_v18  ;;  %v6367_v61 = vpack.c.bf16 %v5103_v57, %v5102_v59  ;;  %v6368_v26 = vpack.c.bf16 %v5105_v6, %v5104_v44  ;;  %5405 = vst [vmem:[%s8679_s1 + $0x84] sm:$0xff] %v6360_v37  ;;  %v6369_v46 = vpack.c.bf16 %v5107_v62, %v5106_v39  ;;  %v16477_v10 = vld [vmem:[%s7078_s28 + $0x838] sm:$0xff]  ;;  %v16480_v7 = vld [vmem:[%s7078_s28 + $0x840] sm:$0xff]  ;;  %v16483_v11 = vld [vmem:[%s7078_s28 + $0x848] sm:$0xff] }
 0x46d   : > { %v6370_v60 = vpack.c.bf16 %v5109_v36, %v5108_v51  ;;  %v6371_v28 = vpack.c.bf16 %v5111_v0, %v5110_v19  ;;  %v6372_v22 = vpack.c.bf16 %v5113_v24, %v5112_v40  ;;  %5406 = vst [vmem:[%s8679_s1 + $0xa8] sm:$0xff] %v6361_v23  ;;  %5407 = vst [vmem:[%s8679_s1 + $0xcc] sm:$0xff] %v6362_v41  ;;  %v16486_v53 = vld [vmem:[%s7078_s28 + $0x850] sm:$0xff]  ;;  %v16489_v5 = vld [vmem:[%s7078_s28 + $0x858] sm:$0xff] }
 0x46e   : > { %5408 = vst [vmem:[%s8679_s1 + $0xf0] sm:$0xff] %v6363_v54  ;;  %5409 = vst [vmem:[%s8679_s1 + $0x114] sm:$0xff] %v6364_v56  ;;  %v16492_v50 = vld [vmem:[%s7078_s28 + $0x860] sm:$0xff]  ;;  %v16495_v2 = vld [vmem:[%s7078_s28 + $0x868] sm:$0xff] }
 0x46f   : > { %5410 = vst [vmem:[%s8679_s1 + $0x138] sm:$0xff] %v6365_v15  ;;  %5411 = vst [vmem:[%s8679_s1 + $0x15c] sm:$0xff] %v6366_v43  ;;  %v4506_v16 = vld [vmem:[%s7078_s28 + $0xa00] sm:$0xff]  ;;  %v4507_v14 = vld [vmem:[%s7078_s28 + $0xa08] sm:$0xff] }
 0x470   : > { %5412 = vst [vmem:[%s8679_s1 + $0x180] sm:$0xff] %v6367_v61  ;;  %5413 = vst [vmem:[%s8679_s1 + $0x1a4] sm:$0xff] %v6368_v26  ;;  %v16500_v3 = vld [vmem:[%s7078_s28 + $0x870] sm:$0xff]  ;;  %v16503_v32 = vld [vmem:[%s7078_s28 + $0x878] sm:$0xff]  ;;  %v4826_v49 = vmax.f32 %v4442_v25, %v4506_v16  ;;  %v4827_v35 = vmax.f32 %v16459_v1, %v4507_v14 }
 0x471   : > { %5414 = vst [vmem:[%s8679_s1 + $0x1c8] sm:$0xff] %v6369_v46  ;;  %5415 = vst [vmem:[%s8679_s1 + $0x1ec] sm:$0xff] %v6370_v60  ;;  %v16506_v45 = vld [vmem:[%s7078_s28 + $0x880] sm:$0xff]  ;;  %v4508_v34 = vld [vmem:[%s7078_s28 + $0xa10] sm:$0xff] }
 0x472   : > { %5416 = vst [vmem:[%s8679_s1 + $0x210] sm:$0xff] %v6371_v28  ;;  %5417 = vst [vmem:[%s8679_s1 + $0x234] sm:$0xff] %v6372_v22  ;;  %v4509_v33 = vld [vmem:[%s7078_s28 + $0xa18] sm:$0xff]  ;;  %v4510_v42 = vld [vmem:[%s7078_s28 + $0xa20] sm:$0xff]  ;;  %v4828_v27 = vmax.f32 %v16462_v30, %v4508_v34 }
 0x473   : > { %v16513_v58 = vld [vmem:[%s7078_s28 + $0x888] sm:$0xff]  ;;  %v16516_v47 = vld [vmem:[%s7078_s28 + $0x890] sm:$0xff]  ;;  %v16519_v48 = vld [vmem:[%s7078_s28 + $0x898] sm:$0xff]  ;;  %v4830_v18 = vmax.f32 %v4446_v63, %v4510_v42  ;;  %v4829_v44 = vmax.f32 %v16470_v12, %v4509_v33 }
 0x474   : > { %v4511_v21 = vld [vmem:[%s7078_s28 + $0xa28] sm:$0xff]  ;;  %v4512_v13 = vld [vmem:[%s7078_s28 + $0xa30] sm:$0xff]  ;;  %v4513_v52 = vld [vmem:[%s7078_s28 + $0xa38] sm:$0xff] }
 0x475   : > { %v16526_v55 = vld [vmem:[%s7078_s28 + $0x8a0] sm:$0xff]  ;;  %v16529_v38 = vld [vmem:[%s7078_s28 + $0x8a8] sm:$0xff]  ;;  %v16532_v31 = vld [vmem:[%s7078_s28 + $0x8b0] sm:$0xff]  ;;  %v4831_v6 = vmax.f32 %v4447_v9, %v4511_v21  ;;  %v4832_v39 = vmax.f32 %v16474_v29, %v4512_v13  ;;  %v4833_v62 = vmax.f32 %v16477_v10, %v4513_v52  ;;  %v16563_v37 = vmax.f32 %v4826_v49, %v4830_v18 }
 0x476   : > { %v4514_v4 = vld [vmem:[%s7078_s28 + $0xa40] sm:$0xff]  ;;  %v16536_v59 = vld [vmem:[%s7078_s28 + $0xa48] sm:$0xff]  ;;  %v16539_v57 = vld [vmem:[%s7078_s28 + $0xa50] sm:$0xff] }
 0x477   : > { %v16545_v51 = vld [vmem:[%s7078_s28 + $0x8b8] sm:$0xff]  ;;  %v16548_v36 = vld [vmem:[%s7078_s28 + $0x8c0] sm:$0xff]  ;;  %v16551_v19 = vld [vmem:[%s7078_s28 + $0x8c8] sm:$0xff]  ;;  %v4834_v17 = vmax.f32 %v16480_v7, %v4514_v4  ;;  %v4835_v8 = vmax.f32 %v16483_v11, %v16536_v59  ;;  %v4836_v20 = vmax.f32 %v16486_v53, %v16539_v57  ;;  %20220 = vst [vmem:[#allocation77_spill] sm:$0xff] %v16563_v37  ;;  %v16585_v60 = vmax.f32 %v4827_v35, %v4831_v6 }
 0x478   : > { %v16554_v0 = vld [vmem:[%s7078_s28 + $0xa58] sm:$0xff]  ;;  %v4518_v40 = vld [vmem:[%s7078_s28 + $0xa60] sm:$0xff]  ;;  %v4519_v24 = vld [vmem:[%s7078_s28 + $0xa68] sm:$0xff]  ;;  %v16610_v10 = vmax.f32 %v4828_v27, %v4832_v39 }
 0x479   : > { %v16566_v23 = vld [vmem:[%s7078_s28 + $0x8d0] sm:$0xff]  ;;  %v16569_v41 = vld [vmem:[%s7078_s28 + $0x8d8] sm:$0xff]  ;;  %v16572_v54 = vld [vmem:[%s7078_s28 + $0x8e0] sm:$0xff]  ;;  %v4837_v61 = vmax.f32 %v16489_v5, %v16554_v0  ;;  %v4838_v26 = vmax.f32 %v16492_v50, %v4518_v40  ;;  %v4839_v46 = vmax.f32 %v16495_v2, %v4519_v24  ;;  %20221 = vst [vmem:[#allocation54_spill] sm:$0xff] %v16585_v60 }
 0x47a   : > { %v4520_v56 = vld [vmem:[%s7078_s28 + $0xa70] sm:$0xff]  ;;  %v16576_v15 = vld [vmem:[%s7078_s28 + $0xa78] sm:$0xff]  ;;  %v16579_v43 = vld [vmem:[%s7078_s28 + $0xa80] sm:$0xff]  ;;  %20222 = vst [vmem:[#allocation69_spill] sm:$0xff] %v16610_v10 }
 0x47b   : > { %v16588_v28 = vld [vmem:[%s7078_s28 + $0x8e8] sm:$0xff]  ;;  %v16591_v22 = vld [vmem:[%s7078_s28 + $0x8f0] sm:$0xff]  ;;  %v16594_v25 = vld [vmem:[%s7078_s28 + $0x8f8] sm:$0xff]  ;;  %v4840_v12 = vmax.f32 %v16500_v3, %v4520_v56  ;;  %v4841_v9 = vmax.f32 %v16503_v32, %v16576_v15  ;;  %v4842_v29 = vmax.f32 %v16506_v45, %v16579_v43  ;;  %v16634_v45 = vmax.f32 %v4829_v44, %v4833_v62 }
 0x47c   : > { %v16597_v1 = vld [vmem:[%s7078_s28 + $0xa88] sm:$0xff]  ;;  %v16600_v30 = vld [vmem:[%s7078_s28 + $0xa90] sm:$0xff]  ;;  %v16603_v63 = vld [vmem:[%s7078_s28 + $0xa98] sm:$0xff]  ;;  %v16659_v18 = vmax.f32 %v4834_v17, %v4838_v26  ;;  %v16685_v62 = vmax.f32 %v4835_v8, %v4839_v46 }
 0x47d   : > { %v16613_v7 = vld [vmem:[%s7078_s28 + $0x900] sm:$0xff]  ;;  %v16616_v11 = vld [vmem:[%s7078_s28 + $0x908] sm:$0xff]  ;;  %v16619_v53 = vld [vmem:[%s7078_s28 + $0x910] sm:$0xff]  ;;  %20223 = vst [vmem:[#allocation137_spill] sm:$0xff] %v16634_v45 }
 0x47e   : > { %v4526_v50 = vld [vmem:[%s7078_s28 + $0xaa0] sm:$0xff]  ;;  %v16623_v2 = vld [vmem:[%s7078_s28 + $0xaa8] sm:$0xff]  ;;  %v16626_v16 = vld [vmem:[%s7078_s28 + $0xab0] sm:$0xff]  ;;  %20225 = vst [vmem:[#allocation46_spill] sm:$0xff] %v16659_v18 }
 0x47f   : > { %v16637_v34 = vld [vmem:[%s7078_s28 + $0x918] sm:$0xff]  ;;  %v16640_v33 = vld [vmem:[%s7078_s28 + $0x920] sm:$0xff]  ;;  %v16643_v42 = vld [vmem:[%s7078_s28 + $0x928] sm:$0xff]  ;;  %v4846_v13 = vmax.f32 %v16526_v55, %v4526_v50  ;;  %v4847_v52 = vmax.f32 %v16529_v38, %v16623_v2  ;;  %v4848_v27 = vmax.f32 %v16532_v31, %v16626_v16  ;;  %20226 = vst [vmem:[#allocation138_spill] sm:$0xff] %v16685_v62  ;;  %v16711_v50 = vmax.f32 %v4836_v20, %v4840_v12 }
 0x480   : > { %20224 = vst [vmem:[#allocation29_spill] sm:$0xff] %v16637_v34  ;;  %v16646_v49 = vld [vmem:[%s7078_s28 + $0xab8] sm:$0xff]  ;;  %v16649_v35 = vld [vmem:[%s7078_s28 + $0xac0] sm:$0xff]  ;;  %v16652_v21 = vld [vmem:[%s7078_s28 + $0xac8] sm:$0xff] }
 0x481   : > { %v16662_v4 = vld [vmem:[%s7078_s28 + $0x930] sm:$0xff]  ;;  %v16665_v59 = vld [vmem:[%s7078_s28 + $0x938] sm:$0xff]  ;;  %v16668_v57 = vld [vmem:[%s7078_s28 + $0x940] sm:$0xff]  ;;  %20227 = vst [vmem:[#allocation47_spill] sm:$0xff] %v16711_v50 }
 0x482   : > { %v16671_v44 = vld [vmem:[%s7078_s28 + $0xad0] sm:$0xff]  ;;  %v16674_v55 = vld [vmem:[%s7078_s28 + $0xad8] sm:$0xff]  ;;  %v16677_v38 = vld [vmem:[%s7078_s28 + $0xae0] sm:$0xff] }
 0x483   : > { %v16688_v40 = vld [vmem:[%s7078_s28 + $0x948] sm:$0xff]  ;;  %v16691_v24 = vld [vmem:[%s7078_s28 + $0x950] sm:$0xff]  ;;  %v16694_v17 = vld [vmem:[%s7078_s28 + $0x958] sm:$0xff]  ;;  %v4854_v46 = vmax.f32 %v16572_v54, %v16677_v38  ;;  %v16740_v38 = vmax.f32 %v4837_v61, %v4841_v9  ;;  %v16766_v9 = vmax.f32 %v4842_v29, %v4846_v13 }
 0x484   : > { %v16697_v56 = vld [vmem:[%s7078_s28 + $0xae8] sm:$0xff]  ;;  %v16700_v15 = vld [vmem:[%s7078_s28 + $0xaf0] sm:$0xff]  ;;  %v16703_v43 = vld [vmem:[%s7078_s28 + $0xaf8] sm:$0xff] }
 0x485   : > { %v16714_v2 = vld [vmem:[%s7078_s28 + $0x960] sm:$0xff]  ;;  %v16717_v16 = vld [vmem:[%s7078_s28 + $0x968] sm:$0xff]  ;;  %v16720_v39 = vld [vmem:[%s7078_s28 + $0x970] sm:$0xff]  ;;  %v4855_v54 = vmax.f32 %v16588_v28, %v16697_v56  ;;  %20228 = vst [vmem:[#allocation71_spill] sm:$0xff] %v16740_v38 }
 0x486   : > { %v16723_v6 = vld [vmem:[%s7078_s28 + $0xb00] sm:$0xff]  ;;  %v16726_v26 = vld [vmem:[%s7078_s28 + $0xb08] sm:$0xff]  ;;  %v16729_v8 = vld [vmem:[%s7078_s28 + $0xb10] sm:$0xff]  ;;  %20230 = vst [vmem:[#allocation41_spill] sm:$0xff] %v16766_v9  ;;  %v20231_v9 = vmax.f32 %v16513_v58, %v16597_v1 }
 0x487   : > { %v16743_v32 = vld [vmem:[%s7078_s28 + $0x978] sm:$0xff]  ;;  %v16746_v31 = vld [vmem:[%s7078_s28 + $0x980] sm:$0xff]  ;;  %v16749_v28 = vld [vmem:[%s7078_s28 + $0x988] sm:$0xff] }
 0x488   : > { %v16752_v56 = vld [vmem:[%s7078_s28 + $0xb18] sm:$0xff]  ;;  %v16755_v20 = vld [vmem:[%s7078_s28 + $0xb20] sm:$0xff]  ;;  %v16758_v3 = vld [vmem:[%s7078_s28 + $0xb28] sm:$0xff]  ;;  %v16795_v18 = vmax.f32 %v20231_v9, %v4847_v52  ;;  %v20233_v9 = vmax.f32 %v16516_v47, %v16600_v30 }
 0x489   : > { %20229 = vst [vmem:[#allocation52_spill] sm:$0xff] %v16752_v56  ;;  %v16769_v12 = vld [vmem:[%s7078_s28 + $0x990] sm:$0xff]  ;;  %v16772_v14 = vld [vmem:[%s7078_s28 + $0x998] sm:$0xff]  ;;  %v16775_v62 = vld [vmem:[%s7078_s28 + $0x9a0] sm:$0xff]  ;;  %v4862_v29 = vmax.f32 %v16640_v33, %v16755_v20 }
 0x48a   : > { %v16778_v38 = vld [vmem:[%s7078_s28 + $0xb30] sm:$0xff]  ;;  %v16781_v5 = vld [vmem:[%s7078_s28 + $0xb38] sm:$0xff]  ;;  %v16784_v0 = vld [vmem:[%s7078_s28 + $0xb40] sm:$0xff]  ;;  %20232 = vst [vmem:[#allocation93_spill] sm:$0xff] %v16795_v18  ;;  %v16824_v13 = vmax.f32 %v20233_v9, %v4848_v27  ;;  %v20235_v27 = vmax.f32 %v16545_v51, %v16646_v49 }
 0x48b   : > { %v16798_v50 = vld [vmem:[%s7078_s28 + $0x9a8] sm:$0xff]  ;;  %v16801_v60 = vld [vmem:[%s7078_s28 + $0x9b0] sm:$0xff]  ;;  %v16804_v61 = vld [vmem:[%s7078_s28 + $0x9b8] sm:$0xff]  ;;  %v4864_v58 = vmax.f32 %v16662_v4, %v16778_v38  ;;  %v4865_v1 = vmax.f32 %v16665_v59, %v16781_v5  ;;  %v4866_v52 = vmax.f32 %v16668_v57, %v16784_v0  ;;  %v20236_v5 = vmax.f32 %v16519_v48, %v16603_v63 }
 0x48c   : > { %v16807_v45 = vld [vmem:[%s7078_s28 + $0xb48] sm:$0xff]  ;;  %v16810_v33 = vld [vmem:[%s7078_s28 + $0xb50] sm:$0xff]  ;;  %v16813_v20 = vld [vmem:[%s7078_s28 + $0xb58] sm:$0xff]  ;;  %20234 = vst [vmem:[#allocation82_spill] sm:$0xff] %v16824_v13  ;;  %v20238_v48 = vmax.f32 %v16548_v36, %v16649_v35 }
 0x48d   : > { %v16827_v18 = vld [vmem:[%s7078_s28 + $0x9c0] sm:$0xff]  ;;  %v16830_v37 = vld [vmem:[%s7078_s28 + $0x9c8] sm:$0xff]  ;;  %v16833_v4 = vld [vmem:[%s7078_s28 + $0x9d0] sm:$0xff]  ;;  %v4867_v57 = vmax.f32 %v16688_v40, %v16807_v45  ;;  %v4868_v47 = vmax.f32 %v16691_v24, %v16810_v33  ;;  %v4869_v30 = vmax.f32 %v16694_v17, %v16813_v20  ;;  %v16850_v0 = vmax.f32 %v20236_v5, %v20235_v27 }
 0x48e   : > { %v4550_v38 = vld [vmem:[%s7078_s28 + $0xb60] sm:$0xff]  ;;  %v4551_v10 = vld [vmem:[%s7078_s28 + $0xb68] sm:$0xff]  ;;  %v4552_v59 = vld [vmem:[%s7078_s28 + $0xb70] sm:$0xff]  ;;  %v16864_v63 = vmax.f32 %v20238_v48, %v4854_v46 }
 0x48f   : > { %20237 = vst [vmem:[#allocation45_spill] sm:$0xff] %v16850_v0  ;;  %v4501_v9 = vld [vmem:[%s7078_s28 + $0x9d8] sm:$0xff]  ;;  %v4502_v13 = vld [vmem:[%s7078_s28 + $0x9e0] sm:$0xff]  ;;  %v4503_v45 = vld [vmem:[%s7078_s28 + $0x9e8] sm:$0xff]  ;;  %v4870_v17 = vmax.f32 %v16714_v2, %v4550_v38  ;;  %v4871_v33 = vmax.f32 %v16717_v16, %v4551_v10  ;;  %v4872_v51 = vmax.f32 %v16720_v39, %v4552_v59  ;;  %v20239_v39 = vmax.f32 %v16551_v19, %v16652_v21 }
 0x490   : > { %v4553_v40 = vld [vmem:[%s7078_s28 + $0xb78] sm:$0xff]  ;;  %v4554_v56 = vld [vmem:[%s7078_s28 + $0xb80] sm:$0xff]  ;;  %v4555_v24 = vld [vmem:[%s7078_s28 + $0xb88] sm:$0xff]  ;;  %v20241_v19 = vmax.f32 %v16566_v23, %v16671_v44 }
 0x491   : > { %v4504_v49 = vld [vmem:[%s7078_s28 + $0x9f0] sm:$0xff]  ;;  %v4505_v20 = vld [vmem:[%s7078_s28 + $0x9f8] sm:$0xff]  ;;  %v4558_v0 = vld [vmem:[%s7078_s28 + $0xba0] sm:$0xff]  ;;  %v4873_v34 = vmax.f32 %v16743_v32, %v4553_v40  ;;  %v4874_v2 = vmax.f32 %v16746_v31, %v4554_v56  ;;  %v4875_v10 = vmax.f32 %v16749_v28, %v4555_v24  ;;  %v16877_v36 = vmax.f32 %v20239_v39, %v4855_v54 }
 0x492   : > { %v4556_v27 = vld [vmem:[%s7078_s28 + $0xb90] sm:$0xff]  ;;  %v4557_v5 = vld [vmem:[%s7078_s28 + $0xb98] sm:$0xff]  ;;  %v4559_v35 = vld [vmem:[%s7078_s28 + $0xba8] sm:$0xff]  ;;  %v4878_v32 = vmax.f32 %v16775_v62, %v4558_v0  ;;  %v20240_v31 = vmax.f32 %v16591_v22, %v16700_v15  ;;  %v20242_v62 = vmax.f32 %v16594_v25, %v16703_v43  ;;  %v20243_v22 = vmax.f32 %v16569_v41, %v16674_v55 }
 0x493   : > { %v4560_v46 = vld [vmem:[%s7078_s28 + $0xbb0] sm:$0xff]  ;;  %v4561_v16 = vld [vmem:[%s7078_s28 + $0xbb8] sm:$0xff]  ;;  %v4876_v38 = vmax.f32 %v16769_v12, %v4556_v27  ;;  %v4877_v59 = vmax.f32 %v16772_v14, %v4557_v5  ;;  %v4562_v54 = vld [vmem:[%s7078_s28 + $0xbc0] sm:$0xff]  ;;  %v4879_v40 = vmax.f32 %v16798_v50, %v4559_v35  ;;  %v20245_v41 = vmax.f32 %v16643_v42, %v16758_v3 }
 0x494   : > { %v5032_v21 = vmax.f32 %v20241_v19, %v20240_v31  ;;  %v4563_v28 = vld [vmem:[%s7078_s28 + $0xbc8] sm:$0xff]  ;;  %v4564_v56 = vld [vmem:[%s7078_s28 + $0xbd0] sm:$0xff]  ;;  %v4880_v12 = vmax.f32 %v16801_v60, %v4560_v46  ;;  %v4881_v14 = vmax.f32 %v16804_v61, %v4561_v16  ;;  %v5033_v15 = vmax.f32 %v20243_v22, %v20242_v62  ;;  %v4565_v23 = vld [vmem:[%s7078_s28 + $0xbd8] sm:$0xff] }
 0x495   : > { %v4566_v44 = vld [vmem:[%s7078_s28 + $0xbe0] sm:$0xff]  ;;  %v4567_v0 = vld [vmem:[%s7078_s28 + $0xbe8] sm:$0xff]  ;;  %v4882_v24 = vmax.f32 %v16827_v18, %v4562_v54  ;;  %v4883_v48 = vmax.f32 %v16830_v37, %v4563_v28  ;;  %v4884_v50 = vmax.f32 %v16833_v4, %v4564_v56  ;;  %v20244_v60 = vmax.f32 %v16613_v7, %v16723_v6  ;;  %v4568_v27 = vld [vmem:[%s7078_s28 + $0xbf0] sm:$0xff] }
 0x496   : > { %v4569_v5 = vld [vmem:[%s7078_s28 + $0xbf8] sm:$0xff]  ;;  %v4885_v25 = vmax.f32 %v4501_v9, %v4565_v23  ;;  %v4886_v43 = vmax.f32 %v4502_v13, %v4566_v44  ;;  %v4887_v39 = vmax.f32 %v4503_v45, %v4567_v0  ;;  %v20246_v55 = vmax.f32 %v16616_v11, %v16726_v26  ;;  %v20248_v7 = vld [vmem:[#allocation29_spill] sm:$0xff]  ;;  %v20249_v6 = vld [vmem:[#allocation52_spill] sm:$0xff] }
 0x497   : > { %v5034_v61 = vmax.f32 %v20244_v60, %v4862_v29  ;;  %v4888_v35 = vmax.f32 %v4504_v49, %v4568_v27  ;;  %v4889_v37 = vmax.f32 %v4505_v20, %v4569_v5  ;;  %v20247_v4 = vmax.f32 %v16619_v53, %v16729_v8  ;;  %v20251_v28 = vld [vmem:[#allocation69_spill] sm:$0xff]  ;;  %v20255_v22 = vld [vmem:[#allocation47_spill] sm:$0xff]  ;;  %v16950_v5 = vld [vmem:[%s7078_s28 + $0xc08] sm:$0xff] }
 0x498   : > { %v5035_v18 = vmax.f32 %v20246_v55, %v20245_v41  ;;  %v20250_v29 = vmax.f32 %v20248_v7, %v20249_v6  ;;  %v5038_v9 = vmax.f32 %v4866_v52, %v4870_v17  ;;  %v5039_v13 = vmax.f32 %v4867_v57, %v4871_v33  ;;  %v20252_v56 = vld [vmem:[#allocation77_spill] sm:$0xff]  ;;  %v20257_v57 = vld [vmem:[#allocation71_spill] sm:$0xff]  ;;  %v16958_v41 = vld [vmem:[%s7078_s28 + $0xc18] sm:$0xff] }
 0x499   : > { %v5036_v46 = vmax.f32 %v20247_v4, %v4864_v58  ;;  %v5040_v45 = vmax.f32 %v4868_v47, %v4872_v51  ;;  %v5041_v31 = vmax.f32 %v4869_v30, %v4873_v34  ;;  %v5042_v19 = vmax.f32 %v4874_v2, %v4878_v32  ;;  %v20253_v8 = vld [vmem:[#allocation137_spill] sm:$0xff]  ;;  %v20254_v58 = vld [vmem:[#allocation54_spill] sm:$0xff]  ;;  %v4570_v27 = vld [vmem:[%s7078_s28 + $0xc00] sm:$0xff] }
 0x49a   : > { %v5037_v16 = vmax.f32 %v20250_v29, %v4865_v1  ;;  %v5043_v3 = vmax.f32 %v4875_v10, %v4879_v40  ;;  %v5044_v42 = vmax.f32 %v4876_v38, %v4880_v12  ;;  %v5045_v54 = vmax.f32 %v4877_v59, %v4881_v14  ;;  %v20256_v1 = vld [vmem:[#allocation46_spill] sm:$0xff]  ;;  %v20260_v17 = vld [vmem:[#allocation41_spill] sm:$0xff]  ;;  %v16979_v7 = vld [vmem:[%s7078_s28 + $0xc60] sm:$0xff] }
 0x49b   : > { %v5046_v11 = vmax.f32 %v4882_v24, %v4886_v43  ;;  %v5047_v26 = vmax.f32 %v4883_v48, %v4887_v39  ;;  %v5048_v49 = vmax.f32 %v4884_v50, %v4888_v35  ;;  %v5049_v20 = vmax.f32 %v4885_v25, %v4889_v37  ;;  %v20258_v47 = vld [vmem:[#allocation138_spill] sm:$0xff]  ;;  %v20261_v51 = vld [vmem:[#allocation45_spill] sm:$0xff]  ;;  %v4574_v43 = vld [vmem:[%s7078_s28 + $0xc20] sm:$0xff] }
 0x49c   : > { %v5114_v53 = vmax.f32 %v20252_v56, %v20251_v28  ;;  %v5115_v62 = vmax.f32 %v20254_v58, %v20253_v8  ;;  %v5116_v52 = vmax.f32 %v20256_v1, %v20255_v22  ;;  %v5117_v34 = vmax.f32 %v20258_v47, %v20257_v57  ;;  %v20259_v30 = vld [vmem:[#allocation82_spill] sm:$0xff]  ;;  %v20262_v2 = vld [vmem:[#allocation93_spill] sm:$0xff]  ;;  %v4575_v39 = vld [vmem:[%s7078_s28 + $0xc28] sm:$0xff] }
 0x49d   : > { %v5118_v33 = vmax.f32 %v20260_v17, %v20259_v30  ;;  %v5119_v10 = vmax.f32 %v20262_v2, %v20261_v51  ;;  %v5120_v38 = vmax.f32 %v16864_v63, %v5032_v21  ;;  %v5121_v59 = vmax.f32 %v16877_v36, %v5033_v15  ;;  %v16953_v25 = vld [vmem:[%s7078_s28 + $0xc10] sm:$0xff]  ;;  %v16967_v35 = vld [vmem:[%s7078_s28 + $0xc40] sm:$0xff]  ;;  %v16970_v37 = vld [vmem:[%s7078_s28 + $0xc48] sm:$0xff] }
 0x49e   : > { %v5122_v32 = vmax.f32 %v5034_v61, %v5036_v46  ;;  %v5123_v40 = vmax.f32 %v5035_v18, %v5037_v16  ;;  %v5124_v12 = vmax.f32 %v5038_v9, %v5040_v45  ;;  %v5125_v14 = vmax.f32 %v5039_v13, %v5041_v31  ;;  %v16961_v55 = vld [vmem:[%s7078_s28 + $0xc30] sm:$0xff]  ;;  %v16964_v18 = vld [vmem:[%s7078_s28 + $0xc38] sm:$0xff]  ;;  %v16982_v6 = vld [vmem:[%s7078_s28 + $0xc68] sm:$0xff] }
 0x49f   : > { %v5126_v23 = vmax.f32 %v5042_v19, %v5044_v42  ;;  %v5127_v44 = vmax.f32 %v5043_v3, %v5045_v54  ;;  %v5128_v0 = vmax.f32 %v5046_v11, %v5048_v49  ;;  %v5129_v24 = vmax.f32 %v5047_v26, %v5049_v20  ;;  %v16973_v4 = vld [vmem:[%s7078_s28 + $0xc50] sm:$0xff]  ;;  %v16976_v46 = vld [vmem:[%s7078_s28 + $0xc58] sm:$0xff]  ;;  %v4634_v16 = vld [vmem:[%s7078_s28 + $0xe00] sm:$0xff] }
 0x4a0   : > { %v6373_v48 = vpack.c.bf16 %v5115_v62, %v5114_v53  ;;  %v6374_v63 = vpack.c.bf16 %v5117_v34, %v5116_v52  ;;  %v6375_v36 = vpack.c.bf16 %v5119_v10, %v5118_v33  ;;  %v6376_v21 = vpack.c.bf16 %v5121_v59, %v5120_v38  ;;  %v16985_v29 = vld [vmem:[%s7078_s28 + $0xc70] sm:$0xff]  ;;  %v4635_v9 = vld [vmem:[%s7078_s28 + $0xe08] sm:$0xff]  ;;  %v16991_v45 = vld [vmem:[%s7078_s28 + $0xc78] sm:$0xff] }
 0x4a1   : > { %v6377_v15 = vpack.c.bf16 %v5123_v40, %v5122_v32  ;;  %v6378_v50 = vpack.c.bf16 %v5125_v14, %v5124_v12  ;;  %v6379_v60 = vpack.c.bf16 %v5127_v44, %v5126_v23  ;;  %v6380_v61 = vpack.c.bf16 %v5129_v24, %v5128_v0  ;;  %v4636_v13 = vld [vmem:[%s7078_s28 + $0xe10] sm:$0xff]  ;;  %v16994_v31 = vld [vmem:[%s7078_s28 + $0xc80] sm:$0xff]  ;;  %v16997_v19 = vld [vmem:[%s7078_s28 + $0xc88] sm:$0xff] }
 0x4a2   : > { %5418 = vst [vmem:[%s8679_s1 + $0x258] sm:$0xff] %v6373_v48  ;;  %5419 = vst [vmem:[%s8679_s1 + $0x27c] sm:$0xff] %v6374_v63  ;;  %v17000_v3 = vld [vmem:[%s7078_s28 + $0xe18] sm:$0xff]  ;;  %v4638_v42 = vld [vmem:[%s7078_s28 + $0xe20] sm:$0xff]  ;;  %v4890_v11 = vmax.f32 %v4570_v27, %v4634_v16  ;;  %v4891_v26 = vmax.f32 %v16950_v5, %v4635_v9  ;;  %v4892_v58 = vmax.f32 %v16953_v25, %v4636_v13 }
 0x4a3   : > { %5420 = vst [vmem:[%s8679_s1 + $0x2a0] sm:$0xff] %v6375_v36  ;;  %5421 = vst [vmem:[%s8679_s1 + $0x2c4] sm:$0xff] %v6376_v21  ;;  %v4639_v54 = vld [vmem:[%s7078_s28 + $0xe28] sm:$0xff]  ;;  %v17006_v49 = vld [vmem:[%s7078_s28 + $0xc90] sm:$0xff]  ;;  %v4894_v62 = vmax.f32 %v4574_v43, %v4638_v42  ;;  %v4893_v17 = vmax.f32 %v16958_v41, %v17000_v3 }
 0x4a4   : > { %5422 = vst [vmem:[%s8679_s1 + $0x2e8] sm:$0xff] %v6377_v15  ;;  %5423 = vst [vmem:[%s8679_s1 + $0x30c] sm:$0xff] %v6378_v50  ;;  %v17009_v20 = vld [vmem:[%s7078_s28 + $0xc98] sm:$0xff]  ;;  %v17012_v28 = vld [vmem:[%s7078_s28 + $0xca0] sm:$0xff]  ;;  %v4895_v22 = vmax.f32 %v4575_v39, %v4639_v54 }
 0x4a5   : > { %5424 = vst [vmem:[%s8679_s1 + $0x330] sm:$0xff] %v6379_v60  ;;  %5425 = vst [vmem:[%s8679_s1 + $0x354] sm:$0xff] %v6380_v61  ;;  %v4640_v56 = vld [vmem:[%s7078_s28 + $0xe30] sm:$0xff]  ;;  %v4641_v53 = vld [vmem:[%s7078_s28 + $0xe38] sm:$0xff]  ;;  %v17064_v0 = vmax.f32 %v4890_v11, %v4894_v62 }
 0x4a6   : > { %v17017_v8 = vld [vmem:[%s7078_s28 + $0xe40] sm:$0xff]  ;;  %v17021_v1 = vld [vmem:[%s7078_s28 + $0xca8] sm:$0xff]  ;;  %v17024_v52 = vld [vmem:[%s7078_s28 + $0xcb0] sm:$0xff]  ;;  %v4896_v33 = vmax.f32 %v16961_v55, %v4640_v56  ;;  %v4897_v51 = vmax.f32 %v16964_v18, %v4641_v53  ;;  %v17088_v27 = vmax.f32 %v4891_v26, %v4895_v22 }
 0x4a7   : > { %v17027_v57 = vld [vmem:[%s7078_s28 + $0xcb8] sm:$0xff]  ;;  %v17030_v47 = vld [vmem:[%s7078_s28 + $0xe48] sm:$0xff]  ;;  %v17033_v34 = vld [vmem:[%s7078_s28 + $0xe50] sm:$0xff]  ;;  %v4898_v2 = vmax.f32 %v16967_v35, %v17017_v8  ;;  %20263 = vst [vmem:[#allocation147_spill] sm:$0xff] %v17064_v0 }
 0x4a8   : > { %v17036_v30 = vld [vmem:[%s7078_s28 + $0xe58] sm:$0xff]  ;;  %v17045_v10 = vld [vmem:[%s7078_s28 + $0xcc0] sm:$0xff]  ;;  %v17048_v38 = vld [vmem:[%s7078_s28 + $0xcc8] sm:$0xff]  ;;  %v4899_v14 = vmax.f32 %v16970_v37, %v17030_v47  ;;  %v4900_v23 = vmax.f32 %v16973_v4, %v17033_v34  ;;  %20264 = vst [vmem:[#allocation98_spill] sm:$0xff] %v17088_v27  ;;  %v17114_v4 = vmax.f32 %v4892_v58, %v4896_v33  ;;  %v17140_v42 = vmax.f32 %v4893_v17, %v4897_v51 }
 0x4a9   : > { %v17051_v59 = vld [vmem:[%s7078_s28 + $0xcd0] sm:$0xff]  ;;  %v4646_v32 = vld [vmem:[%s7078_s28 + $0xe60] sm:$0xff]  ;;  %v4647_v40 = vld [vmem:[%s7078_s28 + $0xe68] sm:$0xff]  ;;  %v4901_v44 = vmax.f32 %v16976_v46, %v17036_v30 }
 0x4aa   : > { %v17056_v12 = vld [vmem:[%s7078_s28 + $0xe70] sm:$0xff]  ;;  %v17067_v24 = vld [vmem:[%s7078_s28 + $0xcd8] sm:$0xff]  ;;  %v17070_v48 = vld [vmem:[%s7078_s28 + $0xce0] sm:$0xff]  ;;  %v4902_v50 = vmax.f32 %v16979_v7, %v4646_v32  ;;  %v4903_v60 = vmax.f32 %v16982_v6, %v4647_v40  ;;  %20265 = vst [vmem:[#allocation75_spill] sm:$0xff] %v17114_v4 }
 0x4ab   : > { %v17073_v63 = vld [vmem:[%s7078_s28 + $0xce8] sm:$0xff]  ;;  %v17076_v36 = vld [vmem:[%s7078_s28 + $0xe78] sm:$0xff]  ;;  %v17079_v21 = vld [vmem:[%s7078_s28 + $0xe80] sm:$0xff]  ;;  %v4904_v61 = vmax.f32 %v16985_v29, %v17056_v12  ;;  %20268 = vst [vmem:[#allocation120_spill] sm:$0xff] %v17140_v42 }
 0x4ac   : > { %v17082_v15 = vld [vmem:[%s7078_s28 + $0xe88] sm:$0xff]  ;;  %v17091_v5 = vld [vmem:[%s7078_s28 + $0xcf0] sm:$0xff]  ;;  %v17094_v25 = vld [vmem:[%s7078_s28 + $0xcf8] sm:$0xff]  ;;  %v4905_v18 = vmax.f32 %v16991_v45, %v17076_v36  ;;  %v4906_v35 = vmax.f32 %v16994_v31, %v17079_v21  ;;  %v17166_v22 = vmax.f32 %v4898_v2, %v4902_v50  ;;  %v17192_v40 = vmax.f32 %v4899_v14, %v4903_v60 }
 0x4ad   : > { %v17097_v43 = vld [vmem:[%s7078_s28 + $0xd00] sm:$0xff]  ;;  %v17100_v39 = vld [vmem:[%s7078_s28 + $0xe90] sm:$0xff]  ;;  %v17103_v41 = vld [vmem:[%s7078_s28 + $0xe98] sm:$0xff]  ;;  %v17218_v32 = vmax.f32 %v4900_v23, %v4904_v61 }
 0x4ae   : > { %v17106_v55 = vld [vmem:[%s7078_s28 + $0xea0] sm:$0xff]  ;;  %v17117_v7 = vld [vmem:[%s7078_s28 + $0xd08] sm:$0xff]  ;;  %v17120_v6 = vld [vmem:[%s7078_s28 + $0xd10] sm:$0xff]  ;;  %20269 = vst [vmem:[#allocation117_spill] sm:$0xff] %v17166_v22  ;;  %v17247_v60 = vmax.f32 %v4901_v44, %v4905_v18 }
 0x4af   : > { %20266 = vst [vmem:[#allocation139_spill] sm:$0xff] %v17120_v6  ;;  %v17123_v29 = vld [vmem:[%s7078_s28 + $0xd18] sm:$0xff]  ;;  %v17126_v16 = vld [vmem:[%s7078_s28 + $0xea8] sm:$0xff]  ;;  %v17129_v9 = vld [vmem:[%s7078_s28 + $0xeb0] sm:$0xff]  ;;  %v4910_v3 = vmax.f32 %v17012_v28, %v17106_v55 }
 0x4b0   : > { %20267 = vst [vmem:[#allocation142_spill] sm:$0xff] %v17123_v29  ;;  %v17132_v13 = vld [vmem:[%s7078_s28 + $0xeb8] sm:$0xff]  ;;  %v17143_v54 = vld [vmem:[%s7078_s28 + $0xd20] sm:$0xff]  ;;  %v17146_v11 = vld [vmem:[%s7078_s28 + $0xd28] sm:$0xff]  ;;  %v4911_v28 = vmax.f32 %v17021_v1, %v17126_v16  ;;  %v4912_v58 = vmax.f32 %v17024_v52, %v17129_v9 }
 0x4b1   : > { %v17149_v26 = vld [vmem:[%s7078_s28 + $0xd30] sm:$0xff]  ;;  %v17152_v56 = vld [vmem:[%s7078_s28 + $0xec0] sm:$0xff]  ;;  %v17155_v53 = vld [vmem:[%s7078_s28 + $0xec8] sm:$0xff]  ;;  %20270 = vst [vmem:[#allocation101_spill] sm:$0xff] %v17192_v40  ;;  %v17273_v18 = vmax.f32 %v4906_v35, %v4910_v3 }
 0x4b2   : > { %v17158_v8 = vld [vmem:[%s7078_s28 + $0xed0] sm:$0xff]  ;;  %v17169_v47 = vld [vmem:[%s7078_s28 + $0xd38] sm:$0xff]  ;;  %v17172_v34 = vld [vmem:[%s7078_s28 + $0xd40] sm:$0xff]  ;;  %20271 = vst [vmem:[#allocation35_spill] sm:$0xff] %v17218_v32 }
 0x4b3   : > { %v17175_v17 = vld [vmem:[%s7078_s28 + $0xd48] sm:$0xff]  ;;  %v17178_v33 = vld [vmem:[%s7078_s28 + $0xed8] sm:$0xff]  ;;  %v17181_v1 = vld [vmem:[%s7078_s28 + $0xee0] sm:$0xff]  ;;  %20274 = vst [vmem:[#allocation83_spill] sm:$0xff] %v17247_v60 }
 0x4b4   : > { %v17184_v52 = vld [vmem:[%s7078_s28 + $0xee8] sm:$0xff]  ;;  %v17195_v12 = vld [vmem:[%s7078_s28 + $0xd50] sm:$0xff]  ;;  %v17198_v36 = vld [vmem:[%s7078_s28 + $0xd58] sm:$0xff]  ;;  %v4918_v14 = vmax.f32 %v17070_v48, %v17181_v1  ;;  %20276 = vst [vmem:[#allocation79_spill] sm:$0xff] %v17273_v18  ;;  %v20277_v18 = vmax.f32 %v16997_v19, %v17082_v15 }
 0x4b5   : > { %v17201_v21 = vld [vmem:[%s7078_s28 + $0xd60] sm:$0xff]  ;;  %v17204_v50 = vld [vmem:[%s7078_s28 + $0xef0] sm:$0xff]  ;;  %v17207_v55 = vld [vmem:[%s7078_s28 + $0xef8] sm:$0xff] }
 0x4b6   : > { %v17210_v16 = vld [vmem:[%s7078_s28 + $0xf00] sm:$0xff]  ;;  %v17221_v2 = vld [vmem:[%s7078_s28 + $0xd68] sm:$0xff]  ;;  %v17224_v51 = vld [vmem:[%s7078_s28 + $0xd70] sm:$0xff]  ;;  %v17302_v42 = vmax.f32 %v20277_v18, %v4911_v28  ;;  %v20279_v18 = vmax.f32 %v17006_v49, %v17100_v39 }
 0x4b7   : > { %v17227_v31 = vld [vmem:[%s7078_s28 + $0xd78] sm:$0xff]  ;;  %v17230_v62 = vld [vmem:[%s7078_s28 + $0xf08] sm:$0xff]  ;;  %v17233_v9 = vld [vmem:[%s7078_s28 + $0xf10] sm:$0xff] }
 0x4b8   : > { %20272 = vst [vmem:[#allocation53_spill] sm:$0xff] %v17233_v9  ;;  %v17236_v48 = vld [vmem:[%s7078_s28 + $0xf18] sm:$0xff]  ;;  %v17250_v45 = vld [vmem:[%s7078_s28 + $0xd80] sm:$0xff]  ;;  %v17253_v37 = vld [vmem:[%s7078_s28 + $0xd88] sm:$0xff]  ;;  %v17331_v3 = vmax.f32 %v20279_v18, %v4912_v58  ;;  %v20281_v58 = vmax.f32 %v17027_v57, %v17132_v13 }
 0x4b9   : > { %20273 = vst [vmem:[#allocation90_spill] sm:$0xff] %v17236_v48  ;;  %v17256_v1 = vld [vmem:[%s7078_s28 + $0xd90] sm:$0xff]  ;;  %v17259_v40 = vld [vmem:[%s7078_s28 + $0xf20] sm:$0xff]  ;;  %v17262_v23 = vld [vmem:[%s7078_s28 + $0xf28] sm:$0xff] }
 0x4ba   : > { %v17265_v22 = vld [vmem:[%s7078_s28 + $0xf30] sm:$0xff]  ;;  %v17276_v61 = vld [vmem:[%s7078_s28 + $0xd98] sm:$0xff]  ;;  %v17279_v60 = vld [vmem:[%s7078_s28 + $0xda0] sm:$0xff]  ;;  %20278 = vst [vmem:[#allocation92_spill] sm:$0xff] %v17302_v42 }
 0x4bb   : > { %20275 = vst [vmem:[#allocation85_spill] sm:$0xff] %v17265_v22  ;;  %v17282_v32 = vld [vmem:[%s7078_s28 + $0xda8] sm:$0xff]  ;;  %v17285_v27 = vld [vmem:[%s7078_s28 + $0xf38] sm:$0xff]  ;;  %v17288_v46 = vld [vmem:[%s7078_s28 + $0xf40] sm:$0xff] }
 0x4bc   : > { %v17291_v30 = vld [vmem:[%s7078_s28 + $0xf48] sm:$0xff]  ;;  %v17305_v0 = vld [vmem:[%s7078_s28 + $0xdb0] sm:$0xff]  ;;  %v17308_v4 = vld [vmem:[%s7078_s28 + $0xdb8] sm:$0xff]  ;;  %v4929_v19 = vmax.f32 %v17169_v47, %v17285_v27  ;;  %v4930_v15 = vmax.f32 %v17172_v34, %v17288_v46  ;;  %20280 = vst [vmem:[#allocation27_spill] sm:$0xff] %v17331_v3  ;;  %v20282_v46 = vmax.f32 %v17009_v20, %v17103_v41  ;;  %v20284_v20 = vmax.f32 %v17045_v10, %v17152_v56 }
 0x4bd   : > { %v17311_v44 = vld [vmem:[%s7078_s28 + $0xdc0] sm:$0xff]  ;;  %v17314_v48 = vld [vmem:[%s7078_s28 + $0xf50] sm:$0xff]  ;;  %v17317_v35 = vld [vmem:[%s7078_s28 + $0xf58] sm:$0xff]  ;;  %v4931_v28 = vmax.f32 %v17175_v17, %v17291_v30  ;;  %v20286_v10 = vmax.f32 %v17048_v38, %v17155_v53  ;;  %v20289_v38 = vmax.f32 %v17051_v59, %v17158_v8 }
 0x4be   : > { %v17320_v29 = vld [vmem:[%s7078_s28 + $0xf60] sm:$0xff]  ;;  %v17334_v42 = vld [vmem:[%s7078_s28 + $0xdc8] sm:$0xff]  ;;  %v17337_v9 = vld [vmem:[%s7078_s28 + $0xdd0] sm:$0xff]  ;;  %v4932_v17 = vmax.f32 %v17195_v12, %v17314_v48  ;;  %v4933_v49 = vmax.f32 %v17198_v36, %v17317_v35  ;;  %v17357_v30 = vmax.f32 %v20282_v46, %v20281_v58  ;;  %v17371_v41 = vmax.f32 %v20284_v20, %v4918_v14 }
 0x4bf   : > { %v17340_v27 = vld [vmem:[%s7078_s28 + $0xdd8] sm:$0xff]  ;;  %v4679_v47 = vld [vmem:[%s7078_s28 + $0xf68] sm:$0xff]  ;;  %v4680_v6 = vld [vmem:[%s7078_s28 + $0xf70] sm:$0xff]  ;;  %v4934_v39 = vmax.f32 %v17201_v21, %v17320_v29 }
 0x4c0   : > { %v4681_v34 = vld [vmem:[%s7078_s28 + $0xf78] sm:$0xff]  ;;  %20283 = vst [vmem:[#allocation111_spill] sm:$0xff] %v17357_v30  ;;  %v4630_v18 = vld [vmem:[%s7078_s28 + $0xde0] sm:$0xff]  ;;  %v4631_v3 = vld [vmem:[%s7078_s28 + $0xde8] sm:$0xff]  ;;  %v4935_v35 = vmax.f32 %v17221_v2, %v4679_v47  ;;  %v4936_v29 = vmax.f32 %v17224_v51, %v4680_v6 }
 0x4c1   : > { %v4632_v22 = vld [vmem:[%s7078_s28 + $0xdf0] sm:$0xff]  ;;  %v4682_v12 = vld [vmem:[%s7078_s28 + $0xf80] sm:$0xff]  ;;  %v4683_v48 = vld [vmem:[%s7078_s28 + $0xf88] sm:$0xff]  ;;  %v4937_v57 = vmax.f32 %v17227_v31, %v4681_v34  ;;  %v20285_v31 = vmax.f32 %v17073_v63, %v17184_v52  ;;  %v20288_v63 = vmax.f32 %v17091_v5, %v17204_v50  ;;  %v20292_v5 = vmax.f32 %v17067_v24, %v17178_v33 }
 0x4c2   : > { %v4684_v36 = vld [vmem:[%s7078_s28 + $0xf90] sm:$0xff]  ;;  %v4633_v13 = vld [vmem:[%s7078_s28 + $0xdf8] sm:$0xff]  ;;  %v4686_v58 = vld [vmem:[%s7078_s28 + $0xfa0] sm:$0xff]  ;;  %v4938_v30 = vmax.f32 %v17250_v45, %v4682_v12  ;;  %v4939_v2 = vmax.f32 %v17253_v37, %v4683_v48 }
 0x4c3   : > { %v4685_v21 = vld [vmem:[%s7078_s28 + $0xf98] sm:$0xff]  ;;  %v4687_v46 = vld [vmem:[%s7078_s28 + $0xfa8] sm:$0xff]  ;;  %v4940_v6 = vmax.f32 %v17256_v1, %v4684_v36  ;;  %v17386_v56 = vmax.f32 %v20286_v10, %v20285_v31  ;;  %v4688_v51 = vld [vmem:[%s7078_s28 + $0xfb0] sm:$0xff]  ;;  %v4942_v37 = vmax.f32 %v17279_v60, %v4686_v58  ;;  %v5064_v53 = vmax.f32 %v20289_v38, %v20288_v63 }
 0x4c4   : > { %v4689_v14 = vld [vmem:[%s7078_s28 + $0xfb8] sm:$0xff]  ;;  %v4690_v47 = vld [vmem:[%s7078_s28 + $0xfc0] sm:$0xff]  ;;  %v4941_v45 = vmax.f32 %v17276_v61, %v4685_v21  ;;  %v4943_v1 = vmax.f32 %v17282_v32, %v4687_v46  ;;  %v4691_v52 = vld [vmem:[%s7078_s28 + $0xfc8] sm:$0xff]  ;;  %v4944_v48 = vmax.f32 %v17305_v0, %v4688_v51  ;;  %v20291_v32 = vmax.f32 %v17094_v25, %v17207_v55 }
 0x4c5   : > { %v4692_v34 = vld [vmem:[%s7078_s28 + $0xfd0] sm:$0xff]  ;;  %v4693_v12 = vld [vmem:[%s7078_s28 + $0xfd8] sm:$0xff]  ;;  %v4945_v61 = vmax.f32 %v17308_v4, %v4689_v14  ;;  %v4946_v60 = vmax.f32 %v17311_v44, %v4690_v47  ;;  %v4694_v59 = vld [vmem:[%s7078_s28 + $0xfe0] sm:$0xff]  ;;  %v4947_v20 = vmax.f32 %v17334_v42, %v4691_v52  ;;  %v20293_v4 = vmax.f32 %v17143_v54, %v17259_v40 }
 0x4c6   : > { %v5065_v50 = vmax.f32 %v20292_v5, %v20291_v32  ;;  %v4695_v8 = vld [vmem:[%s7078_s28 + $0xfe8] sm:$0xff]  ;;  %v4696_v36 = vld [vmem:[%s7078_s28 + $0xff0] sm:$0xff]  ;;  %v4948_v21 = vmax.f32 %v17337_v9, %v4692_v34  ;;  %v4949_v0 = vmax.f32 %v17340_v27, %v4693_v12  ;;  %v20294_v25 = vmax.f32 %v17097_v43, %v17210_v16  ;;  %v4697_v24 = vld [vmem:[%s7078_s28 + $0xff8] sm:$0xff] }
 0x4c7   : > { %v4950_v33 = vmax.f32 %v4630_v18, %v4694_v59  ;;  %v4951_v44 = vmax.f32 %v4631_v3, %v4695_v8  ;;  %v4952_v58 = vmax.f32 %v4632_v22, %v4696_v36  ;;  %v20295_v46 = vmax.f32 %v17146_v11, %v17262_v23  ;;  %v20297_v31 = vld [vmem:[#allocation85_spill] sm:$0xff]  ;;  %v20299_v40 = vld [vmem:[#allocation139_spill] sm:$0xff]  ;;  %v20302_v51 = vld [vmem:[#allocation142_spill] sm:$0xff] }
 0x4c8   : > { %v5066_v55 = vmax.f32 %v20294_v25, %v20293_v4  ;;  %v20296_v42 = vmax.f32 %v17117_v7, %v17230_v62  ;;  %v4953_v27 = vmax.f32 %v4633_v13, %v4697_v24  ;;  %v20298_v54 = vmax.f32 %v17149_v26, %v20297_v31  ;;  %v20300_v10 = vld [vmem:[#allocation53_spill] sm:$0xff]  ;;  %v20303_v14 = vld [vmem:[#allocation90_spill] sm:$0xff]  ;;  %v20305_v12 = vld [vmem:[#allocation75_spill] sm:$0xff] }
 0x4c9   : > { %v20301_v43 = vmax.f32 %v20299_v40, %v20300_v10  ;;  %v20304_v18 = vmax.f32 %v20302_v51, %v20303_v14  ;;  %v5070_v22 = vmax.f32 %v4930_v15, %v4934_v39  ;;  %v5071_v47 = vmax.f32 %v4931_v28, %v4935_v35  ;;  %v20306_v32 = vld [vmem:[#allocation147_spill] sm:$0xff]  ;;  %v20308_v15 = vld [vmem:[#allocation98_spill] sm:$0xff]  ;;  %v20310_v39 = vld [vmem:[#allocation117_spill] sm:$0xff] }
 0x4ca   : > { %v5067_v9 = vmax.f32 %v20296_v42, %v20295_v46  ;;  %v5072_v63 = vmax.f32 %v4932_v17, %v4936_v29  ;;  %v5073_v11 = vmax.f32 %v4933_v49, %v4937_v57  ;;  %v5074_v23 = vmax.f32 %v4938_v30, %v4942_v37  ;;  %v20309_v17 = vld [vmem:[#allocation35_spill] sm:$0xff]  ;;  %v20312_v35 = vld [vmem:[#allocation101_spill] sm:$0xff]  ;;  %v20316_v37 = vld [vmem:[#allocation92_spill] sm:$0xff] }
 0x4cb   : > { %v5068_v16 = vmax.f32 %v20301_v43, %v20298_v54  ;;  %v5069_v3 = vmax.f32 %v20304_v18, %v4929_v19  ;;  %v5075_v7 = vmax.f32 %v4939_v2, %v4943_v1  ;;  %v5076_v62 = vmax.f32 %v4940_v6, %v4944_v48  ;;  %v20307_v19 = vld [vmem:[#allocation120_spill] sm:$0xff]  ;;  %v20311_v30 = vld [vmem:[#allocation83_spill] sm:$0xff] }
 0x4cc   : > { %v5077_v13 = vmax.f32 %v4941_v45, %v4945_v61  ;;  %v5078_v38 = vmax.f32 %v4946_v60, %v4950_v33  ;;  %v5079_v26 = vmax.f32 %v4947_v20, %v4951_v44  ;;  %v5080_v52 = vmax.f32 %v4948_v21, %v4952_v58  ;;  %v20313_v57 = vld [vmem:[#allocation27_spill] sm:$0xff] }
 0x4cd   : > { %v5081_v34 = vmax.f32 %v4949_v0, %v4953_v27  ;;  %v5130_v5 = vmax.f32 %v20306_v32, %v20305_v12  ;;  %v5131_v28 = vmax.f32 %v20308_v15, %v20307_v19  ;;  %v5132_v49 = vmax.f32 %v20310_v39, %v20309_v17  ;;  %v20314_v2 = vld [vmem:[#allocation79_spill] sm:$0xff] }
 0x4ce   : > { %v5133_v29 = vmax.f32 %v20312_v35, %v20311_v30  ;;  %v5134_v6 = vmax.f32 %v20314_v2, %v20313_v57  ;;  %v20315_v45 = vld [vmem:[#allocation111_spill] sm:$0xff]  ;;  %v5136_v48 = vmax.f32 %v17371_v41, %v5064_v53  ;;  %v5137_v61 = vmax.f32 %v17386_v56, %v5065_v50 }
 0x4cf   : > { %v5135_v1 = vmax.f32 %v20316_v37, %v20315_v45  ;;  %v5138_v60 = vmax.f32 %v5066_v55, %v5068_v16  ;;  %v5139_v59 = vmax.f32 %v5067_v9, %v5069_v3  ;;  %v5140_v8 = vmax.f32 %v5070_v22, %v5072_v63 }
 0x4d0   : > { %v5141_v36 = vmax.f32 %v5071_v47, %v5073_v11  ;;  %v5142_v20 = vmax.f32 %v5074_v23, %v5076_v62  ;;  %v5143_v21 = vmax.f32 %v5075_v7, %v5077_v13  ;;  %v5144_v0 = vmax.f32 %v5078_v38, %v5080_v52 }
 0x4d1   : > { %v5145_v4 = vmax.f32 %v5079_v26, %v5081_v34  ;;  %v6381_v25 = vpack.c.bf16 %v5131_v28, %v5130_v5  ;;  %v6382_v41 = vpack.c.bf16 %v5133_v29, %v5132_v49  ;;  %v6383_v56 = vpack.c.bf16 %v5135_v1, %v5134_v6 }
 0x4d2   : > { %v6384_v53 = vpack.c.bf16 %v5137_v61, %v5136_v48  ;;  %v6385_v50 = vpack.c.bf16 %v5139_v59, %v5138_v60  ;;  %v6386_v55 = vpack.c.bf16 %v5141_v36, %v5140_v8  ;;  %v6387_v24 = vpack.c.bf16 %v5143_v21, %v5142_v20 }
 0x4d3   : > { %v6388_v33 = vpack.c.bf16 %v5145_v4, %v5144_v0  ;;  %5426 = vst [vmem:[%s8679_s1 + $0x378] sm:$0xff] %v6381_v25  ;;  %5427 = vst [vmem:[%s8679_s1 + $0x39c] sm:$0xff] %v6382_v41 }
 0x4d4   : > { %5428 = vst [vmem:[%s8679_s1 + $0x3c0] sm:$0xff] %v6383_v56  ;;  %5429 = vst [vmem:[%s8679_s1 + $0x3e4] sm:$0xff] %v6384_v53 }
 0x4d5   : > { %5430 = vst [vmem:[%s8679_s1 + $0x408] sm:$0xff] %v6385_v50  ;;  %5431 = vst [vmem:[%s8679_s1 + $0x42c] sm:$0xff] %v6386_v55 }
 0x4d6   : > { %5432 = vst [vmem:[%s8679_s1 + $0x450] sm:$0xff] %v6387_v24  ;;  %5433 = vst [vmem:[%s8679_s1 + $0x474] sm:$0xff] %v6388_v33 }
 0x4d7   : > { %6730 = shalt.err (!%p6727_p11)
}
 0x4d8   : > { %s6731_s15 = scalar_lea.hbm %s17465_s11, 18432  ;;  %s6735_s30 = scalar_lea.hbm %s20317_s6, 73728 }
 0x4d9   : > { %p6732_p13 = scmp.ne.s32.totalorder %s17465_s11, %s6731_s15  ;;  %p6736_p6 = scmp.lt.s32.totalorder %s17465_s11, %s20317_s6 }
 0x4da   : > { %p6737_p7 = scmp.lt.s32.totalorder %s6735_s30, %s6731_s15 }
 0x4db   : > { %p6733_p4 = pnand %p6732_p13, %p6935_p9 }
 0x4dc   : > { %p6738_p8 = por %p6737_p7, %p6736_p6 }
 0x4dd   : > { %p6734_p5 = pneg %p6733_p4 }
 0x4df   : > { %p6739_p0 = pnand %p6738_p8, %p6734_p5 }
 0x4e1   : > { %6742 = shalt.err (!%p6739_p0)
}
 0x4e2   : > { %s6834_s1 = smov 576   ;;  %s6835_s29 = smov 36  }
 0x4e3   : > { %6402 = dma.vmem_to_hbm [thread:$0]  (%p6935_p9), %s17460_s5, 18432, %s17465_s11, %s5884_s27, %s6834_s1, %s6834_s1, %s6835_s29  }
 0x4e4 PF: > { %s20319_s21 = sld [smem:[#allocation20_spill]] }
 0x4e5   : > { %s20320_s22 = sld [smem:[#allocation16_spill]] }
 0x4ea   : > { %p6425_p2 = scmp.ge.s32.totalorder %s20319_s21, 2 }
 0x4eb   : > { %s5915_s10 = sand.u32 1, %s20320_s22  }
 0x4ec   : > { %p6421_p3 = pnand %p6425_p2, %p6941_p12  ;;  %s5916_s3 = scalar_lea.sflag [#allocation4], %s5915_s10 }
 0x4ee   : > { %p6422_p1 = pneg %p6421_p3 }
 0x4f0   : > { %6788 = dma.done.wait (%p6422_p1), %s5916_s3, 18432  }
 0x4f1   : > { %6790 = vsyncadd (%p6422_p1), %s5916_s3, 4294948864  ;;  %s27_s25 = sadd.s32 1, %s20319_s21   ;;  %s20322_s7 = sld [smem:[#allocation17_spill]] }
 0x4f2   : > { %p24_p10 = scmp.ge.s32.totalorder %s27_s25, 6   ;;  %s20323_s20 = sld [smem:[#allocation26_spill]] }
 0x4f3   : > { %s20324_s12 = sld [smem:[#allocation22_spill]]  ;;  %s20326_s18 = smov %s6797_s19 }
 0x4f4   : > { %s20325_s5 = sld [smem:[#allocation23_spill]]  ;;  %s20328_s21 = smov %s6813_s23 }
 0x4f5   : > { %s20329_s22 = smov %s6817_s24 }
 0x4f6   :  { %26 = sbr.rel (!%p24_p10) target bundleno = 15 (0xf), region = 133 }
 0x4f7   : > { %s20327_s19 = smov %s20322_s7 }
 0x4f9   : > { %s20330_s23 = smov %s20324_s12 }
 0x4fa   : > { %s20331_s24 = smov %s20325_s5 }
 0x4fb   :  { %5921 = vsyncpa [#allocation3], 1 }
 0x4fc   :  { %5923 = vsyncpa [#allocation3 + $0x1], 1 }
 0x4fd   :  { %5924 = vsyncpa [#allocation6], 1 }
 0x4fe   :  { %5926 = vsyncpa [#allocation6 + $0x1], 1 }
 0x4ff   :  { %5927 = vsyncpa [#allocation9], 1 }
 0x500   :  { %5929 = vsyncpa [#allocation9 + $0x1], 1 }
 0x501   :  { %5930 = vsyncpa [#allocation4], 1 }
 0x502   :  { %5932 = vsyncpa [#allocation4 + $0x1], 1 }

</bundles_post_ra>
